<compile_context>
chip_gen: v6e
topology: v6e:2x2x1
jax: 0.10.0
libtpu: 0.0.40
codegen_flags: <defaults>
</compile_context>

<pallas_src>
import math
import numpy as np

import jax
import jax.numpy as jnp
from jax.experimental import pallas as pl
from jax.experimental.pallas import tpu as pltpu


# dilations of the HighwayConv1d stacks (static, from the nn.ModuleList)
AE_DILATIONS = (1, 3, 9, 27, 1, 3, 9, 27, 3, 3)
AD_DILATIONS = (1, 3, 9, 27, 1, 1)


def _pick_tile_m(M, cap=256):
    """Largest multiple of 8 that divides M and is <= cap (falls back to M)."""
    t = min(M, cap)
    t -= t % 8
    while t >= 8:
        if M % t == 0:
            return t
        t -= 8
    return M


# ----------------------------------------------------------------------------
# Kernel 1: audio-encoder prenet  (Conv k=1 + ReLU, Conv k=1 + ReLU, Conv k=1)
# ----------------------------------------------------------------------------
def _ae_prenet_call(x, w0, b0, w1, b1, w2, b2, tile_m):
    M, Fdim = x.shape
    D = w0.shape[1]

    def kernel(x_ref, w0_ref, b0_ref, w1_ref, b1_ref, w2_ref, b2_ref, o_ref):
        h = jnp.dot(x_ref[...].astype(jnp.bfloat16), w0_ref[...],
                    preferred_element_type=jnp.float32) + b0_ref[...]
        h = jnp.maximum(h, 0.0)
        h = jnp.dot(h.astype(jnp.bfloat16), w1_ref[...],
                    preferred_element_type=jnp.float32) + b1_ref[...]
        h = jnp.maximum(h, 0.0)
        o_ref[...] = jnp.dot(h.astype(jnp.bfloat16), w2_ref[...],
                             preferred_element_type=jnp.float32) + b2_ref[...]

    return pl.pallas_call(
        kernel,
        out_shape=jax.ShapeDtypeStruct((M, D), jnp.float32),
        grid=(M // tile_m,),
        in_specs=[
            pl.BlockSpec((tile_m, Fdim), lambda i: (i, 0)),
            pl.BlockSpec((Fdim, D), lambda i: (0, 0)),
            pl.BlockSpec((1, D), lambda i: (0, 0)),
            pl.BlockSpec((D, D), lambda i: (0, 0)),
            pl.BlockSpec((1, D), lambda i: (0, 0)),
            pl.BlockSpec((D, D), lambda i: (0, 0)),
            pl.BlockSpec((1, D), lambda i: (0, 0)),
        ],
        out_specs=pl.BlockSpec((tile_m, D), lambda i: (i, 0)),
        compiler_params=pltpu.CompilerParams(dimension_semantics=("parallel",)),
    )(x, w0, b0, w1, b1, w2, b2)


# ----------------------------------------------------------------------------
# Kernel 2/4: fused stack of causal dilated HighwayConv1d layers (k=3)
# ----------------------------------------------------------------------------
def _highway_stack_call(x_btd, w_stack, b_stack, dilations):
    """w_stack: (L, 3D, 2D) bf16  (rows = taps [shift 2d, shift d, shift 0],
    columns = [Wa | Wb]);  b_stack: (L, 1, 2D) f32."""
    B, T, D = x_btd.shape
    L, threeD, twoD = w_stack.shape
    # zero-pad region big enough for the largest causal shift, sublane-aligned
    PAD = ((2 * max(dilations) + 7) // 8) * 8

    def kernel(x_ref, w_ref, b_ref, o_ref, xpad_ref):
        xpad_ref[0:PAD, :] = jnp.zeros((PAD, D), jnp.float32)
        x = x_ref[0]                                       # (T, D) f32, resident
        for l in range(L):                                 # static unroll (L small)
            dil = dilations[l]
            xpad_ref[PAD:PAD + T, :] = x
            w = w_ref[l]                                   # (3D, 2D) bf16
            b = b_ref[l]                                   # (1, 2D) f32
            # causal taps: shifted[t] = x[t - s] (zeros where t < s)
            x2 = xpad_ref[PAD - 2 * dil:PAD - 2 * dil + T, :].astype(jnp.bfloat16)
            x1 = xpad_ref[PAD - dil:PAD - dil + T, :].astype(jnp.bfloat16)
            x0 = x.astype(jnp.bfloat16)
            ag = (jnp.dot(x2, w[0:D], preferred_element_type=jnp.float32)
                  + jnp.dot(x1, w[D:2 * D], preferred_element_type=jnp.float32)
                  + jnp.dot(x0, w[2 * D:3 * D], preferred_element_type=jnp.float32)
                  + b)                                     # (T, 2D)
            a = ag[:, 0:D]
            g = ag[:, D:2 * D]
            t = jax.nn.sigmoid(g)
            x = t * a + (1.0 - t) * x
        o_ref[0] = x

    return pl.pallas_call(
        kernel,
        out_shape=jax.ShapeDtypeStruct((B, T, D), jnp.float32),
        grid=(B,),
        in_specs=[
            pl.BlockSpec((1, T, D), lambda b: (b, 0, 0)),
            pl.BlockSpec((L, threeD, twoD), lambda b: (0, 0, 0)),
            pl.BlockSpec((L, 1, twoD), lambda b: (0, 0, 0)),
        ],
        out_specs=pl.BlockSpec((1, T, D), lambda b: (b, 0, 0)),
        scratch_shapes=[pltpu.VMEM((PAD + T, D), jnp.float32)],
        compiler_params=pltpu.CompilerParams(dimension_semantics=("parallel",)),
    )(x_btd, w_stack, b_stack)


# ----------------------------------------------------------------------------
# Kernel 3: dual attention (shared query projection) + audio-decoder conv0
# ----------------------------------------------------------------------------
def _attention_decode_call(Q, pos, keys_t, values, keysf_t, values_f,
                           wq, bq, wo_text, wo_face, bo, wd0, bd0):
    B, T, D = Q.shape
    Tk = values.shape[1]
    Tv = values_f.shape[1]
    rs = math.sqrt(0.5)

    def kernel(q_ref, pos_ref, kt_ref, v_ref, kft_ref, vf_ref,
               wq_ref, bq_ref, wot_ref, wof_ref, bo_ref, wd0_ref, bd0_ref,
               y_ref, al_ref, alf_ref):
        Qb = q_ref[0]                                       # (T, D) pre-pos
        q = Qb + pos_ref[0]                                 # attention query / residual
        qp = jnp.dot(q.astype(jnp.bfloat16), wq_ref[...],
                     preferred_element_type=jnp.float32) + bq_ref[...]
        qp16 = qp.astype(jnp.bfloat16)

        # --- text stream ---
        s = jnp.dot(qp16, kt_ref[0].astype(jnp.bfloat16),
                    preferred_element_type=jnp.float32)     # (T, Tk)
        m = jnp.max(s, axis=-1, keepdims=True)
        e = jnp.exp(s - m)
        p = e * pl.reciprocal(jnp.sum(e, axis=-1, keepdims=True), approx=True)
        al_ref[0] = p
        ctx = jnp.dot(p.astype(jnp.bfloat16), v_ref[0].astype(jnp.bfloat16),
                      preferred_element_type=jnp.float32)   # (T, D)
        # sqrt(Tk) context scale is folded into wo_text at trace time
        R = (jnp.dot(ctx.astype(jnp.bfloat16), wot_ref[...],
                     preferred_element_type=jnp.float32) + bo_ref[...] + q) * rs

        # --- face stream (reuses the query projection) ---
        sf = jnp.dot(qp16, kft_ref[0].astype(jnp.bfloat16),
                     preferred_element_type=jnp.float32)    # (T, Tv)
        mf = jnp.max(sf, axis=-1, keepdims=True)
        ef = jnp.exp(sf - mf)
        pf = ef * pl.reciprocal(jnp.sum(ef, axis=-1, keepdims=True), approx=True)
        alf_ref[0] = pf
        ctxf = jnp.dot(pf.astype(jnp.bfloat16), vf_ref[0].astype(jnp.bfloat16),
                       preferred_element_type=jnp.float32)
        Rf = (jnp.dot(ctxf.astype(jnp.bfloat16), wof_ref[...],
                      preferred_element_type=jnp.float32) + bo_ref[...] + q) * rs

        # --- ad_conv0 on Rd = [R ; Q ; R_f] without materializing the concat ---
        wd = wd0_ref[...]                                   # (3D, D) bf16
        y = (jnp.dot(R.astype(jnp.bfloat16), wd[0:D],
                     preferred_element_type=jnp.float32)
             + jnp.dot(Qb.astype(jnp.bfloat16), wd[D:2 * D],
                       preferred_element_type=jnp.float32)
             + jnp.dot(Rf.astype(jnp.bfloat16), wd[2 * D:3 * D],
                       preferred_element_type=jnp.float32)
             + bd0_ref[...])
        y_ref[0] = y

    return pl.pallas_call(
        kernel,
        out_shape=(
            jax.ShapeDtypeStruct((B, T, D), jnp.float32),
            jax.ShapeDtypeStruct((B, T, Tk), jnp.float32),
            jax.ShapeDtypeStruct((B, T, Tv), jnp.float32),
        ),
        grid=(B,),
        in_specs=[
            pl.BlockSpec((1, T, D), lambda b: (b, 0, 0)),
            pl.BlockSpec((1, T, D), lambda b: (b, 0, 0)),
            pl.BlockSpec((1, D, Tk), lambda b: (b, 0, 0)),
            pl.BlockSpec((1, Tk, D), lambda b: (b, 0, 0)),
            pl.BlockSpec((1, D, Tv), lambda b: (b, 0, 0)),
            pl.BlockSpec((1, Tv, D), lambda b: (b, 0, 0)),
            pl.BlockSpec((D, D), lambda b: (0, 0)),
            pl.BlockSpec((1, D), lambda b: (0, 0)),
            pl.BlockSpec((D, D), lambda b: (0, 0)),
            pl.BlockSpec((D, D), lambda b: (0, 0)),
            pl.BlockSpec((1, D), lambda b: (0, 0)),
            pl.BlockSpec((3 * D, D), lambda b: (0, 0)),
            pl.BlockSpec((1, D), lambda b: (0, 0)),
        ],
        out_specs=(
            pl.BlockSpec((1, T, D), lambda b: (b, 0, 0)),
            pl.BlockSpec((1, T, Tk), lambda b: (b, 0, 0)),
            pl.BlockSpec((1, T, Tv), lambda b: (b, 0, 0)),
        ),
        compiler_params=pltpu.CompilerParams(dimension_semantics=("parallel",)),
    )(Q, pos, keys_t, values, keysf_t, values_f,
      wq, bq, wo_text, wo_face, bo, wd0, bd0)


# ----------------------------------------------------------------------------
# Kernel 5: postnet = 3 fused (Conv k=1 + ReLU) + last_conv + sigmoid + done fc
# ----------------------------------------------------------------------------
def _postnet_call(h, w_stack3, b_stack3, wl, bl, wf, bf_bias, tile_m):
    M, D = h.shape
    Fdim = wl.shape[1]

    def kernel(h_ref, w_ref, b_ref, wl_ref, bl_ref, wf_ref, bf_ref,
               ds_ref, out_ref, done_ref):
        x = h_ref[...]
        for i in range(3):
            x = jnp.dot(x.astype(jnp.bfloat16), w_ref[i],
                        preferred_element_type=jnp.float32) + b_ref[i]
            x = jnp.maximum(x, 0.0)
        ds_ref[...] = x                                      # decoder_states
        z = jnp.dot(x.astype(jnp.bfloat16), wl_ref[...],
                    preferred_element_type=jnp.float32) + bl_ref[...]
        out_ref[...] = jax.nn.sigmoid(z)
        d = jnp.sum(z * wf_ref[...], axis=-1, keepdims=True) + bf_ref[...]
        done_ref[...] = jax.nn.sigmoid(d)

    return pl.pallas_call(
        kernel,
        out_shape=(
            jax.ShapeDtypeStruct((M, D), jnp.float32),
            jax.ShapeDtypeStruct((M, Fdim), jnp.float32),
            jax.ShapeDtypeStruct((M, 1), jnp.float32),
        ),
        grid=(M // tile_m,),
        in_specs=[
            pl.BlockSpec((tile_m, D), lambda i: (i, 0)),
            pl.BlockSpec((3, D, D), lambda i: (0, 0, 0)),
            pl.BlockSpec((3, 1, D), lambda i: (0, 0, 0)),
            pl.BlockSpec((D, Fdim), lambda i: (0, 0)),
            pl.BlockSpec((1, Fdim), lambda i: (0, 0)),
            pl.BlockSpec((1, Fdim), lambda i: (0, 0)),
            pl.BlockSpec((1, 1), lambda i: (0, 0)),
        ],
        out_specs=(
            pl.BlockSpec((tile_m, D), lambda i: (i, 0)),
            pl.BlockSpec((tile_m, Fdim), lambda i: (i, 0)),
            pl.BlockSpec((tile_m, 1), lambda i: (i, 0)),
        ),
        compiler_params=pltpu.CompilerParams(dimension_semantics=("parallel",)),
    )(h, w_stack3, b_stack3, wl, bl, wf, bf_bias)


# ----------------------------------------------------------------------------
# Parameters (deterministic, synthetic)
# ----------------------------------------------------------------------------
def position_encoding_init(n_position, d, position_rate=1.0):
    pe = np.array(
        [[position_rate * pos / np.power(10000.0, 2 * (i // 2) / d) for i in range(d)]
         if pos != 0 else np.zeros(d) for pos in range(n_position)],
        dtype=np.float32)
    pe[1:, 0::2] = np.sin(pe[1:, 0::2])
    pe[1:, 1::2] = np.cos(pe[1:, 1::2])
    return jnp.asarray(pe, dtype=jnp.float32)


def init_params(key, in_dim, r, D, max_positions,
                query_position_rate=1.0, key_position_rate=1.29):
    Fdim = in_dim * r
    ks = iter(jax.random.split(key, 64))

    def w(shape, scale=0.1):
        return jax.random.normal(next(ks), shape, jnp.float32) * scale

    z = lambda *s: jnp.zeros(s, jnp.float32)
    p = {}
    # audio-encoder prenet
    p["ae_w0"], p["ae_b0"] = w((Fdim, D)), z(1, D)
    p["ae_w1"], p["ae_b1"] = w((D, D)), z(1, D)
    p["ae_w2"], p["ae_b2"] = w((D, D)), z(1, D)
    # audio-encoder highway stack (L, 3D, 2D): columns [Wa | Wb]
    p["ae_hw_w"] = jnp.stack([w((3 * D, 2 * D), 0.05) for _ in AE_DILATIONS])
    p["ae_hw_b"] = z(len(AE_DILATIONS), 1, 2 * D)
    # attention (key/value projections disabled in the reference config)
    p["attn_wq"], p["attn_bq"] = w((D, D)), z(1, D)
    p["attn_wo"], p["attn_bo"] = w((D, D)), z(1, D)
    # audio-decoder conv0 (3D -> D) + highway stack + 3 relu convs
    p["ad_w0"], p["ad_b0"] = w((3 * D, D)), z(1, D)
    p["ad_hw_w"] = jnp.stack([w((3 * D, 2 * D), 0.05) for _ in AD_DILATIONS])
    p["ad_hw_b"] = z(len(AD_DILATIONS), 1, 2 * D)
    p["ad_pw_w"] = jnp.stack([w((D, D)) for _ in range(3)])
    p["ad_pw_b"] = z(3, 1, D)
    # last conv + fc
    p["last_w"], p["last_b"] = w((D, Fdim)), z(1, Fdim)
    p["fc_w"], p["fc_b"] = w((Fdim,)).reshape(1, Fdim), z(1, 1)
    # sinusoidal position tables
    p["query_pos_table"] = position_encoding_init(max_positions, D, query_position_rate)
    p["key_pos_table"] = position_encoding_init(max_positions, D, key_position_rate)
    return p


# ----------------------------------------------------------------------------
# Decoder forward (teacher-forced path)
# ----------------------------------------------------------------------------
def decoder_forward(params, encoder_out, face_encoder_out, inputs,
                    text_positions, frame_positions, vid_positions):
    keys, values = encoder_out
    keys_f, values_f = face_encoder_out
    B, T_dec, Fdim = inputs.shape
    D = params["attn_wq"].shape[0]
    bf16 = lambda a: a.astype(jnp.bfloat16)

    # positional embeddings (cheap JAX gather/add glue)
    keys = keys + params["key_pos_table"][text_positions]
    keys_f = keys_f + params["key_pos_table"][vid_positions]
    frame_pos_embed = params["query_pos_table"][frame_positions]
    keys_t = jnp.transpose(keys, (0, 2, 1))        # (B, D, T_text)
    keys_f_t = jnp.transpose(keys_f, (0, 2, 1))    # (B, D, T_vid)

    M = B * T_dec
    tile_m = _pick_tile_m(M)

    # ---- audio encoder ----
    x = _ae_prenet_call(inputs.reshape(M, Fdim),
                        bf16(params["ae_w0"]), params["ae_b0"],
                        bf16(params["ae_w1"]), params["ae_b1"],
                        bf16(params["ae_w2"]), params["ae_b2"], tile_m)
    x = x.reshape(B, T_dec, D)
    Q = _highway_stack_call(x, bf16(params["ae_hw_w"]), params["ae_hw_b"],
                            AE_DILATIONS)

    # ---- dual attention + ad_conv0 (fused; Rd concat never materialized) ----
    Tk, Tv = values.shape[1], values_f.shape[1]
    wo_text = bf16(params["attn_wo"] * math.sqrt(Tk))   # fold Tk*sqrt(1/Tk)
    wo_face = bf16(params["attn_wo"] * math.sqrt(Tv))
    y, alignments, alignments_f = _attention_decode_call(
        Q, frame_pos_embed, keys_t, values, keys_f_t, values_f,
        bf16(params["attn_wq"]), params["attn_bq"], wo_text, wo_face,
        params["attn_bo"], bf16(params["ad_w0"]), params["ad_b0"])

    # ---- audio decoder ----
    x = _highway_stack_call(y, bf16(params["ad_hw_w"]), params["ad_hw_b"],
                            AD_DILATIONS)
    decoder_states, outputs, done = _postnet_call(
        x.reshape(M, D), bf16(params["ad_pw_w"]), params["ad_pw_b"],
        bf16(params["last_w"]), params["last_b"],
        params["fc_w"], params["fc_b"], tile_m)

    outputs = outputs.reshape(B, T_dec, Fdim)
    done = done.reshape(B, T_dec, 1)
    decoder_states = decoder_states.reshape(B, T_dec, D)
    return (outputs, alignments[None], done, decoder_states, alignments_f[None])


# ----------------------------------------------------------------------------
if __name__ == "__main__":
    B = 2
    in_dim = 16
    r = 8                      # Fdim = in_dim * r = 128 (lane-dense)
    D = 128                    # channels (lane-dense)
    max_positions = 128
    T_dec, T_text, T_vid = 32, 64, 48

    key = jax.random.PRNGKey(0)
    kp, ki, ke, kv, kef, kvf = jax.random.split(key, 6)
    params = init_params(kp, in_dim, r, D, max_positions)

    inputs = jax.random.normal(ki, (B, T_dec, in_dim * r), jnp.float32)
    keys = jax.random.normal(ke, (B, T_text, D), jnp.float32) * 0.5
    values = jax.random.normal(kv, (B, T_text, D), jnp.float32) * 0.5
    keys_f = jax.random.normal(kef, (B, T_vid, D), jnp.float32) * 0.5
    values_f = jax.random.normal(kvf, (B, T_vid, D), jnp.float32) * 0.5

    text_positions = jnp.tile(jnp.arange(1, T_text + 1)[None, :], (B, 1))
    frame_positions = jnp.tile(jnp.arange(1, T_dec + 1)[None, :], (B, 1))
    vid_positions = jnp.tile(jnp.arange(1, T_vid + 1)[None, :], (B, 1))

    fwd = jax.jit(decoder_forward)
    out = fwd(params, (keys, values), (keys_f, values_f), inputs,
              text_positions, frame_positions, vid_positions)
    jax.block_until_ready(out)
    outputs, alignments, done, decoder_states, alignments_f = out
    assert outputs.shape == (B, T_dec, in_dim * r)
    assert alignments.shape == (1, B, T_dec, T_text)
    assert done.shape == (B, T_dec, 1)
    assert decoder_states.shape == (B, T_dec, D)
    assert alignments_f.shape == (1, B, T_dec, T_vid)
    assert all(bool(jnp.all(jnp.isfinite(o))) for o in
               (outputs, alignments, done, decoder_states, alignments_f))
    print("KERNEL_OK")
</pallas_src>

<mosaic_0001>
module attributes {stable_mosaic.version = 11 : i64} {
  func.func @kernel(%arg0: i32, %arg1: memref<1x32x128xf32, #tpu.memory_space<vmem>>, %arg2: memref<10x384x256xbf16, #tpu.memory_space<vmem>>, %arg3: memref<10x1x256xf32, #tpu.memory_space<vmem>>, %arg4: memref<1x32x128xf32, #tpu.memory_space<vmem>>, %arg5: memref<88x128xf32, #tpu.memory_space<vmem>>) attributes {dimension_semantics = [#tpu.dimension_semantics<parallel>], iteration_bounds = array<i64: 2>, scalar_prefetch = 0 : i64, scratch_operands = 1 : i64, tpu.core_type = #tpu.core_type<tc>, window_params = [{transform_indices = @transform_0, window_bounds = array<i64: 1, 32, 128>}, {pipeline_mode = #tpu.pipeline_mode<synchronous>, transform_indices = @transform_1, window_bounds = array<i64: 10, 384, 256>}, {pipeline_mode = #tpu.pipeline_mode<synchronous>, transform_indices = @transform_2, window_bounds = array<i64: 10, 1, 256>}, {transform_indices = @transform_3, window_bounds = array<i64: 1, 32, 128>}]} {
    %cst = arith.constant 0.000000e+00 : f32
    %0 = vector.broadcast %cst : f32 to vector<56x128xf32>
    %c0 = arith.constant 0 : index
    %c0_0 = arith.constant 0 : index
    %1 = vector.load %arg5[%c0, %c0_0] : memref<88x128xf32, #tpu.memory_space<vmem>>, vector<56x128xf32>
    tpu.vector_store %arg5[%c0, %c0_0], %0 {strides = array<i32>} : memref<88x128xf32, #tpu.memory_space<vmem>>, vector<56x128xf32>,
    %c0_1 = arith.constant 0 : index
    %c0_2 = arith.constant 0 : index
    %c0_3 = arith.constant 0 : index
    %2 = vector.load %arg1[%c0_1, %c0_2, %c0_3] : memref<1x32x128xf32, #tpu.memory_space<vmem>>, vector<1x32x128xf32>
    %3 = vector.shape_cast %2 : vector<1x32x128xf32> to vector<32x128xf32>
    %c56 = arith.constant 56 : index
    %c0_4 = arith.constant 0 : index
    %4 = vector.load %arg5[%c56, %c0_4] : memref<88x128xf32, #tpu.memory_space<vmem>>, vector<32x128xf32>
    tpu.vector_store %arg5[%c56, %c0_4], %3 {strides = array<i32>} : memref<88x128xf32, #tpu.memory_space<vmem>>, vector<32x128xf32>,
    %c0_5 = arith.constant 0 : index
    %c0_6 = arith.constant 0 : index
    %c0_7 = arith.constant 0 : index
    %5 = vector.load %arg2[%c0_5, %c0_6, %c0_7] : memref<10x384x256xbf16, #tpu.memory_space<vmem>>, vector<1x384x256xbf16>
    %6 = vector.shape_cast %5 : vector<1x384x256xbf16> to vector<384x256xbf16>
    %c0_8 = arith.constant 0 : index
    %c0_9 = arith.constant 0 : index
    %c0_10 = arith.constant 0 : index
    %7 = vector.load %arg3[%c0_8, %c0_9, %c0_10] : memref<10x1x256xf32, #tpu.memory_space<vmem>>, vector<1x1x256xf32>
    %8 = vector.shape_cast %7 : vector<1x1x256xf32> to vector<1x256xf32>
    %c54 = arith.constant 54 : index
    %c0_11 = arith.constant 0 : index
    %9 = vector.load %arg5[%c54, %c0_11] : memref<88x128xf32, #tpu.memory_space<vmem>>, vector<32x128xf32>
    %10 = arith.truncf %9 : vector<32x128xf32> to vector<32x128xbf16>
    %c55 = arith.constant 55 : index
    %c0_12 = arith.constant 0 : index
    %11 = vector.load %arg5[%c55, %c0_12] : memref<88x128xf32, #tpu.memory_space<vmem>>, vector<32x128xf32>
    %12 = arith.truncf %11 : vector<32x128xf32> to vector<32x128xbf16>
    %13 = arith.truncf %3 : vector<32x128xf32> to vector<32x128xbf16>
    %14 = vector.extract_strided_slice %6 {offsets = [0, 0], sizes = [128, 256], strides = [1, 1]} : vector<384x256xbf16> to vector<128x256xbf16>
    %cst_13 = arith.constant dense<0.000000e+00> : vector<32x256xf32>
    %15 = tpu.matmul %10, %14, %cst_13 {dimension_numbers = #tpu.dot_dimension_numbers<[1], [0], [0], [1], [0, 0, 1, 1], [], []>} : vector<32x128xbf16>, vector<128x256xbf16>, vector<32x256xf32> -> vector<32x256xf32>
    %16 = vector.extract_strided_slice %6 {offsets = [128, 0], sizes = [128, 256], strides = [1, 1]} : vector<384x256xbf16> to vector<128x256xbf16>
    %cst_14 = arith.constant dense<0.000000e+00> : vector<32x256xf32>
    %17 = tpu.matmul %12, %16, %cst_14 {dimension_numbers = #tpu.dot_dimension_numbers<[1], [0], [0], [1], [0, 0, 1, 1], [], []>} : vector<32x128xbf16>, vector<128x256xbf16>, vector<32x256xf32> -> vector<32x256xf32>
    %18 = arith.addf %15, %17 : vector<32x256xf32>
    %19 = vector.extract_strided_slice %6 {offsets = [256, 0], sizes = [128, 256], strides = [1, 1]} : vector<384x256xbf16> to vector<128x256xbf16>
    %cst_15 = arith.constant dense<0.000000e+00> : vector<32x256xf32>
    %20 = tpu.matmul %13, %19, %cst_15 {dimension_numbers = #tpu.dot_dimension_numbers<[1], [0], [0], [1], [0, 0, 1, 1], [], []>} : vector<32x128xbf16>, vector<128x256xbf16>, vector<32x256xf32> -> vector<32x256xf32>
    %21 = arith.addf %18, %20 : vector<32x256xf32>
    %22 = vector.broadcast %8 : vector<1x256xf32> to vector<32x256xf32>
    %23 = arith.addf %21, %22 : vector<32x256xf32>
    %24 = vector.extract_strided_slice %23 {offsets = [0, 0], sizes = [32, 128], strides = [1, 1]} : vector<32x256xf32> to vector<32x128xf32>
    %25 = vector.extract_strided_slice %23 {offsets = [0, 128], sizes = [32, 128], strides = [1, 1]} : vector<32x256xf32> to vector<32x128xf32>
    %26 = arith.negf %25 : vector<32x128xf32>
    %27 = math.exp %26 : vector<32x128xf32>
    %cst_16 = arith.constant 1.000000e+00 : f32
    %28 = vector.broadcast %cst_16 : f32 to vector<32x128xf32>
    %29 = arith.addf %28, %27 : vector<32x128xf32>
    %30 = arith.divf %28, %29 : vector<32x128xf32>
    %31 = arith.mulf %30, %24 : vector<32x128xf32>
    %cst_17 = arith.constant 1.000000e+00 : f32
    %32 = vector.broadcast %cst_17 : f32 to vector<32x128xf32>
    %33 = arith.subf %32, %30 : vector<32x128xf32>
    %34 = arith.mulf %33, %3 : vector<32x128xf32>
    %35 = arith.addf %31, %34 : vector<32x128xf32>
    %c56_18 = arith.constant 56 : index
    %c0_19 = arith.constant 0 : index
    %36 = vector.load %arg5[%c56_18, %c0_19] : memref<88x128xf32, #tpu.memory_space<vmem>>, vector<32x128xf32>
    tpu.vector_store %arg5[%c56_18, %c0_19], %35 {strides = array<i32>} : memref<88x128xf32, #tpu.memory_space<vmem>>, vector<32x128xf32>,
    %c1 = arith.constant 1 : index
    %c0_20 = arith.constant 0 : index
    %c0_21 = arith.constant 0 : index
    %37 = vector.load %arg2[%c1, %c0_20, %c0_21] : memref<10x384x256xbf16, #tpu.memory_space<vmem>>, vector<1x384x256xbf16>
    %38 = vector.shape_cast %37 : vector<1x384x256xbf16> to vector<384x256xbf16>
    %c1_22 = arith.constant 1 : index
    %c0_23 = arith.constant 0 : index
    %c0_24 = arith.constant 0 : index
    %39 = vector.load %arg3[%c1_22, %c0_23, %c0_24] : memref<10x1x256xf32, #tpu.memory_space<vmem>>, vector<1x1x256xf32>
    %40 = vector.shape_cast %39 : vector<1x1x256xf32> to vector<1x256xf32>
    %c50 = arith.constant 50 : index
    %c0_25 = arith.constant 0 : index
    %41 = vector.load %arg5[%c50, %c0_25] : memref<88x128xf32, #tpu.memory_space<vmem>>, vector<32x128xf32>
    %42 = arith.truncf %41 : vector<32x128xf32> to vector<32x128xbf16>
    %c53 = arith.constant 53 : index
    %c0_26 = arith.constant 0 : index
    %43 = vector.load %arg5[%c53, %c0_26] : memref<88x128xf32, #tpu.memory_space<vmem>>, vector<32x128xf32>
    %44 = arith.truncf %43 : vector<32x128xf32> to vector<32x128xbf16>
    %45 = arith.truncf %35 : vector<32x128xf32> to vector<32x128xbf16>
    %46 = vector.extract_strided_slice %38 {offsets = [0, 0], sizes = [128, 256], strides = [1, 1]} : vector<384x256xbf16> to vector<128x256xbf16>
    %cst_27 = arith.constant dense<0.000000e+00> : vector<32x256xf32>
    %47 = tpu.matmul %42, %46, %cst_27 {dimension_numbers = #tpu.dot_dimension_numbers<[1], [0], [0], [1], [0, 0, 1, 1], [], []>} : vector<32x128xbf16>, vector<128x256xbf16>, vector<32x256xf32> -> vector<32x256xf32>
    %48 = vector.extract_strided_slice %38 {offsets = [128, 0], sizes = [128, 256], strides = [1, 1]} : vector<384x256xbf16> to vector<128x256xbf16>
    %cst_28 = arith.constant dense<0.000000e+00> : vector<32x256xf32>
    %49 = tpu.matmul %44, %48, %cst_28 {dimension_numbers = #tpu.dot_dimension_numbers<[1], [0], [0], [1], [0, 0, 1, 1], [], []>} : vector<32x128xbf16>, vector<128x256xbf16>, vector<32x256xf32> -> vector<32x256xf32>
    %50 = arith.addf %47, %49 : vector<32x256xf32>
    %51 = vector.extract_strided_slice %38 {offsets = [256, 0], sizes = [128, 256], strides = [1, 1]} : vector<384x256xbf16> to vector<128x256xbf16>
    %cst_29 = arith.constant dense<0.000000e+00> : vector<32x256xf32>
    %52 = tpu.matmul %45, %51, %cst_29 {dimension_numbers = #tpu.dot_dimension_numbers<[1], [0], [0], [1], [0, 0, 1, 1], [], []>} : vector<32x128xbf16>, vector<128x256xbf16>, vector<32x256xf32> -> vector<32x256xf32>
    %53 = arith.addf %50, %52 : vector<32x256xf32>
    %54 = vector.broadcast %40 : vector<1x256xf32> to vector<32x256xf32>
    %55 = arith.addf %53, %54 : vector<32x256xf32>
    %56 = vector.extract_strided_slice %55 {offsets = [0, 0], sizes = [32, 128], strides = [1, 1]} : vector<32x256xf32> to vector<32x128xf32>
    %57 = vector.extract_strided_slice %55 {offsets = [0, 128], sizes = [32, 128], strides = [1, 1]} : vector<32x256xf32> to vector<32x128xf32>
    %58 = arith.negf %57 : vector<32x128xf32>
    %59 = math.exp %58 : vector<32x128xf32>
    %cst_30 = arith.constant 1.000000e+00 : f32
    %60 = vector.broadcast %cst_30 : f32 to vector<32x128xf32>
    %61 = arith.addf %60, %59 : vector<32x128xf32>
    %62 = arith.divf %60, %61 : vector<32x128xf32>
    %63 = arith.mulf %62, %56 : vector<32x128xf32>
    %cst_31 = arith.constant 1.000000e+00 : f32
    %64 = vector.broadcast %cst_31 : f32 to vector<32x128xf32>
    %65 = arith.subf %64, %62 : vector<32x128xf32>
    %66 = arith.mulf %65, %35 : vector<32x128xf32>
    %67 = arith.addf %63, %66 : vector<32x128xf32>
    %c56_32 = arith.constant 56 : index
    %c0_33 = arith.constant 0 : index
    %68 = vector.load %arg5[%c56_32, %c0_33] : memref<88x128xf32, #tpu.memory_space<vmem>>, vector<32x128xf32>
    tpu.vector_store %arg5[%c56_32, %c0_33], %67 {strides = array<i32>} : memref<88x128xf32, #tpu.memory_space<vmem>>, vector<32x128xf32>,
    %c2 = arith.constant 2 : index
    %c0_34 = arith.constant 0 : index
    %c0_35 = arith.constant 0 : index
    %69 = vector.load %arg2[%c2, %c0_34, %c0_35] : memref<10x384x256xbf16, #tpu.memory_space<vmem>>, vector<1x384x256xbf16>
    %70 = vector.shape_cast %69 : vector<1x384x256xbf16> to vector<384x256xbf16>
    %c2_36 = arith.constant 2 : index
    %c0_37 = arith.constant 0 : index
    %c0_38 = arith.constant 0 : index
    %71 = vector.load %arg3[%c2_36, %c0_37, %c0_38] : memref<10x1x256xf32, #tpu.memory_space<vmem>>, vector<1x1x256xf32>
    %72 = vector.shape_cast %71 : vector<1x1x256xf32> to vector<1x256xf32>
    %c38 = arith.constant 38 : index
    %c0_39 = arith.constant 0 : index
    %73 = vector.load %arg5[%c38, %c0_39] : memref<88x128xf32, #tpu.memory_space<vmem>>, vector<32x128xf32>
    %74 = arith.truncf %73 : vector<32x128xf32> to vector<32x128xbf16>
    %c47 = arith.constant 47 : index
    %c0_40 = arith.constant 0 : index
    %75 = vector.load %arg5[%c47, %c0_40] : memref<88x128xf32, #tpu.memory_space<vmem>>, vector<32x128xf32>
    %76 = arith.truncf %75 : vector<32x128xf32> to vector<32x128xbf16>
    %77 = arith.truncf %67 : vector<32x128xf32> to vector<32x128xbf16>
    %78 = vector.extract_strided_slice %70 {offsets = [0, 0], sizes = [128, 256], strides = [1, 1]} : vector<384x256xbf16> to vector<128x256xbf16>
    %cst_41 = arith.constant dense<0.000000e+00> : vector<32x256xf32>
    %79 = tpu.matmul %74, %78, %cst_41 {dimension_numbers = #tpu.dot_dimension_numbers<[1], [0], [0], [1], [0, 0, 1, 1], [], []>} : vector<32x128xbf16>, vector<128x256xbf16>, vector<32x256xf32> -> vector<32x256xf32>
    %80 = vector.extract_strided_slice %70 {offsets = [128, 0], sizes = [128, 256], strides = [1, 1]} : vector<384x256xbf16> to vector<128x256xbf16>
    %cst_42 = arith.constant dense<0.000000e+00> : vector<32x256xf32>
    %81 = tpu.matmul %76, %80, %cst_42 {dimension_numbers = #tpu.dot_dimension_numbers<[1], [0], [0], [1], [0, 0, 1, 1], [], []>} : vector<32x128xbf16>, vector<128x256xbf16>, vector<32x256xf32> -> vector<32x256xf32>
    %82 = arith.addf %79, %81 : vector<32x256xf32>
    %83 = vector.extract_strided_slice %70 {offsets = [256, 0], sizes = [128, 256], strides = [1, 1]} : vector<384x256xbf16> to vector<128x256xbf16>
    %cst_43 = arith.constant dense<0.000000e+00> : vector<32x256xf32>
    %84 = tpu.matmul %77, %83, %cst_43 {dimension_numbers = #tpu.dot_dimension_numbers<[1], [0], [0], [1], [0, 0, 1, 1], [], []>} : vector<32x128xbf16>, vector<128x256xbf16>, vector<32x256xf32> -> vector<32x256xf32>
    %85 = arith.addf %82, %84 : vector<32x256xf32>
    %86 = vector.broadcast %72 : vector<1x256xf32> to vector<32x256xf32>
    %87 = arith.addf %85, %86 : vector<32x256xf32>
    %88 = vector.extract_strided_slice %87 {offsets = [0, 0], sizes = [32, 128], strides = [1, 1]} : vector<32x256xf32> to vector<32x128xf32>
    %89 = vector.extract_strided_slice %87 {offsets = [0, 128], sizes = [32, 128], strides = [1, 1]} : vector<32x256xf32> to vector<32x128xf32>
    %90 = arith.negf %89 : vector<32x128xf32>
    %91 = math.exp %90 : vector<32x128xf32>
    %cst_44 = arith.constant 1.000000e+00 : f32
    %92 = vector.broadcast %cst_44 : f32 to vector<32x128xf32>
    %93 = arith.addf %92, %91 : vector<32x128xf32>
    %94 = arith.divf %92, %93 : vector<32x128xf32>
    %95 = arith.mulf %94, %88 : vector<32x128xf32>
    %cst_45 = arith.constant 1.000000e+00 : f32
    %96 = vector.broadcast %cst_45 : f32 to vector<32x128xf32>
    %97 = arith.subf %96, %94 : vector<32x128xf32>
    %98 = arith.mulf %97, %67 : vector<32x128xf32>
    %99 = arith.addf %95, %98 : vector<32x128xf32>
    %c56_46 = arith.constant 56 : index
    %c0_47 = arith.constant 0 : index
    %100 = vector.load %arg5[%c56_46, %c0_47] : memref<88x128xf32, #tpu.memory_space<vmem>>, vector<32x128xf32>
    tpu.vector_store %arg5[%c56_46, %c0_47], %99 {strides = array<i32>} : memref<88x128xf32, #tpu.memory_space<vmem>>, vector<32x128xf32>,
    %c3 = arith.constant 3 : index
    %c0_48 = arith.constant 0 : index
    %c0_49 = arith.constant 0 : index
    %101 = vector.load %arg2[%c3, %c0_48, %c0_49] : memref<10x384x256xbf16, #tpu.memory_space<vmem>>, vector<1x384x256xbf16>
    %102 = vector.shape_cast %101 : vector<1x384x256xbf16> to vector<384x256xbf16>
    %c3_50 = arith.constant 3 : index
    %c0_51 = arith.constant 0 : index
    %c0_52 = arith.constant 0 : index
    %103 = vector.load %arg3[%c3_50, %c0_51, %c0_52] : memref<10x1x256xf32, #tpu.memory_space<vmem>>, vector<1x1x256xf32>
    %104 = vector.shape_cast %103 : vector<1x1x256xf32> to vector<1x256xf32>
    %c2_53 = arith.constant 2 : index
    %c0_54 = arith.constant 0 : index
    %105 = vector.load %arg5[%c2_53, %c0_54] : memref<88x128xf32, #tpu.memory_space<vmem>>, vector<32x128xf32>
    %106 = arith.truncf %105 : vector<32x128xf32> to vector<32x128xbf16>
    %c29 = arith.constant 29 : index
    %c0_55 = arith.constant 0 : index
    %107 = vector.load %arg5[%c29, %c0_55] : memref<88x128xf32, #tpu.memory_space<vmem>>, vector<32x128xf32>
    %108 = arith.truncf %107 : vector<32x128xf32> to vector<32x128xbf16>
    %109 = arith.truncf %99 : vector<32x128xf32> to vector<32x128xbf16>
    %110 = vector.extract_strided_slice %102 {offsets = [0, 0], sizes = [128, 256], strides = [1, 1]} : vector<384x256xbf16> to vector<128x256xbf16>
    %cst_56 = arith.constant dense<0.000000e+00> : vector<32x256xf32>
    %111 = tpu.matmul %106, %110, %cst_56 {dimension_numbers = #tpu.dot_dimension_numbers<[1], [0], [0], [1], [0, 0, 1, 1], [], []>} : vector<32x128xbf16>, vector<128x256xbf16>, vector<32x256xf32> -> vector<32x256xf32>
    %112 = vector.extract_strided_slice %102 {offsets = [128, 0], sizes = [128, 256], strides = [1, 1]} : vector<384x256xbf16> to vector<128x256xbf16>
    %cst_57 = arith.constant dense<0.000000e+00> : vector<32x256xf32>
    %113 = tpu.matmul %108, %112, %cst_57 {dimension_numbers = #tpu.dot_dimension_numbers<[1], [0], [0], [1], [0, 0, 1, 1], [], []>} : vector<32x128xbf16>, vector<128x256xbf16>, vector<32x256xf32> -> vector<32x256xf32>
    %114 = arith.addf %111, %113 : vector<32x256xf32>
    %115 = vector.extract_strided_slice %102 {offsets = [256, 0], sizes = [128, 256], strides = [1, 1]} : vector<384x256xbf16> to vector<128x256xbf16>
    %cst_58 = arith.constant dense<0.000000e+00> : vector<32x256xf32>
    %116 = tpu.matmul %109, %115, %cst_58 {dimension_numbers = #tpu.dot_dimension_numbers<[1], [0], [0], [1], [0, 0, 1, 1], [], []>} : vector<32x128xbf16>, vector<128x256xbf16>, vector<32x256xf32> -> vector<32x256xf32>
    %117 = arith.addf %114, %116 : vector<32x256xf32>
    %118 = vector.broadcast %104 : vector<1x256xf32> to vector<32x256xf32>
    %119 = arith.addf %117, %118 : vector<32x256xf32>
    %120 = vector.extract_strided_slice %119 {offsets = [0, 0], sizes = [32, 128], strides = [1, 1]} : vector<32x256xf32> to vector<32x128xf32>
    %121 = vector.extract_strided_slice %119 {offsets = [0, 128], sizes = [32, 128], strides = [1, 1]} : vector<32x256xf32> to vector<32x128xf32>
    %122 = arith.negf %121 : vector<32x128xf32>
    %123 = math.exp %122 : vector<32x128xf32>
    %cst_59 = arith.constant 1.000000e+00 : f32
    %124 = vector.broadcast %cst_59 : f32 to vector<32x128xf32>
    %125 = arith.addf %124, %123 : vector<32x128xf32>
    %126 = arith.divf %124, %125 : vector<32x128xf32>
    %127 = arith.mulf %126, %120 : vector<32x128xf32>
    %cst_60 = arith.constant 1.000000e+00 : f32
    %128 = vector.broadcast %cst_60 : f32 to vector<32x128xf32>
    %129 = arith.subf %128, %126 : vector<32x128xf32>
    %130 = arith.mulf %129, %99 : vector<32x128xf32>
    %131 = arith.addf %127, %130 : vector<32x128xf32>
    %c56_61 = arith.constant 56 : index
    %c0_62 = arith.constant 0 : index
    %132 = vector.load %arg5[%c56_61, %c0_62] : memref<88x128xf32, #tpu.memory_space<vmem>>, vector<32x128xf32>
    tpu.vector_store %arg5[%c56_61, %c0_62], %131 {strides = array<i32>} : memref<88x128xf32, #tpu.memory_space<vmem>>, vector<32x128xf32>,
    %c4 = arith.constant 4 : index
    %c0_63 = arith.constant 0 : index
    %c0_64 = arith.constant 0 : index
    %133 = vector.load %arg2[%c4, %c0_63, %c0_64] : memref<10x384x256xbf16, #tpu.memory_space<vmem>>, vector<1x384x256xbf16>
    %134 = vector.shape_cast %133 : vector<1x384x256xbf16> to vector<384x256xbf16>
    %c4_65 = arith.constant 4 : index
    %c0_66 = arith.constant 0 : index
    %c0_67 = arith.constant 0 : index
    %135 = vector.load %arg3[%c4_65, %c0_66, %c0_67] : memref<10x1x256xf32, #tpu.memory_space<vmem>>, vector<1x1x256xf32>
    %136 = vector.shape_cast %135 : vector<1x1x256xf32> to vector<1x256xf32>
    %c54_68 = arith.constant 54 : index
    %c0_69 = arith.constant 0 : index
    %137 = vector.load %arg5[%c54_68, %c0_69] : memref<88x128xf32, #tpu.memory_space<vmem>>, vector<32x128xf32>
    %138 = arith.truncf %137 : vector<32x128xf32> to vector<32x128xbf16>
    %c55_70 = arith.constant 55 : index
    %c0_71 = arith.constant 0 : index
    %139 = vector.load %arg5[%c55_70, %c0_71] : memref<88x128xf32, #tpu.memory_space<vmem>>, vector<32x128xf32>
    %140 = arith.truncf %139 : vector<32x128xf32> to vector<32x128xbf16>
    %141 = arith.truncf %131 : vector<32x128xf32> to vector<32x128xbf16>
    %142 = vector.extract_strided_slice %134 {offsets = [0, 0], sizes = [128, 256], strides = [1, 1]} : vector<384x256xbf16> to vector<128x256xbf16>
    %cst_72 = arith.constant dense<0.000000e+00> : vector<32x256xf32>
    %143 = tpu.matmul %138, %142, %cst_72 {dimension_numbers = #tpu.dot_dimension_numbers<[1], [0], [0], [1], [0, 0, 1, 1], [], []>} : vector<32x128xbf16>, vector<128x256xbf16>, vector<32x256xf32> -> vector<32x256xf32>
    %144 = vector.extract_strided_slice %134 {offsets = [128, 0], sizes = [128, 256], strides = [1, 1]} : vector<384x256xbf16> to vector<128x256xbf16>
    %cst_73 = arith.constant dense<0.000000e+00> : vector<32x256xf32>
    %145 = tpu.matmul %140, %144, %cst_73 {dimension_numbers = #tpu.dot_dimension_numbers<[1], [0], [0], [1], [0, 0, 1, 1], [], []>} : vector<32x128xbf16>, vector<128x256xbf16>, vector<32x256xf32> -> vector<32x256xf32>
    %146 = arith.addf %143, %145 : vector<32x256xf32>
    %147 = vector.extract_strided_slice %134 {offsets = [256, 0], sizes = [128, 256], strides = [1, 1]} : vector<384x256xbf16> to vector<128x256xbf16>
    %cst_74 = arith.constant dense<0.000000e+00> : vector<32x256xf32>
    %148 = tpu.matmul %141, %147, %cst_74 {dimension_numbers = #tpu.dot_dimension_numbers<[1], [0], [0], [1], [0, 0, 1, 1], [], []>} : vector<32x128xbf16>, vector<128x256xbf16>, vector<32x256xf32> -> vector<32x256xf32>
    %149 = arith.addf %146, %148 : vector<32x256xf32>
    %150 = vector.broadcast %136 : vector<1x256xf32> to vector<32x256xf32>
    %151 = arith.addf %149, %150 : vector<32x256xf32>
    %152 = vector.extract_strided_slice %151 {offsets = [0, 0], sizes = [32, 128], strides = [1, 1]} : vector<32x256xf32> to vector<32x128xf32>
    %153 = vector.extract_strided_slice %151 {offsets = [0, 128], sizes = [32, 128], strides = [1, 1]} : vector<32x256xf32> to vector<32x128xf32>
    %154 = arith.negf %153 : vector<32x128xf32>
    %155 = math.exp %154 : vector<32x128xf32>
    %cst_75 = arith.constant 1.000000e+00 : f32
    %156 = vector.broadcast %cst_75 : f32 to vector<32x128xf32>
    %157 = arith.addf %156, %155 : vector<32x128xf32>
    %158 = arith.divf %156, %157 : vector<32x128xf32>
    %159 = arith.mulf %158, %152 : vector<32x128xf32>
    %cst_76 = arith.constant 1.000000e+00 : f32
    %160 = vector.broadcast %cst_76 : f32 to vector<32x128xf32>
    %161 = arith.subf %160, %158 : vector<32x128xf32>
    %162 = arith.mulf %161, %131 : vector<32x128xf32>
    %163 = arith.addf %159, %162 : vector<32x128xf32>
    %c56_77 = arith.constant 56 : index
    %c0_78 = arith.constant 0 : index
    %164 = vector.load %arg5[%c56_77, %c0_78] : memref<88x128xf32, #tpu.memory_space<vmem>>, vector<32x128xf32>
    tpu.vector_store %arg5[%c56_77, %c0_78], %163 {strides = array<i32>} : memref<88x128xf32, #tpu.memory_space<vmem>>, vector<32x128xf32>,
    %c5 = arith.constant 5 : index
    %c0_79 = arith.constant 0 : index
    %c0_80 = arith.constant 0 : index
    %165 = vector.load %arg2[%c5, %c0_79, %c0_80] : memref<10x384x256xbf16, #tpu.memory_space<vmem>>, vector<1x384x256xbf16>
    %166 = vector.shape_cast %165 : vector<1x384x256xbf16> to vector<384x256xbf16>
    %c5_81 = arith.constant 5 : index
    %c0_82 = arith.constant 0 : index
    %c0_83 = arith.constant 0 : index
    %167 = vector.load %arg3[%c5_81, %c0_82, %c0_83] : memref<10x1x256xf32, #tpu.memory_space<vmem>>, vector<1x1x256xf32>
    %168 = vector.shape_cast %167 : vector<1x1x256xf32> to vector<1x256xf32>
    %c50_84 = arith.constant 50 : index
    %c0_85 = arith.constant 0 : index
    %169 = vector.load %arg5[%c50_84, %c0_85] : memref<88x128xf32, #tpu.memory_space<vmem>>, vector<32x128xf32>
    %170 = arith.truncf %169 : vector<32x128xf32> to vector<32x128xbf16>
    %c53_86 = arith.constant 53 : index
    %c0_87 = arith.constant 0 : index
    %171 = vector.load %arg5[%c53_86, %c0_87] : memref<88x128xf32, #tpu.memory_space<vmem>>, vector<32x128xf32>
    %172 = arith.truncf %171 : vector<32x128xf32> to vector<32x128xbf16>
    %173 = arith.truncf %163 : vector<32x128xf32> to vector<32x128xbf16>
    %174 = vector.extract_strided_slice %166 {offsets = [0, 0], sizes = [128, 256], strides = [1, 1]} : vector<384x256xbf16> to vector<128x256xbf16>
    %cst_88 = arith.constant dense<0.000000e+00> : vector<32x256xf32>
    %175 = tpu.matmul %170, %174, %cst_88 {dimension_numbers = #tpu.dot_dimension_numbers<[1], [0], [0], [1], [0, 0, 1, 1], [], []>} : vector<32x128xbf16>, vector<128x256xbf16>, vector<32x256xf32> -> vector<32x256xf32>
    %176 = vector.extract_strided_slice %166 {offsets = [128, 0], sizes = [128, 256], strides = [1, 1]} : vector<384x256xbf16> to vector<128x256xbf16>
    %cst_89 = arith.constant dense<0.000000e+00> : vector<32x256xf32>
    %177 = tpu.matmul %172, %176, %cst_89 {dimension_numbers = #tpu.dot_dimension_numbers<[1], [0], [0], [1], [0, 0, 1, 1], [], []>} : vector<32x128xbf16>, vector<128x256xbf16>, vector<32x256xf32> -> vector<32x256xf32>
    %178 = arith.addf %175, %177 : vector<32x256xf32>
    %179 = vector.extract_strided_slice %166 {offsets = [256, 0], sizes = [128, 256], strides = [1, 1]} : vector<384x256xbf16> to vector<128x256xbf16>
    %cst_90 = arith.constant dense<0.000000e+00> : vector<32x256xf32>
    %180 = tpu.matmul %173, %179, %cst_90 {dimension_numbers = #tpu.dot_dimension_numbers<[1], [0], [0], [1], [0, 0, 1, 1], [], []>} : vector<32x128xbf16>, vector<128x256xbf16>, vector<32x256xf32> -> vector<32x256xf32>
    %181 = arith.addf %178, %180 : vector<32x256xf32>
    %182 = vector.broadcast %168 : vector<1x256xf32> to vector<32x256xf32>
    %183 = arith.addf %181, %182 : vector<32x256xf32>
    %184 = vector.extract_strided_slice %183 {offsets = [0, 0], sizes = [32, 128], strides = [1, 1]} : vector<32x256xf32> to vector<32x128xf32>
    %185 = vector.extract_strided_slice %183 {offsets = [0, 128], sizes = [32, 128], strides = [1, 1]} : vector<32x256xf32> to vector<32x128xf32>
    %186 = arith.negf %185 : vector<32x128xf32>
    %187 = math.exp %186 : vector<32x128xf32>
    %cst_91 = arith.constant 1.000000e+00 : f32
    %188 = vector.broadcast %cst_91 : f32 to vector<32x128xf32>
    %189 = arith.addf %188, %187 : vector<32x128xf32>
    %190 = arith.divf %188, %189 : vector<32x128xf32>
    %191 = arith.mulf %190, %184 : vector<32x128xf32>
    %cst_92 = arith.constant 1.000000e+00 : f32
    %192 = vector.broadcast %cst_92 : f32 to vector<32x128xf32>
    %193 = arith.subf %192, %190 : vector<32x128xf32>
    %194 = arith.mulf %193, %163 : vector<32x128xf32>
    %195 = arith.addf %191, %194 : vector<32x128xf32>
    %c56_93 = arith.constant 56 : index
    %c0_94 = arith.constant 0 : index
    %196 = vector.load %arg5[%c56_93, %c0_94] : memref<88x128xf32, #tpu.memory_space<vmem>>, vector<32x128xf32>
    tpu.vector_store %arg5[%c56_93, %c0_94], %195 {strides = array<i32>} : memref<88x128xf32, #tpu.memory_space<vmem>>, vector<32x128xf32>,
    %c6 = arith.constant 6 : index
    %c0_95 = arith.constant 0 : index
    %c0_96 = arith.constant 0 : index
    %197 = vector.load %arg2[%c6, %c0_95, %c0_96] : memref<10x384x256xbf16, #tpu.memory_space<vmem>>, vector<1x384x256xbf16>
    %198 = vector.shape_cast %197 : vector<1x384x256xbf16> to vector<384x256xbf16>
    %c6_97 = arith.constant 6 : index
    %c0_98 = arith.constant 0 : index
    %c0_99 = arith.constant 0 : index
    %199 = vector.load %arg3[%c6_97, %c0_98, %c0_99] : memref<10x1x256xf32, #tpu.memory_space<vmem>>, vector<1x1x256xf32>
    %200 = vector.shape_cast %199 : vector<1x1x256xf32> to vector<1x256xf32>
    %c38_100 = arith.constant 38 : index
    %c0_101 = arith.constant 0 : index
    %201 = vector.load %arg5[%c38_100, %c0_101] : memref<88x128xf32, #tpu.memory_space<vmem>>, vector<32x128xf32>
    %202 = arith.truncf %201 : vector<32x128xf32> to vector<32x128xbf16>
    %c47_102 = arith.constant 47 : index
    %c0_103 = arith.constant 0 : index
    %203 = vector.load %arg5[%c47_102, %c0_103] : memref<88x128xf32, #tpu.memory_space<vmem>>, vector<32x128xf32>
    %204 = arith.truncf %203 : vector<32x128xf32> to vector<32x128xbf16>
    %205 = arith.truncf %195 : vector<32x128xf32> to vector<32x128xbf16>
    %206 = vector.extract_strided_slice %198 {offsets = [0, 0], sizes = [128, 256], strides = [1, 1]} : vector<384x256xbf16> to vector<128x256xbf16>
    %cst_104 = arith.constant dense<0.000000e+00> : vector<32x256xf32>
    %207 = tpu.matmul %202, %206, %cst_104 {dimension_numbers = #tpu.dot_dimension_numbers<[1], [0], [0], [1], [0, 0, 1, 1], [], []>} : vector<32x128xbf16>, vector<128x256xbf16>, vector<32x256xf32> -> vector<32x256xf32>
    %208 = vector.extract_strided_slice %198 {offsets = [128, 0], sizes = [128, 256], strides = [1, 1]} : vector<384x256xbf16> to vector<128x256xbf16>
    %cst_105 = arith.constant dense<0.000000e+00> : vector<32x256xf32>
    %209 = tpu.matmul %204, %208, %cst_105 {dimension_numbers = #tpu.dot_dimension_numbers<[1], [0], [0], [1], [0, 0, 1, 1], [], []>} : vector<32x128xbf16>, vector<128x256xbf16>, vector<32x256xf32> -> vector<32x256xf32>
    %210 = arith.addf %207, %209 : vector<32x256xf32>
    %211 = vector.extract_strided_slice %198 {offsets = [256, 0], sizes = [128, 256], strides = [1, 1]} : vector<384x256xbf16> to vector<128x256xbf16>
    %cst_106 = arith.constant dense<0.000000e+00> : vector<32x256xf32>
    %212 = tpu.matmul %205, %211, %cst_106 {dimension_numbers = #tpu.dot_dimension_numbers<[1], [0], [0], [1], [0, 0, 1, 1], [], []>} : vector<32x128xbf16>, vector<128x256xbf16>, vector<32x256xf32> -> vector<32x256xf32>
    %213 = arith.addf %210, %212 : vector<32x256xf32>
    %214 = vector.broadcast %200 : vector<1x256xf32> to vector<32x256xf32>
    %215 = arith.addf %213, %214 : vector<32x256xf32>
    %216 = vector.extract_strided_slice %215 {offsets = [0, 0], sizes = [32, 128], strides = [1, 1]} : vector<32x256xf32> to vector<32x128xf32>
    %217 = vector.extract_strided_slice %215 {offsets = [0, 128], sizes = [32, 128], strides = [1, 1]} : vector<32x256xf32> to vector<32x128xf32>
    %218 = arith.negf %217 : vector<32x128xf32>
    %219 = math.exp %218 : vector<32x128xf32>
    %cst_107 = arith.constant 1.000000e+00 : f32
    %220 = vector.broadcast %cst_107 : f32 to vector<32x128xf32>
    %221 = arith.addf %220, %219 : vector<32x128xf32>
    %222 = arith.divf %220, %221 : vector<32x128xf32>
    %223 = arith.mulf %222, %216 : vector<32x128xf32>
    %cst_108 = arith.constant 1.000000e+00 : f32
    %224 = vector.broadcast %cst_108 : f32 to vector<32x128xf32>
    %225 = arith.subf %224, %222 : vector<32x128xf32>
    %226 = arith.mulf %225, %195 : vector<32x128xf32>
    %227 = arith.addf %223, %226 : vector<32x128xf32>
    %c56_109 = arith.constant 56 : index
    %c0_110 = arith.constant 0 : index
    %228 = vector.load %arg5[%c56_109, %c0_110] : memref<88x128xf32, #tpu.memory_space<vmem>>, vector<32x128xf32>
    tpu.vector_store %arg5[%c56_109, %c0_110], %227 {strides = array<i32>} : memref<88x128xf32, #tpu.memory_space<vmem>>, vector<32x128xf32>,
    %c7 = arith.constant 7 : index
    %c0_111 = arith.constant 0 : index
    %c0_112 = arith.constant 0 : index
    %229 = vector.load %arg2[%c7, %c0_111, %c0_112] : memref<10x384x256xbf16, #tpu.memory_space<vmem>>, vector<1x384x256xbf16>
    %230 = vector.shape_cast %229 : vector<1x384x256xbf16> to vector<384x256xbf16>
    %c7_113 = arith.constant 7 : index
    %c0_114 = arith.constant 0 : index
    %c0_115 = arith.constant 0 : index
    %231 = vector.load %arg3[%c7_113, %c0_114, %c0_115] : memref<10x1x256xf32, #tpu.memory_space<vmem>>, vector<1x1x256xf32>
    %232 = vector.shape_cast %231 : vector<1x1x256xf32> to vector<1x256xf32>
    %c2_116 = arith.constant 2 : index
    %c0_117 = arith.constant 0 : index
    %233 = vector.load %arg5[%c2_116, %c0_117] : memref<88x128xf32, #tpu.memory_space<vmem>>, vector<32x128xf32>
    %234 = arith.truncf %233 : vector<32x128xf32> to vector<32x128xbf16>
    %c29_118 = arith.constant 29 : index
    %c0_119 = arith.constant 0 : index
    %235 = vector.load %arg5[%c29_118, %c0_119] : memref<88x128xf32, #tpu.memory_space<vmem>>, vector<32x128xf32>
    %236 = arith.truncf %235 : vector<32x128xf32> to vector<32x128xbf16>
    %237 = arith.truncf %227 : vector<32x128xf32> to vector<32x128xbf16>
    %238 = vector.extract_strided_slice %230 {offsets = [0, 0], sizes = [128, 256], strides = [1, 1]} : vector<384x256xbf16> to vector<128x256xbf16>
    %cst_120 = arith.constant dense<0.000000e+00> : vector<32x256xf32>
    %239 = tpu.matmul %234, %238, %cst_120 {dimension_numbers = #tpu.dot_dimension_numbers<[1], [0], [0], [1], [0, 0, 1, 1], [], []>} : vector<32x128xbf16>, vector<128x256xbf16>, vector<32x256xf32> -> vector<32x256xf32>
    %240 = vector.extract_strided_slice %230 {offsets = [128, 0], sizes = [128, 256], strides = [1, 1]} : vector<384x256xbf16> to vector<128x256xbf16>
    %cst_121 = arith.constant dense<0.000000e+00> : vector<32x256xf32>
    %241 = tpu.matmul %236, %240, %cst_121 {dimension_numbers = #tpu.dot_dimension_numbers<[1], [0], [0], [1], [0, 0, 1, 1], [], []>} : vector<32x128xbf16>, vector<128x256xbf16>, vector<32x256xf32> -> vector<32x256xf32>
    %242 = arith.addf %239, %241 : vector<32x256xf32>
    %243 = vector.extract_strided_slice %230 {offsets = [256, 0], sizes = [128, 256], strides = [1, 1]} : vector<384x256xbf16> to vector<128x256xbf16>
    %cst_122 = arith.constant dense<0.000000e+00> : vector<32x256xf32>
    %244 = tpu.matmul %237, %243, %cst_122 {dimension_numbers = #tpu.dot_dimension_numbers<[1], [0], [0], [1], [0, 0, 1, 1], [], []>} : vector<32x128xbf16>, vector<128x256xbf16>, vector<32x256xf32> -> vector<32x256xf32>
    %245 = arith.addf %242, %244 : vector<32x256xf32>
    %246 = vector.broadcast %232 : vector<1x256xf32> to vector<32x256xf32>
    %247 = arith.addf %245, %246 : vector<32x256xf32>
    %248 = vector.extract_strided_slice %247 {offsets = [0, 0], sizes = [32, 128], strides = [1, 1]} : vector<32x256xf32> to vector<32x128xf32>
    %249 = vector.extract_strided_slice %247 {offsets = [0, 128], sizes = [32, 128], strides = [1, 1]} : vector<32x256xf32> to vector<32x128xf32>
    %250 = arith.negf %249 : vector<32x128xf32>
    %251 = math.exp %250 : vector<32x128xf32>
    %cst_123 = arith.constant 1.000000e+00 : f32
    %252 = vector.broadcast %cst_123 : f32 to vector<32x128xf32>
    %253 = arith.addf %252, %251 : vector<32x128xf32>
    %254 = arith.divf %252, %253 : vector<32x128xf32>
    %255 = arith.mulf %254, %248 : vector<32x128xf32>
    %cst_124 = arith.constant 1.000000e+00 : f32
    %256 = vector.broadcast %cst_124 : f32 to vector<32x128xf32>
    %257 = arith.subf %256, %254 : vector<32x128xf32>
    %258 = arith.mulf %257, %227 : vector<32x128xf32>
    %259 = arith.addf %255, %258 : vector<32x128xf32>
    %c56_125 = arith.constant 56 : index
    %c0_126 = arith.constant 0 : index
    %260 = vector.load %arg5[%c56_125, %c0_126] : memref<88x128xf32, #tpu.memory_space<vmem>>, vector<32x128xf32>
    tpu.vector_store %arg5[%c56_125, %c0_126], %259 {strides = array<i32>} : memref<88x128xf32, #tpu.memory_space<vmem>>, vector<32x128xf32>,
    %c8 = arith.constant 8 : index
    %c0_127 = arith.constant 0 : index
    %c0_128 = arith.constant 0 : index
    %261 = vector.load %arg2[%c8, %c0_127, %c0_128] : memref<10x384x256xbf16, #tpu.memory_space<vmem>>, vector<1x384x256xbf16>
    %262 = vector.shape_cast %261 : vector<1x384x256xbf16> to vector<384x256xbf16>
    %c8_129 = arith.constant 8 : index
    %c0_130 = arith.constant 0 : index
    %c0_131 = arith.constant 0 : index
    %263 = vector.load %arg3[%c8_129, %c0_130, %c0_131] : memref<10x1x256xf32, #tpu.memory_space<vmem>>, vector<1x1x256xf32>
    %264 = vector.shape_cast %263 : vector<1x1x256xf32> to vector<1x256xf32>
    %c50_132 = arith.constant 50 : index
    %c0_133 = arith.constant 0 : index
    %265 = vector.load %arg5[%c50_132, %c0_133] : memref<88x128xf32, #tpu.memory_space<vmem>>, vector<32x128xf32>
    %266 = arith.truncf %265 : vector<32x128xf32> to vector<32x128xbf16>
    %c53_134 = arith.constant 53 : index
    %c0_135 = arith.constant 0 : index
    %267 = vector.load %arg5[%c53_134, %c0_135] : memref<88x128xf32, #tpu.memory_space<vmem>>, vector<32x128xf32>
    %268 = arith.truncf %267 : vector<32x128xf32> to vector<32x128xbf16>
    %269 = arith.truncf %259 : vector<32x128xf32> to vector<32x128xbf16>
    %270 = vector.extract_strided_slice %262 {offsets = [0, 0], sizes = [128, 256], strides = [1, 1]} : vector<384x256xbf16> to vector<128x256xbf16>
    %cst_136 = arith.constant dense<0.000000e+00> : vector<32x256xf32>
    %271 = tpu.matmul %266, %270, %cst_136 {dimension_numbers = #tpu.dot_dimension_numbers<[1], [0], [0], [1], [0, 0, 1, 1], [], []>} : vector<32x128xbf16>, vector<128x256xbf16>, vector<32x256xf32> -> vector<32x256xf32>
    %272 = vector.extract_strided_slice %262 {offsets = [128, 0], sizes = [128, 256], strides = [1, 1]} : vector<384x256xbf16> to vector<128x256xbf16>
    %cst_137 = arith.constant dense<0.000000e+00> : vector<32x256xf32>
    %273 = tpu.matmul %268, %272, %cst_137 {dimension_numbers = #tpu.dot_dimension_numbers<[1], [0], [0], [1], [0, 0, 1, 1], [], []>} : vector<32x128xbf16>, vector<128x256xbf16>, vector<32x256xf32> -> vector<32x256xf32>
    %274 = arith.addf %271, %273 : vector<32x256xf32>
    %275 = vector.extract_strided_slice %262 {offsets = [256, 0], sizes = [128, 256], strides = [1, 1]} : vector<384x256xbf16> to vector<128x256xbf16>
    %cst_138 = arith.constant dense<0.000000e+00> : vector<32x256xf32>
    %276 = tpu.matmul %269, %275, %cst_138 {dimension_numbers = #tpu.dot_dimension_numbers<[1], [0], [0], [1], [0, 0, 1, 1], [], []>} : vector<32x128xbf16>, vector<128x256xbf16>, vector<32x256xf32> -> vector<32x256xf32>
    %277 = arith.addf %274, %276 : vector<32x256xf32>
    %278 = vector.broadcast %264 : vector<1x256xf32> to vector<32x256xf32>
    %279 = arith.addf %277, %278 : vector<32x256xf32>
    %280 = vector.extract_strided_slice %279 {offsets = [0, 0], sizes = [32, 128], strides = [1, 1]} : vector<32x256xf32> to vector<32x128xf32>
    %281 = vector.extract_strided_slice %279 {offsets = [0, 128], sizes = [32, 128], strides = [1, 1]} : vector<32x256xf32> to vector<32x128xf32>
    %282 = arith.negf %281 : vector<32x128xf32>
    %283 = math.exp %282 : vector<32x128xf32>
    %cst_139 = arith.constant 1.000000e+00 : f32
    %284 = vector.broadcast %cst_139 : f32 to vector<32x128xf32>
    %285 = arith.addf %284, %283 : vector<32x128xf32>
    %286 = arith.divf %284, %285 : vector<32x128xf32>
    %287 = arith.mulf %286, %280 : vector<32x128xf32>
    %cst_140 = arith.constant 1.000000e+00 : f32
    %288 = vector.broadcast %cst_140 : f32 to vector<32x128xf32>
    %289 = arith.subf %288, %286 : vector<32x128xf32>
    %290 = arith.mulf %289, %259 : vector<32x128xf32>
    %291 = arith.addf %287, %290 : vector<32x128xf32>
    %c56_141 = arith.constant 56 : index
    %c0_142 = arith.constant 0 : index
    %292 = vector.load %arg5[%c56_141, %c0_142] : memref<88x128xf32, #tpu.memory_space<vmem>>, vector<32x128xf32>
    tpu.vector_store %arg5[%c56_141, %c0_142], %291 {strides = array<i32>} : memref<88x128xf32, #tpu.memory_space<vmem>>, vector<32x128xf32>,
    %c9 = arith.constant 9 : index
    %c0_143 = arith.constant 0 : index
    %c0_144 = arith.constant 0 : index
    %293 = vector.load %arg2[%c9, %c0_143, %c0_144] : memref<10x384x256xbf16, #tpu.memory_space<vmem>>, vector<1x384x256xbf16>
    %294 = vector.shape_cast %293 : vector<1x384x256xbf16> to vector<384x256xbf16>
    %c9_145 = arith.constant 9 : index
    %c0_146 = arith.constant 0 : index
    %c0_147 = arith.constant 0 : index
    %295 = vector.load %arg3[%c9_145, %c0_146, %c0_147] : memref<10x1x256xf32, #tpu.memory_space<vmem>>, vector<1x1x256xf32>
    %296 = vector.shape_cast %295 : vector<1x1x256xf32> to vector<1x256xf32>
    %c50_148 = arith.constant 50 : index
    %c0_149 = arith.constant 0 : index
    %297 = vector.load %arg5[%c50_148, %c0_149] : memref<88x128xf32, #tpu.memory_space<vmem>>, vector<32x128xf32>
    %298 = arith.truncf %297 : vector<32x128xf32> to vector<32x128xbf16>
    %c53_150 = arith.constant 53 : index
    %c0_151 = arith.constant 0 : index
    %299 = vector.load %arg5[%c53_150, %c0_151] : memref<88x128xf32, #tpu.memory_space<vmem>>, vector<32x128xf32>
    %300 = arith.truncf %299 : vector<32x128xf32> to vector<32x128xbf16>
    %301 = arith.truncf %291 : vector<32x128xf32> to vector<32x128xbf16>
    %302 = vector.extract_strided_slice %294 {offsets = [0, 0], sizes = [128, 256], strides = [1, 1]} : vector<384x256xbf16> to vector<128x256xbf16>
    %cst_152 = arith.constant dense<0.000000e+00> : vector<32x256xf32>
    %303 = tpu.matmul %298, %302, %cst_152 {dimension_numbers = #tpu.dot_dimension_numbers<[1], [0], [0], [1], [0, 0, 1, 1], [], []>} : vector<32x128xbf16>, vector<128x256xbf16>, vector<32x256xf32> -> vector<32x256xf32>
    %304 = vector.extract_strided_slice %294 {offsets = [128, 0], sizes = [128, 256], strides = [1, 1]} : vector<384x256xbf16> to vector<128x256xbf16>
    %cst_153 = arith.constant dense<0.000000e+00> : vector<32x256xf32>
    %305 = tpu.matmul %300, %304, %cst_153 {dimension_numbers = #tpu.dot_dimension_numbers<[1], [0], [0], [1], [0, 0, 1, 1], [], []>} : vector<32x128xbf16>, vector<128x256xbf16>, vector<32x256xf32> -> vector<32x256xf32>
    %306 = arith.addf %303, %305 : vector<32x256xf32>
    %307 = vector.extract_strided_slice %294 {offsets = [256, 0], sizes = [128, 256], strides = [1, 1]} : vector<384x256xbf16> to vector<128x256xbf16>
    %cst_154 = arith.constant dense<0.000000e+00> : vector<32x256xf32>
    %308 = tpu.matmul %301, %307, %cst_154 {dimension_numbers = #tpu.dot_dimension_numbers<[1], [0], [0], [1], [0, 0, 1, 1], [], []>} : vector<32x128xbf16>, vector<128x256xbf16>, vector<32x256xf32> -> vector<32x256xf32>
    %309 = arith.addf %306, %308 : vector<32x256xf32>
    %310 = vector.broadcast %296 : vector<1x256xf32> to vector<32x256xf32>
    %311 = arith.addf %309, %310 : vector<32x256xf32>
    %312 = vector.extract_strided_slice %311 {offsets = [0, 0], sizes = [32, 128], strides = [1, 1]} : vector<32x256xf32> to vector<32x128xf32>
    %313 = vector.extract_strided_slice %311 {offsets = [0, 128], sizes = [32, 128], strides = [1, 1]} : vector<32x256xf32> to vector<32x128xf32>
    %314 = arith.negf %313 : vector<32x128xf32>
    %315 = math.exp %314 : vector<32x128xf32>
    %cst_155 = arith.constant 1.000000e+00 : f32
    %316 = vector.broadcast %cst_155 : f32 to vector<32x128xf32>
    %317 = arith.addf %316, %315 : vector<32x128xf32>
    %318 = arith.divf %316, %317 : vector<32x128xf32>
    %319 = arith.mulf %318, %312 : vector<32x128xf32>
    %cst_156 = arith.constant 1.000000e+00 : f32
    %320 = vector.broadcast %cst_156 : f32 to vector<32x128xf32>
    %321 = arith.subf %320, %318 : vector<32x128xf32>
    %322 = arith.mulf %321, %291 : vector<32x128xf32>
    %323 = arith.addf %319, %322 : vector<32x128xf32>
    %c0_157 = arith.constant 0 : index
    %c0_158 = arith.constant 0 : index
    %c0_159 = arith.constant 0 : index
    %324 = vector.load %arg4[%c0_157, %c0_158, %c0_159] : memref<1x32x128xf32, #tpu.memory_space<vmem>>, vector<1x32x128xf32>
    %325 = vector.shape_cast %324 : vector<1x32x128xf32> to vector<32x128xf32>
    %326 = vector.shape_cast %323 : vector<32x128xf32> to vector<1x32x128xf32>
    tpu.vector_store %arg4[%c0_157, %c0_158, %c0_159], %326 {strides = array<i32>} : memref<1x32x128xf32, #tpu.memory_space<vmem>>, vector<1x32x128xf32>,
    return
  }
  func.func @transform_0(%arg0: i32) -> (i32, i32, i32) {
    %c0_i32 = arith.constant 0 : i32
    %c0_i32_0 = arith.constant 0 : i32
    %c0_i32_1 = arith.constant 0 : i32
    return %arg0, %c0_i32, %c0_i32_0 : i32, i32, i32
  }
  func.func @transform_1(%arg0: i32) -> (i32, i32, i32) {
    %c0_i32 = arith.constant 0 : i32
    %c0_i32_0 = arith.constant 0 : i32
    %c0_i32_1 = arith.constant 0 : i32
    %c0_i32_2 = arith.constant 0 : i32
    return %c0_i32, %c0_i32_0, %c0_i32_1 : i32, i32, i32
  }
  func.func @transform_2(%arg0: i32) -> (i32, i32, i32) {
    %c0_i32 = arith.constant 0 : i32
    %c0_i32_0 = arith.constant 0 : i32
    %c0_i32_1 = arith.constant 0 : i32
    %c0_i32_2 = arith.constant 0 : i32
    return %c0_i32, %c0_i32_0, %c0_i32_1 : i32, i32, i32
  }
  func.func @transform_3(%arg0: i32) -> (i32, i32, i32) {
    %c0_i32 = arith.constant 0 : i32
    %c0_i32_0 = arith.constant 0 : i32
    %c0_i32_1 = arith.constant 0 : i32
    return %arg0, %c0_i32, %c0_i32_0 : i32, i32, i32
  }
}

module attributes {stable_mosaic.version = 11 : i64} {
  func.func @kernel(%arg0: i32, %arg1: memref<64x128xf32, #tpu.memory_space<vmem>>, %arg2: memref<128x128xbf16, #tpu.memory_space<vmem>>, %arg3: memref<1x128xf32, #tpu.memory_space<vmem>>, %arg4: memref<128x128xbf16, #tpu.memory_space<vmem>>, %arg5: memref<1x128xf32, #tpu.memory_space<vmem>>, %arg6: memref<128x128xbf16, #tpu.memory_space<vmem>>, %arg7: memref<1x128xf32, #tpu.memory_space<vmem>>, %arg8: memref<64x128xf32, #tpu.memory_space<vmem>>) attributes {dimension_semantics = [#tpu.dimension_semantics<parallel>], iteration_bounds = array<i64: 1>, scalar_prefetch = 0 : i64, scratch_operands = 0 : i64, tpu.core_type = #tpu.core_type<tc>, window_params = [{transform_indices = @transform_0, window_bounds = array<i64: 64, 128>}, {pipeline_mode = #tpu.pipeline_mode<synchronous>, transform_indices = @transform_1, window_bounds = array<i64: 128, 128>}, {pipeline_mode = #tpu.pipeline_mode<synchronous>, transform_indices = @transform_2, window_bounds = array<i64: 1, 128>}, {pipeline_mode = #tpu.pipeline_mode<synchronous>, transform_indices = @transform_3, window_bounds = array<i64: 128, 128>}, {pipeline_mode = #tpu.pipeline_mode<synchronous>, transform_indices = @transform_4, window_bounds = array<i64: 1, 128>}, {pipeline_mode = #tpu.pipeline_mode<synchronous>, transform_indices = @transform_5, window_bounds = array<i64: 128, 128>}, {pipeline_mode = #tpu.pipeline_mode<synchronous>, transform_indices = @transform_6, window_bounds = array<i64: 1, 128>}, {transform_indices = @transform_7, window_bounds = array<i64: 64, 128>}]} {
    %c0 = arith.constant 0 : index
    %c0_0 = arith.constant 0 : index
    %0 = vector.load %arg1[%c0, %c0_0] : memref<64x128xf32, #tpu.memory_space<vmem>>, vector<64x128xf32>
    %1 = arith.truncf %0 : vector<64x128xf32> to vector<64x128xbf16>
    %c0_1 = arith.constant 0 : index
    %c0_2 = arith.constant 0 : index
    %2 = vector.load %arg2[%c0_1, %c0_2] : memref<128x128xbf16, #tpu.memory_space<vmem>>, vector<128x128xbf16>
    %cst = arith.constant dense<0.000000e+00> : vector<64x128xf32>
    %3 = tpu.matmul %1, %2, %cst {dimension_numbers = #tpu.dot_dimension_numbers<[1], [0], [0], [1], [0, 0, 1, 1], [], []>} : vector<64x128xbf16>, vector<128x128xbf16>, vector<64x128xf32> -> vector<64x128xf32>
    %c0_3 = arith.constant 0 : index
    %c0_4 = arith.constant 0 : index
    %4 = vector.load %arg3[%c0_3, %c0_4] : memref<1x128xf32, #tpu.memory_space<vmem>>, vector<1x128xf32>
    %5 = vector.broadcast %4 : vector<1x128xf32> to vector<64x128xf32>
    %6 = arith.addf %3, %5 : vector<64x128xf32>
    %cst_5 = arith.constant 0.000000e+00 : f32
    %7 = vector.broadcast %cst_5 : f32 to vector<64x128xf32>
    %8 = arith.maximumf %6, %7 : vector<64x128xf32>
    %9 = arith.truncf %8 : vector<64x128xf32> to vector<64x128xbf16>
    %c0_6 = arith.constant 0 : index
    %c0_7 = arith.constant 0 : index
    %10 = vector.load %arg4[%c0_6, %c0_7] : memref<128x128xbf16, #tpu.memory_space<vmem>>, vector<128x128xbf16>
    %cst_8 = arith.constant dense<0.000000e+00> : vector<64x128xf32>
    %11 = tpu.matmul %9, %10, %cst_8 {dimension_numbers = #tpu.dot_dimension_numbers<[1], [0], [0], [1], [0, 0, 1, 1], [], []>} : vector<64x128xbf16>, vector<128x128xbf16>, vector<64x128xf32> -> vector<64x128xf32>
    %c0_9 = arith.constant 0 : index
    %c0_10 = arith.constant 0 : index
    %12 = vector.load %arg5[%c0_9, %c0_10] : memref<1x128xf32, #tpu.memory_space<vmem>>, vector<1x128xf32>
    %13 = vector.broadcast %12 : vector<1x128xf32> to vector<64x128xf32>
    %14 = arith.addf %11, %13 : vector<64x128xf32>
    %cst_11 = arith.constant 0.000000e+00 : f32
    %15 = vector.broadcast %cst_11 : f32 to vector<64x128xf32>
    %16 = arith.maximumf %14, %15 : vector<64x128xf32>
    %17 = arith.truncf %16 : vector<64x128xf32> to vector<64x128xbf16>
    %c0_12 = arith.constant 0 : index
    %c0_13 = arith.constant 0 : index
    %18 = vector.load %arg6[%c0_12, %c0_13] : memref<128x128xbf16, #tpu.memory_space<vmem>>, vector<128x128xbf16>
    %cst_14 = arith.constant dense<0.000000e+00> : vector<64x128xf32>
    %19 = tpu.matmul %17, %18, %cst_14 {dimension_numbers = #tpu.dot_dimension_numbers<[1], [0], [0], [1], [0, 0, 1, 1], [], []>} : vector<64x128xbf16>, vector<128x128xbf16>, vector<64x128xf32> -> vector<64x128xf32>
    %c0_15 = arith.constant 0 : index
    %c0_16 = arith.constant 0 : index
    %20 = vector.load %arg7[%c0_15, %c0_16] : memref<1x128xf32, #tpu.memory_space<vmem>>, vector<1x128xf32>
    %21 = vector.broadcast %20 : vector<1x128xf32> to vector<64x128xf32>
    %22 = arith.addf %19, %21 : vector<64x128xf32>
    %c0_17 = arith.constant 0 : index
    %c0_18 = arith.constant 0 : index
    %23 = vector.load %arg8[%c0_17, %c0_18] : memref<64x128xf32, #tpu.memory_space<vmem>>, vector<64x128xf32>
    tpu.vector_store %arg8[%c0_17, %c0_18], %22 {strides = array<i32>} : memref<64x128xf32, #tpu.memory_space<vmem>>, vector<64x128xf32>,
    return
  }
  func.func @transform_0(%arg0: i32) -> (i32, i32) {
    %c0_i32 = arith.constant 0 : i32
    %c0_i32_0 = arith.constant 0 : i32
    return %arg0, %c0_i32 : i32, i32
  }
  func.func @transform_1(%arg0: i32) -> (i32, i32) {
    %c0_i32 = arith.constant 0 : i32
    %c0_i32_0 = arith.constant 0 : i32
    %c0_i32_1 = arith.constant 0 : i32
    return %c0_i32, %c0_i32_0 : i32, i32
  }
  func.func @transform_2(%arg0: i32) -> (i32, i32) {
    %c0_i32 = arith.constant 0 : i32
    %c0_i32_0 = arith.constant 0 : i32
    %c0_i32_1 = arith.constant 0 : i32
    return %c0_i32, %c0_i32_0 : i32, i32
  }
  func.func @transform_3(%arg0: i32) -> (i32, i32) {
    %c0_i32 = arith.constant 0 : i32
    %c0_i32_0 = arith.constant 0 : i32
    %c0_i32_1 = arith.constant 0 : i32
    return %c0_i32, %c0_i32_0 : i32, i32
  }
  func.func @transform_4(%arg0: i32) -> (i32, i32) {
    %c0_i32 = arith.constant 0 : i32
    %c0_i32_0 = arith.constant 0 : i32
    %c0_i32_1 = arith.constant 0 : i32
    return %c0_i32, %c0_i32_0 : i32, i32
  }
  func.func @transform_5(%arg0: i32) -> (i32, i32) {
    %c0_i32 = arith.constant 0 : i32
    %c0_i32_0 = arith.constant 0 : i32
    %c0_i32_1 = arith.constant 0 : i32
    return %c0_i32, %c0_i32_0 : i32, i32
  }
  func.func @transform_6(%arg0: i32) -> (i32, i32) {
    %c0_i32 = arith.constant 0 : i32
    %c0_i32_0 = arith.constant 0 : i32
    %c0_i32_1 = arith.constant 0 : i32
    return %c0_i32, %c0_i32_0 : i32, i32
  }
  func.func @transform_7(%arg0: i32) -> (i32, i32) {
    %c0_i32 = arith.constant 0 : i32
    %c0_i32_0 = arith.constant 0 : i32
    return %arg0, %c0_i32 : i32, i32
  }
}

module attributes {stable_mosaic.version = 11 : i64} {
  func.func @kernel(%arg0: i32, %arg1: memref<1x32x128xf32, #tpu.memory_space<vmem>>, %arg2: memref<1x32x128xf32, #tpu.memory_space<vmem>>, %arg3: memref<1x128x64xf32, #tpu.memory_space<vmem>>, %arg4: memref<1x64x128xf32, #tpu.memory_space<vmem>>, %arg5: memref<1x128x48xf32, #tpu.memory_space<vmem>>, %arg6: memref<1x48x128xf32, #tpu.memory_space<vmem>>, %arg7: memref<128x128xbf16, #tpu.memory_space<vmem>>, %arg8: memref<1x128xf32, #tpu.memory_space<vmem>>, %arg9: memref<128x128xbf16, #tpu.memory_space<vmem>>, %arg10: memref<128x128xbf16, #tpu.memory_space<vmem>>, %arg11: memref<1x128xf32, #tpu.memory_space<vmem>>, %arg12: memref<384x128xbf16, #tpu.memory_space<vmem>>, %arg13: memref<1x128xf32, #tpu.memory_space<vmem>>, %arg14: memref<1x32x128xf32, #tpu.memory_space<vmem>>, %arg15: memref<1x32x64xf32, #tpu.memory_space<vmem>>, %arg16: memref<1x32x48xf32, #tpu.memory_space<vmem>>) attributes {dimension_semantics = [#tpu.dimension_semantics<parallel>], iteration_bounds = array<i64: 2>, scalar_prefetch = 0 : i64, scratch_operands = 0 : i64, tpu.core_type = #tpu.core_type<tc>, window_params = [{transform_indices = @transform_0, window_bounds = array<i64: 1, 32, 128>}, {transform_indices = @transform_1, window_bounds = array<i64: 1, 32, 128>}, {transform_indices = @transform_2, window_bounds = array<i64: 1, 128, 64>}, {transform_indices = @transform_3, window_bounds = array<i64: 1, 64, 128>}, {transform_indices = @transform_4, window_bounds = array<i64: 1, 128, 48>}, {transform_indices = @transform_5, window_bounds = array<i64: 1, 48, 128>}, {pipeline_mode = #tpu.pipeline_mode<synchronous>, transform_indices = @transform_6, window_bounds = array<i64: 128, 128>}, {pipeline_mode = #tpu.pipeline_mode<synchronous>, transform_indices = @transform_7, window_bounds = array<i64: 1, 128>}, {pipeline_mode = #tpu.pipeline_mode<synchronous>, transform_indices = @transform_8, window_bounds = array<i64: 128, 128>}, {pipeline_mode = #tpu.pipeline_mode<synchronous>, transform_indices = @transform_9, window_bounds = array<i64: 128, 128>}, {pipeline_mode = #tpu.pipeline_mode<synchronous>, transform_indices = @transform_10, window_bounds = array<i64: 1, 128>}, {pipeline_mode = #tpu.pipeline_mode<synchronous>, transform_indices = @transform_11, window_bounds = array<i64: 384, 128>}, {pipeline_mode = #tpu.pipeline_mode<synchronous>, transform_indices = @transform_12, window_bounds = array<i64: 1, 128>}, {transform_indices = @transform_13, window_bounds = array<i64: 1, 32, 128>}, {transform_indices = @transform_14, window_bounds = array<i64: 1, 32, 64>}, {transform_indices = @transform_15, window_bounds = array<i64: 1, 32, 48>}]} {
    %c0 = arith.constant 0 : index
    %c0_0 = arith.constant 0 : index
    %c0_1 = arith.constant 0 : index
    %0 = vector.load %arg1[%c0, %c0_0, %c0_1] : memref<1x32x128xf32, #tpu.memory_space<vmem>>, vector<1x32x128xf32>
    %1 = vector.shape_cast %0 : vector<1x32x128xf32> to vector<32x128xf32>
    %c0_2 = arith.constant 0 : index
    %c0_3 = arith.constant 0 : index
    %c0_4 = arith.constant 0 : index
    %2 = vector.load %arg2[%c0_2, %c0_3, %c0_4] : memref<1x32x128xf32, #tpu.memory_space<vmem>>, vector<1x32x128xf32>
    %3 = vector.shape_cast %2 : vector<1x32x128xf32> to vector<32x128xf32>
    %4 = arith.addf %1, %3 : vector<32x128xf32>
    %5 = arith.truncf %4 : vector<32x128xf32> to vector<32x128xbf16>
    %c0_5 = arith.constant 0 : index
    %c0_6 = arith.constant 0 : index
    %6 = vector.load %arg7[%c0_5, %c0_6] : memref<128x128xbf16, #tpu.memory_space<vmem>>, vector<128x128xbf16>
    %cst = arith.constant dense<0.000000e+00> : vector<32x128xf32>
    %7 = tpu.matmul %5, %6, %cst {dimension_numbers = #tpu.dot_dimension_numbers<[1], [0], [0], [1], [0, 0, 1, 1], [], []>} : vector<32x128xbf16>, vector<128x128xbf16>, vector<32x128xf32> -> vector<32x128xf32>
    %c0_7 = arith.constant 0 : index
    %c0_8 = arith.constant 0 : index
    %8 = vector.load %arg8[%c0_7, %c0_8] : memref<1x128xf32, #tpu.memory_space<vmem>>, vector<1x128xf32>
    %9 = vector.broadcast %8 : vector<1x128xf32> to vector<32x128xf32>
    %10 = arith.addf %7, %9 : vector<32x128xf32>
    %11 = arith.truncf %10 : vector<32x128xf32> to vector<32x128xbf16>
    %c0_9 = arith.constant 0 : index
    %c0_10 = arith.constant 0 : index
    %c0_11 = arith.constant 0 : index
    %12 = vector.load %arg3[%c0_9, %c0_10, %c0_11] : memref<1x128x64xf32, #tpu.memory_space<vmem>>, vector<1x128x64xf32>
    %13 = vector.shape_cast %12 : vector<1x128x64xf32> to vector<128x64xf32>
    %14 = arith.truncf %13 : vector<128x64xf32> to vector<128x64xbf16>
    %cst_12 = arith.constant dense<0.000000e+00> : vector<32x64xf32>
    %15 = tpu.matmul %11, %14, %cst_12 {dimension_numbers = #tpu.dot_dimension_numbers<[1], [0], [0], [1], [0, 0, 1, 1], [], []>} : vector<32x128xbf16>, vector<128x64xbf16>, vector<32x64xf32> -> vector<32x64xf32>
    %cst_13 = arith.constant dense<0xFF800000> : vector<32xf32>
    %16 = vector.multi_reduction <maximumf>, %15, %cst_13 [1] : vector<32x64xf32> to vector<32xf32>
    %17 = vector.shape_cast %16 : vector<32xf32> to vector<32x1xf32>
    %18 = vector.broadcast %17 : vector<32x1xf32> to vector<32x64xf32>
    %19 = arith.subf %15, %18 : vector<32x64xf32>
    %20 = math.exp %19 : vector<32x64xf32>
    %cst_14 = arith.constant dense<0.000000e+00> : vector<32xf32>
    %21 = vector.multi_reduction <add>, %20, %cst_14 [1] : vector<32x64xf32> to vector<32xf32>
    %22 = vector.shape_cast %21 : vector<32xf32> to vector<32x1xf32>
    %23 = tpu.reciprocal %22 {approx = true} : vector<32x1xf32> -> vector<32x1xf32>
    %24 = vector.broadcast %23 : vector<32x1xf32> to vector<32x64xf32>
    %25 = arith.mulf %20, %24 : vector<32x64xf32>
    %c0_15 = arith.constant 0 : index
    %c0_16 = arith.constant 0 : index
    %c0_17 = arith.constant 0 : index
    %26 = vector.load %arg15[%c0_15, %c0_16, %c0_17] : memref<1x32x64xf32, #tpu.memory_space<vmem>>, vector<1x32x64xf32>
    %27 = vector.shape_cast %26 : vector<1x32x64xf32> to vector<32x64xf32>
    %28 = vector.shape_cast %25 : vector<32x64xf32> to vector<1x32x64xf32>
    tpu.vector_store %arg15[%c0_15, %c0_16, %c0_17], %28 {strides = array<i32>} : memref<1x32x64xf32, #tpu.memory_space<vmem>>, vector<1x32x64xf32>,
    %29 = arith.truncf %25 : vector<32x64xf32> to vector<32x64xbf16>
    %c0_18 = arith.constant 0 : index
    %c0_19 = arith.constant 0 : index
    %c0_20 = arith.constant 0 : index
    %30 = vector.load %arg4[%c0_18, %c0_19, %c0_20] : memref<1x64x128xf32, #tpu.memory_space<vmem>>, vector<1x64x128xf32>
    %31 = vector.shape_cast %30 : vector<1x64x128xf32> to vector<64x128xf32>
    %32 = arith.truncf %31 : vector<64x128xf32> to vector<64x128xbf16>
    %cst_21 = arith.constant dense<0.000000e+00> : vector<32x128xf32>
    %33 = tpu.matmul %29, %32, %cst_21 {dimension_numbers = #tpu.dot_dimension_numbers<[1], [0], [0], [1], [0, 0, 1, 1], [], []>} : vector<32x64xbf16>, vector<64x128xbf16>, vector<32x128xf32> -> vector<32x128xf32>
    %34 = arith.truncf %33 : vector<32x128xf32> to vector<32x128xbf16>
    %c0_22 = arith.constant 0 : index
    %c0_23 = arith.constant 0 : index
    %35 = vector.load %arg9[%c0_22, %c0_23] : memref<128x128xbf16, #tpu.memory_space<vmem>>, vector<128x128xbf16>
    %cst_24 = arith.constant dense<0.000000e+00> : vector<32x128xf32>
    %36 = tpu.matmul %34, %35, %cst_24 {dimension_numbers = #tpu.dot_dimension_numbers<[1], [0], [0], [1], [0, 0, 1, 1], [], []>} : vector<32x128xbf16>, vector<128x128xbf16>, vector<32x128xf32> -> vector<32x128xf32>
    %c0_25 = arith.constant 0 : index
    %c0_26 = arith.constant 0 : index
    %37 = vector.load %arg11[%c0_25, %c0_26] : memref<1x128xf32, #tpu.memory_space<vmem>>, vector<1x128xf32>
    %38 = vector.broadcast %37 : vector<1x128xf32> to vector<32x128xf32>
    %39 = arith.addf %36, %38 : vector<32x128xf32>
    %40 = arith.addf %39, %4 : vector<32x128xf32>
    %cst_27 = arith.constant 0.707106769 : f32
    %41 = vector.broadcast %cst_27 : f32 to vector<32x128xf32>
    %42 = arith.mulf %40, %41 : vector<32x128xf32>
    %c0_28 = arith.constant 0 : index
    %c0_29 = arith.constant 0 : index
    %c0_30 = arith.constant 0 : index
    %43 = vector.load %arg5[%c0_28, %c0_29, %c0_30] : memref<1x128x48xf32, #tpu.memory_space<vmem>>, vector<1x128x48xf32>
    %44 = vector.shape_cast %43 : vector<1x128x48xf32> to vector<128x48xf32>
    %45 = arith.truncf %44 : vector<128x48xf32> to vector<128x48xbf16>
    %cst_31 = arith.constant dense<0.000000e+00> : vector<32x48xf32>
    %46 = tpu.matmul %11, %45, %cst_31 {dimension_numbers = #tpu.dot_dimension_numbers<[1], [0], [0], [1], [0, 0, 1, 1], [], []>} : vector<32x128xbf16>, vector<128x48xbf16>, vector<32x48xf32> -> vector<32x48xf32>
    %cst_32 = arith.constant dense<0xFF800000> : vector<32xf32>
    %47 = vector.multi_reduction <maximumf>, %46, %cst_32 [1] : vector<32x48xf32> to vector<32xf32>
    %48 = vector.shape_cast %47 : vector<32xf32> to vector<32x1xf32>
    %49 = vector.broadcast %48 : vector<32x1xf32> to vector<32x48xf32>
    %50 = arith.subf %46, %49 : vector<32x48xf32>
    %51 = math.exp %50 : vector<32x48xf32>
    %cst_33 = arith.constant dense<0.000000e+00> : vector<32xf32>
    %52 = vector.multi_reduction <add>, %51, %cst_33 [1] : vector<32x48xf32> to vector<32xf32>
    %53 = vector.shape_cast %52 : vector<32xf32> to vector<32x1xf32>
    %54 = tpu.reciprocal %53 {approx = true} : vector<32x1xf32> -> vector<32x1xf32>
    %55 = vector.broadcast %54 : vector<32x1xf32> to vector<32x48xf32>
    %56 = arith.mulf %51, %55 : vector<32x48xf32>
    %c0_34 = arith.constant 0 : index
    %c0_35 = arith.constant 0 : index
    %c0_36 = arith.constant 0 : index
    %57 = vector.load %arg16[%c0_34, %c0_35, %c0_36] : memref<1x32x48xf32, #tpu.memory_space<vmem>>, vector<1x32x48xf32>
    %58 = vector.shape_cast %57 : vector<1x32x48xf32> to vector<32x48xf32>
    %59 = vector.shape_cast %56 : vector<32x48xf32> to vector<1x32x48xf32>
    tpu.vector_store %arg16[%c0_34, %c0_35, %c0_36], %59 {strides = array<i32>} : memref<1x32x48xf32, #tpu.memory_space<vmem>>, vector<1x32x48xf32>,
    %60 = arith.truncf %56 : vector<32x48xf32> to vector<32x48xbf16>
    %c0_37 = arith.constant 0 : index
    %c0_38 = arith.constant 0 : index
    %c0_39 = arith.constant 0 : index
    %61 = vector.load %arg6[%c0_37, %c0_38, %c0_39] : memref<1x48x128xf32, #tpu.memory_space<vmem>>, vector<1x48x128xf32>
    %62 = vector.shape_cast %61 : vector<1x48x128xf32> to vector<48x128xf32>
    %63 = arith.truncf %62 : vector<48x128xf32> to vector<48x128xbf16>
    %cst_40 = arith.constant dense<0.000000e+00> : vector<32x128xf32>
    %64 = tpu.matmul %60, %63, %cst_40 {dimension_numbers = #tpu.dot_dimension_numbers<[1], [0], [0], [1], [0, 0, 1, 1], [], []>} : vector<32x48xbf16>, vector<48x128xbf16>, vector<32x128xf32> -> vector<32x128xf32>
    %65 = arith.truncf %64 : vector<32x128xf32> to vector<32x128xbf16>
    %c0_41 = arith.constant 0 : index
    %c0_42 = arith.constant 0 : index
    %66 = vector.load %arg10[%c0_41, %c0_42] : memref<128x128xbf16, #tpu.memory_space<vmem>>, vector<128x128xbf16>
    %cst_43 = arith.constant dense<0.000000e+00> : vector<32x128xf32>
    %67 = tpu.matmul %65, %66, %cst_43 {dimension_numbers = #tpu.dot_dimension_numbers<[1], [0], [0], [1], [0, 0, 1, 1], [], []>} : vector<32x128xbf16>, vector<128x128xbf16>, vector<32x128xf32> -> vector<32x128xf32>
    %c0_44 = arith.constant 0 : index
    %c0_45 = arith.constant 0 : index
    %68 = vector.load %arg11[%c0_44, %c0_45] : memref<1x128xf32, #tpu.memory_space<vmem>>, vector<1x128xf32>
    %69 = vector.broadcast %68 : vector<1x128xf32> to vector<32x128xf32>
    %70 = arith.addf %67, %69 : vector<32x128xf32>
    %71 = arith.addf %70, %4 : vector<32x128xf32>
    %cst_46 = arith.constant 0.707106769 : f32
    %72 = vector.broadcast %cst_46 : f32 to vector<32x128xf32>
    %73 = arith.mulf %71, %72 : vector<32x128xf32>
    %c0_47 = arith.constant 0 : index
    %c0_48 = arith.constant 0 : index
    %74 = vector.load %arg12[%c0_47, %c0_48] : memref<384x128xbf16, #tpu.memory_space<vmem>>, vector<384x128xbf16>
    %75 = arith.truncf %42 : vector<32x128xf32> to vector<32x128xbf16>
    %76 = vector.extract_strided_slice %74 {offsets = [0, 0], sizes = [128, 128], strides = [1, 1]} : vector<384x128xbf16> to vector<128x128xbf16>
    %cst_49 = arith.constant dense<0.000000e+00> : vector<32x128xf32>
    %77 = tpu.matmul %75, %76, %cst_49 {dimension_numbers = #tpu.dot_dimension_numbers<[1], [0], [0], [1], [0, 0, 1, 1], [], []>} : vector<32x128xbf16>, vector<128x128xbf16>, vector<32x128xf32> -> vector<32x128xf32>
    %78 = arith.truncf %1 : vector<32x128xf32> to vector<32x128xbf16>
    %79 = vector.extract_strided_slice %74 {offsets = [128, 0], sizes = [128, 128], strides = [1, 1]} : vector<384x128xbf16> to vector<128x128xbf16>
    %cst_50 = arith.constant dense<0.000000e+00> : vector<32x128xf32>
    %80 = tpu.matmul %78, %79, %cst_50 {dimension_numbers = #tpu.dot_dimension_numbers<[1], [0], [0], [1], [0, 0, 1, 1], [], []>} : vector<32x128xbf16>, vector<128x128xbf16>, vector<32x128xf32> -> vector<32x128xf32>
    %81 = arith.addf %77, %80 : vector<32x128xf32>
    %82 = arith.truncf %73 : vector<32x128xf32> to vector<32x128xbf16>
    %83 = vector.extract_strided_slice %74 {offsets = [256, 0], sizes = [128, 128], strides = [1, 1]} : vector<384x128xbf16> to vector<128x128xbf16>
    %cst_51 = arith.constant dense<0.000000e+00> : vector<32x128xf32>
    %84 = tpu.matmul %82, %83, %cst_51 {dimension_numbers = #tpu.dot_dimension_numbers<[1], [0], [0], [1], [0, 0, 1, 1], [], []>} : vector<32x128xbf16>, vector<128x128xbf16>, vector<32x128xf32> -> vector<32x128xf32>
    %85 = arith.addf %81, %84 : vector<32x128xf32>
    %c0_52 = arith.constant 0 : index
    %c0_53 = arith.constant 0 : index
    %86 = vector.load %arg13[%c0_52, %c0_53] : memref<1x128xf32, #tpu.memory_space<vmem>>, vector<1x128xf32>
    %87 = vector.broadcast %86 : vector<1x128xf32> to vector<32x128xf32>
    %88 = arith.addf %85, %87 : vector<32x128xf32>
    %c0_54 = arith.constant 0 : index
    %c0_55 = arith.constant 0 : index
    %c0_56 = arith.constant 0 : index
    %89 = vector.load %arg14[%c0_54, %c0_55, %c0_56] : memref<1x32x128xf32, #tpu.memory_space<vmem>>, vector<1x32x128xf32>
    %90 = vector.shape_cast %89 : vector<1x32x128xf32> to vector<32x128xf32>
    %91 = vector.shape_cast %88 : vector<32x128xf32> to vector<1x32x128xf32>
    tpu.vector_store %arg14[%c0_54, %c0_55, %c0_56], %91 {strides = array<i32>} : memref<1x32x128xf32, #tpu.memory_space<vmem>>, vector<1x32x128xf32>,
    return
  }
  func.func @transform_0(%arg0: i32) -> (i32, i32, i32) {
    %c0_i32 = arith.constant 0 : i32
    %c0_i32_0 = arith.constant 0 : i32
    %c0_i32_1 = arith.constant 0 : i32
    return %arg0, %c0_i32, %c0_i32_0 : i32, i32, i32
  }
  func.func @transform_1(%arg0: i32) -> (i32, i32, i32) {
    %c0_i32 = arith.constant 0 : i32
    %c0_i32_0 = arith.constant 0 : i32
    %c0_i32_1 = arith.constant 0 : i32
    return %arg0, %c0_i32, %c0_i32_0 : i32, i32, i32
  }
  func.func @transform_2(%arg0: i32) -> (i32, i32, i32) {
    %c0_i32 = arith.constant 0 : i32
    %c0_i32_0 = arith.constant 0 : i32
    %c0_i32_1 = arith.constant 0 : i32
    return %arg0, %c0_i32, %c0_i32_0 : i32, i32, i32
  }
  func.func @transform_3(%arg0: i32) -> (i32, i32, i32) {
    %c0_i32 = arith.constant 0 : i32
    %c0_i32_0 = arith.constant 0 : i32
    %c0_i32_1 = arith.constant 0 : i32
    return %arg0, %c0_i32, %c0_i32_0 : i32, i32, i32
  }
  func.func @transform_4(%arg0: i32) -> (i32, i32, i32) {
    %c0_i32 = arith.constant 0 : i32
    %c0_i32_0 = arith.constant 0 : i32
    %c0_i32_1 = arith.constant 0 : i32
    return %arg0, %c0_i32, %c0_i32_0 : i32, i32, i32
  }
  func.func @transform_5(%arg0: i32) -> (i32, i32, i32) {
    %c0_i32 = arith.constant 0 : i32
    %c0_i32_0 = arith.constant 0 : i32
    %c0_i32_1 = arith.constant 0 : i32
    return %arg0, %c0_i32, %c0_i32_0 : i32, i32, i32
  }
  func.func @transform_6(%arg0: i32) -> (i32, i32) {
    %c0_i32 = arith.constant 0 : i32
    %c0_i32_0 = arith.constant 0 : i32
    %c0_i32_1 = arith.constant 0 : i32
    return %c0_i32, %c0_i32_0 : i32, i32
  }
  func.func @transform_7(%arg0: i32) -> (i32, i32) {
    %c0_i32 = arith.constant 0 : i32
    %c0_i32_0 = arith.constant 0 : i32
    %c0_i32_1 = arith.constant 0 : i32
    return %c0_i32, %c0_i32_0 : i32, i32
  }
  func.func @transform_8(%arg0: i32) -> (i32, i32) {
    %c0_i32 = arith.constant 0 : i32
    %c0_i32_0 = arith.constant 0 : i32
    %c0_i32_1 = arith.constant 0 : i32
    return %c0_i32, %c0_i32_0 : i32, i32
  }
  func.func @transform_9(%arg0: i32) -> (i32, i32) {
    %c0_i32 = arith.constant 0 : i32
    %c0_i32_0 = arith.constant 0 : i32
    %c0_i32_1 = arith.constant 0 : i32
    return %c0_i32, %c0_i32_0 : i32, i32
  }
  func.func @transform_10(%arg0: i32) -> (i32, i32) {
    %c0_i32 = arith.constant 0 : i32
    %c0_i32_0 = arith.constant 0 : i32
    %c0_i32_1 = arith.constant 0 : i32
    return %c0_i32, %c0_i32_0 : i32, i32
  }
  func.func @transform_11(%arg0: i32) -> (i32, i32) {
    %c0_i32 = arith.constant 0 : i32
    %c0_i32_0 = arith.constant 0 : i32
    %c0_i32_1 = arith.constant 0 : i32
    return %c0_i32, %c0_i32_0 : i32, i32
  }
  func.func @transform_12(%arg0: i32) -> (i32, i32) {
    %c0_i32 = arith.constant 0 : i32
    %c0_i32_0 = arith.constant 0 : i32
    %c0_i32_1 = arith.constant 0 : i32
    return %c0_i32, %c0_i32_0 : i32, i32
  }
  func.func @transform_13(%arg0: i32) -> (i32, i32, i32) {
    %c0_i32 = arith.constant 0 : i32
    %c0_i32_0 = arith.constant 0 : i32
    %c0_i32_1 = arith.constant 0 : i32
    return %arg0, %c0_i32, %c0_i32_0 : i32, i32, i32
  }
  func.func @transform_14(%arg0: i32) -> (i32, i32, i32) {
    %c0_i32 = arith.constant 0 : i32
    %c0_i32_0 = arith.constant 0 : i32
    %c0_i32_1 = arith.constant 0 : i32
    return %arg0, %c0_i32, %c0_i32_0 : i32, i32, i32
  }
  func.func @transform_15(%arg0: i32) -> (i32, i32, i32) {
    %c0_i32 = arith.constant 0 : i32
    %c0_i32_0 = arith.constant 0 : i32
    %c0_i32_1 = arith.constant 0 : i32
    return %arg0, %c0_i32, %c0_i32_0 : i32, i32, i32
  }
}

module attributes {stable_mosaic.version = 11 : i64} {
  func.func @kernel(%arg0: i32, %arg1: memref<1x32x128xf32, #tpu.memory_space<vmem>>, %arg2: memref<6x384x256xbf16, #tpu.memory_space<vmem>>, %arg3: memref<6x1x256xf32, #tpu.memory_space<vmem>>, %arg4: memref<1x32x128xf32, #tpu.memory_space<vmem>>, %arg5: memref<88x128xf32, #tpu.memory_space<vmem>>) attributes {dimension_semantics = [#tpu.dimension_semantics<parallel>], iteration_bounds = array<i64: 2>, scalar_prefetch = 0 : i64, scratch_operands = 1 : i64, tpu.core_type = #tpu.core_type<tc>, window_params = [{transform_indices = @transform_0, window_bounds = array<i64: 1, 32, 128>}, {pipeline_mode = #tpu.pipeline_mode<synchronous>, transform_indices = @transform_1, window_bounds = array<i64: 6, 384, 256>}, {pipeline_mode = #tpu.pipeline_mode<synchronous>, transform_indices = @transform_2, window_bounds = array<i64: 6, 1, 256>}, {transform_indices = @transform_3, window_bounds = array<i64: 1, 32, 128>}]} {
    %cst = arith.constant 0.000000e+00 : f32
    %0 = vector.broadcast %cst : f32 to vector<56x128xf32>
    %c0 = arith.constant 0 : index
    %c0_0 = arith.constant 0 : index
    %1 = vector.load %arg5[%c0, %c0_0] : memref<88x128xf32, #tpu.memory_space<vmem>>, vector<56x128xf32>
    tpu.vector_store %arg5[%c0, %c0_0], %0 {strides = array<i32>} : memref<88x128xf32, #tpu.memory_space<vmem>>, vector<56x128xf32>,
    %c0_1 = arith.constant 0 : index
    %c0_2 = arith.constant 0 : index
    %c0_3 = arith.constant 0 : index
    %2 = vector.load %arg1[%c0_1, %c0_2, %c0_3] : memref<1x32x128xf32, #tpu.memory_space<vmem>>, vector<1x32x128xf32>
    %3 = vector.shape_cast %2 : vector<1x32x128xf32> to vector<32x128xf32>
    %c56 = arith.constant 56 : index
    %c0_4 = arith.constant 0 : index
    %4 = vector.load %arg5[%c56, %c0_4] : memref<88x128xf32, #tpu.memory_space<vmem>>, vector<32x128xf32>
    tpu.vector_store %arg5[%c56, %c0_4], %3 {strides = array<i32>} : memref<88x128xf32, #tpu.memory_space<vmem>>, vector<32x128xf32>,
    %c0_5 = arith.constant 0 : index
    %c0_6 = arith.constant 0 : index
    %c0_7 = arith.constant 0 : index
    %5 = vector.load %arg2[%c0_5, %c0_6, %c0_7] : memref<6x384x256xbf16, #tpu.memory_space<vmem>>, vector<1x384x256xbf16>
    %6 = vector.shape_cast %5 : vector<1x384x256xbf16> to vector<384x256xbf16>
    %c0_8 = arith.constant 0 : index
    %c0_9 = arith.constant 0 : index
    %c0_10 = arith.constant 0 : index
    %7 = vector.load %arg3[%c0_8, %c0_9, %c0_10] : memref<6x1x256xf32, #tpu.memory_space<vmem>>, vector<1x1x256xf32>
    %8 = vector.shape_cast %7 : vector<1x1x256xf32> to vector<1x256xf32>
    %c54 = arith.constant 54 : index
    %c0_11 = arith.constant 0 : index
    %9 = vector.load %arg5[%c54, %c0_11] : memref<88x128xf32, #tpu.memory_space<vmem>>, vector<32x128xf32>
    %10 = arith.truncf %9 : vector<32x128xf32> to vector<32x128xbf16>
    %c55 = arith.constant 55 : index
    %c0_12 = arith.constant 0 : index
    %11 = vector.load %arg5[%c55, %c0_12] : memref<88x128xf32, #tpu.memory_space<vmem>>, vector<32x128xf32>
    %12 = arith.truncf %11 : vector<32x128xf32> to vector<32x128xbf16>
    %13 = arith.truncf %3 : vector<32x128xf32> to vector<32x128xbf16>
    %14 = vector.extract_strided_slice %6 {offsets = [0, 0], sizes = [128, 256], strides = [1, 1]} : vector<384x256xbf16> to vector<128x256xbf16>
    %cst_13 = arith.constant dense<0.000000e+00> : vector<32x256xf32>
    %15 = tpu.matmul %10, %14, %cst_13 {dimension_numbers = #tpu.dot_dimension_numbers<[1], [0], [0], [1], [0, 0, 1, 1], [], []>} : vector<32x128xbf16>, vector<128x256xbf16>, vector<32x256xf32> -> vector<32x256xf32>
    %16 = vector.extract_strided_slice %6 {offsets = [128, 0], sizes = [128, 256], strides = [1, 1]} : vector<384x256xbf16> to vector<128x256xbf16>
    %cst_14 = arith.constant dense<0.000000e+00> : vector<32x256xf32>
    %17 = tpu.matmul %12, %16, %cst_14 {dimension_numbers = #tpu.dot_dimension_numbers<[1], [0], [0], [1], [0, 0, 1, 1], [], []>} : vector<32x128xbf16>, vector<128x256xbf16>, vector<32x256xf32> -> vector<32x256xf32>
    %18 = arith.addf %15, %17 : vector<32x256xf32>
    %19 = vector.extract_strided_slice %6 {offsets = [256, 0], sizes = [128, 256], strides = [1, 1]} : vector<384x256xbf16> to vector<128x256xbf16>
    %cst_15 = arith.constant dense<0.000000e+00> : vector<32x256xf32>
    %20 = tpu.matmul %13, %19, %cst_15 {dimension_numbers = #tpu.dot_dimension_numbers<[1], [0], [0], [1], [0, 0, 1, 1], [], []>} : vector<32x128xbf16>, vector<128x256xbf16>, vector<32x256xf32> -> vector<32x256xf32>
    %21 = arith.addf %18, %20 : vector<32x256xf32>
    %22 = vector.broadcast %8 : vector<1x256xf32> to vector<32x256xf32>
    %23 = arith.addf %21, %22 : vector<32x256xf32>
    %24 = vector.extract_strided_slice %23 {offsets = [0, 0], sizes = [32, 128], strides = [1, 1]} : vector<32x256xf32> to vector<32x128xf32>
    %25 = vector.extract_strided_slice %23 {offsets = [0, 128], sizes = [32, 128], strides = [1, 1]} : vector<32x256xf32> to vector<32x128xf32>
    %26 = arith.negf %25 : vector<32x128xf32>
    %27 = math.exp %26 : vector<32x128xf32>
    %cst_16 = arith.constant 1.000000e+00 : f32
    %28 = vector.broadcast %cst_16 : f32 to vector<32x128xf32>
    %29 = arith.addf %28, %27 : vector<32x128xf32>
    %30 = arith.divf %28, %29 : vector<32x128xf32>
    %31 = arith.mulf %30, %24 : vector<32x128xf32>
    %cst_17 = arith.constant 1.000000e+00 : f32
    %32 = vector.broadcast %cst_17 : f32 to vector<32x128xf32>
    %33 = arith.subf %32, %30 : vector<32x128xf32>
    %34 = arith.mulf %33, %3 : vector<32x128xf32>
    %35 = arith.addf %31, %34 : vector<32x128xf32>
    %c56_18 = arith.constant 56 : index
    %c0_19 = arith.constant 0 : index
    %36 = vector.load %arg5[%c56_18, %c0_19] : memref<88x128xf32, #tpu.memory_space<vmem>>, vector<32x128xf32>
    tpu.vector_store %arg5[%c56_18, %c0_19], %35 {strides = array<i32>} : memref<88x128xf32, #tpu.memory_space<vmem>>, vector<32x128xf32>,
    %c1 = arith.constant 1 : index
    %c0_20 = arith.constant 0 : index
    %c0_21 = arith.constant 0 : index
    %37 = vector.load %arg2[%c1, %c0_20, %c0_21] : memref<6x384x256xbf16, #tpu.memory_space<vmem>>, vector<1x384x256xbf16>
    %38 = vector.shape_cast %37 : vector<1x384x256xbf16> to vector<384x256xbf16>
    %c1_22 = arith.constant 1 : index
    %c0_23 = arith.constant 0 : index
    %c0_24 = arith.constant 0 : index
    %39 = vector.load %arg3[%c1_22, %c0_23, %c0_24] : memref<6x1x256xf32, #tpu.memory_space<vmem>>, vector<1x1x256xf32>
    %40 = vector.shape_cast %39 : vector<1x1x256xf32> to vector<1x256xf32>
    %c50 = arith.constant 50 : index
    %c0_25 = arith.constant 0 : index
    %41 = vector.load %arg5[%c50, %c0_25] : memref<88x128xf32, #tpu.memory_space<vmem>>, vector<32x128xf32>
    %42 = arith.truncf %41 : vector<32x128xf32> to vector<32x128xbf16>
    %c53 = arith.constant 53 : index
    %c0_26 = arith.constant 0 : index
    %43 = vector.load %arg5[%c53, %c0_26] : memref<88x128xf32, #tpu.memory_space<vmem>>, vector<32x128xf32>
    %44 = arith.truncf %43 : vector<32x128xf32> to vector<32x128xbf16>
    %45 = arith.truncf %35 : vector<32x128xf32> to vector<32x128xbf16>
    %46 = vector.extract_strided_slice %38 {offsets = [0, 0], sizes = [128, 256], strides = [1, 1]} : vector<384x256xbf16> to vector<128x256xbf16>
    %cst_27 = arith.constant dense<0.000000e+00> : vector<32x256xf32>
    %47 = tpu.matmul %42, %46, %cst_27 {dimension_numbers = #tpu.dot_dimension_numbers<[1], [0], [0], [1], [0, 0, 1, 1], [], []>} : vector<32x128xbf16>, vector<128x256xbf16>, vector<32x256xf32> -> vector<32x256xf32>
    %48 = vector.extract_strided_slice %38 {offsets = [128, 0], sizes = [128, 256], strides = [1, 1]} : vector<384x256xbf16> to vector<128x256xbf16>
    %cst_28 = arith.constant dense<0.000000e+00> : vector<32x256xf32>
    %49 = tpu.matmul %44, %48, %cst_28 {dimension_numbers = #tpu.dot_dimension_numbers<[1], [0], [0], [1], [0, 0, 1, 1], [], []>} : vector<32x128xbf16>, vector<128x256xbf16>, vector<32x256xf32> -> vector<32x256xf32>
    %50 = arith.addf %47, %49 : vector<32x256xf32>
    %51 = vector.extract_strided_slice %38 {offsets = [256, 0], sizes = [128, 256], strides = [1, 1]} : vector<384x256xbf16> to vector<128x256xbf16>
    %cst_29 = arith.constant dense<0.000000e+00> : vector<32x256xf32>
    %52 = tpu.matmul %45, %51, %cst_29 {dimension_numbers = #tpu.dot_dimension_numbers<[1], [0], [0], [1], [0, 0, 1, 1], [], []>} : vector<32x128xbf16>, vector<128x256xbf16>, vector<32x256xf32> -> vector<32x256xf32>
    %53 = arith.addf %50, %52 : vector<32x256xf32>
    %54 = vector.broadcast %40 : vector<1x256xf32> to vector<32x256xf32>
    %55 = arith.addf %53, %54 : vector<32x256xf32>
    %56 = vector.extract_strided_slice %55 {offsets = [0, 0], sizes = [32, 128], strides = [1, 1]} : vector<32x256xf32> to vector<32x128xf32>
    %57 = vector.extract_strided_slice %55 {offsets = [0, 128], sizes = [32, 128], strides = [1, 1]} : vector<32x256xf32> to vector<32x128xf32>
    %58 = arith.negf %57 : vector<32x128xf32>
    %59 = math.exp %58 : vector<32x128xf32>
    %cst_30 = arith.constant 1.000000e+00 : f32
    %60 = vector.broadcast %cst_30 : f32 to vector<32x128xf32>
    %61 = arith.addf %60, %59 : vector<32x128xf32>
    %62 = arith.divf %60, %61 : vector<32x128xf32>
    %63 = arith.mulf %62, %56 : vector<32x128xf32>
    %cst_31 = arith.constant 1.000000e+00 : f32
    %64 = vector.broadcast %cst_31 : f32 to vector<32x128xf32>
    %65 = arith.subf %64, %62 : vector<32x128xf32>
    %66 = arith.mulf %65, %35 : vector<32x128xf32>
    %67 = arith.addf %63, %66 : vector<32x128xf32>
    %c56_32 = arith.constant 56 : index
    %c0_33 = arith.constant 0 : index
    %68 = vector.load %arg5[%c56_32, %c0_33] : memref<88x128xf32, #tpu.memory_space<vmem>>, vector<32x128xf32>
    tpu.vector_store %arg5[%c56_32, %c0_33], %67 {strides = array<i32>} : memref<88x128xf32, #tpu.memory_space<vmem>>, vector<32x128xf32>,
    %c2 = arith.constant 2 : index
    %c0_34 = arith.constant 0 : index
    %c0_35 = arith.constant 0 : index
    %69 = vector.load %arg2[%c2, %c0_34, %c0_35] : memref<6x384x256xbf16, #tpu.memory_space<vmem>>, vector<1x384x256xbf16>
    %70 = vector.shape_cast %69 : vector<1x384x256xbf16> to vector<384x256xbf16>
    %c2_36 = arith.constant 2 : index
    %c0_37 = arith.constant 0 : index
    %c0_38 = arith.constant 0 : index
    %71 = vector.load %arg3[%c2_36, %c0_37, %c0_38] : memref<6x1x256xf32, #tpu.memory_space<vmem>>, vector<1x1x256xf32>
    %72 = vector.shape_cast %71 : vector<1x1x256xf32> to vector<1x256xf32>
    %c38 = arith.constant 38 : index
    %c0_39 = arith.constant 0 : index
    %73 = vector.load %arg5[%c38, %c0_39] : memref<88x128xf32, #tpu.memory_space<vmem>>, vector<32x128xf32>
    %74 = arith.truncf %73 : vector<32x128xf32> to vector<32x128xbf16>
    %c47 = arith.constant 47 : index
    %c0_40 = arith.constant 0 : index
    %75 = vector.load %arg5[%c47, %c0_40] : memref<88x128xf32, #tpu.memory_space<vmem>>, vector<32x128xf32>
    %76 = arith.truncf %75 : vector<32x128xf32> to vector<32x128xbf16>
    %77 = arith.truncf %67 : vector<32x128xf32> to vector<32x128xbf16>
    %78 = vector.extract_strided_slice %70 {offsets = [0, 0], sizes = [128, 256], strides = [1, 1]} : vector<384x256xbf16> to vector<128x256xbf16>
    %cst_41 = arith.constant dense<0.000000e+00> : vector<32x256xf32>
    %79 = tpu.matmul %74, %78, %cst_41 {dimension_numbers = #tpu.dot_dimension_numbers<[1], [0], [0], [1], [0, 0, 1, 1], [], []>} : vector<32x128xbf16>, vector<128x256xbf16>, vector<32x256xf32> -> vector<32x256xf32>
    %80 = vector.extract_strided_slice %70 {offsets = [128, 0], sizes = [128, 256], strides = [1, 1]} : vector<384x256xbf16> to vector<128x256xbf16>
    %cst_42 = arith.constant dense<0.000000e+00> : vector<32x256xf32>
    %81 = tpu.matmul %76, %80, %cst_42 {dimension_numbers = #tpu.dot_dimension_numbers<[1], [0], [0], [1], [0, 0, 1, 1], [], []>} : vector<32x128xbf16>, vector<128x256xbf16>, vector<32x256xf32> -> vector<32x256xf32>
    %82 = arith.addf %79, %81 : vector<32x256xf32>
    %83 = vector.extract_strided_slice %70 {offsets = [256, 0], sizes = [128, 256], strides = [1, 1]} : vector<384x256xbf16> to vector<128x256xbf16>
    %cst_43 = arith.constant dense<0.000000e+00> : vector<32x256xf32>
    %84 = tpu.matmul %77, %83, %cst_43 {dimension_numbers = #tpu.dot_dimension_numbers<[1], [0], [0], [1], [0, 0, 1, 1], [], []>} : vector<32x128xbf16>, vector<128x256xbf16>, vector<32x256xf32> -> vector<32x256xf32>
    %85 = arith.addf %82, %84 : vector<32x256xf32>
    %86 = vector.broadcast %72 : vector<1x256xf32> to vector<32x256xf32>
    %87 = arith.addf %85, %86 : vector<32x256xf32>
    %88 = vector.extract_strided_slice %87 {offsets = [0, 0], sizes = [32, 128], strides = [1, 1]} : vector<32x256xf32> to vector<32x128xf32>
    %89 = vector.extract_strided_slice %87 {offsets = [0, 128], sizes = [32, 128], strides = [1, 1]} : vector<32x256xf32> to vector<32x128xf32>
    %90 = arith.negf %89 : vector<32x128xf32>
    %91 = math.exp %90 : vector<32x128xf32>
    %cst_44 = arith.constant 1.000000e+00 : f32
    %92 = vector.broadcast %cst_44 : f32 to vector<32x128xf32>
    %93 = arith.addf %92, %91 : vector<32x128xf32>
    %94 = arith.divf %92, %93 : vector<32x128xf32>
    %95 = arith.mulf %94, %88 : vector<32x128xf32>
    %cst_45 = arith.constant 1.000000e+00 : f32
    %96 = vector.broadcast %cst_45 : f32 to vector<32x128xf32>
    %97 = arith.subf %96, %94 : vector<32x128xf32>
    %98 = arith.mulf %97, %67 : vector<32x128xf32>
    %99 = arith.addf %95, %98 : vector<32x128xf32>
    %c56_46 = arith.constant 56 : index
    %c0_47 = arith.constant 0 : index
    %100 = vector.load %arg5[%c56_46, %c0_47] : memref<88x128xf32, #tpu.memory_space<vmem>>, vector<32x128xf32>
    tpu.vector_store %arg5[%c56_46, %c0_47], %99 {strides = array<i32>} : memref<88x128xf32, #tpu.memory_space<vmem>>, vector<32x128xf32>,
    %c3 = arith.constant 3 : index
    %c0_48 = arith.constant 0 : index
    %c0_49 = arith.constant 0 : index
    %101 = vector.load %arg2[%c3, %c0_48, %c0_49] : memref<6x384x256xbf16, #tpu.memory_space<vmem>>, vector<1x384x256xbf16>
    %102 = vector.shape_cast %101 : vector<1x384x256xbf16> to vector<384x256xbf16>
    %c3_50 = arith.constant 3 : index
    %c0_51 = arith.constant 0 : index
    %c0_52 = arith.constant 0 : index
    %103 = vector.load %arg3[%c3_50, %c0_51, %c0_52] : memref<6x1x256xf32, #tpu.memory_space<vmem>>, vector<1x1x256xf32>
    %104 = vector.shape_cast %103 : vector<1x1x256xf32> to vector<1x256xf32>
    %c2_53 = arith.constant 2 : index
    %c0_54 = arith.constant 0 : index
    %105 = vector.load %arg5[%c2_53, %c0_54] : memref<88x128xf32, #tpu.memory_space<vmem>>, vector<32x128xf32>
    %106 = arith.truncf %105 : vector<32x128xf32> to vector<32x128xbf16>
    %c29 = arith.constant 29 : index
    %c0_55 = arith.constant 0 : index
    %107 = vector.load %arg5[%c29, %c0_55] : memref<88x128xf32, #tpu.memory_space<vmem>>, vector<32x128xf32>
    %108 = arith.truncf %107 : vector<32x128xf32> to vector<32x128xbf16>
    %109 = arith.truncf %99 : vector<32x128xf32> to vector<32x128xbf16>
    %110 = vector.extract_strided_slice %102 {offsets = [0, 0], sizes = [128, 256], strides = [1, 1]} : vector<384x256xbf16> to vector<128x256xbf16>
    %cst_56 = arith.constant dense<0.000000e+00> : vector<32x256xf32>
    %111 = tpu.matmul %106, %110, %cst_56 {dimension_numbers = #tpu.dot_dimension_numbers<[1], [0], [0], [1], [0, 0, 1, 1], [], []>} : vector<32x128xbf16>, vector<128x256xbf16>, vector<32x256xf32> -> vector<32x256xf32>
    %112 = vector.extract_strided_slice %102 {offsets = [128, 0], sizes = [128, 256], strides = [1, 1]} : vector<384x256xbf16> to vector<128x256xbf16>
    %cst_57 = arith.constant dense<0.000000e+00> : vector<32x256xf32>
    %113 = tpu.matmul %108, %112, %cst_57 {dimension_numbers = #tpu.dot_dimension_numbers<[1], [0], [0], [1], [0, 0, 1, 1], [], []>} : vector<32x128xbf16>, vector<128x256xbf16>, vector<32x256xf32> -> vector<32x256xf32>
    %114 = arith.addf %111, %113 : vector<32x256xf32>
    %115 = vector.extract_strided_slice %102 {offsets = [256, 0], sizes = [128, 256], strides = [1, 1]} : vector<384x256xbf16> to vector<128x256xbf16>
    %cst_58 = arith.constant dense<0.000000e+00> : vector<32x256xf32>
    %116 = tpu.matmul %109, %115, %cst_58 {dimension_numbers = #tpu.dot_dimension_numbers<[1], [0], [0], [1], [0, 0, 1, 1], [], []>} : vector<32x128xbf16>, vector<128x256xbf16>, vector<32x256xf32> -> vector<32x256xf32>
    %117 = arith.addf %114, %116 : vector<32x256xf32>
    %118 = vector.broadcast %104 : vector<1x256xf32> to vector<32x256xf32>
    %119 = arith.addf %117, %118 : vector<32x256xf32>
    %120 = vector.extract_strided_slice %119 {offsets = [0, 0], sizes = [32, 128], strides = [1, 1]} : vector<32x256xf32> to vector<32x128xf32>
    %121 = vector.extract_strided_slice %119 {offsets = [0, 128], sizes = [32, 128], strides = [1, 1]} : vector<32x256xf32> to vector<32x128xf32>
    %122 = arith.negf %121 : vector<32x128xf32>
    %123 = math.exp %122 : vector<32x128xf32>
    %cst_59 = arith.constant 1.000000e+00 : f32
    %124 = vector.broadcast %cst_59 : f32 to vector<32x128xf32>
    %125 = arith.addf %124, %123 : vector<32x128xf32>
    %126 = arith.divf %124, %125 : vector<32x128xf32>
    %127 = arith.mulf %126, %120 : vector<32x128xf32>
    %cst_60 = arith.constant 1.000000e+00 : f32
    %128 = vector.broadcast %cst_60 : f32 to vector<32x128xf32>
    %129 = arith.subf %128, %126 : vector<32x128xf32>
    %130 = arith.mulf %129, %99 : vector<32x128xf32>
    %131 = arith.addf %127, %130 : vector<32x128xf32>
    %c56_61 = arith.constant 56 : index
    %c0_62 = arith.constant 0 : index
    %132 = vector.load %arg5[%c56_61, %c0_62] : memref<88x128xf32, #tpu.memory_space<vmem>>, vector<32x128xf32>
    tpu.vector_store %arg5[%c56_61, %c0_62], %131 {strides = array<i32>} : memref<88x128xf32, #tpu.memory_space<vmem>>, vector<32x128xf32>,
    %c4 = arith.constant 4 : index
    %c0_63 = arith.constant 0 : index
    %c0_64 = arith.constant 0 : index
    %133 = vector.load %arg2[%c4, %c0_63, %c0_64] : memref<6x384x256xbf16, #tpu.memory_space<vmem>>, vector<1x384x256xbf16>
    %134 = vector.shape_cast %133 : vector<1x384x256xbf16> to vector<384x256xbf16>
    %c4_65 = arith.constant 4 : index
    %c0_66 = arith.constant 0 : index
    %c0_67 = arith.constant 0 : index
    %135 = vector.load %arg3[%c4_65, %c0_66, %c0_67] : memref<6x1x256xf32, #tpu.memory_space<vmem>>, vector<1x1x256xf32>
    %136 = vector.shape_cast %135 : vector<1x1x256xf32> to vector<1x256xf32>
    %c54_68 = arith.constant 54 : index
    %c0_69 = arith.constant 0 : index
    %137 = vector.load %arg5[%c54_68, %c0_69] : memref<88x128xf32, #tpu.memory_space<vmem>>, vector<32x128xf32>
    %138 = arith.truncf %137 : vector<32x128xf32> to vector<32x128xbf16>
    %c55_70 = arith.constant 55 : index
    %c0_71 = arith.constant 0 : index
    %139 = vector.load %arg5[%c55_70, %c0_71] : memref<88x128xf32, #tpu.memory_space<vmem>>, vector<32x128xf32>
    %140 = arith.truncf %139 : vector<32x128xf32> to vector<32x128xbf16>
    %141 = arith.truncf %131 : vector<32x128xf32> to vector<32x128xbf16>
    %142 = vector.extract_strided_slice %134 {offsets = [0, 0], sizes = [128, 256], strides = [1, 1]} : vector<384x256xbf16> to vector<128x256xbf16>
    %cst_72 = arith.constant dense<0.000000e+00> : vector<32x256xf32>
    %143 = tpu.matmul %138, %142, %cst_72 {dimension_numbers = #tpu.dot_dimension_numbers<[1], [0], [0], [1], [0, 0, 1, 1], [], []>} : vector<32x128xbf16>, vector<128x256xbf16>, vector<32x256xf32> -> vector<32x256xf32>
    %144 = vector.extract_strided_slice %134 {offsets = [128, 0], sizes = [128, 256], strides = [1, 1]} : vector<384x256xbf16> to vector<128x256xbf16>
    %cst_73 = arith.constant dense<0.000000e+00> : vector<32x256xf32>
    %145 = tpu.matmul %140, %144, %cst_73 {dimension_numbers = #tpu.dot_dimension_numbers<[1], [0], [0], [1], [0, 0, 1, 1], [], []>} : vector<32x128xbf16>, vector<128x256xbf16>, vector<32x256xf32> -> vector<32x256xf32>
    %146 = arith.addf %143, %145 : vector<32x256xf32>
    %147 = vector.extract_strided_slice %134 {offsets = [256, 0], sizes = [128, 256], strides = [1, 1]} : vector<384x256xbf16> to vector<128x256xbf16>
    %cst_74 = arith.constant dense<0.000000e+00> : vector<32x256xf32>
    %148 = tpu.matmul %141, %147, %cst_74 {dimension_numbers = #tpu.dot_dimension_numbers<[1], [0], [0], [1], [0, 0, 1, 1], [], []>} : vector<32x128xbf16>, vector<128x256xbf16>, vector<32x256xf32> -> vector<32x256xf32>
    %149 = arith.addf %146, %148 : vector<32x256xf32>
    %150 = vector.broadcast %136 : vector<1x256xf32> to vector<32x256xf32>
    %151 = arith.addf %149, %150 : vector<32x256xf32>
    %152 = vector.extract_strided_slice %151 {offsets = [0, 0], sizes = [32, 128], strides = [1, 1]} : vector<32x256xf32> to vector<32x128xf32>
    %153 = vector.extract_strided_slice %151 {offsets = [0, 128], sizes = [32, 128], strides = [1, 1]} : vector<32x256xf32> to vector<32x128xf32>
    %154 = arith.negf %153 : vector<32x128xf32>
    %155 = math.exp %154 : vector<32x128xf32>
    %cst_75 = arith.constant 1.000000e+00 : f32
    %156 = vector.broadcast %cst_75 : f32 to vector<32x128xf32>
    %157 = arith.addf %156, %155 : vector<32x128xf32>
    %158 = arith.divf %156, %157 : vector<32x128xf32>
    %159 = arith.mulf %158, %152 : vector<32x128xf32>
    %cst_76 = arith.constant 1.000000e+00 : f32
    %160 = vector.broadcast %cst_76 : f32 to vector<32x128xf32>
    %161 = arith.subf %160, %158 : vector<32x128xf32>
    %162 = arith.mulf %161, %131 : vector<32x128xf32>
    %163 = arith.addf %159, %162 : vector<32x128xf32>
    %c56_77 = arith.constant 56 : index
    %c0_78 = arith.constant 0 : index
    %164 = vector.load %arg5[%c56_77, %c0_78] : memref<88x128xf32, #tpu.memory_space<vmem>>, vector<32x128xf32>
    tpu.vector_store %arg5[%c56_77, %c0_78], %163 {strides = array<i32>} : memref<88x128xf32, #tpu.memory_space<vmem>>, vector<32x128xf32>,
    %c5 = arith.constant 5 : index
    %c0_79 = arith.constant 0 : index
    %c0_80 = arith.constant 0 : index
    %165 = vector.load %arg2[%c5, %c0_79, %c0_80] : memref<6x384x256xbf16, #tpu.memory_space<vmem>>, vector<1x384x256xbf16>
    %166 = vector.shape_cast %165 : vector<1x384x256xbf16> to vector<384x256xbf16>
    %c5_81 = arith.constant 5 : index
    %c0_82 = arith.constant 0 : index
    %c0_83 = arith.constant 0 : index
    %167 = vector.load %arg3[%c5_81, %c0_82, %c0_83] : memref<6x1x256xf32, #tpu.memory_space<vmem>>, vector<1x1x256xf32>
    %168 = vector.shape_cast %167 : vector<1x1x256xf32> to vector<1x256xf32>
    %c54_84 = arith.constant 54 : index
    %c0_85 = arith.constant 0 : index
    %169 = vector.load %arg5[%c54_84, %c0_85] : memref<88x128xf32, #tpu.memory_space<vmem>>, vector<32x128xf32>
    %170 = arith.truncf %169 : vector<32x128xf32> to vector<32x128xbf16>
    %c55_86 = arith.constant 55 : index
    %c0_87 = arith.constant 0 : index
    %171 = vector.load %arg5[%c55_86, %c0_87] : memref<88x128xf32, #tpu.memory_space<vmem>>, vector<32x128xf32>
    %172 = arith.truncf %171 : vector<32x128xf32> to vector<32x128xbf16>
    %173 = arith.truncf %163 : vector<32x128xf32> to vector<32x128xbf16>
    %174 = vector.extract_strided_slice %166 {offsets = [0, 0], sizes = [128, 256], strides = [1, 1]} : vector<384x256xbf16> to vector<128x256xbf16>
    %cst_88 = arith.constant dense<0.000000e+00> : vector<32x256xf32>
    %175 = tpu.matmul %170, %174, %cst_88 {dimension_numbers = #tpu.dot_dimension_numbers<[1], [0], [0], [1], [0, 0, 1, 1], [], []>} : vector<32x128xbf16>, vector<128x256xbf16>, vector<32x256xf32> -> vector<32x256xf32>
    %176 = vector.extract_strided_slice %166 {offsets = [128, 0], sizes = [128, 256], strides = [1, 1]} : vector<384x256xbf16> to vector<128x256xbf16>
    %cst_89 = arith.constant dense<0.000000e+00> : vector<32x256xf32>
    %177 = tpu.matmul %172, %176, %cst_89 {dimension_numbers = #tpu.dot_dimension_numbers<[1], [0], [0], [1], [0, 0, 1, 1], [], []>} : vector<32x128xbf16>, vector<128x256xbf16>, vector<32x256xf32> -> vector<32x256xf32>
    %178 = arith.addf %175, %177 : vector<32x256xf32>
    %179 = vector.extract_strided_slice %166 {offsets = [256, 0], sizes = [128, 256], strides = [1, 1]} : vector<384x256xbf16> to vector<128x256xbf16>
    %cst_90 = arith.constant dense<0.000000e+00> : vector<32x256xf32>
    %180 = tpu.matmul %173, %179, %cst_90 {dimension_numbers = #tpu.dot_dimension_numbers<[1], [0], [0], [1], [0, 0, 1, 1], [], []>} : vector<32x128xbf16>, vector<128x256xbf16>, vector<32x256xf32> -> vector<32x256xf32>
    %181 = arith.addf %178, %180 : vector<32x256xf32>
    %182 = vector.broadcast %168 : vector<1x256xf32> to vector<32x256xf32>
    %183 = arith.addf %181, %182 : vector<32x256xf32>
    %184 = vector.extract_strided_slice %183 {offsets = [0, 0], sizes = [32, 128], strides = [1, 1]} : vector<32x256xf32> to vector<32x128xf32>
    %185 = vector.extract_strided_slice %183 {offsets = [0, 128], sizes = [32, 128], strides = [1, 1]} : vector<32x256xf32> to vector<32x128xf32>
    %186 = arith.negf %185 : vector<32x128xf32>
    %187 = math.exp %186 : vector<32x128xf32>
    %cst_91 = arith.constant 1.000000e+00 : f32
    %188 = vector.broadcast %cst_91 : f32 to vector<32x128xf32>
    %189 = arith.addf %188, %187 : vector<32x128xf32>
    %190 = arith.divf %188, %189 : vector<32x128xf32>
    %191 = arith.mulf %190, %184 : vector<32x128xf32>
    %cst_92 = arith.constant 1.000000e+00 : f32
    %192 = vector.broadcast %cst_92 : f32 to vector<32x128xf32>
    %193 = arith.subf %192, %190 : vector<32x128xf32>
    %194 = arith.mulf %193, %163 : vector<32x128xf32>
    %195 = arith.addf %191, %194 : vector<32x128xf32>
    %c0_93 = arith.constant 0 : index
    %c0_94 = arith.constant 0 : index
    %c0_95 = arith.constant 0 : index
    %196 = vector.load %arg4[%c0_93, %c0_94, %c0_95] : memref<1x32x128xf32, #tpu.memory_space<vmem>>, vector<1x32x128xf32>
    %197 = vector.shape_cast %196 : vector<1x32x128xf32> to vector<32x128xf32>
    %198 = vector.shape_cast %195 : vector<32x128xf32> to vector<1x32x128xf32>
    tpu.vector_store %arg4[%c0_93, %c0_94, %c0_95], %198 {strides = array<i32>} : memref<1x32x128xf32, #tpu.memory_space<vmem>>, vector<1x32x128xf32>,
    return
  }
  func.func @transform_0(%arg0: i32) -> (i32, i32, i32) {
    %c0_i32 = arith.constant 0 : i32
    %c0_i32_0 = arith.constant 0 : i32
    %c0_i32_1 = arith.constant 0 : i32
    return %arg0, %c0_i32, %c0_i32_0 : i32, i32, i32
  }
  func.func @transform_1(%arg0: i32) -> (i32, i32, i32) {
    %c0_i32 = arith.constant 0 : i32
    %c0_i32_0 = arith.constant 0 : i32
    %c0_i32_1 = arith.constant 0 : i32
    %c0_i32_2 = arith.constant 0 : i32
    return %c0_i32, %c0_i32_0, %c0_i32_1 : i32, i32, i32
  }
  func.func @transform_2(%arg0: i32) -> (i32, i32, i32) {
    %c0_i32 = arith.constant 0 : i32
    %c0_i32_0 = arith.constant 0 : i32
    %c0_i32_1 = arith.constant 0 : i32
    %c0_i32_2 = arith.constant 0 : i32
    return %c0_i32, %c0_i32_0, %c0_i32_1 : i32, i32, i32
  }
  func.func @transform_3(%arg0: i32) -> (i32, i32, i32) {
    %c0_i32 = arith.constant 0 : i32
    %c0_i32_0 = arith.constant 0 : i32
    %c0_i32_1 = arith.constant 0 : i32
    return %arg0, %c0_i32, %c0_i32_0 : i32, i32, i32
  }
}

module attributes {stable_mosaic.version = 11 : i64} {
  func.func @kernel(%arg0: i32, %arg1: memref<64x128xf32, #tpu.memory_space<vmem>>, %arg2: memref<3x128x128xbf16, #tpu.memory_space<vmem>>, %arg3: memref<3x1x128xf32, #tpu.memory_space<vmem>>, %arg4: memref<128x128xbf16, #tpu.memory_space<vmem>>, %arg5: memref<1x128xf32, #tpu.memory_space<vmem>>, %arg6: memref<1x128xf32, #tpu.memory_space<vmem>>, %arg7: memref<1x1xf32, #tpu.memory_space<vmem>>, %arg8: memref<64x128xf32, #tpu.memory_space<vmem>>, %arg9: memref<64x128xf32, #tpu.memory_space<vmem>>, %arg10: memref<64x1xf32, #tpu.memory_space<vmem>>) attributes {dimension_semantics = [#tpu.dimension_semantics<parallel>], iteration_bounds = array<i64: 1>, scalar_prefetch = 0 : i64, scratch_operands = 0 : i64, tpu.core_type = #tpu.core_type<tc>, window_params = [{transform_indices = @transform_0, window_bounds = array<i64: 64, 128>}, {pipeline_mode = #tpu.pipeline_mode<synchronous>, transform_indices = @transform_1, window_bounds = array<i64: 3, 128, 128>}, {pipeline_mode = #tpu.pipeline_mode<synchronous>, transform_indices = @transform_2, window_bounds = array<i64: 3, 1, 128>}, {pipeline_mode = #tpu.pipeline_mode<synchronous>, transform_indices = @transform_3, window_bounds = array<i64: 128, 128>}, {pipeline_mode = #tpu.pipeline_mode<synchronous>, transform_indices = @transform_4, window_bounds = array<i64: 1, 128>}, {pipeline_mode = #tpu.pipeline_mode<synchronous>, transform_indices = @transform_5, window_bounds = array<i64: 1, 128>}, {pipeline_mode = #tpu.pipeline_mode<synchronous>, transform_indices = @transform_6, window_bounds = array<i64: 1, 1>}, {transform_indices = @transform_7, window_bounds = array<i64: 64, 128>}, {transform_indices = @transform_8, window_bounds = array<i64: 64, 128>}, {transform_indices = @transform_9, window_bounds = array<i64: 64, 1>}]} {
    %c0 = arith.constant 0 : index
    %c0_0 = arith.constant 0 : index
    %0 = vector.load %arg1[%c0, %c0_0] : memref<64x128xf32, #tpu.memory_space<vmem>>, vector<64x128xf32>
    %1 = arith.truncf %0 : vector<64x128xf32> to vector<64x128xbf16>
    %c0_1 = arith.constant 0 : index
    %c0_2 = arith.constant 0 : index
    %c0_3 = arith.constant 0 : index
    %2 = vector.load %arg2[%c0_1, %c0_2, %c0_3] : memref<3x128x128xbf16, #tpu.memory_space<vmem>>, vector<1x128x128xbf16>
    %3 = vector.shape_cast %2 : vector<1x128x128xbf16> to vector<128x128xbf16>
    %cst = arith.constant dense<0.000000e+00> : vector<64x128xf32>
    %4 = tpu.matmul %1, %3, %cst {dimension_numbers = #tpu.dot_dimension_numbers<[1], [0], [0], [1], [0, 0, 1, 1], [], []>} : vector<64x128xbf16>, vector<128x128xbf16>, vector<64x128xf32> -> vector<64x128xf32>
    %c0_4 = arith.constant 0 : index
    %c0_5 = arith.constant 0 : index
    %c0_6 = arith.constant 0 : index
    %5 = vector.load %arg3[%c0_4, %c0_5, %c0_6] : memref<3x1x128xf32, #tpu.memory_space<vmem>>, vector<1x1x128xf32>
    %6 = vector.shape_cast %5 : vector<1x1x128xf32> to vector<1x128xf32>
    %7 = vector.broadcast %6 : vector<1x128xf32> to vector<64x128xf32>
    %8 = arith.addf %4, %7 : vector<64x128xf32>
    %cst_7 = arith.constant 0.000000e+00 : f32
    %9 = vector.broadcast %cst_7 : f32 to vector<64x128xf32>
    %10 = arith.maximumf %8, %9 : vector<64x128xf32>
    %11 = arith.truncf %10 : vector<64x128xf32> to vector<64x128xbf16>
    %c1 = arith.constant 1 : index
    %c0_8 = arith.constant 0 : index
    %c0_9 = arith.constant 0 : index
    %12 = vector.load %arg2[%c1, %c0_8, %c0_9] : memref<3x128x128xbf16, #tpu.memory_space<vmem>>, vector<1x128x128xbf16>
    %13 = vector.shape_cast %12 : vector<1x128x128xbf16> to vector<128x128xbf16>
    %cst_10 = arith.constant dense<0.000000e+00> : vector<64x128xf32>
    %14 = tpu.matmul %11, %13, %cst_10 {dimension_numbers = #tpu.dot_dimension_numbers<[1], [0], [0], [1], [0, 0, 1, 1], [], []>} : vector<64x128xbf16>, vector<128x128xbf16>, vector<64x128xf32> -> vector<64x128xf32>
    %c1_11 = arith.constant 1 : index
    %c0_12 = arith.constant 0 : index
    %c0_13 = arith.constant 0 : index
    %15 = vector.load %arg3[%c1_11, %c0_12, %c0_13] : memref<3x1x128xf32, #tpu.memory_space<vmem>>, vector<1x1x128xf32>
    %16 = vector.shape_cast %15 : vector<1x1x128xf32> to vector<1x128xf32>
    %17 = vector.broadcast %16 : vector<1x128xf32> to vector<64x128xf32>
    %18 = arith.addf %14, %17 : vector<64x128xf32>
    %cst_14 = arith.constant 0.000000e+00 : f32
    %19 = vector.broadcast %cst_14 : f32 to vector<64x128xf32>
    %20 = arith.maximumf %18, %19 : vector<64x128xf32>
    %21 = arith.truncf %20 : vector<64x128xf32> to vector<64x128xbf16>
    %c2 = arith.constant 2 : index
    %c0_15 = arith.constant 0 : index
    %c0_16 = arith.constant 0 : index
    %22 = vector.load %arg2[%c2, %c0_15, %c0_16] : memref<3x128x128xbf16, #tpu.memory_space<vmem>>, vector<1x128x128xbf16>
    %23 = vector.shape_cast %22 : vector<1x128x128xbf16> to vector<128x128xbf16>
    %cst_17 = arith.constant dense<0.000000e+00> : vector<64x128xf32>
    %24 = tpu.matmul %21, %23, %cst_17 {dimension_numbers = #tpu.dot_dimension_numbers<[1], [0], [0], [1], [0, 0, 1, 1], [], []>} : vector<64x128xbf16>, vector<128x128xbf16>, vector<64x128xf32> -> vector<64x128xf32>
    %c2_18 = arith.constant 2 : index
    %c0_19 = arith.constant 0 : index
    %c0_20 = arith.constant 0 : index
    %25 = vector.load %arg3[%c2_18, %c0_19, %c0_20] : memref<3x1x128xf32, #tpu.memory_space<vmem>>, vector<1x1x128xf32>
    %26 = vector.shape_cast %25 : vector<1x1x128xf32> to vector<1x128xf32>
    %27 = vector.broadcast %26 : vector<1x128xf32> to vector<64x128xf32>
    %28 = arith.addf %24, %27 : vector<64x128xf32>
    %cst_21 = arith.constant 0.000000e+00 : f32
    %29 = vector.broadcast %cst_21 : f32 to vector<64x128xf32>
    %30 = arith.maximumf %28, %29 : vector<64x128xf32>
    %c0_22 = arith.constant 0 : index
    %c0_23 = arith.constant 0 : index
    %31 = vector.load %arg8[%c0_22, %c0_23] : memref<64x128xf32, #tpu.memory_space<vmem>>, vector<64x128xf32>
    tpu.vector_store %arg8[%c0_22, %c0_23], %30 {strides = array<i32>} : memref<64x128xf32, #tpu.memory_space<vmem>>, vector<64x128xf32>,
    %32 = arith.truncf %30 : vector<64x128xf32> to vector<64x128xbf16>
    %c0_24 = arith.constant 0 : index
    %c0_25 = arith.constant 0 : index
    %33 = vector.load %arg4[%c0_24, %c0_25] : memref<128x128xbf16, #tpu.memory_space<vmem>>, vector<128x128xbf16>
    %cst_26 = arith.constant dense<0.000000e+00> : vector<64x128xf32>
    %34 = tpu.matmul %32, %33, %cst_26 {dimension_numbers = #tpu.dot_dimension_numbers<[1], [0], [0], [1], [0, 0, 1, 1], [], []>} : vector<64x128xbf16>, vector<128x128xbf16>, vector<64x128xf32> -> vector<64x128xf32>
    %c0_27 = arith.constant 0 : index
    %c0_28 = arith.constant 0 : index
    %35 = vector.load %arg5[%c0_27, %c0_28] : memref<1x128xf32, #tpu.memory_space<vmem>>, vector<1x128xf32>
    %36 = vector.broadcast %35 : vector<1x128xf32> to vector<64x128xf32>
    %37 = arith.addf %34, %36 : vector<64x128xf32>
    %38 = arith.negf %37 : vector<64x128xf32>
    %39 = math.exp %38 : vector<64x128xf32>
    %cst_29 = arith.constant 1.000000e+00 : f32
    %40 = vector.broadcast %cst_29 : f32 to vector<64x128xf32>
    %41 = arith.addf %40, %39 : vector<64x128xf32>
    %42 = arith.divf %40, %41 : vector<64x128xf32>
    %c0_30 = arith.constant 0 : index
    %c0_31 = arith.constant 0 : index
    %43 = vector.load %arg9[%c0_30, %c0_31] : memref<64x128xf32, #tpu.memory_space<vmem>>, vector<64x128xf32>
    tpu.vector_store %arg9[%c0_30, %c0_31], %42 {strides = array<i32>} : memref<64x128xf32, #tpu.memory_space<vmem>>, vector<64x128xf32>,
    %c0_32 = arith.constant 0 : index
    %c0_33 = arith.constant 0 : index
    %44 = vector.load %arg6[%c0_32, %c0_33] : memref<1x128xf32, #tpu.memory_space<vmem>>, vector<1x128xf32>
    %45 = vector.broadcast %44 : vector<1x128xf32> to vector<64x128xf32>
    %46 = arith.mulf %37, %45 : vector<64x128xf32>
    %cst_34 = arith.constant dense<0.000000e+00> : vector<64xf32>
    %47 = vector.multi_reduction <add>, %46, %cst_34 [1] : vector<64x128xf32> to vector<64xf32>
    %48 = vector.shape_cast %47 : vector<64xf32> to vector<64x1xf32>
    %c0_35 = arith.constant 0 : index
    %c0_36 = arith.constant 0 : index
    %49 = vector.load %arg7[%c0_35, %c0_36] : memref<1x1xf32, #tpu.memory_space<vmem>>, vector<1x1xf32>
    %50 = vector.broadcast %49 : vector<1x1xf32> to vector<64x1xf32>
    %51 = arith.addf %48, %50 : vector<64x1xf32>
    %52 = arith.negf %51 : vector<64x1xf32>
    %53 = math.exp %52 : vector<64x1xf32>
    %cst_37 = arith.constant 1.000000e+00 : f32
    %54 = vector.broadcast %cst_37 : f32 to vector<64x1xf32>
    %55 = arith.addf %54, %53 : vector<64x1xf32>
    %56 = arith.divf %54, %55 : vector<64x1xf32>
    %c0_38 = arith.constant 0 : index
    %c0_39 = arith.constant 0 : index
    %57 = vector.load %arg10[%c0_38, %c0_39] : memref<64x1xf32, #tpu.memory_space<vmem>>, vector<64x1xf32>
    tpu.vector_store %arg10[%c0_38, %c0_39], %56 {strides = array<i32>} : memref<64x1xf32, #tpu.memory_space<vmem>>, vector<64x1xf32>,
    return
  }
  func.func @transform_0(%arg0: i32) -> (i32, i32) {
    %c0_i32 = arith.constant 0 : i32
    %c0_i32_0 = arith.constant 0 : i32
    return %arg0, %c0_i32 : i32, i32
  }
  func.func @transform_1(%arg0: i32) -> (i32, i32, i32) {
    %c0_i32 = arith.constant 0 : i32
    %c0_i32_0 = arith.constant 0 : i32
    %c0_i32_1 = arith.constant 0 : i32
    %c0_i32_2 = arith.constant 0 : i32
    return %c0_i32, %c0_i32_0, %c0_i32_1 : i32, i32, i32
  }
  func.func @transform_2(%arg0: i32) -> (i32, i32, i32) {
    %c0_i32 = arith.constant 0 : i32
    %c0_i32_0 = arith.constant 0 : i32
    %c0_i32_1 = arith.constant 0 : i32
    %c0_i32_2 = arith.constant 0 : i32
    return %c0_i32, %c0_i32_0, %c0_i32_1 : i32, i32, i32
  }
  func.func @transform_3(%arg0: i32) -> (i32, i32) {
    %c0_i32 = arith.constant 0 : i32
    %c0_i32_0 = arith.constant 0 : i32
    %c0_i32_1 = arith.constant 0 : i32
    return %c0_i32, %c0_i32_0 : i32, i32
  }
  func.func @transform_4(%arg0: i32) -> (i32, i32) {
    %c0_i32 = arith.constant 0 : i32
    %c0_i32_0 = arith.constant 0 : i32
    %c0_i32_1 = arith.constant 0 : i32
    return %c0_i32, %c0_i32_0 : i32, i32
  }
  func.func @transform_5(%arg0: i32) -> (i32, i32) {
    %c0_i32 = arith.constant 0 : i32
    %c0_i32_0 = arith.constant 0 : i32
    %c0_i32_1 = arith.constant 0 : i32
    return %c0_i32, %c0_i32_0 : i32, i32
  }
  func.func @transform_6(%arg0: i32) -> (i32, i32) {
    %c0_i32 = arith.constant 0 : i32
    %c0_i32_0 = arith.constant 0 : i32
    %c0_i32_1 = arith.constant 0 : i32
    return %c0_i32, %c0_i32_0 : i32, i32
  }
  func.func @transform_7(%arg0: i32) -> (i32, i32) {
    %c0_i32 = arith.constant 0 : i32
    %c0_i32_0 = arith.constant 0 : i32
    return %arg0, %c0_i32 : i32, i32
  }
  func.func @transform_8(%arg0: i32) -> (i32, i32) {
    %c0_i32 = arith.constant 0 : i32
    %c0_i32_0 = arith.constant 0 : i32
    return %arg0, %c0_i32 : i32, i32
  }
  func.func @transform_9(%arg0: i32) -> (i32, i32) {
    %c0_i32 = arith.constant 0 : i32
    %c0_i32_0 = arith.constant 0 : i32
    return %arg0, %c0_i32 : i32, i32
  }
}

</mosaic_0001>

<bundles_post_ra>
// kernel: decoder_forward.5
= control target key start
LH: loop header
LB: loop body
LE: loop exit
PB: predicated region body
PF: predicated region fallthrough
CT: control target
= control target key end

     0   :  { %12 = vsyncpa [#allocation3], 0  ;;  %s956_s0 = inlined_call_operand.hbm [shape: f32[64,128], index: 0, kind: input, shape index: {}]   ;;  %s957_s1 = inlined_call_operand.vmem [shape: bf16[128,128], index: 1, kind: input, shape index: {}]   ;;  %s958_s2 = inlined_call_operand.hbm [shape: f32[1,128], index: 2, kind: input, shape index: {}]   ;;  %s959_s3 = inlined_call_operand.vmem [shape: bf16[128,128], index: 3, kind: input, shape index: {}]   ;;  %s960_s4 = inlined_call_operand.hbm [shape: f32[1,128], index: 4, kind: input, shape index: {}]   ;;  %s961_s5 = inlined_call_operand.vmem [shape: bf16[128,128], index: 5, kind: input, shape index: {}]   ;;  %s962_s6 = inlined_call_operand.hbm [shape: f32[1,128], index: 6, kind: input, shape index: {}]   ;;  %s963_s7 = inlined_call_operand.vmem [shape: f32[64,128], index: 7, kind: output, shape index: {}]  }
   0x1   :  { %13 = vsyncpa [#allocation5], 0 }
   0x2   :  { %14 = vsyncpa [#allocation8], 0  ;;  %s802_s24 = smov [#allocation4]   ;;  %s803_s26 = smov [#allocation2]  }
   0x3   :  { %s35_s25 = sshll.u32 %s802_s24, 4  ;;  %s20_s27 = sshll.u32 %s803_s26, 4  ;;  %s36_s25 = int_to_ptr.vmem [resolvable:$true] %s35_s25  ;;  %s21_s27 = int_to_ptr.vmem [resolvable:$true] %s20_s27 }
   0x4   :  { %s724_s28 = scalar_lea.vmem %s36_s25, 16  ;;  %s728_s29 = scalar_lea.vmem %s36_s25, 32 }
   0x5   :  { %p725_p0 = scmp.ne.s32.totalorder %s36_s25, %s724_s28  ;;  %p729_p1 = scmp.lt.s32.totalorder %s36_s25, %s36_s25 }
   0x6   :  { %p730_p2 = scmp.lt.s32.totalorder %s728_s29, %s724_s28 }
   0x8   :  { %p731_p3 = por %p730_p2, %p729_p1 }
   0xa   :  { %p732_p4 = pnand %p731_p3, %p725_p0 }
   0xc   :  { %735 = shalt.err (!%p732_p4)
}
   0xd   :  { %38 = dma.hbm_to_vmem [thread:$0]  %s958_s2, 16, %s36_s25, [#allocation5]  }
   0xe   :  { %s744_s9 = scalar_lea.vmem %s21_s27, 1024  ;;  %p749_p6 = scmp.lt.s32.totalorder %s21_s27, %s21_s27 }
   0xf   :  { %p745_p5 = scmp.ne.s32.totalorder %s21_s27, %s744_s9  ;;  %p750_p7 = scmp.lt.s32.totalorder %s744_s9, %s744_s9 }
  0x11   :  { %p751_p8 = por %p750_p7, %p749_p6 }
  0x13   :  { %p752_p9 = pnand %p751_p8, %p745_p5 }
  0x15   :  { %755 = shalt.err (!%p752_p9)
}
  0x16   :  { %s804_s10 = smov 128   ;;  %s805_s11 = smov 8  }
  0x17   :  { %26 = dma.hbm_to_vmem [thread:$0]  %s956_s0, 1024, %s21_s27, [#allocation3], %s804_s10, %s804_s10, %s805_s11  }
  0x18   :  { %s806_s14 = smov [#allocation6]   ;;  %s807_s16 = smov [#allocation7]  }
  0x19   :  { %s47_s15 = sshll.u32 %s806_s14, 4  ;;  %s59_s17 = sshll.u32 %s807_s16, 4  ;;  %s48_s15 = int_to_ptr.vmem [resolvable:$true] %s47_s15  ;;  %s60_s17 = int_to_ptr.vmem [resolvable:$true] %s59_s17 }
  0x1a   :  { %s764_s2 = scalar_lea.vmem %s48_s15, 16  ;;  %s768_s18 = scalar_lea.vmem %s48_s15, 32 }
  0x1b   :  { %p765_p10 = scmp.ne.s32.totalorder %s48_s15, %s764_s2  ;;  %p769_p11 = scmp.lt.s32.totalorder %s48_s15, %s48_s15 }
  0x1c   :  { %p770_p12 = scmp.lt.s32.totalorder %s768_s18, %s764_s2 }
  0x1e   :  { %p771_p13 = por %p770_p12, %p769_p11 }
  0x20   :  { %p772_p0 = pnand %p771_p13, %p765_p10 }
  0x22   :  { %775 = shalt.err (!%p772_p0)
}
  0x23   :  { %50 = dma.hbm_to_vmem [thread:$0]  %s960_s4, 16, %s48_s15, [#allocation5]  }
  0x24   :  { %s784_s21 = scalar_lea.vmem %s60_s17, 16  ;;  %s788_s0 = scalar_lea.vmem %s60_s17, 32 }
  0x25   :  { %p785_p1 = scmp.ne.s32.totalorder %s60_s17, %s784_s21  ;;  %p789_p2 = scmp.lt.s32.totalorder %s60_s17, %s60_s17 }
  0x26   :  { %p790_p3 = scmp.lt.s32.totalorder %s788_s0, %s784_s21 }
  0x28   :  { %p791_p4 = por %p790_p3, %p789_p2 }
  0x2a   :  { %p792_p5 = pnand %p791_p4, %p785_p1 }
  0x2c   :  { %795 = shalt.err (!%p792_p5)
}
  0x2d   :  { %62 = dma.hbm_to_vmem [thread:$0]  %s962_s6, 16, %s60_s17, [#allocation8]  }
  0x2e   :  { %796 = dma.done.wait [#allocation3], 1024  }
  0x2f   :  { %797 = vsyncadd [#allocation3], 4294966272 }
  0x30   :  { %798 = dma.done.wait [#allocation5], 32  }
  0x31   :  { %799 = vsyncadd [#allocation5], 4294967264 }
  0x32   :  { %800 = dma.done.wait [#allocation8], 16  }
  0x33   :  { %801 = vsyncadd [#allocation8], 4294967280  ;;  %v692_v0 = vld [vmem:[%s957_s1 + $0x38] sm:$0xff]   ;;  %v693_v1 = vld [vmem:[%s957_s1 + $0x30] sm:$0xff]  }
  0x34   :  { %598 = vmatprep.subr.bf16.mxu0 %v692_v0  ;;  %v694_v2 = vld [vmem:[%s957_s1 + $0x28] sm:$0xff]   ;;  %v695_v3 = vld [vmem:[%s957_s1 + $0x20] sm:$0xff]   ;;  %v696_v7 = vld [vmem:[%s957_s1 + $0x18] sm:$0xff]  }
  0x35   :  { %599 = vmatpush3.bf16.msra.mxu0 %v692_v0  ;;  %v76_v4 = vld [vmem:[#allocation2] sm:$0xff]  ;;  %v77_v5 = vld [vmem:[#allocation2 + $0x8] sm:$0xff]  ;;  %v700_v8 = vld [vmem:[%s959_s3 + $0x38] sm:$0xff]  }
  0x36   :  { %600 = vmatprep.subr.bf16.mxu0 %v693_v1  ;;  %v84_v6 = vpack.c.bf16 %v77_v5, %v76_v4  ;;  %v701_v9 = vld [vmem:[%s959_s3 + $0x30] sm:$0xff]   ;;  %622 = vmatprep.subr.bf16.mxu1 %v700_v8  ;;  %v702_v11 = vld [vmem:[%s959_s3 + $0x28] sm:$0xff]   ;;  %v703_v12 = vld [vmem:[%s959_s3 + $0x20] sm:$0xff]  }
  0x37   :  { %v697_v10 = vld [vmem:[%s957_s1 + $0x10] sm:$0xff]   ;;  %623 = vmatpush3.bf16.msra.mxu1 %v700_v8  ;;  %v698_v13 = vld [vmem:[%s957_s1 + $0x8] sm:$0xff]   ;;  %v704_v14 = vld [vmem:[%s959_s3 + $0x18] sm:$0xff]  }
  0x38   :  { %614 = vmatprep.mubr.bf16.mxu0 %v84_v6  ;;  %624 = vmatprep.subr.bf16.mxu1 %v701_v9  ;;  %v699_v15 = vld [vmem:[%s957_s1] sm:$0xff]   ;;  %v78_v16 = vld [vmem:[#allocation2 + $0x10] sm:$0xff]  ;;  %v79_v17 = vld [vmem:[#allocation2 + $0x18] sm:$0xff] }
  0x39   :  { %601 = vmatpush3.bf16.msra.mxu0 %v693_v1  ;;  %v80_v18 = vld [vmem:[#allocation2 + $0x20] sm:$0xff]  ;;  %v81_v19 = vld [vmem:[#allocation2 + $0x28] sm:$0xff]  ;;  %v85_v20 = vpack.c.bf16 %v79_v17, %v78_v16  ;;  %v82_v22 = vld [vmem:[#allocation2 + $0x30] sm:$0xff] }
  0x3a   :  { %602 = vmatprep.subr.bf16.mxu0 %v694_v2  ;;  %v86_v21 = vpack.c.bf16 %v81_v19, %v80_v18  ;;  %v83_v23 = vld [vmem:[#allocation2 + $0x38] sm:$0xff]  ;;  %v705_v25 = vld [vmem:[%s959_s3 + $0x10] sm:$0xff]   ;;  %v706_v26 = vld [vmem:[%s959_s3 + $0x8] sm:$0xff]  }
  0x3b   :  { %625 = vmatpush3.bf16.msra.mxu1 %v701_v9  ;;  %v87_v24 = vpack.c.bf16 %v83_v23, %v82_v22  ;;  %v707_v27 = vld [vmem:[%s959_s3] sm:$0xff]   ;;  %v708_v28 = vld [vmem:[%s961_s5 + $0x38] sm:$0xff]   ;;  %v709_v29 = vld [vmem:[%s961_s5 + $0x30] sm:$0xff]  }
  0x3c   :  { %626 = vmatprep.subr.bf16.mxu1 %v702_v11  ;;  %v710_v30 = vld [vmem:[%s961_s5 + $0x28] sm:$0xff]   ;;  %v711_v31 = vld [vmem:[%s961_s5 + $0x20] sm:$0xff]   ;;  %v712_v32 = vld [vmem:[%s961_s5 + $0x18] sm:$0xff]  }
  0x3d   :  { %603 = vmatpush3.bf16.msra.mxu0 %v694_v2  ;;  %v535_v35 = vld [vmem:[#allocation4] ss:$0 sm:$0xff]  ;;  %v713_v62 = vld [vmem:[%s961_s5 + $0x10] sm:$0xff]   ;;  %v714_v63 = vld [vmem:[%s961_s5 + $0x8] sm:$0xff]  }
  0x3e   :  { %604 = vmatprep.subr.bf16.mxu0 %v695_v3  ;;  %v715_v0 = vld [vmem:[%s961_s5] sm:$0xff]  }
  0x3f   :  { %627 = vmatpush3.bf16.msra.mxu1 %v702_v11 }
  0x40   :  { %628 = vmatprep.subr.bf16.mxu1 %v703_v12 }
  0x41   :  { %605 = vmatpush3.bf16.msra.mxu0 %v695_v3  ;;  %v544_v3 = vld [vmem:[#allocation6] ss:$0 sm:$0xff] }
  0x42   :  { %606 = vmatprep.subr.bf16.mxu0 %v696_v7 }
  0x43   :  { %629 = vmatpush3.bf16.msra.mxu1 %v703_v12 }
  0x44   :  { %630 = vmatprep.subr.bf16.mxu1 %v704_v14 }
  0x45   :  { %607 = vmatpush3.bf16.msra.mxu0 %v696_v7 }
  0x46   :  { %608 = vmatprep.subr.bf16.mxu0 %v697_v10 }
  0x47   :  { %631 = vmatpush3.bf16.msra.mxu1 %v704_v14 }
  0x48   :  { %632 = vmatprep.subr.bf16.mxu1 %v705_v25 }
  0x49   :  { %609 = vmatpush3.bf16.msra.mxu0 %v697_v10 }
  0x4a   :  { %610 = vmatprep.subr.bf16.mxu0 %v698_v13 }
  0x4b   :  { %633 = vmatpush3.bf16.msra.mxu1 %v705_v25 }
  0x4c   :  { %634 = vmatprep.subr.bf16.mxu1 %v706_v26 }
  0x4d   :  { %611 = vmatpush3.bf16.msra.mxu0 %v698_v13 }
  0x4e   :  { %612 = vmatprep.subr.bf16.mxu0 %v699_v15 }
  0x4f   :  { %635 = vmatpush3.bf16.msra.mxu1 %v706_v26 }
  0x50   :  { %636 = vmatprep.subr.bf16.mxu1 %v707_v27 }
  0x51   :  { %613 = vmatpush3.bf16.msra.mxu0 %v699_v15 }
  0x52   :  { %646 = vmatprep.subr.bf16.mxu0 %v708_v28 }
  0x53   :  { %637 = vmatpush3.bf16.msra.mxu1 %v707_v27 }
  0x54   :  { %615 = vmatmul.mubr.bf16.vlgmr.msra.gmra.mxu0 %v85_v20  ;;  %670 = vmatprep.subr.bf16.mxu1 %v708_v28 }
  0x55   :  { %618 = vmatprep.mubr.bf16.mxu0 %v86_v21  ;;  %647 = vmatpush3.bf16.msra.mxu0 %v708_v28 }
  0x56   :  { %648 = vmatprep.subr.bf16.mxu0 %v709_v29 }
  0x59   :  { %649 = vmatpush3.bf16.msra.mxu0 %v709_v29 }
  0x5a   :  { %650 = vmatprep.subr.bf16.mxu0 %v710_v30 }
  0x5c   :  { %619 = vmatmul.mubr.bf16.gmra.mxu0 %v87_v24 }
  0x5d   :  { %651 = vmatpush3.bf16.msra.mxu0 %v710_v30 }
  0x5e   :  { %652 = vmatprep.subr.bf16.mxu0 %v711_v31 }
  0x61   :  { %653 = vmatpush3.bf16.msra.mxu0 %v711_v31 }
  0x62   :  { %654 = vmatprep.subr.bf16.mxu0 %v712_v32 }
  0x65   :  { %655 = vmatpush3.bf16.msra.mxu0 %v712_v32 }
  0x66   :  { %656 = vmatprep.subr.bf16.mxu0 %v713_v62 }
  0x69   :  { %657 = vmatpush3.bf16.msra.mxu0 %v713_v62 }
  0x6a   :  { %658 = vmatprep.subr.bf16.mxu0 %v714_v63 }
  0x6d   :  { %659 = vmatpush3.bf16.msra.mxu0 %v714_v63 }
  0x6e   :  { %660 = vmatprep.subr.bf16.mxu0 %v715_v0 }
  0x71   :  { %661 = vmatpush3.bf16.msra.mxu0 %v715_v0 }
 0x114   :  { %v616_v33 = vpop.f32.mrf.mxu0 }
 0x115   :  { %v202_v39 = vadd.f32 %v616_v33, %v535_v35 }
 0x116   :  { %v193_v34 = vpop.f32.mrf.mxu0 }
 0x117   :  { %v194_v37 = vadd.f32 %v535_v35, %v193_v34  ;;  %v226_v46 = vmax.f32 %v202_v39, 0.0 }
 0x118   :  { %v617_v36 = vpop.f32.mrf.mxu0 }
 0x119   :  { %v205_v38 = vadd.f32 %v617_v36, %v535_v35  ;;  %v224_v44 = vmax.f32 %v194_v37, 0.0 }
 0x11a   :  { %v196_v40 = vpop.f32.mrf.mxu0 }
 0x11b   :  { %v197_v41 = vadd.f32 %v535_v35, %v196_v40  ;;  %v227_v42 = vmax.f32 %v205_v38, 0.0 }
 0x11c   :  { %v620_v43 = vpop.f32.mrf.mxu0 }
 0x11d   :  { %v225_v45 = vmax.f32 %v197_v41, 0.0  ;;  %v233_v49 = vpack.c.bf16 %v227_v42, %v226_v46  ;;  %v218_v53 = vadd.f32 %v620_v43, %v535_v35 }
 0x11e   :  { %v209_v47 = vpop.f32.mrf.mxu0 }
 0x11f   :  { %v232_v48 = vpack.c.bf16 %v225_v45, %v224_v44  ;;  %v210_v51 = vadd.f32 %v535_v35, %v209_v47  ;;  %v230_v59 = vmax.f32 %v218_v53, 0.0 }
 0x120   :  { %v621_v50 = vpop.f32.mrf.mxu0 }
 0x121   :  { %v221_v52 = vadd.f32 %v621_v50, %v535_v35  ;;  %638 = vmatprep.mubr.bf16.mxu1 %v232_v48  ;;  %v228_v57 = vmax.f32 %v210_v51, 0.0 }
 0x122   :  { %v212_v54 = vpop.f32.mrf.mxu0  ;;  %639 = vmatmul.mubr.bf16.vlgmr.msra.gmra.mxu1 %v233_v49 }
 0x123   :  { %v213_v55 = vadd.f32 %v535_v35, %v212_v54  ;;  %678 = vmatpush3.bf16.msra.mxu1 %v708_v28  ;;  %v231_v56 = vmax.f32 %v221_v52, 0.0 }
 0x124   :  { %671 = vmatprep.subr.bf16.mxu1 %v709_v29 }
 0x125   :  { %v229_v58 = vmax.f32 %v213_v55, 0.0  ;;  %v235_v61 = vpack.c.bf16 %v231_v56, %v230_v59 }
 0x127   :  { %v234_v60 = vpack.c.bf16 %v229_v58, %v228_v57  ;;  %679 = vmatpush3.bf16.msra.mxu1 %v709_v29 }
 0x128   :  { %672 = vmatprep.subr.bf16.mxu1 %v710_v30 }
 0x129   :  { %642 = vmatprep.mubr.bf16.mxu1 %v234_v60 }
 0x12a   :  { %643 = vmatmul.mubr.bf16.gmra.mxu1 %v235_v61 }
 0x12b   :  { %680 = vmatpush3.bf16.msra.mxu1 %v710_v30  ;;  %v553_v30 = vld [vmem:[#allocation7] ss:$0 sm:$0xff] }
 0x12c   :  { %673 = vmatprep.subr.bf16.mxu1 %v711_v31 }
 0x12f   :  { %681 = vmatpush3.bf16.msra.mxu1 %v711_v31 }
 0x130   :  { %674 = vmatprep.subr.bf16.mxu1 %v712_v32 }
 0x133   :  { %682 = vmatpush3.bf16.msra.mxu1 %v712_v32 }
 0x134   :  { %675 = vmatprep.subr.bf16.mxu1 %v713_v62 }
 0x137   :  { %683 = vmatpush3.bf16.msra.mxu1 %v713_v62 }
 0x138   :  { %676 = vmatprep.subr.bf16.mxu1 %v714_v63 }
 0x13b   :  { %684 = vmatpush3.bf16.msra.mxu1 %v714_v63 }
 0x13c   :  { %677 = vmatprep.subr.bf16.mxu1 %v715_v0 }
 0x13f   :  { %685 = vmatpush3.bf16.msra.mxu1 %v715_v0 }
 0x1e2   :  { %v640_v1 = vpop.f32.mrf.mxu1 }
 0x1e3   :  { %v350_v7 = vadd.f32 %v640_v1, %v544_v3 }
 0x1e4   :  { %v341_v2 = vpop.f32.mrf.mxu1 }
 0x1e5   :  { %v342_v5 = vadd.f32 %v544_v3, %v341_v2  ;;  %v374_v14 = vmax.f32 %v350_v7, 0.0 }
 0x1e6   :  { %v641_v4 = vpop.f32.mrf.mxu1 }
 0x1e7   :  { %v353_v6 = vadd.f32 %v641_v4, %v544_v3  ;;  %v372_v12 = vmax.f32 %v342_v5, 0.0 }
 0x1e8   :  { %v344_v8 = vpop.f32.mrf.mxu1 }
 0x1e9   :  { %v345_v9 = vadd.f32 %v544_v3, %v344_v8  ;;  %v375_v10 = vmax.f32 %v353_v6, 0.0 }
 0x1ea   :  { %v644_v11 = vpop.f32.mrf.mxu1 }
 0x1eb   :  { %v373_v13 = vmax.f32 %v345_v9, 0.0  ;;  %v381_v17 = vpack.c.bf16 %v375_v10, %v374_v14  ;;  %v366_v21 = vadd.f32 %v644_v11, %v544_v3 }
 0x1ec   :  { %v357_v15 = vpop.f32.mrf.mxu1 }
 0x1ed   :  { %v380_v16 = vpack.c.bf16 %v373_v13, %v372_v12  ;;  %v358_v19 = vadd.f32 %v544_v3, %v357_v15  ;;  %v378_v27 = vmax.f32 %v366_v21, 0.0 }
 0x1ee   :  { %v645_v18 = vpop.f32.mrf.mxu1 }
 0x1ef   :  { %v369_v20 = vadd.f32 %v645_v18, %v544_v3  ;;  %662 = vmatprep.mubr.bf16.mxu0 %v380_v16  ;;  %v376_v25 = vmax.f32 %v358_v19, 0.0 }
 0x1f0   :  { %v360_v22 = vpop.f32.mrf.mxu1  ;;  %663 = vmatmul.mubr.bf16.vlgmr.msra.gmra.mxu0 %v381_v17 }
 0x1f1   :  { %v361_v23 = vadd.f32 %v544_v3, %v360_v22  ;;  %v379_v24 = vmax.f32 %v369_v20, 0.0 }
 0x1f3   :  { %v377_v26 = vmax.f32 %v361_v23, 0.0  ;;  %v383_v29 = vpack.c.bf16 %v379_v24, %v378_v27 }
 0x1f5   :  { %v382_v28 = vpack.c.bf16 %v377_v26, %v376_v25 }
 0x1f7   :  { %666 = vmatprep.mubr.bf16.mxu1 %v382_v28 }
 0x1f8   :  { %667 = vmatmul.mubr.bf16.vlgmr.msra.gmra.mxu1 %v383_v29 }
 0x2b0   :  { %v664_v31 = vpop.f32.mrf.mxu0 }
 0x2b1   :  { %v498_v32 = vadd.f32 %v664_v31, %v553_v30 }
 0x2b2   :  { %v489_v33 = vpop.f32.mrf.mxu0 }
 0x2b3   :  { %522 = vst [vmem:[%s963_s7 + $0x10] sm:$0xff] %v498_v32  ;;  %v490_v34 = vadd.f32 %v553_v30, %v489_v33 }
 0x2b4   :  { %v665_v35 = vpop.f32.mrf.mxu0 }
 0x2b5   :  { %520 = vst [vmem:[%s963_s7] sm:$0xff] %v490_v34  ;;  %v501_v36 = vadd.f32 %v665_v35, %v553_v30 }
 0x2b6   :  { %v492_v37 = vpop.f32.mrf.mxu0 }
 0x2b7   :  { %523 = vst [vmem:[%s963_s7 + $0x18] sm:$0xff] %v501_v36  ;;  %v493_v38 = vadd.f32 %v553_v30, %v492_v37 }
 0x2b8   :  { %v668_v39 = vpop.f32.mrf.mxu1 }
 0x2b9   :  { %521 = vst [vmem:[%s963_s7 + $0x8] sm:$0xff] %v493_v38  ;;  %v514_v40 = vadd.f32 %v668_v39, %v553_v30 }
 0x2ba   :  { %v505_v41 = vpop.f32.mrf.mxu1 }
 0x2bb   :  { %526 = vst [vmem:[%s963_s7 + $0x30] sm:$0xff] %v514_v40  ;;  %v506_v42 = vadd.f32 %v553_v30, %v505_v41 }
 0x2bc   :  { %v669_v43 = vpop.f32.mrf.mxu1 }
 0x2bd   :  { %524 = vst [vmem:[%s963_s7 + $0x20] sm:$0xff] %v506_v42  ;;  %v517_v44 = vadd.f32 %v669_v43, %v553_v30 }
 0x2be   :  { %v508_v45 = vpop.f32.mrf.mxu1 }
 0x2bf   :  { %527 = vst [vmem:[%s963_s7 + $0x38] sm:$0xff] %v517_v44  ;;  %v509_v46 = vadd.f32 %v553_v30, %v508_v45 }
 0x2c1   :  { %525 = vst [vmem:[%s963_s7 + $0x28] sm:$0xff] %v509_v46 }
 0x2c2   :  { %532 = vsyncpa [#allocation3], 1 }
 0x2c3   :  { %533 = vsyncpa [#allocation5], 1 }
 0x2c4   :  { %534 = vsyncpa [#allocation8], 1 }

// kernel: decoder_forward.7
= control target key start
LH: loop header
LB: loop body
LE: loop exit
PB: predicated region body
PF: predicated region fallthrough
CT: control target
= control target key end

     0   :  { %s3138_s0 = inlined_call_operand.vmem [shape: f32[2,32,128], index: 0, kind: input, shape index: {}]   ;;  %s3139_s1 = inlined_call_operand.vmem [shape: f32[2,32,128], index: 1, kind: input, shape index: {}]   ;;  %s3140_s2 = inlined_call_operand.vmem [shape: f32[2,128,64], index: 2, kind: input, shape index: {}]   ;;  %s3141_s3 = inlined_call_operand.vmem [shape: f32[2,64,128], index: 3, kind: input, shape index: {}]   ;;  %s3142_s4 = inlined_call_operand.vmem [shape: f32[2,128,48], index: 4, kind: input, shape index: {}]   ;;  %s3143_s5 = inlined_call_operand.vmem [shape: f32[2,48,128], index: 5, kind: input, shape index: {}]   ;;  %s3144_s6 = inlined_call_operand.vmem [shape: bf16[128,128], index: 6, kind: input, shape index: {}]   ;;  %s3145_s7 = inlined_call_operand.vmem [shape: f32[1,128], index: 7, kind: input, shape index: {}]   ;;  %s3146_s8 = inlined_call_operand.vmem [shape: bf16[128,128], index: 8, kind: input, shape index: {}]   ;;  %s3147_s9 = inlined_call_operand.vmem [shape: bf16[128,128], index: 9, kind: input, shape index: {}]   ;;  %s3148_s10 = inlined_call_operand.vmem [shape: f32[1,128], index: 10, kind: input, shape index: {}]   ;;  %s3149_s11 = inlined_call_operand.vmem [shape: bf16[384,128], index: 11, kind: input, shape index: {}]   ;;  %s3150_s12 = inlined_call_operand.vmem [shape: f32[1,128], index: 12, kind: input, shape index: {}]   ;;  %s3151_s13 = inlined_call_operand.vmem [shape: f32[2,32,128], index: 13, kind: output, shape index: {0}]   ;;  %s3152_s14 = inlined_call_operand.hbm [shape: f32[2,32,64], index: 14, kind: output, shape index: {1}]   ;;  %s3153_s15 = inlined_call_operand.hbm [shape: f32[2,32,48], index: 15, kind: output, shape index: {2}]  }
   0x1   :  { %3160 = sst [smem:[#allocation13_spill]] %s3138_s0 }
   0x2   :  { %3161 = sst [smem:[#allocation14_spill]] %s3139_s1 }
   0x3   :  { %3162 = sst [smem:[#allocation15_spill]] %s3140_s2 }
   0x4   :  { %3163 = sst [smem:[#allocation16_spill]] %s3141_s3 }
   0x5   :  { %3164 = sst [smem:[#allocation17_spill]] %s3142_s4 }
   0x6   :  { %21 = vsyncpa [#allocation3], 0 }
   0x7   :  { %23 = vsyncpa [#allocation3 + $0x1], 0 }
   0x8   :  { %24 = vsyncpa [#allocation5], 0 }
   0x9   :  { %26 = vsyncpa [#allocation5 + $0x1], 0  ;;  %s2645_s18 = smov 0   ;;  %s2647_s19 = smov 0  }
   0xa   :  { %s2649_s20 = smov 0   ;;  %s2651_s21 = smov 0  }
   0xb LB: > { %3165 = sst [smem:[#allocation8_spill]] %s2547_s18  ;;  %s2666_s22 = sadd.s32 4294967295, %s2559_s21   ;;  %s2559_s21 = sphi %s2651_s21, %s3181_s21   ;;  %s2555_s20 = sphi %s2649_s20, %s3183_s20   ;;  %s2551_s19 = sphi %s2647_s19, %s3185_s19   ;;  %s2547_s18 = sphi %s2645_s18, %s3184_s18  }
   0xc   : > { %3166 = sst [smem:[#allocation9_spill]] %s2555_s20  ;;  %s1978_s23 = sadd.s32 4294967294, %s2559_s21  }
   0xd   : > { %s2670_s24 = sadd.s32 1, %s2559_s21   ;;  %s368_s25 = sadd.s32 1, %s2555_s20 }
   0xe   : > { %3167 = sst [smem:[#allocation10_spill]] %s2670_s24  ;;  %s365_s26 = ssub.s32 %s2559_s21, %s2670_s24 }
   0xf   : > { %p378_p0 = scmp.ne.s32.totalorder %s2555_s20, %s2551_s19  ;;  %p366_p1 = scmp.eq.s32.totalorder %s365_s26, 0 }
  0x10   : > { %p379_p2 = scmp.eq.s32.totalorder %s2666_s22, 1  ;;  %p384_p3 = scmp.ne.s32.totalorder %s2551_s19, %s2547_s18 }
  0x11   : > { %p385_p4 = scmp.eq.s32.totalorder %s1978_s23, 1  ;;  %p1981_p7 = scmp.ge.s32.totalorder %s2559_s21, 1 }
  0x12   : > { %s2681_s27 = scalar_select %p366_p1, %s2555_s20, %s368_s25  }
  0x13   : > { %p2683_p5 = por %p379_p2, %p378_p0  ;;  %p2687_p6 = por %p385_p4, %p384_p3 }
  0x14   : > { %3168 = sst [smem:[#allocation11_spill]] %s2681_s27  ;;  %p498_p8 = scmp.lt.s32.totalorder %s2559_s21, 3 }
  0x15   : > { %s3170_s29 = scalar_select %p2687_p6, 1, 0 }
  0x16   : > { %p499_p9 = pnand %p1981_p7, %p498_p8 }
  0x17   : > { %3171 = sst [smem:[#allocation12_spill]] %s3170_s29  ;;  %p581_p10 = scmp.lt.s32.totalorder (!%p499_p9), %s2666_s22, 1 }
  0x18   : > { %502 = sbr.rel (%p499_p9) target bundleno = 1947 (0x79b), region = 72  ;;  %s3172_s0 = sld [smem:[#allocation13_spill]] (!%p499_p9) }
  0x19   : > { %s3173_s1 = sld [smem:[#allocation14_spill]] (!%p499_p9)  ;;  %s2853_s23 = sand.u32 (!%p499_p9), 1, %s2551_s19  }
  0x1a   : > { %s3174_s2 = sld [smem:[#allocation15_spill]] (!%p499_p9)  ;;  %s2561_s16 = smov (!%p499_p9), [#allocation2]  }
  0x1b   : > { %s3175_s3 = sld [smem:[#allocation16_spill]] (!%p499_p9) }
  0x1c   : > { %s3176_s4 = sld [smem:[#allocation17_spill]] (!%p499_p9) }
  0x1d   : > { %v2389_v0 = vld [vmem:[%s3144_s6 + $0x38] sm:$0xff]   ;;  %v2390_v1 = vld [vmem:[%s3144_s6 + $0x30] sm:$0xff]   ;;  %s2701_s25 = scalar_select %p581_p10, %s2666_s22, 1  ;;  %v2391_v2 = vld [vmem:[%s3144_s6 + $0x28] sm:$0xff]   ;;  %vm826_vm0 = vcmask 523264   ;;  %vm1147_vm1 = vcmask 392192  }
  0x1e   : > { %2160 = vmatprep.subr.bf16.mxu0 %v2389_v0  ;;  %v2392_v3 = vld [vmem:[%s3144_s6 + $0x20] sm:$0xff]   ;;  %v2393_v14 = vld [vmem:[%s3144_s6 + $0x18] sm:$0xff]   ;;  %v2394_v20 = vld [vmem:[%s3144_s6 + $0x10] sm:$0xff]  }
  0x1f   : > { %2161 = vmatpush3.bf16.msra.mxu0 %v2389_v0  ;;  %s2707_s30 = sshll.u32 %s2701_s25, 5  ;;  %s2063_s27 = sshll.u32 %s2701_s25, 7  ;;  %v2395_v24 = vld [vmem:[%s3144_s6 + $0x8] sm:$0xff]   ;;  %v2396_v32 = vld [vmem:[%s3144_s6] sm:$0xff]  }
  0x20   : > { %2162 = vmatprep.subr.bf16.mxu0 %v2390_v1  ;;  %s2713_s17 = scalar_lea.vmem %s3172_s0, %s2707_s30  ;;  %s2719_s29 = scalar_lea.vmem %s3173_s1, %s2707_s30  ;;  %v1997_v49 = vld [vmem:[%s3145_s7] ss:$0 sm:$0xff] }
  0x21   : > { %s2730_s0 = scalar_lea.vmem %s3174_s2, %s2063_s27  ;;  %v2733_v4 = vld [vmem:[%s2713_s17] sm:$0xff]  ;;  %v2736_v5 = vld [vmem:[%s2713_s17 + $0x8] sm:$0xff]  ;;  %v2768_v28 = vld [vmem:[%s2713_s17 + $0x10] sm:$0xff]  ;;  %s2473_s1 = sshll.u32 %s2561_s16, 4  ;;  %s2474_s1 = int_to_ptr.vmem [resolvable:$false] %s2473_s1 }
  0x22   : > { %v621_v6 = vld [vmem:[%s2719_s29] sm:$0xff]  ;;  %v622_v7 = vld [vmem:[%s2719_s29 + $0x8] sm:$0xff]  ;;  %v767_v10 = vld [vmem:[%s2730_s0 + $0x70] sm:$0xff]  ;;  %s2830_s24 = scalar_lea.vmem %s3176_s4, %s2063_s27  ;;  %s1982_s27 = sshll.u32 %s2853_s23, 5 }
  0x23   : > { %2163 = vmatpush3.bf16.msra.mxu0 %v2390_v1  ;;  %v2741_v8 = vadd.f32 %v621_v6, %v2733_v4  ;;  %v2744_v9 = vadd.f32 %v622_v7, %v2736_v5  ;;  %v768_v11 = vld [vmem:[%s2730_s0 + $0x78] sm:$0xff]  ;;  %v765_v12 = vld [vmem:[%s2730_s0 + $0x60] sm:$0xff]  ;;  %v766_v13 = vld [vmem:[%s2730_s0 + $0x68] sm:$0xff]  ;;  %s2859_s26 = scalar_lea.vmem [#allocation2], %s1982_s27  ;;  %s2913_s18 = scalar_lea.vmem [#allocation4], %s1982_s27 }
  0x24   : > { %2164 = vmatprep.subr.bf16.mxu0 %v2391_v2  ;;  %v776_v16 = vpack.c.bf16 %v768_v11, %v767_v10  ;;  %v775_v17 = vpack.c.bf16 %v766_v13, %v765_v12  ;;  %v763_v18 = vld [vmem:[%s2730_s0 + $0x50] sm:$0xff]  ;;  %v764_v19 = vld [vmem:[%s2730_s0 + $0x58] sm:$0xff]  ;;  %v761_v21 = vld [vmem:[%s2730_s0 + $0x40] sm:$0xff]  ;;  %s3159_s27 = sshll.u32 %s2666_s22, 9 }
  0x25   : > { %v629_v15 = vpack.c.bf16 %v2744_v9, %v2741_v8  ;;  %v762_v22 = vld [vmem:[%s2730_s0 + $0x48] sm:$0xff]  ;;  %v774_v23 = vpack.c.bf16 %v764_v19, %v763_v18  ;;  %v759_v25 = vld [vmem:[%s2730_s0 + $0x30] sm:$0xff]  ;;  %v760_v26 = vld [vmem:[%s2730_s0 + $0x38] sm:$0xff] }
  0x26   : > { %2180 = vmatprep.subr.bf16.mxu1 %v776_v16  ;;  %v773_v27 = vpack.c.bf16 %v762_v22, %v761_v21  ;;  %v2771_v29 = vld [vmem:[%s2713_s17 + $0x18] sm:$0xff]  ;;  %v623_v30 = vld [vmem:[%s2719_s29 + $0x10] sm:$0xff]  ;;  %v772_v33 = vpack.c.bf16 %v760_v26, %v759_v25  ;;  %v757_v37 = vld [vmem:[%s2730_s0 + $0x20] sm:$0xff] }
  0x27   : > { %2165 = vmatpush3.bf16.msra.mxu0 %v2391_v2  ;;  %2176 = vmatprep.mubr.bf16.mxu0 %v629_v15  ;;  %v624_v31 = vld [vmem:[%s2719_s29 + $0x18] sm:$0xff]  ;;  %v2779_v34 = vadd.f32 %v623_v30, %v2768_v28  ;;  %v758_v38 = vld [vmem:[%s2730_s0 + $0x28] sm:$0xff]  ;;  %v755_v40 = vld [vmem:[%s2730_s0 + $0x10] sm:$0xff]  ;;  %s1783_s29 = sshll.u32 %s2859_s26, 4  ;;  %s3052_s29 = int_to_ptr.vmem [resolvable:$true] %s1783_s29 }
  0x28   : > { %2166 = vmatprep.subr.bf16.mxu0 %v2392_v3  ;;  %2181 = vmatpush3.bf16.msra.mxu1 %v776_v16  ;;  %v2782_v35 = vadd.f32 %v624_v31, %v2771_v29  ;;  %v771_v39 = vpack.c.bf16 %v758_v38, %v757_v37  ;;  %v756_v41 = vld [vmem:[%s2730_s0 + $0x18] sm:$0xff]  ;;  %v753_v43 = vld [vmem:[%s2730_s0] sm:$0xff]  ;;  %v754_v44 = vld [vmem:[%s2730_s0 + $0x8] sm:$0xff]  ;;  %s2064_s0 = sshll.u32 %s2701_s25, 6  ;;  %p2476_p0 = scmp.lt.s32.totalorder %s3052_s29, %s2474_s1 }
  0x29   : > { %2182 = vmatprep.subr.bf16.mxu1 %v775_v17  ;;  %v770_v42 = vpack.c.bf16 %v756_v41, %v755_v40  ;;  %v769_v45 = vpack.c.bf16 %v754_v44, %v753_v43  ;;  %s600_s20 = scalar_lea.vmem %s3175_s3, %s2064_s0  ;;  %v1088_v41 = vld [vmem:[%s2830_s24 + $0x70] sm:$0xff]  ;;  %v2397_v44 = vld [vmem:[%s3146_s8 + $0x38] sm:$0xff]   ;;  %s3050_s0 = scalar_lea.hbm %s3152_s14, %s3159_s27 }
  0x2a   : > { %v630_v36 = vpack.c.bf16 %v2782_v35, %v2779_v34  ;;  %v883_v25 = vld [vmem:[%s600_s20 + $0x30] sm:$0xff]  ;;  %v884_v26 = vld [vmem:[%s600_s20 + $0x38] sm:$0xff]  ;;  %v881_v30 = vld [vmem:[%s600_s20 + $0x20] sm:$0xff] }
  0x2b   : > { %2167 = vmatpush3.bf16.msra.mxu0 %v2392_v3  ;;  %v882_v31 = vld [vmem:[%s600_s20 + $0x28] sm:$0xff]  ;;  %v877_v38 = vld [vmem:[%s600_s20] sm:$0xff] }
  0x2c   : > { %2168 = vmatprep.subr.bf16.mxu0 %v2393_v14  ;;  %2183 = vmatpush3.bf16.msra.mxu1 %v775_v17 }
  0x2d   : > { %2184 = vmatprep.subr.bf16.mxu1 %v774_v23 }
  0x2f   : > { %2169 = vmatpush3.bf16.msra.mxu0 %v2393_v14 }
  0x30   : > { %2170 = vmatprep.subr.bf16.mxu0 %v2394_v20  ;;  %2185 = vmatpush3.bf16.msra.mxu1 %v774_v23 }
  0x31   : > { %2186 = vmatprep.subr.bf16.mxu1 %v773_v27 }
  0x33   : > { %2171 = vmatpush3.bf16.msra.mxu0 %v2394_v20 }
  0x34   : > { %2172 = vmatprep.subr.bf16.mxu0 %v2395_v24  ;;  %2187 = vmatpush3.bf16.msra.mxu1 %v773_v27  ;;  %v888_v27 = vpack.c.bf16 %v884_v26, %v883_v25  ;;  %v2403_v26 = vld [vmem:[%s3146_s8 + $0x8] sm:$0xff]  }
  0x35   : > { %2188 = vmatprep.subr.bf16.mxu1 %v772_v33 }
  0x37   : > { %2173 = vmatpush3.bf16.msra.mxu0 %v2395_v24 }
  0x38   : > { %2174 = vmatprep.subr.bf16.mxu0 %v2396_v32  ;;  %2189 = vmatpush3.bf16.msra.mxu1 %v772_v33  ;;  %v879_v33 = vld [vmem:[%s600_s20 + $0x10] sm:$0xff] }
  0x39   : > { %2190 = vmatprep.subr.bf16.mxu1 %v771_v39 }
  0x3b   : > { %2175 = vmatpush3.bf16.msra.mxu0 %v2396_v32  ;;  %v887_v32 = vpack.c.bf16 %v882_v31, %v881_v30 }
  0x3c   : > { %2191 = vmatpush3.bf16.msra.mxu1 %v771_v39  ;;  %2200 = vmatprep.subr.bf16.mxu0 %v888_v27  ;;  %v878_v39 = vld [vmem:[%s600_s20 + $0x8] sm:$0xff] }
  0x3d   : > { %2192 = vmatprep.subr.bf16.mxu1 %v770_v42  ;;  %v885_v40 = vpack.c.bf16 %v878_v39, %v877_v38 }
  0x3e   : > { %2177 = vmatmul.mubr.bf16.vlgmr.msra.gmra.mxu0 %v630_v36  ;;  %v880_v36 = vld [vmem:[%s600_s20 + $0x18] sm:$0xff] }
  0x3f   : > { %2201 = vmatpush3.bf16.msra.mxu0 %v888_v27  ;;  %v886_v37 = vpack.c.bf16 %v880_v36, %v879_v33  ;;  %v2404_v27 = vld [vmem:[%s3146_s8] sm:$0xff]  }
  0x40   : > { %2193 = vmatpush3.bf16.msra.mxu1 %v770_v42  ;;  %2202 = vmatprep.subr.bf16.mxu0 %v887_v32  ;;  %v1089_v42 = vld [vmem:[%s2830_s24 + $0x78] sm:$0xff] }
  0x41   : > { %2194 = vmatprep.subr.bf16.mxu1 %v769_v45  ;;  %v1097_v43 = vpack.c.bf16 %v1089_v42, %v1088_v41 }
  0x43   : > { %2203 = vmatpush3.bf16.msra.mxu0 %v887_v32 }
  0x44   : > { %2195 = vmatpush3.bf16.msra.mxu1 %v769_v45  ;;  %2204 = vmatprep.subr.bf16.mxu0 %v886_v37  ;;  %v2398_v45 = vld [vmem:[%s3146_s8 + $0x30] sm:$0xff]  }
  0x45   : > { %2212 = vmatprep.subr.bf16.mxu1 %v2397_v44 }
  0x47   : > { %2205 = vmatpush3.bf16.msra.mxu0 %v886_v37 }
  0x48   : > { %2206 = vmatprep.subr.bf16.mxu0 %v885_v40 }
  0x4b   : > { %2207 = vmatpush3.bf16.msra.mxu0 %v885_v40 }
  0x4c   : > { %2232 = vmatprep.subr.bf16.mxu0 %v1097_v43 }
  0xfe   : > { %v2178_v46 = vpop.f32.mrf.mxu0 }
  0xff   : > { %v745_v54 = vadd.f32 %v2178_v46, %v1997_v49  ;;  %v2399_v46 = vld [vmem:[%s3146_s8 + $0x28] sm:$0xff]  }
 0x100   : > { %v736_v47 = vpop.f32.mrf.mxu0 }
 0x101   : > { %v737_v52 = vadd.f32 %v1997_v49, %v736_v47  ;;  %v2400_v47 = vld [vmem:[%s3146_s8 + $0x20] sm:$0xff]  }
 0x102   : > { %v2179_v48 = vpop.f32.mrf.mxu0 }
 0x103   : > { %v748_v50 = vadd.f32 %v2179_v48, %v1997_v49  ;;  %v2401_v48 = vld [vmem:[%s3146_s8 + $0x18] sm:$0xff]  }
 0x104   : > { %v739_v51 = vpop.f32.mrf.mxu0 }
 0x105   : > { %v740_v53 = vadd.f32 %v1997_v49, %v739_v51  ;;  %v2797_v56 = vpack.c.bf16 %v748_v50, %v745_v54  ;;  %v2402_v49 = vld [vmem:[%s3146_s8 + $0x10] sm:$0xff]  }
 0x107   : > { %v2795_v55 = vpack.c.bf16 %v740_v53, %v737_v52 }
 0x109   : > { %2196 = vmatprep.mubr.bf16.mxu1 %v2795_v55 }
 0x10a   : > { %2197 = vmatmul.mubr.bf16.vlgmr.msra.gmra.mxu1 %v2797_v56 }
 0x10b   : > { %2213 = vmatpush3.bf16.msra.mxu1 %v2397_v44 }
 0x10c   : > { %2214 = vmatprep.subr.bf16.mxu1 %v2398_v45 }
 0x10f   : > { %2215 = vmatpush3.bf16.msra.mxu1 %v2398_v45 }
 0x110   : > { %2216 = vmatprep.subr.bf16.mxu1 %v2399_v46 }
 0x113   : > { %2217 = vmatpush3.bf16.msra.mxu1 %v2399_v46 }
 0x114   : > { %2218 = vmatprep.subr.bf16.mxu1 %v2400_v47 }
 0x117   : > { %2219 = vmatpush3.bf16.msra.mxu1 %v2400_v47 }
 0x118   : > { %2220 = vmatprep.subr.bf16.mxu1 %v2401_v48 }
 0x11b   : > { %2221 = vmatpush3.bf16.msra.mxu1 %v2401_v48 }
 0x11c   : > { %2222 = vmatprep.subr.bf16.mxu1 %v2402_v49 }
 0x11f   : > { %2223 = vmatpush3.bf16.msra.mxu1 %v2402_v49 }
 0x120   : > { %2224 = vmatprep.subr.bf16.mxu1 %v2403_v26 }
 0x123   : > { %2225 = vmatpush3.bf16.msra.mxu1 %v2403_v26 }
 0x124   : > { %2226 = vmatprep.subr.bf16.mxu1 %v2404_v27 }
 0x127   : > { %2227 = vmatpush3.bf16.msra.mxu1 %v2404_v27 }
 0x1ca   : > { %v2198_v57 = vpop.f32.mrf.mxu1 }
 0x1cb   : > { %v833_v58 = vsel %vm826_vm0, %v2198_v57, -inf }
 0x1cc   : > { %834 = vmax.xlane.f32.xlu1 %v833_v58  ;;  %v811_v59 = vpop.f32.mrf.mxu1 }
 0x1cd   : > { %v827_v60 = vsel %vm826_vm0, %v811_v59, -inf }
 0x1ce   : > { %828 = vmax.xlane.f32.xlu0 %v827_v60  ;;  %v2199_v61 = vpop.f32.mrf.mxu1 }
 0x1cf   : > { %v836_v62 = vsel %vm826_vm0, %v2199_v61, -inf }
 0x1d0   : > { %837 = vmax.xlane.f32.xlu1 %v836_v62  ;;  %v814_v63 = vpop.f32.mrf.mxu1 }
 0x1d1   : > { %v830_v0 = vsel %vm826_vm0, %v814_v63, -inf }
 0x1d2   : > { %831 = vmax.xlane.f32.xlu0 %v830_v0  ;;  %v1086_v0 = vld [vmem:[%s2830_s24 + $0x60] sm:$0xff] }
 0x255   : > { %v835_v1 = vpop.xlane.xlu1 %834 }
 0x256   : > { %v841_v2 = vsub.f32 %v2198_v57, %v835_v1  ;;  %v1087_v1 = vld [vmem:[%s2830_s24 + $0x68] sm:$0xff] }
 0x257   : > { %v829_v3 = vpop.xlane.xlu0 %828 }
 0x258   : > { %v839_v6 = vsub.f32 %v811_v59, %v829_v3  ;;  %v847_v10 = vmul.f32 1.442695, %v841_v2 }
 0x259   : > { %v838_v7 = vpop.xlane.xlu1 %837 }
 0x25a   : > { %v843_v11 = vmul.f32 1.442695, %v839_v6  ;;  %v842_v12 = vsub.f32 %v2199_v61, %v838_v7  ;;  %v1096_v6 = vpack.c.bf16 %v1087_v1, %v1086_v0  ;;  %v1084_v7 = vld [vmem:[%s2830_s24 + $0x50] sm:$0xff] }
 0x25b   : > { %v832_v13 = vpop.xlane.xlu0 %831 }
 0x25c   : > { %2437 = vpow2.f32 %v843_v11  ;;  %v840_v14 = vsub.f32 %v814_v63, %v832_v13  ;;  %v849_v15 = vmul.f32 1.442695, %v842_v12  ;;  %v1082_v12 = vld [vmem:[%s2830_s24 + $0x40] sm:$0xff]  ;;  %v1083_v13 = vld [vmem:[%s2830_s24 + $0x48] sm:$0xff] }
 0x25d   : > { %2439 = vpow2.f32 %v847_v10  ;;  %v1085_v10 = vld [vmem:[%s2830_s24 + $0x58] sm:$0xff] }
 0x25e   : > { %v845_v16 = vmul.f32 1.442695, %v840_v14  ;;  %v1095_v11 = vpack.c.bf16 %v1085_v10, %v1084_v7  ;;  %v1094_v14 = vpack.c.bf16 %v1083_v13, %v1082_v12 }
 0x260   : > { %2441 = vpow2.f32 %v845_v16  ;;  %v1081_v16 = vld [vmem:[%s2830_s24 + $0x38] sm:$0xff] }
 0x261   : > { %2443 = vpow2.f32 %v849_v15  ;;  %v1080_v15 = vld [vmem:[%s2830_s24 + $0x30] sm:$0xff] }
 0x269   : > { %v2805_v17 = vpop.eup %2437 }
 0x26a   : > { %v851_v18 = vsel %vm826_vm0, %v2805_v17, 0.0  ;;  %v2809_v19 = vpop.eup %2439 }
 0x26b   : > { %852 = vadd.xlane.f32.xlu0 %v851_v18  ;;  %v857_v21 = vsel %vm826_vm0, %v2809_v19, 0.0  ;;  %v1078_v18 = vld [vmem:[%s2830_s24 + $0x20] sm:$0xff] }
 0x26d   : > { %v2811_v20 = vpop.eup %2441 }
 0x26e   : > { %v854_v22 = vsel %vm826_vm0, %v2811_v20, 0.0  ;;  %v2817_v23 = vpop.eup %2443 }
 0x26f   : > { %858 = vadd.xlane.f32.xlu0 %v857_v21  ;;  %855 = vadd.xlane.f32.xlu1 %v854_v22  ;;  %v860_v24 = vsel %vm826_vm0, %v2817_v23, 0.0  ;;  %v1077_v21 = vld [vmem:[%s2830_s24 + $0x18] sm:$0xff] }
 0x273   : > { %861 = vadd.xlane.f32.xlu1 %v860_v24  ;;  %v1075_v24 = vld [vmem:[%s2830_s24 + $0x8] sm:$0xff] }
 0x2f4   : > { %v853_v50 = vpop.xlane.xlu0 %852 }
 0x2f5   : > { %2445 = vrcp.f32 %v853_v50 }
 0x2f8   : > { %v856_v51 = vpop.xlane.xlu1 %855  ;;  %v859_v52 = vpop.xlane.xlu0 %858 }
 0x2f9   : > { %2447 = vrcp.f32 %v856_v51 }
 0x2fa   : > { %2449 = vrcp.f32 %v859_v52 }
 0x2fc   : > { %v862_v53 = vpop.xlane.xlu1 %861 }
 0x2fd   : > { %2451 = vrcp.f32 %v862_v53 }
 0x302   : > { %v2446_v54 = vpop.eup %2445 }
 0x303   : > { %v867_v57 = vmul.f32 %v2446_v54, %v2805_v17  ;;  %v1093_v17 = vpack.c.bf16 %v1081_v16, %v1080_v15  ;;  %v2405_v16 = vld [vmem:[%s3147_s9 + $0x38] sm:$0xff]  }
 0x305   : > { %871 = vst.msk [vmem:[%s2859_s26] sm:$0xff] %vm826_vm0, %v867_v57 }
 0x306   : > { %v2448_v58 = vpop.eup %2447 }
 0x307   : > { %v2450_v59 = vpop.eup %2449  ;;  %v868_v60 = vmul.f32 %v2448_v58, %v2811_v20  ;;  %v1076_v20 = vld [vmem:[%s2830_s24 + $0x10] sm:$0xff] }
 0x308   : > { %v869_v61 = vmul.f32 %v2450_v59, %v2809_v19  ;;  %v1079_v19 = vld [vmem:[%s2830_s24 + $0x28] sm:$0xff]  ;;  %v1091_v22 = vpack.c.bf16 %v1077_v21, %v1076_v20 }
 0x309   : > { %872 = vst.msk [vmem:[%s2859_s26 + $0x8] sm:$0xff] %vm826_vm0, %v868_v60  ;;  %v875_v62 = vpack.c.bf16 %v868_v60, %v867_v57 }
 0x30a   : > { %v2452_v63 = vpop.eup %2451  ;;  %873 = vst.msk [vmem:[%s2859_s26 + $0x10] sm:$0xff] %vm826_vm0, %v869_v61 }
 0x30b   : > { %2208 = vmatprep.mubr.msk.bf16.mxu0 %vm826_vm0, %v875_v62  ;;  %v870_v2 = vmul.f32 %v2452_v63, %v2817_v23  ;;  %v1074_v23 = vld [vmem:[%s2830_s24] sm:$0xff]  ;;  %s2342_s24 = smul.u32 48, %s2701_s25  ;;  %s2469_s25 = scalar_lea.vmem %s3052_s29, 512 }
 0x30c   : > { %v1090_v25 = vpack.c.bf16 %v1075_v24, %v1074_v23  ;;  %p2470_p11 = scmp.ne.s32.totalorder %s3052_s29, %s2469_s25 }
 0x30d   : > { %874 = vst.msk [vmem:[%s2859_s26 + $0x18] sm:$0xff] %vm826_vm0, %v870_v2  ;;  %v876_v3 = vpack.c.bf16 %v870_v2, %v869_v61  ;;  %s610_s20 = scalar_lea.vmem %s3143_s5, %s2342_s24  ;;  %s2475_s26 = scalar_lea.vmem %s2474_s1, 1024 }
 0x30e   : > { %v1200_v10 = vld [vmem:[%s610_s20 + $0x10] sm:$0xff]  ;;  %v1198_v13 = vld [vmem:[%s610_s20] sm:$0xff]  ;;  %p2471_p12 = pnand %p2470_p11, %p2683_p5  ;;  %p2477_p1 = scmp.lt.s32.totalorder %s2475_s26, %s2469_s25 }
 0x30f   : > { %2209 = vmatmul.mubr.msk.bf16.vlgmr.msra.gmra.mxu0 %vm826_vm0, %v876_v3  ;;  %v1202_v3 = vld [vmem:[%s610_s20 + $0x20] sm:$0xff] }
 0x310   : > { %2233 = vmatpush3.bf16.msra.mxu0 %v1097_v43  ;;  %2248 = vmatprep.mubr.bf16.mxu0 %v2795_v55  ;;  %v1092_v55 = vpack.c.bf16 %v1079_v19, %v1078_v18  ;;  %p2472_p13 = pneg %p2471_p12  ;;  %p2478_p2 = por %p2477_p1, %p2476_p0 }
 0x311   : > { %2234 = vmatprep.subr.bf16.mxu0 %v1096_v6 }
 0x312   : > { %p2479_p3 = pnand %p2478_p2, %p2472_p13 }
 0x314   : > { %2235 = vmatpush3.bf16.msra.mxu0 %v1096_v6  ;;  %v1203_v6 = vld [vmem:[%s610_s20 + $0x28] sm:$0xff] }
 0x315   : > { %2236 = vmatprep.subr.bf16.mxu0 %v1095_v11  ;;  %v1206_v7 = vpack.c.bf16 %v1203_v6, %v1202_v3 }
 0x317   : > { %2252 = vmatprep.subr.bf16.mxu1 %v1206_v7 }
 0x318   : > { %2237 = vmatpush3.bf16.msra.mxu0 %v1095_v11  ;;  %v1201_v11 = vld [vmem:[%s610_s20 + $0x18] sm:$0xff] }
 0x319   : > { %2238 = vmatprep.subr.bf16.mxu0 %v1094_v14  ;;  %v1205_v12 = vpack.c.bf16 %v1201_v11, %v1200_v10  ;;  %v2416_v10 = vld [vmem:[%s3149_s11 + $0x30] sm:$0xff]  }
 0x31c   : > { %2239 = vmatpush3.bf16.msra.mxu0 %v1094_v14  ;;  %v1199_v14 = vld [vmem:[%s610_s20 + $0x8] sm:$0xff] }
 0x31d   : > { %2240 = vmatprep.subr.bf16.mxu0 %v1093_v17  ;;  %v1204_v15 = vpack.c.bf16 %v1199_v14, %v1198_v13  ;;  %v2420_v13 = vld [vmem:[%s3149_s11 + $0x20] sm:$0xff]   ;;  %v2422_v14 = vld [vmem:[%s3149_s11 + $0x18] sm:$0xff]  }
 0x320   : > { %2241 = vmatpush3.bf16.msra.mxu0 %v1093_v17 }
 0x321   : > { %2242 = vmatprep.subr.bf16.mxu0 %v1092_v55 }
 0x324   : > { %2243 = vmatpush3.bf16.msra.mxu0 %v1092_v55 }
 0x325   : > { %2244 = vmatprep.subr.bf16.mxu0 %v1091_v22 }
 0x328   : > { %2245 = vmatpush3.bf16.msra.mxu0 %v1091_v22 }
 0x329   : > { %2246 = vmatprep.subr.bf16.mxu0 %v1090_v25 }
 0x32c   : > { %2247 = vmatpush3.bf16.msra.mxu0 %v1090_v25 }
 0x32f   : > { %2249 = vmatmul.mubr.bf16.vlgmr.msra.gmra.mxu0 %v2797_v56 }
 0x3cf   : > { %v2210_v30 = vpop.f32.mrf.mxu0 }
 0x3d1   : > { %v929_v31 = vpop.f32.mrf.mxu0 }
 0x3d3   : > { %v2211_v32 = vpop.f32.mrf.mxu0 }
 0x3d4   : > { %v945_v37 = vpack.c.bf16 %v2211_v32, %v2210_v30  ;;  %v2406_v32 = vld [vmem:[%s3147_s9 + $0x30] sm:$0xff]  }
 0x3d5   : > { %v932_v33 = vpop.f32.mrf.mxu0 }
 0x3d6   : > { %v944_v36 = vpack.c.bf16 %v932_v33, %v929_v31  ;;  %v2407_v33 = vld [vmem:[%s3147_s9 + $0x28] sm:$0xff]  }
 0x3d8   : > { %2228 = vmatprep.mubr.bf16.mxu1 %v944_v36  ;;  %v2408_v36 = vld [vmem:[%s3147_s9 + $0x20] sm:$0xff]  }
 0x3d9   : > { %2229 = vmatmul.mubr.bf16.vlgmr.msra.gmra.mxu1 %v945_v37  ;;  %v2409_v37 = vld [vmem:[%s3147_s9 + $0x18] sm:$0xff]  }
 0x3da   : > { %2253 = vmatpush3.bf16.msra.mxu1 %v1206_v7 }
 0x3db   : > { %2254 = vmatprep.subr.bf16.mxu1 %v1205_v12 }
 0x3de   : > { %2255 = vmatpush3.bf16.msra.mxu1 %v1205_v12  ;;  %v2418_v12 = vld [vmem:[%s3149_s11 + $0x28] sm:$0xff]  }
 0x3df   : > { %2256 = vmatprep.subr.bf16.mxu1 %v1204_v15 }
 0x3e2   : > { %2257 = vmatpush3.bf16.msra.mxu1 %v1204_v15  ;;  %v2424_v15 = vld [vmem:[%s3149_s11 + $0x10] sm:$0xff]  }
 0x3e3   : > { %2262 = vmatprep.subr.bf16.mxu1 %v2405_v16 }
 0x3ef   : > { %v2250_v56 = vpop.f32.mrf.mxu0 }
 0x3f0   : > { %v1154_v42 = vsel %vm1147_vm1, %v2250_v56, -inf }
 0x3f1   : > { %v1132_v38 = vpop.f32.mrf.mxu0 }
 0x3f2   : > { %v1148_v39 = vsel %vm1147_vm1, %v1132_v38, -inf }
 0x3f3   : > { %1149 = vmax.xlane.f32.xlu0 %v1148_v39  ;;  %v2251_v40 = vpop.f32.mrf.mxu0  ;;  %v2412_v39 = vld [vmem:[%s3147_s9] sm:$0xff]  }
 0x3f4   : > { %v1157_v44 = vsel %vm1147_vm1, %v2251_v40, -inf }
 0x3f5   : > { %v1135_v41 = vpop.f32.mrf.mxu0 }
 0x3f6   : > { %v1151_v43 = vsel %vm1147_vm1, %v1135_v41, -inf }
 0x3f7   : > { %1155 = vmax.xlane.f32.xlu0 %v1154_v42  ;;  %1152 = vmax.xlane.f32.xlu1 %v1151_v43  ;;  %v2415_v42 = vld [vmem:[%s3149_s11 + $0x70] sm:$0xff]   ;;  %v2417_v43 = vld [vmem:[%s3149_s11 + $0x68] sm:$0xff]  }
 0x3fb   : > { %1158 = vmax.xlane.f32.xlu1 %v1157_v44  ;;  %v2419_v44 = vld [vmem:[%s3149_s11 + $0x60] sm:$0xff]  }
 0x47c   : > { %v1150_v45 = vpop.xlane.xlu0 %1149 }
 0x47d   : > { %v1160_v46 = vsub.f32 %v1132_v38, %v1150_v45  ;;  %v2411_v38 = vld [vmem:[%s3147_s9 + $0x8] sm:$0xff]   ;;  %v2421_v45 = vld [vmem:[%s3149_s11 + $0x58] sm:$0xff]  }
 0x47f   : > { %v1164_v47 = vmul.f32 1.442695, %v1160_v46  ;;  %v2423_v46 = vld [vmem:[%s3149_s11 + $0x50] sm:$0xff]  }
 0x480   : > { %v1156_v48 = vpop.xlane.xlu0 %1155  ;;  %v1153_v49 = vpop.xlane.xlu1 %1152 }
 0x481   : > { %2453 = vpow2.f32 %v1164_v47  ;;  %v1162_v50 = vsub.f32 %v2250_v56, %v1156_v48  ;;  %v1161_v51 = vsub.f32 %v1135_v41, %v1153_v49  ;;  %v2410_v56 = vld [vmem:[%s3147_s9 + $0x10] sm:$0xff]   ;;  %v2414_v41 = vld [vmem:[%s3149_s11 + $0x38] sm:$0xff]   ;;  %v2425_v47 = vld [vmem:[%s3149_s11 + $0x48] sm:$0xff]   ;;  %v1442_v49 = vpack.c.bf16 %v2736_v5, %v2733_v4 }
 0x482   : > { %v2427_v48 = vld [vmem:[%s3149_s11 + $0x40] sm:$0xff]   ;;  %v2431_v4 = vld [vmem:[%s3149_s11 + $0xa8] sm:$0xff]  }
 0x483   : > { %v1168_v52 = vmul.f32 1.442695, %v1162_v50  ;;  %v1166_v53 = vmul.f32 1.442695, %v1161_v51  ;;  %v1443_v50 = vpack.c.bf16 %v2771_v29, %v2768_v28  ;;  %2298 = vmatprep.mubr.bf16.mxu0 %v1442_v49  ;;  %v2429_v51 = vld [vmem:[%s3149_s11 + $0xb8] sm:$0xff]   ;;  %v2432_v5 = vld [vmem:[%s3149_s11 + $0xa0] sm:$0xff]  }
 0x484   : > { %v1159_v54 = vpop.xlane.xlu1 %1158 }
 0x485   : > { %2455 = vpow2.f32 %v1168_v52  ;;  %v1163_v57 = vsub.f32 %v2251_v40, %v1159_v54  ;;  %v2413_v40 = vld [vmem:[%s3149_s11 + $0x78] sm:$0xff]   ;;  %v2430_v52 = vld [vmem:[%s3149_s11 + $0xb0] sm:$0xff]  }
 0x486   : > { %2457 = vpow2.f32 %v1166_v53  ;;  %2282 = vmatprep.subr.bf16.mxu0 %v2413_v40 }
 0x487   : > { %v1170_v58 = vmul.f32 1.442695, %v1163_v57  ;;  %2283 = vmatpush3.bf16.msra.mxu0 %v2413_v40  ;;  %v2992_v57 = vld [vmem:[%s3148_s10] ss:$0 sm:$0xff] }
 0x488   : > { %2284 = vmatprep.subr.bf16.mxu0 %v2415_v42 }
 0x489   : > { %2459 = vpow2.f32 %v1170_v58 }
 0x48b   : > { %2285 = vmatpush3.bf16.msra.mxu0 %v2415_v42 }
 0x48c   : > { %2286 = vmatprep.subr.bf16.mxu0 %v2417_v43 }
 0x48e   : > { %v2454_v59 = vpop.eup %2453 }
 0x48f   : > { %v1172_v60 = vsel %vm1147_vm1, %v2454_v59, 0.0  ;;  %2287 = vmatpush3.bf16.msra.mxu0 %v2417_v43 }
 0x490   : > { %1173 = vadd.xlane.f32.xlu0 %v1172_v60  ;;  %2288 = vmatprep.subr.bf16.mxu0 %v2419_v44 }
 0x492   : > { %v2456_v61 = vpop.eup %2455 }
 0x493   : > { %v2458_v62 = vpop.eup %2457  ;;  %v1178_v63 = vsel %vm1147_vm1, %v2456_v61, 0.0  ;;  %2289 = vmatpush3.bf16.msra.mxu0 %v2419_v44 }
 0x494   : > { %1179 = vadd.xlane.f32.xlu0 %v1178_v63  ;;  %v1175_v0 = vsel %vm1147_vm1, %v2458_v62, 0.0  ;;  %2290 = vmatprep.subr.bf16.mxu0 %v2421_v45 }
 0x495   : > { %1176 = vadd.xlane.f32.xlu1 %v1175_v0 }
 0x496   : > { %v2460_v1 = vpop.eup %2459 }
 0x497   : > { %v1181_v2 = vsel %vm1147_vm1, %v2460_v1, 0.0  ;;  %2291 = vmatpush3.bf16.msra.mxu0 %v2421_v45 }
 0x498   : > { %2292 = vmatprep.subr.bf16.mxu0 %v2423_v46 }
 0x499   : > { %1182 = vadd.xlane.f32.xlu1 %v1181_v2  ;;  %v2230_v28 = vpop.f32.mrf.mxu1 }
 0x49b   : > { %2293 = vmatpush3.bf16.msra.mxu0 %v2423_v46  ;;  %v1051_v29 = vpop.f32.mrf.mxu1 }
 0x49c   : > { %2294 = vmatprep.subr.bf16.mxu0 %v2425_v47 }
 0x49d   : > { %v2231_v53 = vpop.f32.mrf.mxu1 }
 0x49f   : > { %2295 = vmatpush3.bf16.msra.mxu0 %v2425_v47  ;;  %v1054_v54 = vpop.f32.mrf.mxu1 }
 0x4a0   : > { %2296 = vmatprep.subr.bf16.mxu0 %v2427_v48  ;;  %v1055_v58 = vadd.f32 %v2992_v57, %v1054_v54 }
 0x4a3   : > { %2297 = vmatpush3.bf16.msra.mxu0 %v2427_v48 }
 0x4a4   : > { %2322 = vmatprep.subr.bf16.mxu0 %v2429_v51 }
 0x4a6   : > { %2299 = vmatmul.mubr.bf16.vlgmr.msra.gmra.mxu0 %v1443_v50 }
 0x4a7   : > { %2323 = vmatpush3.bf16.msra.mxu0 %v2429_v51 }
 0x4a8   : > { %2324 = vmatprep.subr.bf16.mxu0 %v2430_v52 }
 0x4ab   : > { %2325 = vmatpush3.bf16.msra.mxu0 %v2430_v52 }
 0x4ac   : > { %2326 = vmatprep.subr.bf16.mxu0 %v2431_v4 }
 0x4af   : > { %2327 = vmatpush3.bf16.msra.mxu0 %v2431_v4 }
 0x4b0   : > { %2328 = vmatprep.subr.bf16.mxu0 %v2432_v5 }
 0x4b3   : > { %2329 = vmatpush3.bf16.msra.mxu0 %v2432_v5 }
 0x519   : > { %v1174_v17 = vpop.xlane.xlu0 %1173 }
 0x51a   : > { %2461 = vrcp.f32 %v1174_v17  ;;  %v2426_v17 = vld [vmem:[%s3149_s11 + $0x8] sm:$0xff]  }
 0x51d   : > { %v1180_v18 = vpop.xlane.xlu0 %1179 }
 0x51e   : > { %2463 = vrcp.f32 %v1180_v18  ;;  %v1177_v19 = vpop.xlane.xlu1 %1176  ;;  %v1060_v18 = vadd.f32 %v2230_v28, %v2992_v57 }
 0x51f   : > { %2465 = vrcp.f32 %v1177_v19 }
 0x522   : > { %v1183_v55 = vpop.xlane.xlu1 %1182 }
 0x523   : > { %2467 = vrcp.f32 %v1183_v55  ;;  %v2428_v55 = vld [vmem:[%s3149_s11] sm:$0xff]  }
 0x527   : > { %v2462_v20 = vpop.eup %2461 }
 0x528   : > { %v1188_v21 = vmul.f32 %v2462_v20, %v2454_v59  ;;  %v1052_v59 = vadd.f32 %v2992_v57, %v1051_v29  ;;  %v1068_v20 = vadd.f32 %v1060_v18, %v2779_v34 }
 0x52a   : > { %1192 = vst.msk [vmem:[%s2913_s18] sm:$0xff] %vm1147_vm1, %v1188_v21  ;;  %v1066_v63 = vadd.f32 %v1052_v59, %v2741_v8 }
 0x52b   : > { %v2464_v22 = vpop.eup %2463 }
 0x52c   : > { %v2466_v23 = vpop.eup %2465  ;;  %v1190_v24 = vmul.f32 %v2464_v22, %v2456_v61  ;;  %v1067_v61 = vadd.f32 %v1055_v58, %v2744_v9  ;;  %v1070_v3 = vmul.f32 0.70710677, %v1066_v63  ;;  %v1072_v22 = vmul.f32 0.70710677, %v1068_v20 }
 0x52d   : > { %v1189_v25 = vmul.f32 %v2466_v23, %v2458_v62 }
 0x52e   : > { %1194 = vst.msk [vmem:[%s2913_s18 + $0x10] sm:$0xff] %vm1147_vm1, %v1190_v24 }
 0x52f   : > { %1193 = vst.msk [vmem:[%s2913_s18 + $0x8] sm:$0xff] %vm1147_vm1, %v1189_v25  ;;  %v1196_v26 = vpack.c.bf16 %v1189_v25, %v1188_v21  ;;  %v2434_v25 = vld [vmem:[%s3149_s11 + $0x90] sm:$0xff]  }
 0x530   : > { %v2468_v27 = vpop.eup %2467 }
 0x531   : > { %v1191_v30 = vmul.f32 %v2468_v27, %v2460_v1  ;;  %2258 = vmatprep.mubr.msk.bf16.mxu1 %vm1147_vm1, %v1196_v26  ;;  %v1071_v1 = vmul.f32 0.70710677, %v1067_v61  ;;  %v2435_v26 = vld [vmem:[%s3149_s11 + $0x88] sm:$0xff]   ;;  %v2436_v27 = vld [vmem:[%s3149_s11 + $0x80] sm:$0xff]  }
 0x533   : > { %1195 = vst.msk [vmem:[%s2913_s18 + $0x18] sm:$0xff] %vm1147_vm1, %v1191_v30  ;;  %v1197_v31 = vpack.c.bf16 %v1191_v30, %v1190_v24  ;;  %v1440_v11 = vpack.c.bf16 %v1071_v1, %v1070_v3  ;;  %v2433_v24 = vld [vmem:[%s3149_s11 + $0x98] sm:$0xff]  }
 0x534   : > { %2330 = vmatprep.subr.bf16.mxu0 %v2433_v24 }
 0x535   : > { %2259 = vmatmul.mubr.msk.bf16.vlgmr.msra.gmra.mxu1 %vm1147_vm1, %v1197_v31  ;;  %2331 = vmatpush3.bf16.msra.mxu0 %v2433_v24 }
 0x536   : > { %2263 = vmatpush3.bf16.msra.mxu1 %v2405_v16  ;;  %v1063_v16 = vadd.f32 %v2231_v53, %v2992_v57  ;;  %2332 = vmatprep.subr.bf16.mxu0 %v2434_v25 }
 0x537   : > { %2264 = vmatprep.subr.bf16.mxu1 %v2406_v32 }
 0x538   : > { %v1069_v19 = vadd.f32 %v1063_v16, %v2782_v35 }
 0x539   : > { %2333 = vmatpush3.bf16.msra.mxu0 %v2434_v25 }
 0x53a   : > { %2265 = vmatpush3.bf16.msra.mxu1 %v2406_v32  ;;  %v1073_v21 = vmul.f32 0.70710677, %v1069_v19  ;;  %2334 = vmatprep.subr.bf16.mxu0 %v2435_v26 }
 0x53b   : > { %2266 = vmatprep.subr.bf16.mxu1 %v2407_v33 }
 0x53c   : > { %v1441_v23 = vpack.c.bf16 %v1073_v21, %v1072_v22 }
 0x53d   : > { %2335 = vmatpush3.bf16.msra.mxu0 %v2435_v26 }
 0x53e   : > { %2267 = vmatpush3.bf16.msra.mxu1 %v2407_v33  ;;  %2336 = vmatprep.subr.bf16.mxu0 %v2436_v27 }
 0x53f   : > { %2268 = vmatprep.subr.bf16.mxu1 %v2408_v36 }
 0x541   : > { %2337 = vmatpush3.bf16.msra.mxu0 %v2436_v27 }
 0x542   : > { %2269 = vmatpush3.bf16.msra.mxu1 %v2408_v36 }
 0x543   : > { %2270 = vmatprep.subr.bf16.mxu1 %v2409_v37 }
 0x546   : > { %2271 = vmatpush3.bf16.msra.mxu1 %v2409_v37 }
 0x547   : > { %2272 = vmatprep.subr.bf16.mxu1 %v2410_v56 }
 0x54a   : > { %2273 = vmatpush3.bf16.msra.mxu1 %v2410_v56 }
 0x54b   : > { %2274 = vmatprep.subr.bf16.mxu1 %v2411_v38 }
 0x54e   : > { %2275 = vmatpush3.bf16.msra.mxu1 %v2411_v38 }
 0x54f   : > { %2276 = vmatprep.subr.bf16.mxu1 %v2412_v39 }
 0x552   : > { %2277 = vmatpush3.bf16.msra.mxu1 %v2412_v39 }
 0x553   : > { %2302 = vmatprep.subr.bf16.mxu1 %v2414_v41 }
 0x5f5   : > { %v2260_v60 = vpop.f32.mrf.mxu1 }
 0x5f7   : > { %v1247_v62 = vpop.f32.mrf.mxu1 }
 0x5f9   : > { %v2261_v0 = vpop.f32.mrf.mxu1 }
 0x5fa   : > { %v1263_v7 = vpack.c.bf16 %v2261_v0, %v2260_v60 }
 0x5fb   : > { %v1250_v2 = vpop.f32.mrf.mxu1 }
 0x5fc   : > { %v1262_v6 = vpack.c.bf16 %v1250_v2, %v1247_v62 }
 0x5fe   : > { %2278 = vmatprep.mubr.bf16.mxu1 %v1262_v6 }
 0x5ff   : > { %2279 = vmatmul.mubr.bf16.vlgmr.msra.gmra.mxu1 %v1263_v7 }
 0x600   : > { %2303 = vmatpush3.bf16.msra.mxu1 %v2414_v41  ;;  %2318 = vmatprep.mubr.bf16.mxu1 %v1440_v11 }
 0x601   : > { %2304 = vmatprep.subr.bf16.mxu1 %v2416_v10 }
 0x604   : > { %2305 = vmatpush3.bf16.msra.mxu1 %v2416_v10 }
 0x605   : > { %2306 = vmatprep.subr.bf16.mxu1 %v2418_v12 }
 0x608   : > { %2307 = vmatpush3.bf16.msra.mxu1 %v2418_v12 }
 0x609   : > { %2308 = vmatprep.subr.bf16.mxu1 %v2420_v13 }
 0x60c   : > { %2309 = vmatpush3.bf16.msra.mxu1 %v2420_v13 }
 0x60d   : > { %2310 = vmatprep.subr.bf16.mxu1 %v2422_v14 }
 0x610   : > { %2311 = vmatpush3.bf16.msra.mxu1 %v2422_v14 }
 0x611   : > { %2312 = vmatprep.subr.bf16.mxu1 %v2424_v15 }
 0x614   : > { %2313 = vmatpush3.bf16.msra.mxu1 %v2424_v15 }
 0x615   : > { %2314 = vmatprep.subr.bf16.mxu1 %v2426_v17 }
 0x618   : > { %2315 = vmatpush3.bf16.msra.mxu1 %v2426_v17 }
 0x619   : > { %2316 = vmatprep.subr.bf16.mxu1 %v2428_v55 }
 0x61c   : > { %2317 = vmatpush3.bf16.msra.mxu1 %v2428_v55 }
 0x61f   : > { %2319 = vmatmul.mubr.bf16.vlgmr.msra.gmra.mxu1 %v1441_v23 }
 0x6bf   : > { %v2280_v30 = vpop.f32.mrf.mxu1 }
 0x6c0   : > { %v1378_v33 = vadd.f32 %v2280_v30, %v2992_v57 }
 0x6c1   : > { %v1369_v31 = vpop.f32.mrf.mxu1 }
 0x6c2   : > { %v1370_v32 = vadd.f32 %v2992_v57, %v1369_v31  ;;  %v1386_v41 = vadd.f32 %v1378_v33, %v2779_v34 }
 0x6c3   : > { %v2281_v36 = vpop.f32.mrf.mxu1 }
 0x6c4   : > { %v1381_v37 = vadd.f32 %v2281_v36, %v2992_v57  ;;  %v1384_v38 = vadd.f32 %v1370_v32, %v2741_v8  ;;  %v1390_v46 = vmul.f32 0.70710677, %v1386_v41 }
 0x6c5   : > { %v1372_v56 = vpop.f32.mrf.mxu1 }
 0x6c6   : > { %v1387_v39 = vadd.f32 %v1381_v37, %v2782_v35  ;;  %v1373_v40 = vadd.f32 %v2992_v57, %v1372_v56  ;;  %v1388_v44 = vmul.f32 0.70710677, %v1384_v38 }
 0x6c8   : > { %v1385_v42 = vadd.f32 %v1373_v40, %v2744_v9  ;;  %v1391_v43 = vmul.f32 0.70710677, %v1387_v39 }
 0x6ca   : > { %v1389_v45 = vmul.f32 0.70710677, %v1385_v42  ;;  %v1639_v48 = vpack.c.bf16 %v1391_v43, %v1390_v46 }
 0x6cc   : > { %v1638_v47 = vpack.c.bf16 %v1389_v45, %v1388_v44 }
 0x6ce   : > { %2338 = vmatprep.mubr.bf16.mxu0 %v1638_v47 }
 0x6cf   : > { %2339 = vmatmul.mubr.bf16.vlgmr.msra.gmra.mxu0 %v1639_v48 }
 0x6d0   : > { %2482 = shalt.err (!%p2479_p3)
}
 0x6d1   : > { %s2483_s24 = scalar_lea.hbm %s3050_s0, 512  ;;  %s2487_s16 = scalar_lea.hbm %s3152_s14, 1024 }
 0x6d2   : > { %p2484_p4 = scmp.ne.s32.totalorder %s3050_s0, %s2483_s24  ;;  %p2488_p9 = scmp.lt.s32.totalorder %s3050_s0, %s3152_s14 }
 0x6d3   : > { %p2489_p10 = scmp.lt.s32.totalorder %s2487_s16, %s2483_s24 }
 0x6d4   : > { %p2485_p7 = pnand %p2484_p4, %p2683_p5 }
 0x6d5   : > { %p2490_p11 = por %p2489_p10, %p2488_p9 }
 0x6d6   : > { %p2486_p8 = pneg %p2485_p7 }
 0x6d8   : > { %p2491_p12 = pnand %p2490_p11, %p2486_p8 }
 0x6da   : > { %2494 = shalt.err (!%p2491_p12)
}
 0x6db   : > { %s2562_s1 = smov 128   ;;  %s2563_s25 = smov 8  }
 0x6dc   : > { %s3177_s2 = scalar_lea.sflag [#allocation3], %s2853_s23  ;;  %s3178_s27 = sshll.u32 %s2666_s22, 9 }
 0x6dd   : > { %2343 = dma.vmem_to_hbm [thread:$0]  (%p2683_p5), %s3052_s29, 512, %s3050_s0, %s3177_s2, %s2562_s1, %s2562_s1, %s2563_s25  }
 0x6de   : > { %s3085_s24 = scalar_lea.hbm %s3153_s15, %s3178_s27  ;;  %s1799_s17 = sshll.u32 %s2913_s18, 4  ;;  %s3088_s17 = int_to_ptr.vmem [resolvable:$true] %s1799_s17 }
 0x6df   : > { %s1767_s16 = scalar_lea.sflag [#allocation5], %s2853_s23  ;;  %s2495_s3 = scalar_lea.vmem %s3088_s17, 512 }
 0x6e0   : > { %p2496_p13 = scmp.ne.s32.totalorder %s3088_s17, %s2495_s3  ;;  %s2564_s4 = smov [#allocation4]  }
 0x6e1   : > { %s2499_s29 = sshll.u32 %s2564_s4, 4  ;;  %s2500_s29 = int_to_ptr.vmem [resolvable:$false] %s2499_s29 }
 0x6e2   : > { %p2497_p0 = pnand %p2496_p13, %p2683_p5  ;;  %s2501_s22 = scalar_lea.vmem %s2500_s29, 1024 }
 0x6e3   : > { %p2502_p2 = scmp.lt.s32.totalorder %s3088_s17, %s2500_s29  ;;  %p2503_p3 = scmp.lt.s32.totalorder %s2501_s22, %s2495_s3 }
 0x6e4   : > { %p2498_p1 = pneg %p2497_p0 }
 0x6e5   : > { %p2504_p4 = por %p2503_p3, %p2502_p2 }
 0x6e7   : > { %p2505_p7 = pnand %p2504_p4, %p2498_p1 }
 0x6e9   : > { %2508 = shalt.err (!%p2505_p7)
}
 0x6ea   : > { %s2509_s18 = scalar_lea.hbm %s3085_s24, 512  ;;  %s2513_s4 = scalar_lea.hbm %s3153_s15, 1024 }
 0x6eb   : > { %p2510_p8 = scmp.ne.s32.totalorder %s3085_s24, %s2509_s18  ;;  %p2514_p11 = scmp.lt.s32.totalorder %s3085_s24, %s3153_s15 }
 0x6ec   : > { %p2515_p12 = scmp.lt.s32.totalorder %s2513_s4, %s2509_s18 }
 0x6ed   : > { %p2511_p9 = pnand %p2510_p8, %p2683_p5 }
 0x6ee   : > { %p2516_p13 = por %p2515_p12, %p2514_p11 }
 0x6ef   : > { %p2512_p10 = pneg %p2511_p9 }
 0x6f1   : > { %p2517_p0 = pnand %p2516_p13, %p2512_p10 }
 0x6f3   : > { %2520 = shalt.err (!%p2517_p0)
}
 0x6f4   : > { %2344 = dma.vmem_to_hbm [thread:$0]  (%p2683_p5), %s3088_s17, 512, %s3085_s24, %s1767_s16, %s2562_s1, %s2562_s1, %s2563_s25   ;;  %v2300_v8 = vpop.f32.mrf.mxu0  ;;  %v2320_v9 = vpop.f32.mrf.mxu1 }
 0x6f5   : > { %v1632_v52 = vadd.f32 %v2320_v9, %v2300_v8  ;;  %v2052_v5 = vld [vmem:[%s3150_s12] ss:$0 sm:$0xff]  ;;  %s615_s1 = scalar_lea.vmem %s3151_s13, %s2707_s30 }
 0x6f6   : > { %v1526_v34 = vpop.f32.mrf.mxu0  ;;  %v1623_v35 = vpop.f32.mrf.mxu1 }
 0x6f7   : > { %v1624_v28 = vadd.f32 %v1623_v35, %v1526_v34 }
 0x6f8   : > { %v2301_v49 = vpop.f32.mrf.mxu0  ;;  %v2321_v50 = vpop.f32.mrf.mxu1 }
 0x6f9   : > { %v1635_v57 = vadd.f32 %v2321_v50, %v2301_v49 }
 0x6fa   : > { %v1529_v51 = vpop.f32.mrf.mxu0  ;;  %v1626_v53 = vpop.f32.mrf.mxu1 }
 0x6fb   : > { %v1627_v61 = vadd.f32 %v1626_v53, %v1529_v51 }
 0x78f   : > { %v2340_v4 = vpop.f32.mrf.mxu0 }
 0x790   : > { %v1739_v29 = vadd.f32 %v2340_v4, %v1632_v52 }
 0x791   : > { %v1722_v54 = vpop.f32.mrf.mxu0 }
 0x792   : > { %v1750_v58 = vadd.f32 %v2052_v5, %v1739_v29  ;;  %v1737_v59 = vadd.f32 %v1722_v54, %v1624_v28 }
 0x793   : > { %v2341_v60 = vpop.f32.mrf.mxu0 }
 0x794   : > { %1754 = vst [vmem:[%s615_s1 + $0x10] sm:$0xff] %v1750_v58  ;;  %v1748_v62 = vadd.f32 %v2052_v5, %v1737_v59  ;;  %v1740_v63 = vadd.f32 %v2341_v60, %v1635_v57 }
 0x795   : > { %v1725_v0 = vpop.f32.mrf.mxu0 }
 0x796   : > { %1752 = vst [vmem:[%s615_s1] sm:$0xff] %v1748_v62  ;;  %v1751_v1 = vadd.f32 %v2052_v5, %v1740_v63  ;;  %v1738_v2 = vadd.f32 %v1725_v0, %v1627_v61 }
 0x798   : > { %1755 = vst [vmem:[%s615_s1 + $0x18] sm:$0xff] %v1751_v1  ;;  %v1749_v3 = vadd.f32 %v2052_v5, %v1738_v2 }
 0x79a   : > { %1753 = vst [vmem:[%s615_s1 + $0x8] sm:$0xff] %v1749_v3 }
 0x79b PF: > { %s3179_s25 = sld [smem:[#allocation8_spill]]  ;;  %p2354_p5 = scmp.ge.s32.totalorder %s2559_s21, 2 }
 0x79d   : > { %p2348_p1 = pnand %p2354_p5, %p2687_p6 }
 0x79f   : > { %p2349_p2 = pneg %p2348_p1 }
 0x7a1   : > { %s1822_s24 = sand.u32 1, %s3179_s25  }
 0x7a2   : > { %s1823_s17 = scalar_lea.sflag [#allocation3], %s1822_s24 }
 0x7a3   : > { %2538 = dma.done.wait (%p2349_p2), %s1823_s17, 512  }
 0x7a4   : > { %2540 = vsyncadd (%p2349_p2), %s1823_s17, 4294966784  ;;  %s1832_s16 = scalar_lea.sflag [#allocation5], %s1822_s24 }
 0x7a5   : > { %2542 = dma.done.wait (%p2349_p2), %s1832_s16, 512  }
 0x7a6   : > { %2544 = vsyncadd (%p2349_p2), %s1832_s16, 4294966784  ;;  %s3181_s21 = sld [smem:[#allocation10_spill]]  ;;  %s3184_s18 = smov %s2551_s19 }
 0x7a7   : > { %s3182_s29 = sld [smem:[#allocation9_spill]] }
 0x7a8   : > { %s3183_s20 = sld [smem:[#allocation11_spill]] }
 0x7ac   : > { %p29_p3 = scmp.ge.s32.totalorder %s3181_s21, 4  }
 0x7ad   : > { %s3185_s19 = smov %s3182_s29 }
 0x7ae   :  { %31 = sbr.rel (!%p29_p3) target bundleno = 11 (0xb), region = 151 }
 0x7b3   :  { %1837 = vsyncpa [#allocation3], 1 }
 0x7b4   :  { %1839 = vsyncpa [#allocation3 + $0x1], 1 }
 0x7b5   :  { %1840 = vsyncpa [#allocation5], 1 }
 0x7b6   :  { %1842 = vsyncpa [#allocation5 + $0x1], 1 }

// kernel: decoder_forward.6
= control target key start
LH: loop header
LB: loop body
LE: loop exit
PB: predicated region body
PF: predicated region fallthrough
CT: control target
= control target key end

     0   :  { %s7488_s12 = smov 0   ;;  %s9333_s0 = inlined_call_operand.vmem [shape: f32[2,32,128], index: 0, kind: input, shape index: {}]   ;;  %s9334_s1 = inlined_call_operand.vmem [shape: bf16[10,384,256], index: 1, kind: input, shape index: {}]   ;;  %s9335_s2 = inlined_call_operand.vmem [shape: f32[10,1,256], index: 2, kind: input, shape index: {}]   ;;  %s9336_s3 = inlined_call_operand.vmem [shape: f32[2,32,128], index: 3, kind: output, shape index: {}]  }
   0x1 LB: > { %s5590_s13 = sadd.s32 4294967295, %s7464_s12   ;;  %p5594_p0 = scmp.ge.s32.totalorder %s7464_s12, 1  ;;  %s7464_s12 = sphi %s7488_s12, %s13_s12  }
   0x2   : > { %p137_p1 = scmp.lt.s32.totalorder %s7464_s12, 3 }
   0x4   : > { %p138_p2 = pnand %p5594_p0, %p137_p1 }
   0x5   : > { %p161_p3 = scmp.lt.s32.totalorder (!%p138_p2), %s5590_s13, 1 }
   0x6   : > { %141 = sbr.rel (%p138_p2) target bundleno = 2811 (0xafb), region = 32 }
   0xb   : > { %v6574_v0 = vld [vmem:[%s9334_s1 + $0xf4] ss:$8 sps:$4 sm:$0xff]   ;;  %v7466_v2 = vmov 0   ;;  %v6578_v3 = vld [vmem:[%s9334_s1 + $0xf0] ss:$8 sps:$4 sm:$0xff]   ;;  %v7467_v5 = vmov 0.0  }
   0xc   : > { %v6576_v1 = vld [vmem:[%s9334_s1 + $0x74] ss:$8 sps:$4 sm:$0xff]   ;;  %362 = vmatprep.mubr.bf16.mxu0 %v7466_v2  ;;  %495 = vmatprep.mubr.bf16.mxu1 %v7466_v2  ;;  %v6579_v4 = vld [vmem:[%s9334_s1 + $0x70] ss:$8 sps:$4 sm:$0xff]   ;;  %178 = vst [vmem:[#allocation2 + $0x30] sm:$0xff] %v7467_v5  ;;  %172 = vst [vmem:[#allocation2] sm:$0xff] %v7467_v5 }
   0xd   : > { %330 = vmatprep.subr.bf16.mxu0 %v6574_v0  ;;  %173 = vst [vmem:[#allocation2 + $0x8] sm:$0xff] %v7467_v5  ;;  %174 = vst [vmem:[#allocation2 + $0x10] sm:$0xff] %v7467_v5  ;;  %463 = vmatprep.subr.bf16.mxu1 %v6576_v1  ;;  %v6580_v6 = vld [vmem:[%s9334_s1 + $0xe4] ss:$8 sps:$4 sm:$0xff]   ;;  %v6584_v8 = vld [vmem:[%s9334_s1 + $0xe0] ss:$8 sps:$4 sm:$0xff]  }
   0xe   : > { %175 = vst [vmem:[#allocation2 + $0x18] sm:$0xff] %v7467_v5  ;;  %176 = vst [vmem:[#allocation2 + $0x20] sm:$0xff] %v7467_v5  ;;  %331 = vmatpush1.bf16.msra.mxu0 %v6578_v3  ;;  %464 = vmatpush1.bf16.msra.mxu1 %v6579_v4  ;;  %v6582_v7 = vld [vmem:[%s9334_s1 + $0x64] ss:$8 sps:$4 sm:$0xff]   ;;  %v6585_v9 = vld [vmem:[%s9334_s1 + $0x60] ss:$8 sps:$4 sm:$0xff]  }
   0xf   : > { %177 = vst [vmem:[#allocation2 + $0x28] sm:$0xff] %v7467_v5  ;;  %332 = vmatprep.subr.bf16.mxu0 %v6580_v6  ;;  %465 = vmatprep.subr.bf16.mxu1 %v6582_v7  ;;  %v6586_v10 = vld [vmem:[%s9334_s1 + $0xd4] ss:$8 sps:$4 sm:$0xff]   ;;  %v6590_v12 = vld [vmem:[%s9334_s1 + $0xd0] ss:$8 sps:$4 sm:$0xff]   ;;  %s9338_s13 = smov (!%p161_p3, %s5590_s13), 1 }
  0x10   : > { %v6588_v11 = vld [vmem:[%s9334_s1 + $0x54] ss:$8 sps:$4 sm:$0xff]   ;;  %v6591_v13 = vld [vmem:[%s9334_s1 + $0x50] ss:$8 sps:$4 sm:$0xff]   ;;  %v6592_v14 = vld [vmem:[%s9334_s1 + $0xc4] ss:$8 sps:$4 sm:$0xff]  }
  0x11   : > { %v6594_v15 = vld [vmem:[%s9334_s1 + $0x44] ss:$8 sps:$4 sm:$0xff]   ;;  %v6596_v16 = vld [vmem:[%s9334_s1 + $0xc0] ss:$8 sps:$4 sm:$0xff]   ;;  %v6598_v18 = vld [vmem:[%s9334_s1 + $0xb4] ss:$8 sps:$4 sm:$0xff]  }
  0x12   : > { %333 = vmatpush1.bf16.msra.mxu0 %v6584_v8  ;;  %466 = vmatpush1.bf16.msra.mxu1 %v6585_v9  ;;  %v6597_v17 = vld [vmem:[%s9334_s1 + $0x40] ss:$8 sps:$4 sm:$0xff]   ;;  %v6600_v19 = vld [vmem:[%s9334_s1 + $0x34] ss:$8 sps:$4 sm:$0xff]   ;;  %v6602_v20 = vld [vmem:[%s9334_s1 + $0xb0] ss:$8 sps:$4 sm:$0xff]  }
  0x13   : > { %334 = vmatprep.subr.bf16.mxu0 %v6586_v10  ;;  %467 = vmatprep.subr.bf16.mxu1 %v6588_v11  ;;  %v6603_v21 = vld [vmem:[%s9334_s1 + $0x30] ss:$8 sps:$4 sm:$0xff]   ;;  %s6562_s29 = sshll.u32 %s9338_s13, 5  ;;  %v6604_v22 = vld [vmem:[%s9334_s1 + $0xa4] ss:$8 sps:$4 sm:$0xff]  }
  0x14   : > { %v6606_v23 = vld [vmem:[%s9334_s1 + $0x24] ss:$8 sps:$4 sm:$0xff]   ;;  %s165_s9 = scalar_lea.vmem %s9333_s0, %s6562_s29  ;;  %v6608_v24 = vld [vmem:[%s9334_s1 + $0xa0] ss:$8 sps:$4 sm:$0xff]   ;;  %v6610_v26 = vld [vmem:[%s9334_s1 + $0x94] ss:$8 sps:$4 sm:$0xff]   ;;  %s170_s14 = scalar_lea.vmem %s9336_s3, %s6562_s29 }
  0x15   : > { %v6609_v25 = vld [vmem:[%s9334_s1 + $0x20] ss:$8 sps:$4 sm:$0xff]   ;;  %v6612_v27 = vld [vmem:[%s9334_s1 + $0x14] ss:$8 sps:$4 sm:$0xff]   ;;  %v6614_v32 = vld [vmem:[%s9334_s1 + $0x90] ss:$8 sps:$4 sm:$0xff]  }
  0x16   : > { %335 = vmatpush1.bf16.msra.mxu0 %v6590_v12  ;;  %468 = vmatpush1.bf16.msra.mxu1 %v6591_v13  ;;  %v7588_v28 = vld [vmem:[%s165_s9] sm:$0xff]  ;;  %v7590_v29 = vld [vmem:[%s165_s9 + $0x8] sm:$0xff]  ;;  %v7592_v30 = vld [vmem:[%s165_s9 + $0x10] sm:$0xff] }
  0x17   : > { %336 = vmatprep.subr.bf16.mxu0 %v6592_v14  ;;  %469 = vmatprep.subr.bf16.mxu1 %v6594_v15  ;;  %v7594_v31 = vld [vmem:[%s165_s9 + $0x18] sm:$0xff]  ;;  %183 = vst [vmem:[#allocation2 + $0x38] sm:$0xff] %v7588_v28  ;;  %184 = vst [vmem:[#allocation2 + $0x40] sm:$0xff] %v7590_v29  ;;  %v6616_v34 = vld [vmem:[%s9334_s1 + $0x84] ss:$8 sps:$4 sm:$0xff]   ;;  %v248_v3 = vpack.c.bf16 %v7590_v29, %v7588_v28 }
  0x18   : > { %v6615_v33 = vld [vmem:[%s9334_s1 + $0x10] ss:$8 sps:$4 sm:$0xff]   ;;  %185 = vst [vmem:[#allocation2 + $0x48] sm:$0xff] %v7592_v30  ;;  %186 = vst [vmem:[#allocation2 + $0x50] sm:$0xff] %v7594_v31  ;;  %v6618_v35 = vld [vmem:[%s9334_s1 + $0x4] ss:$8 sps:$4 sm:$0xff]   ;;  %v249_v4 = vpack.c.bf16 %v7594_v31, %v7592_v30 }
  0x19   : > { %v6620_v36 = vld [vmem:[%s9334_s1 + $0x80] ss:$8 sps:$4 sm:$0xff]   ;;  %v6624_v38 = vld [vmem:[%s9334_s1 + $0x174] ss:$8 sps:$4 sm:$0xff]   ;;  %v6622_v45 = vld [vmem:[%s9334_s1 + $0x170] ss:$8 sps:$4 sm:$0xff]  }
  0x1a   : > { %337 = vmatpush1.bf16.msra.mxu0 %v6596_v16  ;;  %470 = vmatpush1.bf16.msra.mxu1 %v6597_v17  ;;  %v6621_v37 = vld [vmem:[%s9334_s1] ss:$8 sps:$4 sm:$0xff]   ;;  %v6627_v46 = vld [vmem:[%s9334_s1 + $0x164] ss:$8 sps:$4 sm:$0xff]   ;;  %v6630_v50 = vld [vmem:[%s9334_s1 + $0x154] ss:$8 sps:$4 sm:$0xff]  }
  0x1b   : > { %338 = vmatprep.subr.bf16.mxu0 %v6598_v18  ;;  %471 = vmatprep.subr.bf16.mxu1 %v6600_v19  ;;  %v6625_v47 = vld [vmem:[%s9334_s1 + $0x160] ss:$8 sps:$4 sm:$0xff]   ;;  %v6628_v53 = vld [vmem:[%s9334_s1 + $0x150] ss:$8 sps:$4 sm:$0xff]   ;;  %v6633_v54 = vld [vmem:[%s9334_s1 + $0x144] ss:$8 sps:$4 sm:$0xff]  }
  0x1c   : > { %v6631_v57 = vld [vmem:[%s9334_s1 + $0x140] ss:$8 sps:$4 sm:$0xff]   ;;  %v6636_v58 = vld [vmem:[%s9334_s1 + $0x134] ss:$8 sps:$4 sm:$0xff]   ;;  %v6634_v59 = vld [vmem:[%s9334_s1 + $0x130] ss:$8 sps:$4 sm:$0xff]  }
  0x1d   : > { %v6639_v60 = vld [vmem:[%s9334_s1 + $0x124] ss:$8 sps:$4 sm:$0xff]   ;;  %v6637_v61 = vld [vmem:[%s9334_s1 + $0x120] ss:$8 sps:$4 sm:$0xff]   ;;  %v6642_v62 = vld [vmem:[%s9334_s1 + $0x114] ss:$8 sps:$4 sm:$0xff]  }
  0x1e   : > { %339 = vmatpush1.bf16.msra.mxu0 %v6602_v20  ;;  %472 = vmatpush1.bf16.msra.mxu1 %v6603_v21  ;;  %v237_v39 = vld [vmem:[#allocation2 + $0x3e] sm:$0xff]  ;;  %v236_v42 = vld [vmem:[#allocation2 + $0x36] sm:$0xff] }
  0x1f   : > { %340 = vmatprep.subr.bf16.mxu0 %v6604_v22  ;;  %473 = vmatprep.subr.bf16.mxu1 %v6606_v23  ;;  %v242_v40 = vld [vmem:[#allocation2 + $0x37] sm:$0xff]  ;;  %v243_v41 = vld [vmem:[#allocation2 + $0x3f] sm:$0xff]  ;;  %v240_v44 = vpack.c.bf16 %v237_v39, %v236_v42  ;;  %v244_v48 = vld [vmem:[#allocation2 + $0x47] sm:$0xff] }
  0x20   : > { %v246_v43 = vpack.c.bf16 %v243_v41, %v242_v40  ;;  %v245_v49 = vld [vmem:[#allocation2 + $0x4f] sm:$0xff]  ;;  %v238_v51 = vld [vmem:[#allocation2 + $0x46] sm:$0xff] }
  0x21   : > { %v239_v52 = vld [vmem:[#allocation2 + $0x4e] sm:$0xff]  ;;  %v247_v55 = vpack.c.bf16 %v245_v49, %v244_v48  ;;  %v6643_v1 = vld [vmem:[%s9334_s1 + $0x100] ss:$8 sps:$4 sm:$0xff]  }
  0x22   : > { %341 = vmatpush1.bf16.msra.mxu0 %v6608_v24  ;;  %474 = vmatpush1.bf16.msra.mxu1 %v6609_v25  ;;  %v241_v56 = vpack.c.bf16 %v239_v52, %v238_v51  ;;  %v6640_v63 = vld [vmem:[%s9334_s1 + $0x110] ss:$8 sps:$4 sm:$0xff]   ;;  %v6645_v0 = vld [vmem:[%s9334_s1 + $0x104] ss:$8 sps:$4 sm:$0xff]   ;;  %v6648_v5 = vld [vmem:[%s9334_s1 + $0x274] ss:$8 sps:$4 sm:$0xff]  }
  0x23   : > { %342 = vmatprep.subr.bf16.mxu0 %v6610_v26  ;;  %475 = vmatprep.subr.bf16.mxu1 %v6612_v27  ;;  %v6646_v6 = vld [vmem:[%s9334_s1 + $0x270] ss:$8 sps:$4 sm:$0xff]   ;;  %v6651_v7 = vld [vmem:[%s9334_s1 + $0x1f4] ss:$8 sps:$4 sm:$0xff]   ;;  %v6654_v9 = vld [vmem:[%s9334_s1 + $0x264] ss:$8 sps:$4 sm:$0xff]  }
  0x24   : > { %v6649_v8 = vld [vmem:[%s9334_s1 + $0x1f0] ss:$8 sps:$4 sm:$0xff]   ;;  %v6652_v10 = vld [vmem:[%s9334_s1 + $0x260] ss:$8 sps:$4 sm:$0xff]   ;;  %v6657_v11 = vld [vmem:[%s9334_s1 + $0x1e4] ss:$8 sps:$4 sm:$0xff]  }
  0x25   : > { %v6655_v12 = vld [vmem:[%s9334_s1 + $0x1e0] ss:$8 sps:$4 sm:$0xff]   ;;  %v6660_v13 = vld [vmem:[%s9334_s1 + $0x254] ss:$8 sps:$4 sm:$0xff]   ;;  %v6658_v14 = vld [vmem:[%s9334_s1 + $0x250] ss:$8 sps:$4 sm:$0xff]  }
  0x26   : > { %343 = vmatpush1.bf16.msra.mxu0 %v6614_v32  ;;  %476 = vmatpush1.bf16.msra.mxu1 %v6615_v33  ;;  %v6663_v15 = vld [vmem:[%s9334_s1 + $0x1d4] ss:$8 sps:$4 sm:$0xff]   ;;  %v6661_v16 = vld [vmem:[%s9334_s1 + $0x1d0] ss:$8 sps:$4 sm:$0xff]   ;;  %v6666_v17 = vld [vmem:[%s9334_s1 + $0x244] ss:$8 sps:$4 sm:$0xff]  }
  0x27   : > { %344 = vmatprep.subr.bf16.mxu0 %v6616_v34  ;;  %477 = vmatprep.subr.bf16.mxu1 %v6618_v35  ;;  %v6664_v18 = vld [vmem:[%s9334_s1 + $0x240] ss:$8 sps:$4 sm:$0xff]   ;;  %v6669_v19 = vld [vmem:[%s9334_s1 + $0x1c4] ss:$8 sps:$4 sm:$0xff]   ;;  %v6672_v21 = vld [vmem:[%s9334_s1 + $0x234] ss:$8 sps:$4 sm:$0xff]  }
  0x28   : > { %v6667_v20 = vld [vmem:[%s9334_s1 + $0x1c0] ss:$8 sps:$4 sm:$0xff]   ;;  %v6670_v22 = vld [vmem:[%s9334_s1 + $0x230] ss:$8 sps:$4 sm:$0xff]   ;;  %v6675_v23 = vld [vmem:[%s9334_s1 + $0x1b4] ss:$8 sps:$4 sm:$0xff]  }
  0x29   : > { %v6673_v24 = vld [vmem:[%s9334_s1 + $0x1b0] ss:$8 sps:$4 sm:$0xff]   ;;  %v6678_v25 = vld [vmem:[%s9334_s1 + $0x224] ss:$8 sps:$4 sm:$0xff]   ;;  %v6676_v26 = vld [vmem:[%s9334_s1 + $0x220] ss:$8 sps:$4 sm:$0xff]  }
  0x2a   : > { %345 = vmatpush1.bf16.msra.mxu0 %v6620_v36  ;;  %478 = vmatpush1.bf16.msra.mxu1 %v6621_v37  ;;  %v6681_v27 = vld [vmem:[%s9334_s1 + $0x1a4] ss:$8 sps:$4 sm:$0xff]   ;;  %v6679_v28 = vld [vmem:[%s9334_s1 + $0x1a0] ss:$8 sps:$4 sm:$0xff]   ;;  %v6684_v29 = vld [vmem:[%s9334_s1 + $0x214] ss:$8 sps:$4 sm:$0xff]  }
  0x2b   : > { %596 = vmatprep.subr.bf16.mxu0 %v6624_v38  ;;  %865 = vmatprep.subr.bf16.mxu1 %v6648_v5  ;;  %v6682_v30 = vld [vmem:[%s9334_s1 + $0x210] ss:$8 sps:$4 sm:$0xff]   ;;  %v6687_v31 = vld [vmem:[%s9334_s1 + $0x194] ss:$8 sps:$4 sm:$0xff]   ;;  %v6690_v33 = vld [vmem:[%s9334_s1 + $0x204] ss:$8 sps:$4 sm:$0xff]  }
  0x2c   : > { %v6685_v32 = vld [vmem:[%s9334_s1 + $0x190] ss:$8 sps:$4 sm:$0xff]   ;;  %v6688_v34 = vld [vmem:[%s9334_s1 + $0x200] ss:$8 sps:$4 sm:$0xff]   ;;  %v6693_v35 = vld [vmem:[%s9334_s1 + $0x184] ss:$8 sps:$4 sm:$0xff]  }
  0x2d   : > { %363 = vmatmul.mubr.bf16.vlgmr.msra.gmra.mxu0 %v246_v43  ;;  %496 = vmatmul.mubr.bf16.vlgmr.msra.gmra.mxu1 %v240_v44  ;;  %v6691_v36 = vld [vmem:[%s9334_s1 + $0x180] ss:$8 sps:$4 sm:$0xff]   ;;  %v6696_v37 = vld [vmem:[%s9334_s1 + $0x2f4] ss:$8 sps:$4 sm:$0xff]  }
  0x2e   : > { %597 = vmatpush1.bf16.msra.mxu0 %v6622_v45  ;;  %372 = vmatprep.mubr.bf16.mxu0 %v7466_v2 }
  0x2f   : > { %598 = vmatprep.subr.bf16.mxu0 %v6627_v46  ;;  %505 = vmatprep.mubr.bf16.mxu1 %v7466_v2  ;;  %v658_v46 = vlaneseq }
  0x30   : > { %866 = vmatpush1.bf16.msra.mxu1 %v6646_v6 }
  0x31   : > { %867 = vmatprep.subr.bf16.mxu1 %v6654_v9  ;;  %v659_v49 = vshrl.u32 %v658_v46, 7 }
  0x32   : > { %599 = vmatpush1.bf16.msra.mxu0 %v6625_v47 }
  0x33   : > { %600 = vmatprep.subr.bf16.mxu0 %v6630_v50  ;;  %v7779_v51 = vsub.s32 1, %v659_v49 }
  0x34   : > { %868 = vmatpush1.bf16.msra.mxu1 %v6652_v10 }
  0x35   : > { %373 = vmatmul.mubr.bf16.gmra.mxu0 %v247_v55  ;;  %506 = vmatmul.mubr.bf16.gmra.mxu1 %v241_v56 }
  0x36   : > { %601 = vmatpush1.bf16.msra.mxu0 %v6628_v53  ;;  %628 = vmatprep.mubr.bf16.mxu0 %v7466_v2 }
  0x37   : > { %602 = vmatprep.subr.bf16.mxu0 %v6633_v54  ;;  %897 = vmatprep.mubr.bf16.mxu1 %v7466_v2  ;;  %v235_v54 = vld [vmem:[%s9335_s2] sm:$0x3] }
  0x38   : > { %869 = vmatprep.subr.bf16.mxu1 %v6660_v13 }
  0x39   : > { %870 = vmatpush1.bf16.msra.mxu1 %v6658_v14 }
  0x3a   : > { %603 = vmatpush1.bf16.msra.mxu0 %v6631_v57  ;;  %871 = vmatprep.subr.bf16.mxu1 %v6666_v17  ;;  %v665_v57 = vrot.slane %v235_v54, %v7779_v51 }
  0x3b   : > { %604 = vmatprep.subr.bf16.mxu0 %v6636_v58 }
  0x3d   : > { %872 = vmatpush1.bf16.msra.mxu1 %v6664_v18 }
  0x3e   : > { %605 = vmatpush1.bf16.msra.mxu0 %v6634_v59  ;;  %873 = vmatprep.subr.bf16.mxu1 %v6672_v21 }
  0x3f   : > { %606 = vmatprep.subr.bf16.mxu0 %v6639_v60 }
  0x41   : > { %874 = vmatpush1.bf16.msra.mxu1 %v6670_v22 }
  0x42   : > { %607 = vmatpush1.bf16.msra.mxu0 %v6637_v61  ;;  %875 = vmatprep.subr.bf16.mxu1 %v6678_v25  ;;  %v7785_v25 = vsub.s32 0, %v659_v49 }
  0x43   : > { %608 = vmatprep.subr.bf16.mxu0 %v6642_v62 }
  0x45   : > { %876 = vmatpush1.bf16.msra.mxu1 %v6676_v26 }
  0x46   : > { %609 = vmatpush1.bf16.msra.mxu0 %v6640_v63  ;;  %877 = vmatprep.subr.bf16.mxu1 %v6684_v29 }
  0x47   : > { %610 = vmatprep.subr.bf16.mxu0 %v6645_v0 }
  0x49   : > { %878 = vmatpush1.bf16.msra.mxu1 %v6682_v30  ;;  %v661_v30 = vrot.slane %v235_v54, %v7785_v25 }
  0x4a   : > { %611 = vmatpush1.bf16.msra.mxu0 %v6643_v1  ;;  %879 = vmatprep.subr.bf16.mxu1 %v6690_v33 }
  0x4b   : > { %998 = vmatprep.subr.bf16.mxu0 %v6651_v7 }
  0x4d   : > { %629 = vmatmul.mubr.bf16.vlgmr.msra.gmra.mxu0 %v248_v3  ;;  %880 = vmatpush1.bf16.msra.mxu1 %v6688_v34 }
  0x4e   : > { %638 = vmatprep.mubr.bf16.mxu0 %v7466_v2  ;;  %999 = vmatpush1.bf16.msra.mxu0 %v6649_v8 }
  0x4f   : > { %1000 = vmatprep.subr.bf16.mxu0 %v6657_v11  ;;  %1131 = vmatprep.subr.bf16.mxu1 %v6696_v37 }
  0x52   : > { %1001 = vmatpush1.bf16.msra.mxu0 %v6655_v12 }
  0x53   : > { %1002 = vmatprep.subr.bf16.mxu0 %v6663_v15 }
  0x55   : > { %639 = vmatmul.mubr.bf16.gmra.mxu0 %v249_v4 }
  0x56   : > { %1030 = vmatprep.mubr.bf16.mxu0 %v7466_v2  ;;  %1003 = vmatpush1.bf16.msra.mxu0 %v6661_v16 }
  0x57   : > { %1004 = vmatprep.subr.bf16.mxu0 %v6669_v19 }
  0x5a   : > { %1005 = vmatpush1.bf16.msra.mxu0 %v6667_v20 }
  0x5b   : > { %1006 = vmatprep.subr.bf16.mxu0 %v6675_v23 }
  0x5e   : > { %1007 = vmatpush1.bf16.msra.mxu0 %v6673_v24 }
  0x5f   : > { %1008 = vmatprep.subr.bf16.mxu0 %v6681_v27 }
  0x62   : > { %1009 = vmatpush1.bf16.msra.mxu0 %v6679_v28 }
  0x63   : > { %1010 = vmatprep.subr.bf16.mxu0 %v6687_v31 }
  0x66   : > { %1011 = vmatpush1.bf16.msra.mxu0 %v6685_v32 }
  0x67   : > { %1012 = vmatprep.subr.bf16.mxu0 %v6693_v35 }
  0x6a   : > { %1013 = vmatpush1.bf16.msra.mxu0 %v6691_v36 }
  0xed   : > { %v364_v38 = vpop.f32.mrf.mxu0  ;;  %v497_v41 = vpop.f32.mrf.mxu1 }
  0xee   : > { %v498_v27 = vadd.f32 %v497_v41, %v364_v38 }
  0xef   : > { %v366_v39 = vpop.f32.mrf.mxu0  ;;  %v499_v44 = vpop.f32.mrf.mxu1 }
  0xf0   : > { %v500_v56 = vadd.f32 %v499_v44, %v366_v39 }
  0xf1   : > { %v368_v40 = vpop.f32.mrf.mxu0  ;;  %v501_v47 = vpop.f32.mrf.mxu1 }
  0xf2   : > { %v502_v32 = vadd.f32 %v501_v47, %v368_v40  ;;  %v7455_v47 = vld [vmem:[#allocation2 + $0x40] sm:$0xff] }
  0xf3   : > { %v370_v42 = vpop.f32.mrf.mxu0  ;;  %v503_v50 = vpop.f32.mrf.mxu1 }
  0xf4   : > { %v504_v62 = vadd.f32 %v503_v50, %v370_v42  ;;  %v7454_v42 = vld [vmem:[#allocation2 + $0x38] sm:$0xff] }
  0xf5   : > { %v7775_v43 = vpop.f32.mrf.mxu0  ;;  %v507_v52 = vpop.f32.mrf.mxu1 }
  0xf6   : > { %v508_v37 = vadd.f32 %v507_v52, %v7775_v43 }
  0xf7   : > { %v376_v45 = vpop.f32.mrf.mxu0  ;;  %v509_v58 = vpop.f32.mrf.mxu1 }
  0xf8   : > { %v510_v6 = vadd.f32 %v509_v58, %v376_v45  ;;  %v7456_v58 = vld [vmem:[#allocation2 + $0x48] sm:$0xff] }
  0xf9   : > { %v7777_v48 = vpop.f32.mrf.mxu0  ;;  %v511_v0 = vpop.f32.mrf.mxu1 }
  0xfa   : > { %v512_v50 = vadd.f32 %v511_v0, %v7777_v48  ;;  %v7457_v0 = vld [vmem:[#allocation2 + $0x50] sm:$0xff] }
  0xfb   : > { %v380_v53 = vpop.f32.mrf.mxu0  ;;  %v513_v8 = vpop.f32.mrf.mxu1 }
  0xfc   : > { %v514_v13 = vadd.f32 %v513_v8, %v380_v53 }
 0x10d   : > { %v630_v55 = vpop.f32.mrf.mxu0 }
 0x10e   : > { %v649_v29 = vadd.f32 %v630_v55, %v498_v27  ;;  %v6709_v27 = vld [vmem:[%s9334_s1 + $0x2a0] ss:$8 sps:$4 sm:$0xff]  }
 0x10f   : > { %v632_v59 = vpop.f32.mrf.mxu0 }
 0x110   : > { %v650_v60 = vadd.f32 %v632_v59, %v500_v56  ;;  %v668_v34 = vadd.f32 %v661_v30, %v649_v29  ;;  %v6712_v29 = vld [vmem:[%s9334_s1 + $0x290] ss:$8 sps:$4 sm:$0xff]  }
 0x111   : > { %v634_v61 = vpop.f32.mrf.mxu0 }
 0x112   : > { %v669_v63 = vadd.f32 %v665_v57, %v650_v60  ;;  %v651_v36 = vadd.f32 %v634_v61, %v502_v32 }
 0x113   : > { %v636_v1 = vpop.f32.mrf.mxu0 }
 0x114   : > { %v5647_v3 = vmul.f32 -1.442695, %v669_v63  ;;  %v652_v4 = vadd.f32 %v636_v1, %v504_v62  ;;  %v670_v38 = vadd.f32 %v661_v30, %v651_v36  ;;  %v6723_v36 = vld [vmem:[%s9334_s1 + $0x3f4] ss:$8 sps:$4 sm:$0xff]  }
 0x115   : > { %v640_v5 = vpop.f32.mrf.mxu0  ;;  %1400 = vmatprep.subr.bf16.mxu0 %v6723_v36 }
 0x116   : > { %7294 = vpow2.f32 %v5647_v3  ;;  %v671_v7 = vadd.f32 %v665_v57, %v652_v4  ;;  %v653_v49 = vadd.f32 %v640_v5, %v508_v37  ;;  %v6694_v4 = vld [vmem:[%s9334_s1 + $0x2f0] ss:$8 sps:$4 sm:$0xff]  }
 0x117   : > { %v642_v9 = vpop.f32.mrf.mxu0  ;;  %v6721_v37 = vld [vmem:[%s9334_s1 + $0x3f0] ss:$8 sps:$4 sm:$0xff]  }
 0x118   : > { %v5648_v10 = vmul.f32 -1.442695, %v671_v7  ;;  %v654_v11 = vadd.f32 %v642_v9, %v510_v6  ;;  %v672_v43 = vadd.f32 %v661_v30, %v653_v49  ;;  %v6735_v49 = vld [vmem:[%s9334_s1 + $0x3d4] ss:$8 sps:$4 sm:$0xff]  }
 0x119   : > { %v644_v12 = vpop.f32.mrf.mxu0 }
 0x11a   : > { %7296 = vpow2.f32 %v5648_v10  ;;  %v673_v14 = vadd.f32 %v665_v57, %v654_v11  ;;  %v655_v56 = vadd.f32 %v644_v12, %v512_v50  ;;  %v6699_v11 = vld [vmem:[%s9334_s1 + $0x2e4] ss:$8 sps:$4 sm:$0xff]   ;;  %v6697_v12 = vld [vmem:[%s9334_s1 + $0x2e0] ss:$8 sps:$4 sm:$0xff]   ;;  %v6733_v50 = vld [vmem:[%s9334_s1 + $0x3d0] ss:$8 sps:$4 sm:$0xff]  }
 0x11b   : > { %v646_v15 = vpop.f32.mrf.mxu0 }
 0x11c   : > { %v5649_v16 = vmul.f32 -1.442695, %v673_v14  ;;  %v656_v17 = vadd.f32 %v646_v15, %v514_v13  ;;  %v674_v48 = vadd.f32 %v661_v30, %v655_v56  ;;  %v6702_v13 = vld [vmem:[%s9334_s1 + $0x2d4] ss:$8 sps:$4 sm:$0xff]   ;;  %v6700_v15 = vld [vmem:[%s9334_s1 + $0x2d0] ss:$8 sps:$4 sm:$0xff]  }
 0x11d   : > { %v6717_v30 = vld [vmem:[%s9334_s1 + $0x284] ss:$8 sps:$4 sm:$0xff]   ;;  %v6747_v56 = vld [vmem:[%s9334_s1 + $0x3b4] ss:$8 sps:$4 sm:$0xff]  }
 0x11e   : > { %7298 = vpow2.f32 %v5649_v16  ;;  %v675_v18 = vadd.f32 %v665_v57, %v656_v17 }
 0x120   : > { %v5650_v19 = vmul.f32 -1.442695, %v675_v18 }
 0x122   : > { %7300 = vpow2.f32 %v5650_v19 }
 0x123   : > { %v7295_v20 = vpop.eup %7294 }
 0x124   : > { %v688_v21 = vadd.f32 1.0, %v7295_v20 }
 0x126   : > { %7302 = vrcp.f32 %v688_v21  ;;  %v6705_v21 = vld [vmem:[%s9334_s1 + $0x2c4] ss:$8 sps:$4 sm:$0xff]  }
 0x127   : > { %v7297_v22 = vpop.eup %7296 }
 0x128   : > { %v689_v23 = vadd.f32 1.0, %v7297_v22  ;;  %v6703_v22 = vld [vmem:[%s9334_s1 + $0x2c0] ss:$8 sps:$4 sm:$0xff]  }
 0x12a   : > { %7304 = vrcp.f32 %v689_v23  ;;  %v6708_v23 = vld [vmem:[%s9334_s1 + $0x2b4] ss:$8 sps:$4 sm:$0xff]  }
 0x12b   : > { %v7299_v24 = vpop.eup %7298 }
 0x12c   : > { %v690_v26 = vadd.f32 1.0, %v7299_v24  ;;  %v6706_v24 = vld [vmem:[%s9334_s1 + $0x2b0] ss:$8 sps:$4 sm:$0xff]  }
 0x12e   : > { %7306 = vrcp.f32 %v690_v26  ;;  %v6711_v26 = vld [vmem:[%s9334_s1 + $0x2a4] ss:$8 sps:$4 sm:$0xff]  }
 0x12f   : > { %v7301_v28 = vpop.eup %7300 }
 0x130   : > { %v691_v31 = vadd.f32 1.0, %v7301_v28  ;;  %v6714_v28 = vld [vmem:[%s9334_s1 + $0x294] ss:$8 sps:$4 sm:$0xff]  }
 0x132   : > { %7308 = vrcp.f32 %v691_v31  ;;  %v6715_v31 = vld [vmem:[%s9334_s1 + $0x280] ss:$8 sps:$4 sm:$0xff]  }
 0x133   : > { %v7303_v33 = vpop.eup %7302 }
 0x134   : > { %v704_v35 = vsub.f32 1.0, %v7303_v33  ;;  %v700_v39 = vmul.f32 %v7303_v33, %v668_v34  ;;  %v6720_v34 = vld [vmem:[%s9334_s1 + $0x374] ss:$8 sps:$4 sm:$0xff]  }
 0x136   : > { %v708_v44 = vmul.f32 %v7454_v42, %v704_v35  ;;  %v6718_v35 = vld [vmem:[%s9334_s1 + $0x370] ss:$8 sps:$4 sm:$0xff]   ;;  %v6724_v42 = vld [vmem:[%s9334_s1 + $0x360] ss:$8 sps:$4 sm:$0xff]  }
 0x137   : > { %v7305_v45 = vpop.eup %7304 }
 0x138   : > { %v7789_v46 = vadd.f32 %v708_v44, %v700_v39  ;;  %v705_v41 = vsub.f32 1.0, %v7305_v45  ;;  %v701_v40 = vmul.f32 %v7305_v45, %v670_v38  ;;  %v6726_v39 = vld [vmem:[%s9334_s1 + $0x364] ss:$8 sps:$4 sm:$0xff]   ;;  %v6727_v45 = vld [vmem:[%s9334_s1 + $0x3e0] ss:$8 sps:$4 sm:$0xff]  }
 0x139   : > { %v6729_v44 = vld [vmem:[%s9334_s1 + $0x3e4] ss:$8 sps:$4 sm:$0xff]   ;;  %v6732_v38 = vld [vmem:[%s9334_s1 + $0x354] ss:$8 sps:$4 sm:$0xff]  }
 0x13a   : > { %716 = vst [vmem:[#allocation2 + $0x38] sm:$0xff] %v7789_v46  ;;  %v709_v53 = vmul.f32 %v7455_v47, %v705_v41  ;;  %v6730_v41 = vld [vmem:[%s9334_s1 + $0x350] ss:$8 sps:$4 sm:$0xff]   ;;  %v6736_v47 = vld [vmem:[%s9334_s1 + $0x340] ss:$8 sps:$4 sm:$0xff]  }
 0x13b   : > { %v7307_v54 = vpop.eup %7306 }
 0x13c   : > { %v7793_v55 = vadd.f32 %v709_v53, %v701_v40  ;;  %v706_v52 = vsub.f32 1.0, %v7307_v54  ;;  %v702_v57 = vmul.f32 %v7307_v54, %v672_v43  ;;  %v6738_v40 = vld [vmem:[%s9334_s1 + $0x344] ss:$8 sps:$4 sm:$0xff]   ;;  %v6739_v54 = vld [vmem:[%s9334_s1 + $0x3c0] ss:$8 sps:$4 sm:$0xff]  }
 0x13d   : > { %v6741_v53 = vld [vmem:[%s9334_s1 + $0x3c4] ss:$8 sps:$4 sm:$0xff]   ;;  %v6744_v43 = vld [vmem:[%s9334_s1 + $0x334] ss:$8 sps:$4 sm:$0xff]  }
 0x13e   : > { %717 = vst [vmem:[#allocation2 + $0x40] sm:$0xff] %v7793_v55  ;;  %v710_v59 = vmul.f32 %v7456_v58, %v706_v52  ;;  %v783_v32 = vpack.c.bf16 %v7793_v55, %v7789_v46  ;;  %v6742_v52 = vld [vmem:[%s9334_s1 + $0x330] ss:$8 sps:$4 sm:$0xff]   ;;  %v6750_v58 = vld [vmem:[%s9334_s1 + $0x324] ss:$8 sps:$4 sm:$0xff]  }
 0x13f   : > { %v7309_v60 = vpop.eup %7308 }
 0x140   : > { %v7796_v61 = vadd.f32 %v710_v59, %v702_v57  ;;  %v707_v62 = vsub.f32 1.0, %v7309_v60  ;;  %v703_v63 = vmul.f32 %v7309_v60, %v674_v48  ;;  %v6745_v57 = vld [vmem:[%s9334_s1 + $0x3b0] ss:$8 sps:$4 sm:$0xff]   ;;  %v6748_v59 = vld [vmem:[%s9334_s1 + $0x320] ss:$8 sps:$4 sm:$0xff]  }
 0x141   : > { %v777_v5 = vld [vmem:[#allocation2 + $0x35] sm:$0xff]  ;;  %v6753_v60 = vld [vmem:[%s9334_s1 + $0x3a4] ss:$8 sps:$4 sm:$0xff]   ;;  %v6751_v48 = vld [vmem:[%s9334_s1 + $0x3a0] ss:$8 sps:$4 sm:$0xff]  }
 0x142   : > { %718 = vst [vmem:[#allocation2 + $0x48] sm:$0xff] %v7796_v61  ;;  %v711_v1 = vmul.f32 %v7457_v0, %v707_v62  ;;  %v771_v8 = vld [vmem:[#allocation2 + $0x32] sm:$0xff] }
 0x143   : > { %v6756_v62 = vld [vmem:[%s9334_s1 + $0x314] ss:$8 sps:$4 sm:$0xff]  }
 0x144   : > { %v7799_v3 = vadd.f32 %v711_v1, %v703_v63  ;;  %v6754_v63 = vld [vmem:[%s9334_s1 + $0x310] ss:$8 sps:$4 sm:$0xff]   ;;  %v6759_v0 = vld [vmem:[%s9334_s1 + $0x394] ss:$8 sps:$4 sm:$0xff]  }
 0x145   : > { %v772_v6 = vld [vmem:[#allocation2 + $0x3a] sm:$0xff] }
 0x146   : > { %v778_v7 = vld [vmem:[#allocation2 + $0x3d] sm:$0xff]  ;;  %719 = vst [vmem:[#allocation2 + $0x50] sm:$0xff] %v7799_v3  ;;  %v775_v10 = vpack.c.bf16 %v772_v6, %v771_v8  ;;  %v784_v33 = vpack.c.bf16 %v7799_v3, %v7796_v61  ;;  %v6757_v1 = vld [vmem:[%s9334_s1 + $0x390] ss:$8 sps:$4 sm:$0xff]  }
 0x147   : > { %v781_v9 = vpack.c.bf16 %v778_v7, %v777_v5  ;;  %v6760_v5 = vld [vmem:[%s9334_s1 + $0x300] ss:$8 sps:$4 sm:$0xff]   ;;  %v6765_v6 = vld [vmem:[%s9334_s1 + $0x384] ss:$8 sps:$4 sm:$0xff]  }
 0x148   : > { %1031 = vmatmul.mubr.bf16.vlgmr.msra.gmra.mxu0 %v775_v10  ;;  %v1306_v7 = vld [vmem:[#allocation2 + $0x26] sm:$0xff]  ;;  %v1307_v8 = vld [vmem:[#allocation2 + $0x2e] sm:$0xff] }
 0x149   : > { %898 = vmatmul.mubr.bf16.vlgmr.msra.gmra.mxu1 %v781_v9  ;;  %1040 = vmatprep.mubr.bf16.mxu0 %v7466_v2  ;;  %v773_v14 = vld [vmem:[#allocation2 + $0x42] sm:$0xff]  ;;  %v1310_v10 = vpack.c.bf16 %v1307_v8, %v1306_v7 }
 0x14a   : > { %1132 = vmatpush1.bf16.msra.mxu1 %v6694_v4  ;;  %907 = vmatprep.mubr.bf16.mxu1 %v7466_v2  ;;  %v779_v16 = vld [vmem:[#allocation2 + $0x45] sm:$0xff] }
 0x14b   : > { %1133 = vmatprep.subr.bf16.mxu1 %v6699_v11  ;;  %1401 = vmatpush1.bf16.msra.mxu0 %v6721_v37  ;;  %v6762_v4 = vld [vmem:[%s9334_s1 + $0x304] ss:$8 sps:$4 sm:$0xff]   ;;  %v6763_v9 = vld [vmem:[%s9334_s1 + $0x380] ss:$8 sps:$4 sm:$0xff]   ;;  %v6768_v11 = vld [vmem:[%s9334_s1 + $0x474] ss:$8 sps:$4 sm:$0xff]  }
 0x14c   : > { %1402 = vmatprep.subr.bf16.mxu0 %v6729_v44 }
 0x14d   : > { %v774_v17 = vld [vmem:[#allocation2 + $0x4a] sm:$0xff] }
 0x14e   : > { %v780_v18 = vld [vmem:[#allocation2 + $0x4d] sm:$0xff]  ;;  %1134 = vmatpush1.bf16.msra.mxu1 %v6697_v12  ;;  %v776_v20 = vpack.c.bf16 %v774_v17, %v773_v14 }
 0x14f   : > { %1135 = vmatprep.subr.bf16.mxu1 %v6702_v13  ;;  %v782_v19 = vpack.c.bf16 %v780_v18, %v779_v16  ;;  %1403 = vmatpush1.bf16.msra.mxu0 %v6727_v45 }
 0x150   : > { %1041 = vmatmul.mubr.bf16.gmra.mxu0 %v776_v20  ;;  %1404 = vmatprep.subr.bf16.mxu0 %v6735_v49 }
 0x151   : > { %908 = vmatmul.mubr.bf16.gmra.mxu1 %v782_v19  ;;  %1432 = vmatprep.mubr.bf16.mxu0 %v7466_v2 }
 0x152   : > { %1136 = vmatpush1.bf16.msra.mxu1 %v6700_v15  ;;  %1163 = vmatprep.mubr.bf16.mxu1 %v7466_v2 }
 0x153   : > { %1137 = vmatprep.subr.bf16.mxu1 %v6705_v21  ;;  %1405 = vmatpush1.bf16.msra.mxu0 %v6733_v50 }
 0x154   : > { %1406 = vmatprep.subr.bf16.mxu0 %v6741_v53 }
 0x156   : > { %1138 = vmatpush1.bf16.msra.mxu1 %v6703_v22 }
 0x157   : > { %1139 = vmatprep.subr.bf16.mxu1 %v6708_v23  ;;  %1407 = vmatpush1.bf16.msra.mxu0 %v6739_v54 }
 0x158   : > { %1408 = vmatprep.subr.bf16.mxu0 %v6747_v56 }
 0x15a   : > { %1140 = vmatpush1.bf16.msra.mxu1 %v6706_v24  ;;  %v5699_v24 = vld [vmem:[%s9335_s2 + $0x2] sm:$0x3] }
 0x15b   : > { %1141 = vmatprep.subr.bf16.mxu1 %v6711_v26  ;;  %1409 = vmatpush1.bf16.msra.mxu0 %v6745_v57 }
 0x15c   : > { %1410 = vmatprep.subr.bf16.mxu0 %v6753_v60 }
 0x15e   : > { %1142 = vmatpush1.bf16.msra.mxu1 %v6709_v27 }
 0x15f   : > { %1143 = vmatprep.subr.bf16.mxu1 %v6714_v28  ;;  %1411 = vmatpush1.bf16.msra.mxu0 %v6751_v48  ;;  %v1200_v28 = vrot.slane %v5699_v24, %v7779_v51 }
 0x160   : > { %1412 = vmatprep.subr.bf16.mxu0 %v6759_v0 }
 0x162   : > { %1144 = vmatpush1.bf16.msra.mxu1 %v6712_v29 }
 0x163   : > { %1145 = vmatprep.subr.bf16.mxu1 %v6717_v30  ;;  %1413 = vmatpush1.bf16.msra.mxu0 %v6757_v1  ;;  %v7968_v1 = vrot.slane %v5699_v24, %v7785_v25 }
 0x164   : > { %1414 = vmatprep.subr.bf16.mxu0 %v6765_v6 }
 0x166   : > { %1146 = vmatpush1.bf16.msra.mxu1 %v6715_v31 }
 0x167   : > { %1533 = vmatprep.subr.bf16.mxu1 %v6720_v34  ;;  %1415 = vmatpush1.bf16.msra.mxu0 %v6763_v9 }
 0x168   : > { %1666 = vmatprep.subr.bf16.mxu0 %v6768_v11 }
 0x169   : > { %1164 = vmatmul.mubr.bf16.vlgmr.msra.gmra.mxu1 %v783_v32 }
 0x16a   : > { %1173 = vmatprep.mubr.bf16.mxu1 %v7466_v2  ;;  %1534 = vmatpush1.bf16.msra.mxu1 %v6718_v35 }
 0x16b   : > { %1535 = vmatprep.subr.bf16.mxu1 %v6726_v39 }
 0x16e   : > { %1536 = vmatpush1.bf16.msra.mxu1 %v6724_v42 }
 0x16f   : > { %1537 = vmatprep.subr.bf16.mxu1 %v6732_v38 }
 0x171   : > { %1174 = vmatmul.mubr.bf16.gmra.mxu1 %v784_v33 }
 0x172   : > { %1565 = vmatprep.mubr.bf16.mxu1 %v7466_v2  ;;  %1538 = vmatpush1.bf16.msra.mxu1 %v6730_v41 }
 0x173   : > { %1539 = vmatprep.subr.bf16.mxu1 %v6738_v40 }
 0x176   : > { %1540 = vmatpush1.bf16.msra.mxu1 %v6736_v47 }
 0x177   : > { %1541 = vmatprep.subr.bf16.mxu1 %v6744_v43 }
 0x17a   : > { %1542 = vmatpush1.bf16.msra.mxu1 %v6742_v52 }
 0x17b   : > { %1543 = vmatprep.subr.bf16.mxu1 %v6750_v58 }
 0x17e   : > { %1544 = vmatpush1.bf16.msra.mxu1 %v6748_v59 }
 0x17f   : > { %1545 = vmatprep.subr.bf16.mxu1 %v6756_v62 }
 0x182   : > { %1546 = vmatpush1.bf16.msra.mxu1 %v6754_v63 }
 0x183   : > { %1547 = vmatprep.subr.bf16.mxu1 %v6762_v4 }
 0x186   : > { %1548 = vmatpush1.bf16.msra.mxu1 %v6760_v5 }
 0x189   : > { %1566 = vmatmul.mubr.bf16.vlgmr.msra.gmra.mxu1 %v1310_v10 }
 0x18a   : > { %1575 = vmatprep.mubr.bf16.mxu1 %v7466_v2 }
 0x208   : > { %v1032_v16 = vpop.f32.mrf.mxu0 }
 0x209   : > { %v899_v12 = vpop.f32.mrf.mxu1 }
 0x20a   : > { %v1034_v18 = vpop.f32.mrf.mxu0  ;;  %v1033_v62 = vadd.f32 %v1032_v16, %v899_v12 }
 0x20b   : > { %v901_v13 = vpop.f32.mrf.mxu1 }
 0x20c   : > { %v1036_v20 = vpop.f32.mrf.mxu0  ;;  %v1035_v27 = vadd.f32 %v1034_v18, %v901_v13 }
 0x20d   : > { %v903_v14 = vpop.f32.mrf.mxu1 }
 0x20e   : > { %v1038_v22 = vpop.f32.mrf.mxu0  ;;  %v1037_v4 = vadd.f32 %v1036_v20, %v903_v14 }
 0x20f   : > { %v905_v15 = vpop.f32.mrf.mxu1 }
 0x210   : > { %v1042_v29 = vpop.f32.mrf.mxu0  ;;  %v1039_v33 = vadd.f32 %v1038_v22, %v905_v15 }
 0x211   : > { %v909_v17 = vpop.f32.mrf.mxu1 }
 0x212   : > { %v1044_v35 = vpop.f32.mrf.mxu0  ;;  %v1043_v10 = vadd.f32 %v1042_v29, %v909_v17 }
 0x213   : > { %v911_v19 = vpop.f32.mrf.mxu1 }
 0x214   : > { %v1045_v44 = vadd.f32 %v1044_v35, %v911_v19  ;;  %v7963_v54 = vpop.f32.mrf.mxu0 }
 0x215   : > { %v7957_v21 = vpop.f32.mrf.mxu1 }
 0x216   : > { %v1048_v57 = vpop.f32.mrf.mxu0 }
 0x217   : > { %v915_v23 = vpop.f32.mrf.mxu1 }
 0x218   : > { %v1049_v60 = vadd.f32 %v1048_v57, %v915_v23  ;;  %v6789_v57 = vld [vmem:[%s9334_s1 + $0x404] ss:$8 sps:$4 sm:$0xff]  }
 0x229   : > { %v1165_v26 = vpop.f32.mrf.mxu1 }
 0x22a   : > { %v1184_v0 = vadd.f32 %v1165_v26, %v1033_v62 }
 0x22b   : > { %v1167_v30 = vpop.f32.mrf.mxu1 }
 0x22c   : > { %v1185_v31 = vadd.f32 %v1167_v30, %v1035_v27  ;;  %v1203_v7 = vadd.f32 %v7968_v1, %v1184_v0  ;;  %v6766_v30 = vld [vmem:[%s9334_s1 + $0x470] ss:$8 sps:$4 sm:$0xff]  }
 0x22d   : > { %v1169_v32 = vpop.f32.mrf.mxu1 }
 0x22e   : > { %v1204_v34 = vadd.f32 %v1200_v28, %v1185_v31  ;;  %v1186_v9 = vadd.f32 %v1169_v32, %v1037_v4  ;;  %v6771_v32 = vld [vmem:[%s9334_s1 + $0x464] ss:$8 sps:$4 sm:$0xff]  }
 0x22f   : > { %v1171_v36 = vpop.f32.mrf.mxu1 }
 0x230   : > { %v5748_v37 = vmul.f32 -1.442695, %v1204_v34  ;;  %v1187_v39 = vadd.f32 %v1171_v36, %v1039_v33  ;;  %v1205_v16 = vadd.f32 %v7968_v1, %v1186_v9  ;;  %v6774_v36 = vld [vmem:[%s9334_s1 + $0x454] ss:$8 sps:$4 sm:$0xff]   ;;  %v6796_v9 = vld [vmem:[%s9334_s1 + $0x560] ss:$8 sps:$4 sm:$0xff]  }
 0x231   : > { %v1175_v42 = vpop.f32.mrf.mxu1 }
 0x232   : > { %7310 = vpow2.f32 %v5748_v37  ;;  %v1206_v45 = vadd.f32 %v1200_v28, %v1187_v39  ;;  %v1188_v22 = vadd.f32 %v1175_v42, %v1043_v10  ;;  %v6772_v39 = vld [vmem:[%s9334_s1 + $0x450] ss:$8 sps:$4 sm:$0xff]   ;;  %v6799_v10 = vld [vmem:[%s9334_s1 + $0x4e0] ss:$8 sps:$4 sm:$0xff]  }
 0x233   : > { %v1177_v38 = vpop.f32.mrf.mxu1 }
 0x234   : > { %v5749_v41 = vmul.f32 -1.442695, %v1206_v45  ;;  %v1189_v49 = vadd.f32 %v1177_v38, %v1045_v44  ;;  %v1207_v17 = vadd.f32 %v7968_v1, %v1188_v22  ;;  %v6808_v22 = vld [vmem:[%s9334_s1 + $0x540] ss:$8 sps:$4 sm:$0xff]  }
 0x235   : > { %v7965_v52 = vpop.f32.mrf.mxu1 }
 0x236   : > { %7312 = vpow2.f32 %v5749_v41  ;;  %v1208_v50 = vadd.f32 %v1200_v28, %v1189_v49  ;;  %v6777_v41 = vld [vmem:[%s9334_s1 + $0x444] ss:$8 sps:$4 sm:$0xff]   ;;  %v6775_v49 = vld [vmem:[%s9334_s1 + $0x440] ss:$8 sps:$4 sm:$0xff]  }
 0x237   : > { %v1181_v59 = vpop.f32.mrf.mxu1 }
 0x238   : > { %v5750_v40 = vmul.f32 -1.442695, %v1208_v50  ;;  %v1191_v63 = vadd.f32 %v1181_v59, %v1049_v60  ;;  %v6780_v50 = vld [vmem:[%s9334_s1 + $0x434] ss:$8 sps:$4 sm:$0xff]   ;;  %v1047_v59 = vadd.f32 %v7963_v54, %v7957_v21  ;;  %v6787_v60 = vld [vmem:[%s9334_s1 + $0x400] ss:$8 sps:$4 sm:$0xff]  }
 0x23a   : > { %7314 = vpow2.f32 %v5750_v40  ;;  %v1210_v5 = vadd.f32 %v1200_v28, %v1191_v63  ;;  %v1312_v28 = vld [vmem:[#allocation2 + $0x2f] sm:$0xff] }
 0x23b   : > { %v6778_v40 = vld [vmem:[%s9334_s1 + $0x430] ss:$8 sps:$4 sm:$0xff]  }
 0x23c   : > { %v5751_v15 = vmul.f32 -1.442695, %v1210_v5 }
 0x23f   : > { %v7311_v47 = vpop.eup %7310 }
 0x240   : > { %v1223_v53 = vadd.f32 1.0, %v7311_v47  ;;  %v6783_v47 = vld [vmem:[%s9334_s1 + $0x424] ss:$8 sps:$4 sm:$0xff]  }
 0x242   : > { %7316 = vrcp.f32 %v1223_v53  ;;  %v6781_v53 = vld [vmem:[%s9334_s1 + $0x420] ss:$8 sps:$4 sm:$0xff]  }
 0x243   : > { %v7313_v43 = vpop.eup %7312 }
 0x244   : > { %v1224_v56 = vadd.f32 1.0, %v7313_v43  ;;  %v6786_v43 = vld [vmem:[%s9334_s1 + $0x414] ss:$8 sps:$4 sm:$0xff]  }
 0x246   : > { %7318 = vrcp.f32 %v1224_v56  ;;  %v6784_v56 = vld [vmem:[%s9334_s1 + $0x410] ss:$8 sps:$4 sm:$0xff]  }
 0x247   : > { %v7315_v58 = vpop.eup %7314 }
 0x248   : > { %v1225_v48 = vadd.f32 1.0, %v7315_v58 }
 0x24a   : > { %7320 = vrcp.f32 %v1225_v48  ;;  %v1190_v48 = vadd.f32 %v7965_v52, %v1047_v59  ;;  %v6790_v52 = vld [vmem:[%s9334_s1 + $0x570] ss:$8 sps:$4 sm:$0xff]   ;;  %v6855_v59 = vld [vmem:[%s9334_s1 + $0x5a4] ss:$8 sps:$4 sm:$0xff]  }
 0x24b   : > { %7322 = vpow2.f32 %v5751_v15  ;;  %v6802_v15 = vld [vmem:[%s9334_s1 + $0x550] ss:$8 sps:$4 sm:$0xff]  }
 0x24c   : > { %v1209_v63 = vadd.f32 %v7968_v1, %v1190_v48  ;;  %v6793_v1 = vld [vmem:[%s9334_s1 + $0x4f0] ss:$8 sps:$4 sm:$0xff]  }
 0x24d   : > { %v1843_v48 = vld [vmem:[#allocation2 + $0x12] sm:$0xff] }
 0x24f   : > { %v7317_v6 = vpop.eup %7316 }
 0x250   : > { %v1239_v8 = vsub.f32 1.0, %v7317_v6  ;;  %v1235_v11 = vmul.f32 %v7317_v6, %v1203_v7  ;;  %v6795_v6 = vld [vmem:[%s9334_s1 + $0x4f4] ss:$8 sps:$4 sm:$0xff]   ;;  %v6798_v7 = vld [vmem:[%s9334_s1 + $0x564] ss:$8 sps:$4 sm:$0xff]  }
 0x252   : > { %v1243_v13 = vmul.f32 %v1239_v8, %v7789_v46  ;;  %v6801_v8 = vld [vmem:[%s9334_s1 + $0x4e4] ss:$8 sps:$4 sm:$0xff]  }
 0x253   : > { %v7319_v18 = vpop.eup %7318 }
 0x254   : > { %v7972_v12 = vadd.f32 %v1243_v13, %v1235_v11  ;;  %v1240_v19 = vsub.f32 1.0, %v7319_v18  ;;  %v1236_v14 = vmul.f32 %v7319_v18, %v1205_v16  ;;  %v6804_v11 = vld [vmem:[%s9334_s1 + $0x554] ss:$8 sps:$4 sm:$0xff]   ;;  %v6805_v18 = vld [vmem:[%s9334_s1 + $0x4d0] ss:$8 sps:$4 sm:$0xff]  }
 0x255   : > { %v6807_v13 = vld [vmem:[%s9334_s1 + $0x4d4] ss:$8 sps:$4 sm:$0xff]   ;;  %v6810_v16 = vld [vmem:[%s9334_s1 + $0x544] ss:$8 sps:$4 sm:$0xff]  }
 0x256   : > { %1251 = vst [vmem:[#allocation2 + $0x38] sm:$0xff] %v7972_v12  ;;  %v1244_v20 = vmul.f32 %v1240_v19, %v7793_v55  ;;  %v6813_v19 = vld [vmem:[%s9334_s1 + $0x4c4] ss:$8 sps:$4 sm:$0xff]  }
 0x257   : > { %v7321_v23 = vpop.eup %7320 }
 0x258   : > { %v7977_v24 = vadd.f32 %v1244_v20, %v1236_v14  ;;  %v1241_v46 = vsub.f32 1.0, %v7321_v23  ;;  %v1237_v26 = vmul.f32 %v7321_v23, %v1207_v17  ;;  %v7323_v37 = vpop.eup %7322  ;;  %v6811_v14 = vld [vmem:[%s9334_s1 + $0x4c0] ss:$8 sps:$4 sm:$0xff]   ;;  %v6816_v20 = vld [vmem:[%s9334_s1 + $0x534] ss:$8 sps:$4 sm:$0xff]  }
 0x259   : > { %v1226_v45 = vadd.f32 1.0, %v7323_v37  ;;  %v6819_v23 = vld [vmem:[%s9334_s1 + $0x4b4] ss:$8 sps:$4 sm:$0xff]   ;;  %v6814_v17 = vld [vmem:[%s9334_s1 + $0x530] ss:$8 sps:$4 sm:$0xff]  }
 0x25a   : > { %1252 = vst [vmem:[#allocation2 + $0x40] sm:$0xff] %v7977_v24  ;;  %v1245_v27 = vmul.f32 %v1241_v46, %v7796_v61  ;;  %v6769_v61 = vld [vmem:[%s9334_s1 + $0x460] ss:$8 sps:$4 sm:$0xff]   ;;  %v1318_v0 = vpack.c.bf16 %v7977_v24, %v7972_v12  ;;  %v6817_v46 = vld [vmem:[%s9334_s1 + $0x4b0] ss:$8 sps:$4 sm:$0xff]  }
 0x25b   : > { %7324 = vrcp.f32 %v1226_v45  ;;  %v1847_v37 = vld [vmem:[#allocation2 + $0x1d] sm:$0xff]  ;;  %v1842_v45 = vld [vmem:[#allocation2 + $0xa] sm:$0xff] }
 0x25c   : > { %v7982_v29 = vadd.f32 %v1245_v27, %v1237_v26  ;;  %v6822_v26 = vld [vmem:[%s9334_s1 + $0x524] ss:$8 sps:$4 sm:$0xff]  }
 0x25d   : > { %v1313_v55 = vld [vmem:[#allocation2 + $0x37] sm:$0xff]  ;;  %v6825_v27 = vld [vmem:[%s9334_s1 + $0x4a4] ss:$8 sps:$4 sm:$0xff]  }
 0x25e   : > { %1253 = vst [vmem:[#allocation2 + $0x48] sm:$0xff] %v7982_v29  ;;  %v1316_v31 = vpack.c.bf16 %v1313_v55, %v1312_v28  ;;  %v1308_v33 = vld [vmem:[#allocation2 + $0x36] sm:$0xff]  ;;  %v6820_v28 = vld [vmem:[%s9334_s1 + $0x520] ss:$8 sps:$4 sm:$0xff]  }
 0x25f   : > { %v6828_v55 = vld [vmem:[%s9334_s1 + $0x514] ss:$8 sps:$4 sm:$0xff]  }
 0x260   : > { %1433 = vmatmul.mubr.bf16.vlgmr.msra.gmra.mxu0 %v1316_v31  ;;  %v6831_v31 = vld [vmem:[%s9334_s1 + $0x494] ss:$8 sps:$4 sm:$0xff]  }
 0x261   : > { %1667 = vmatpush1.bf16.msra.mxu0 %v6766_v30  ;;  %v1309_v34 = vld [vmem:[#allocation2 + $0x3e] sm:$0xff]  ;;  %1442 = vmatprep.mubr.bf16.mxu0 %v7466_v2 }
 0x262   : > { %1668 = vmatprep.subr.bf16.mxu0 %v6771_v32  ;;  %v1311_v35 = vpack.c.bf16 %v1309_v34, %v1308_v33  ;;  %v1314_v42 = vld [vmem:[#allocation2 + $0x3f] sm:$0xff]  ;;  %v6826_v32 = vld [vmem:[%s9334_s1 + $0x510] ss:$8 sps:$4 sm:$0xff]  }
 0x263   : > { %v6823_v30 = vld [vmem:[%s9334_s1 + $0x4a0] ss:$8 sps:$4 sm:$0xff]   ;;  %v6834_v33 = vld [vmem:[%s9334_s1 + $0x504] ss:$8 sps:$4 sm:$0xff]  }
 0x264   : > { %1576 = vmatmul.mubr.bf16.gmra.mxu1 %v1311_v35  ;;  %v6837_v34 = vld [vmem:[%s9334_s1 + $0x484] ss:$8 sps:$4 sm:$0xff]   ;;  %v6832_v35 = vld [vmem:[%s9334_s1 + $0x500] ss:$8 sps:$4 sm:$0xff]  }
 0x265   : > { %1669 = vmatpush1.bf16.msra.mxu0 %v6769_v61  ;;  %v1315_v44 = vld [vmem:[#allocation2 + $0x47] sm:$0xff]  ;;  %1967 = vmatprep.mubr.bf16.mxu1 %v7466_v2  ;;  %v6829_v61 = vld [vmem:[%s9334_s1 + $0x490] ss:$8 sps:$4 sm:$0xff]  }
 0x266   : > { %1670 = vmatprep.subr.bf16.mxu0 %v6774_v36  ;;  %v1317_v38 = vpack.c.bf16 %v1315_v44, %v1314_v42  ;;  %v6835_v36 = vld [vmem:[%s9334_s1 + $0x480] ss:$8 sps:$4 sm:$0xff]  }
 0x267   : > { %v1841_v42 = vld [vmem:[#allocation2 + $0x2] sm:$0xff] }
 0x268   : > { %1443 = vmatmul.mubr.bf16.gmra.mxu0 %v1317_v38  ;;  %v7325_v58 = vpop.eup %7324  ;;  %v1845_v38 = vpack.c.bf16 %v1842_v45, %v1841_v42 }
 0x269   : > { %1671 = vmatpush1.bf16.msra.mxu0 %v6772_v39  ;;  %1698 = vmatprep.mubr.bf16.mxu0 %v7466_v2  ;;  %v1242_v62 = vsub.f32 1.0, %v7325_v58  ;;  %v1238_v5 = vmul.f32 %v7325_v58, %v1209_v63  ;;  %v1848_v39 = vld [vmem:[#allocation2 + $0x25] sm:$0xff]  ;;  %v6852_v58 = vld [vmem:[%s9334_s1 + $0x5b4] ss:$8 sps:$4 sm:$0xff]  }
 0x26a   : > { %1672 = vmatprep.subr.bf16.mxu0 %v6777_v41  ;;  %v1851_v44 = vpack.c.bf16 %v1848_v39, %v1847_v37  ;;  %v6840_v41 = vld [vmem:[%s9334_s1 + $0x5f4] ss:$8 sps:$4 sm:$0xff]  }
 0x26b   : > { %v1246_v4 = vmul.f32 %v1242_v62, %v7799_v3  ;;  %v6792_v3 = vld [vmem:[%s9334_s1 + $0x574] ss:$8 sps:$4 sm:$0xff]  }
 0x26c   : > { %1935 = vmatprep.subr.bf16.mxu1 %v6792_v3  ;;  %v1844_v62 = vld [vmem:[#allocation2 + $0x1a] sm:$0xff] }
 0x26d   : > { %1673 = vmatpush1.bf16.msra.mxu0 %v6775_v49  ;;  %v8041_v21 = vadd.f32 %v1246_v4, %v1238_v5  ;;  %1936 = vmatpush1.bf16.msra.mxu1 %v6790_v52  ;;  %v6838_v49 = vld [vmem:[%s9334_s1 + $0x5f0] ss:$8 sps:$4 sm:$0xff]   ;;  %v1846_v63 = vpack.c.bf16 %v1844_v62, %v1843_v48  ;;  %v6861_v5 = vld [vmem:[%s9334_s1 + $0x584] ss:$8 sps:$4 sm:$0xff]  }
 0x26e   : > { %1674 = vmatprep.subr.bf16.mxu0 %v6780_v50  ;;  %1937 = vmatprep.subr.bf16.mxu1 %v6798_v7  ;;  %v6843_v50 = vld [vmem:[%s9334_s1 + $0x5e4] ss:$8 sps:$4 sm:$0xff]   ;;  %v6856_v4 = vld [vmem:[%s9334_s1 + $0x590] ss:$8 sps:$4 sm:$0xff]   ;;  %v1567_v7 = vpop.f32.mrf.mxu1 }
 0x26f   : > { %v1319_v54 = vpack.c.bf16 %v8041_v21, %v7982_v29 }
 0x271   : > { %1675 = vmatpush1.bf16.msra.mxu0 %v6778_v40  ;;  %1938 = vmatpush1.bf16.msra.mxu1 %v6796_v9  ;;  %v6841_v40 = vld [vmem:[%s9334_s1 + $0x5e0] ss:$8 sps:$4 sm:$0xff]   ;;  %v1569_v9 = vpop.f32.mrf.mxu1 }
 0x272   : > { %1676 = vmatprep.subr.bf16.mxu0 %v6783_v47  ;;  %1939 = vmatprep.subr.bf16.mxu1 %v6804_v11  ;;  %v6846_v47 = vld [vmem:[%s9334_s1 + $0x5d4] ss:$8 sps:$4 sm:$0xff]  }
 0x273   : > { %v1571_v11 = vpop.f32.mrf.mxu1 }
 0x275   : > { %1677 = vmatpush1.bf16.msra.mxu0 %v6781_v53  ;;  %1940 = vmatpush1.bf16.msra.mxu1 %v6802_v15  ;;  %v6844_v53 = vld [vmem:[%s9334_s1 + $0x5d0] ss:$8 sps:$4 sm:$0xff]   ;;  %v1573_v15 = vpop.f32.mrf.mxu1 }
 0x276   : > { %1678 = vmatprep.subr.bf16.mxu0 %v6786_v43  ;;  %1941 = vmatprep.subr.bf16.mxu1 %v6810_v16  ;;  %v6849_v43 = vld [vmem:[%s9334_s1 + $0x5c4] ss:$8 sps:$4 sm:$0xff]  }
 0x279   : > { %1679 = vmatpush1.bf16.msra.mxu0 %v6784_v56  ;;  %1942 = vmatpush1.bf16.msra.mxu1 %v6808_v22  ;;  %v6847_v56 = vld [vmem:[%s9334_s1 + $0x5c0] ss:$8 sps:$4 sm:$0xff]  }
 0x27a   : > { %1680 = vmatprep.subr.bf16.mxu0 %v6789_v57  ;;  %1943 = vmatprep.subr.bf16.mxu1 %v6816_v20  ;;  %v6850_v57 = vld [vmem:[%s9334_s1 + $0x5b0] ss:$8 sps:$4 sm:$0xff]  }
 0x27d   : > { %1681 = vmatpush1.bf16.msra.mxu0 %v6787_v60  ;;  %1944 = vmatpush1.bf16.msra.mxu1 %v6814_v17  ;;  %v6853_v60 = vld [vmem:[%s9334_s1 + $0x5a0] ss:$8 sps:$4 sm:$0xff]  }
 0x27e   : > { %2068 = vmatprep.subr.bf16.mxu0 %v6795_v6  ;;  %1945 = vmatprep.subr.bf16.mxu1 %v6822_v26 }
 0x280   : > { %1699 = vmatmul.mubr.bf16.vlgmr.msra.gmra.mxu0 %v1318_v0  ;;  %v6858_v0 = vld [vmem:[%s9334_s1 + $0x594] ss:$8 sps:$4 sm:$0xff]  }
 0x281   : > { %1708 = vmatprep.mubr.bf16.mxu0 %v7466_v2  ;;  %2069 = vmatpush1.bf16.msra.mxu0 %v6793_v1 }
 0x282   : > { %2070 = vmatprep.subr.bf16.mxu0 %v6801_v8  ;;  %1946 = vmatpush1.bf16.msra.mxu1 %v6820_v28 }
 0x283   : > { %1947 = vmatprep.subr.bf16.mxu1 %v6828_v55 }
 0x285   : > { %2071 = vmatpush1.bf16.msra.mxu0 %v6799_v10 }
 0x286   : > { %2072 = vmatprep.subr.bf16.mxu0 %v6807_v13  ;;  %1948 = vmatpush1.bf16.msra.mxu1 %v6826_v32 }
 0x287   : > { %1949 = vmatprep.subr.bf16.mxu1 %v6834_v33 }
 0x288   : > { %1709 = vmatmul.mubr.bf16.gmra.mxu0 %v1319_v54  ;;  %v6859_v54 = vld [vmem:[%s9334_s1 + $0x580] ss:$8 sps:$4 sm:$0xff]  }
 0x289   : > { %2100 = vmatprep.mubr.bf16.mxu0 %v7466_v2  ;;  %2073 = vmatpush1.bf16.msra.mxu0 %v6805_v18 }
 0x28a   : > { %2074 = vmatprep.subr.bf16.mxu0 %v6813_v19  ;;  %1950 = vmatpush1.bf16.msra.mxu1 %v6832_v35  ;;  %v5800_v19 = vld [vmem:[%s9335_s2 + $0x4] sm:$0x3] }
 0x28b   : > { %2201 = vmatprep.subr.bf16.mxu1 %v6840_v41  ;;  %v1735_v20 = vrot.slane %v5800_v19, %v7779_v51 }
 0x28d   : > { %2075 = vmatpush1.bf16.msra.mxu0 %v6811_v14  ;;  %1968 = vmatmul.mubr.bf16.vlgmr.msra.gmra.mxu1 %v1851_v44 }
 0x28e   : > { %2076 = vmatprep.subr.bf16.mxu0 %v6819_v23  ;;  %1977 = vmatprep.mubr.bf16.mxu1 %v7466_v2 }
 0x28f   : > { %2202 = vmatpush1.bf16.msra.mxu1 %v6838_v49 }
 0x290   : > { %2203 = vmatprep.subr.bf16.mxu1 %v6843_v50 }
 0x291   : > { %2077 = vmatpush1.bf16.msra.mxu0 %v6817_v46 }
 0x292   : > { %2078 = vmatprep.subr.bf16.mxu0 %v6825_v27 }
 0x293   : > { %2204 = vmatpush1.bf16.msra.mxu1 %v6841_v40 }
 0x294   : > { %2205 = vmatprep.subr.bf16.mxu1 %v6846_v47 }
 0x295   : > { %2079 = vmatpush1.bf16.msra.mxu0 %v6823_v30 }
 0x296   : > { %2080 = vmatprep.subr.bf16.mxu0 %v6831_v31 }
 0x297   : > { %2206 = vmatpush1.bf16.msra.mxu1 %v6844_v53 }
 0x298   : > { %2207 = vmatprep.subr.bf16.mxu1 %v6849_v43 }
 0x299   : > { %2081 = vmatpush1.bf16.msra.mxu0 %v6829_v61 }
 0x29a   : > { %2082 = vmatprep.subr.bf16.mxu0 %v6837_v34 }
 0x29b   : > { %2208 = vmatpush1.bf16.msra.mxu1 %v6847_v56 }
 0x29c   : > { %2209 = vmatprep.subr.bf16.mxu1 %v6852_v58 }
 0x29d   : > { %2083 = vmatpush1.bf16.msra.mxu0 %v6835_v36 }
 0x29f   : > { %2210 = vmatpush1.bf16.msra.mxu1 %v6850_v57 }
 0x2a0   : > { %2101 = vmatmul.mubr.bf16.vlgmr.msra.gmra.mxu0 %v1845_v38  ;;  %2211 = vmatprep.subr.bf16.mxu1 %v6855_v59 }
 0x2a1   : > { %2110 = vmatprep.mubr.bf16.mxu0 %v7466_v2 }
 0x2a3   : > { %2212 = vmatpush1.bf16.msra.mxu1 %v6853_v60  ;;  %v1731_v60 = vrot.slane %v5800_v19, %v7785_v25 }
 0x2a4   : > { %2213 = vmatprep.subr.bf16.mxu1 %v6858_v0 }
 0x2a7   : > { %2214 = vmatpush1.bf16.msra.mxu1 %v6856_v4 }
 0x2a8   : > { %2111 = vmatmul.mubr.bf16.gmra.mxu0 %v1846_v63  ;;  %2215 = vmatprep.subr.bf16.mxu1 %v6861_v5 }
 0x2a9   : > { %2502 = vmatprep.mubr.bf16.mxu0 %v7466_v2 }
 0x2ab   : > { %2216 = vmatpush1.bf16.msra.mxu1 %v6859_v54 }
 0x320   : > { %v1434_v52 = vpop.f32.mrf.mxu0 }
 0x321   : > { %v1568_v57 = vadd.f32 %v1567_v7, %v1434_v52 }
 0x322   : > { %v1436_v3 = vpop.f32.mrf.mxu0 }
 0x323   : > { %v1570_v14 = vadd.f32 %v1569_v9, %v1436_v3 }
 0x324   : > { %v8193_v1 = vpop.f32.mrf.mxu0  ;;  %v8199_v16 = vpop.f32.mrf.mxu1 }
 0x325   : > { %v1572_v7 = vadd.f32 %v1571_v11, %v8193_v1 }
 0x326   : > { %v1440_v6 = vpop.f32.mrf.mxu0  ;;  %v1579_v46 = vpop.f32.mrf.mxu1 }
 0x327   : > { %v1574_v27 = vadd.f32 %v1573_v15, %v1440_v6  ;;  %v1849_v15 = vld [vmem:[#allocation2 + $0x2d] sm:$0xff] }
 0x328   : > { %v8195_v8 = vpop.f32.mrf.mxu0  ;;  %v1581_v32 = vpop.f32.mrf.mxu1 }
 0x32a   : > { %v1446_v10 = vpop.f32.mrf.mxu0  ;;  %v1583_v39 = vpop.f32.mrf.mxu1 }
 0x32b   : > { %v1580_v33 = vadd.f32 %v1579_v46, %v1446_v10  ;;  %v1578_v46 = vadd.f32 %v8199_v16, %v8195_v8 }
 0x32c   : > { %v8197_v13 = vpop.f32.mrf.mxu0 }
 0x32e   : > { %v1450_v18 = vpop.f32.mrf.mxu0 }
 0x32f   : > { %v1584_v44 = vadd.f32 %v1583_v39, %v1450_v18  ;;  %v6873_v39 = vld [vmem:[%s9334_s1 + $0x664] ss:$8 sps:$4 sm:$0xff]  }
 0x340   : > { %v1700_v22 = vpop.f32.mrf.mxu0 }
 0x341   : > { %v1719_v59 = vadd.f32 %v1700_v22, %v1568_v57  ;;  %v6889_v57 = vld [vmem:[%s9334_s1 + $0x630] ss:$8 sps:$4 sm:$0xff]  }
 0x342   : > { %v1702_v23 = vpop.f32.mrf.mxu0 }
 0x343   : > { %v1720_v17 = vadd.f32 %v1702_v23, %v1570_v14  ;;  %v1738_v0 = vadd.f32 %v1731_v60, %v1719_v59  ;;  %v6892_v59 = vld [vmem:[%s9334_s1 + $0x6a0] ss:$8 sps:$4 sm:$0xff]  }
 0x344   : > { %v1704_v26 = vpop.f32.mrf.mxu0 }
 0x345   : > { %v1739_v28 = vadd.f32 %v1735_v20, %v1720_v17  ;;  %v1721_v9 = vadd.f32 %v1704_v26, %v1572_v7  ;;  %v6912_v7 = vld [vmem:[%s9334_s1 + $0x774] ss:$8 sps:$4 sm:$0xff]  }
 0x346   : > { %v1706_v30 = vpop.f32.mrf.mxu0 }
 0x347   : > { %v5849_v55 = vmul.f32 -1.442695, %v1739_v28  ;;  %v1722_v31 = vadd.f32 %v1706_v30, %v1574_v27  ;;  %v1740_v19 = vadd.f32 %v1731_v60, %v1721_v9 }
 0x348   : > { %v1710_v61 = vpop.f32.mrf.mxu0 }
 0x349   : > { %7326 = vpow2.f32 %v5849_v55  ;;  %v1741_v34 = vadd.f32 %v1735_v20, %v1722_v31  ;;  %v1723_v27 = vadd.f32 %v1710_v61, %v1578_v46 }
 0x34a   : > { %v1712_v35 = vpop.f32.mrf.mxu0 }
 0x34b   : > { %v5850_v36 = vmul.f32 -1.442695, %v1741_v34  ;;  %v1724_v37 = vadd.f32 %v1712_v35, %v1580_v33  ;;  %v1742_v55 = vadd.f32 %v1731_v60, %v1723_v27  ;;  %v6867_v34 = vld [vmem:[%s9334_s1 + $0x674] ss:$8 sps:$4 sm:$0xff]   ;;  %v6865_v35 = vld [vmem:[%s9334_s1 + $0x670] ss:$8 sps:$4 sm:$0xff]  }
 0x34c   : > { %v1714_v42 = vpop.f32.mrf.mxu0  ;;  %2603 = vmatprep.subr.bf16.mxu1 %v6867_v34 }
 0x34d   : > { %7328 = vpow2.f32 %v5850_v36  ;;  %v1743_v38 = vadd.f32 %v1735_v20, %v1724_v37  ;;  %v6870_v36 = vld [vmem:[%s9334_s1 + $0x6e4] ss:$8 sps:$4 sm:$0xff]   ;;  %v6868_v37 = vld [vmem:[%s9334_s1 + $0x6e0] ss:$8 sps:$4 sm:$0xff]   ;;  %v1969_v9 = vpop.f32.mrf.mxu1 }
 0x34e   : > { %v1716_v45 = vpop.f32.mrf.mxu0 }
 0x34f   : > { %v1726_v41 = vadd.f32 %v1716_v45, %v1584_v44  ;;  %v5851_v50 = vmul.f32 -1.442695, %v1743_v38  ;;  %v6876_v44 = vld [vmem:[%s9334_s1 + $0x6d4] ss:$8 sps:$4 sm:$0xff]   ;;  %v6874_v45 = vld [vmem:[%s9334_s1 + $0x6d0] ss:$8 sps:$4 sm:$0xff]  }
 0x350   : > { %v6879_v38 = vld [vmem:[%s9334_s1 + $0x654] ss:$8 sps:$4 sm:$0xff]  }
 0x351   : > { %v1745_v49 = vadd.f32 %v1735_v20, %v1726_v41  ;;  %v6877_v41 = vld [vmem:[%s9334_s1 + $0x650] ss:$8 sps:$4 sm:$0xff]  }
 0x353   : > { %v5852_v40 = vmul.f32 -1.442695, %v1745_v49  ;;  %v6882_v49 = vld [vmem:[%s9334_s1 + $0x6c4] ss:$8 sps:$4 sm:$0xff]  }
 0x355   : > { %7330 = vpow2.f32 %v5852_v40  ;;  %v6885_v40 = vld [vmem:[%s9334_s1 + $0x644] ss:$8 sps:$4 sm:$0xff]  }
 0x356   : > { %v7327_v47 = vpop.eup %7326  ;;  %7332 = vpow2.f32 %v5851_v50  ;;  %v6880_v50 = vld [vmem:[%s9334_s1 + $0x6c0] ss:$8 sps:$4 sm:$0xff]  }
 0x357   : > { %v1758_v53 = vadd.f32 1.0, %v7327_v47  ;;  %v6883_v47 = vld [vmem:[%s9334_s1 + $0x640] ss:$8 sps:$4 sm:$0xff]  }
 0x359   : > { %7334 = vrcp.f32 %v1758_v53  ;;  %v6888_v53 = vld [vmem:[%s9334_s1 + $0x6b4] ss:$8 sps:$4 sm:$0xff]  }
 0x35a   : > { %v7329_v43 = vpop.eup %7328 }
 0x35b   : > { %v1759_v56 = vadd.f32 1.0, %v7329_v43  ;;  %v6886_v43 = vld [vmem:[%s9334_s1 + $0x6b0] ss:$8 sps:$4 sm:$0xff]  }
 0x35d   : > { %7336 = vrcp.f32 %v1759_v56  ;;  %v6891_v56 = vld [vmem:[%s9334_s1 + $0x634] ss:$8 sps:$4 sm:$0xff]  }
 0x362   : > { %v7331_v58 = vpop.eup %7330 }
 0x363   : > { %v7333_v48 = vpop.eup %7332  ;;  %v1761_v62 = vadd.f32 1.0, %v7331_v58  ;;  %v6894_v58 = vld [vmem:[%s9334_s1 + $0x6a4] ss:$8 sps:$4 sm:$0xff]  }
 0x364   : > { %v1760_v5 = vadd.f32 1.0, %v7333_v48  ;;  %v6895_v48 = vld [vmem:[%s9334_s1 + $0x620] ss:$8 sps:$4 sm:$0xff]  }
 0x365   : > { %7338 = vrcp.f32 %v1761_v62  ;;  %v6900_v62 = vld [vmem:[%s9334_s1 + $0x694] ss:$8 sps:$4 sm:$0xff]  }
 0x366   : > { %v7335_v63 = vpop.eup %7334  ;;  %7340 = vrcp.f32 %v1760_v5  ;;  %v6906_v5 = vld [vmem:[%s9334_s1 + $0x684] ss:$8 sps:$4 sm:$0xff]  }
 0x367   : > { %v1774_v4 = vsub.f32 1.0, %v7335_v63  ;;  %v1770_v54 = vmul.f32 %v7335_v63, %v1738_v0  ;;  %v6898_v63 = vld [vmem:[%s9334_s1 + $0x690] ss:$8 sps:$4 sm:$0xff]   ;;  %v6903_v0 = vld [vmem:[%s9334_s1 + $0x614] ss:$8 sps:$4 sm:$0xff]  }
 0x369   : > { %v1778_v3 = vmul.f32 %v1774_v4, %v7972_v12  ;;  %v1582_v12 = vadd.f32 %v1581_v32, %v8197_v13  ;;  %v6901_v4 = vld [vmem:[%s9334_s1 + $0x610] ss:$8 sps:$4 sm:$0xff]  }
 0x36a   : > { %v7337_v52 = vpop.eup %7336 }
 0x36b   : > { %v8207_v6 = vadd.f32 %v1778_v3, %v1770_v54  ;;  %v1775_v10 = vsub.f32 1.0, %v7337_v52  ;;  %v1771_v23 = vmul.f32 %v7337_v52, %v1740_v19  ;;  %v1725_v1 = vadd.f32 %v1714_v42, %v1582_v12  ;;  %v6871_v42 = vld [vmem:[%s9334_s1 + $0x660] ss:$8 sps:$4 sm:$0xff]   ;;  %v6909_v3 = vld [vmem:[%s9334_s1 + $0x604] ss:$8 sps:$4 sm:$0xff]  }
 0x36c   : > { %v6904_v54 = vld [vmem:[%s9334_s1 + $0x680] ss:$8 sps:$4 sm:$0xff]  }
 0x36d   : > { %1786 = vst [vmem:[#allocation2 + $0x38] sm:$0xff] %v8207_v6  ;;  %v1779_v14 = vmul.f32 %v1775_v10, %v7977_v24  ;;  %v1744_v30 = vadd.f32 %v1731_v60, %v1725_v1  ;;  %v6897_v60 = vld [vmem:[%s9334_s1 + $0x624] ss:$8 sps:$4 sm:$0xff]   ;;  %v6907_v52 = vld [vmem:[%s9334_s1 + $0x600] ss:$8 sps:$4 sm:$0xff]   ;;  %v1971_v10 = vpop.f32.mrf.mxu1 }
 0x36f   : > { %v8216_v11 = vadd.f32 %v1779_v14, %v1771_v23 }
 0x371   : > { %v1853_v24 = vpack.c.bf16 %v8216_v11, %v8207_v6 }
 0x372   : > { %v7339_v20 = vpop.eup %7338 }
 0x373   : > { %v7341_v17 = vpop.eup %7340  ;;  %v1777_v26 = vsub.f32 1.0, %v7339_v20  ;;  %v1773_v31 = vmul.f32 %v7339_v20, %v1744_v30 }
 0x374   : > { %v1850_v18 = vld [vmem:[#allocation2 + $0x35] sm:$0xff]  ;;  %v1776_v28 = vsub.f32 1.0, %v7341_v17  ;;  %v1772_v8 = vmul.f32 %v7341_v17, %v1742_v55 }
 0x375   : > { %v1852_v22 = vpack.c.bf16 %v1850_v18, %v1849_v15  ;;  %v1781_v13 = vmul.f32 %v1777_v26, %v8041_v21  ;;  %v6864_v21 = vld [vmem:[%s9334_s1 + $0x6f4] ss:$8 sps:$4 sm:$0xff]   ;;  %v2102_v15 = vpop.f32.mrf.mxu0  ;;  %v1973_v18 = vpop.f32.mrf.mxu1  ;;  %v5901_v26 = vld [vmem:[%s9335_s2 + $0x6] sm:$0x3] }
 0x376   : > { %v1780_v32 = vmul.f32 %v1776_v28, %v7982_v29  ;;  %v6862_v29 = vld [vmem:[%s9334_s1 + $0x6f0] ss:$8 sps:$4 sm:$0xff]   ;;  %2470 = vmatprep.subr.bf16.mxu0 %v6864_v21  ;;  %v2270_v30 = vrot.slane %v5901_v26, %v7779_v51 }
 0x377   : > { %1978 = vmatmul.mubr.bf16.gmra.mxu1 %v1852_v22  ;;  %v8223_v16 = vadd.f32 %v1781_v13, %v1773_v31  ;;  %2471 = vmatpush1.bf16.msra.mxu0 %v6862_v29  ;;  %v2104_v19 = vpop.f32.mrf.mxu0  ;;  %v1975_v22 = vpop.f32.mrf.mxu1 }
 0x378   : > { %2233 = vmatprep.mubr.bf16.mxu1 %v7466_v2  ;;  %v8225_v33 = vadd.f32 %v1780_v32, %v1772_v8  ;;  %2472 = vmatprep.subr.bf16.mxu0 %v6870_v36  ;;  %v2105_v28 = vadd.f32 %v2104_v19, %v1971_v10 }
 0x379   : > { %v2106_v14 = vpop.f32.mrf.mxu0 }
 0x37a   : > { %v1854_v61 = vpack.c.bf16 %v8223_v16, %v8225_v33 }
 0x37b   : > { %2473 = vmatpush1.bf16.msra.mxu0 %v6868_v37  ;;  %v2108_v23 = vpop.f32.mrf.mxu0 }
 0x37c   : > { %2474 = vmatprep.subr.bf16.mxu0 %v6876_v44  ;;  %v2109_v32 = vadd.f32 %v2108_v23, %v1975_v22 }
 0x37d   : > { %v2112_v46 = vpop.f32.mrf.mxu0 }
 0x37f   : > { %2234 = vmatmul.mubr.bf16.vlgmr.msra.gmra.mxu1 %v1853_v24  ;;  %2475 = vmatpush1.bf16.msra.mxu0 %v6874_v45  ;;  %v2114_v24 = vpop.f32.mrf.mxu0 }
 0x380   : > { %2243 = vmatprep.mubr.bf16.mxu1 %v7466_v2  ;;  %2604 = vmatpush1.bf16.msra.mxu1 %v6865_v35 }
 0x381   : > { %2605 = vmatprep.subr.bf16.mxu1 %v6873_v39  ;;  %2476 = vmatprep.subr.bf16.mxu0 %v6882_v49 }
 0x383   : > { %2477 = vmatpush1.bf16.msra.mxu0 %v6880_v50 }
 0x384   : > { %2606 = vmatpush1.bf16.msra.mxu1 %v6871_v42  ;;  %2478 = vmatprep.subr.bf16.mxu0 %v6888_v53 }
 0x385   : > { %2607 = vmatprep.subr.bf16.mxu1 %v6879_v38 }
 0x387   : > { %2244 = vmatmul.mubr.bf16.gmra.mxu1 %v1854_v61  ;;  %2479 = vmatpush1.bf16.msra.mxu0 %v6886_v43  ;;  %v2116_v61 = vpop.f32.mrf.mxu0 }
 0x388   : > { %2635 = vmatprep.mubr.bf16.mxu1 %v7466_v2  ;;  %2608 = vmatpush1.bf16.msra.mxu1 %v6877_v41 }
 0x389   : > { %2609 = vmatprep.subr.bf16.mxu1 %v6885_v40  ;;  %2480 = vmatprep.subr.bf16.mxu0 %v6894_v58  ;;  %v2118_v39 = vpop.f32.mrf.mxu0 }
 0x38b   : > { %2481 = vmatpush1.bf16.msra.mxu0 %v6892_v59 }
 0x38c   : > { %2610 = vmatpush1.bf16.msra.mxu1 %v6883_v47  ;;  %2482 = vmatprep.subr.bf16.mxu0 %v6900_v62  ;;  %v2103_v62 = vadd.f32 %v2102_v15, %v1969_v9 }
 0x38d   : > { %2611 = vmatprep.subr.bf16.mxu1 %v6891_v56 }
 0x38f   : > { %2483 = vmatpush1.bf16.msra.mxu0 %v6898_v63 }
 0x390   : > { %2612 = vmatpush1.bf16.msra.mxu1 %v6889_v57  ;;  %2484 = vmatprep.subr.bf16.mxu0 %v6906_v5 }
 0x391   : > { %2613 = vmatprep.subr.bf16.mxu1 %v6897_v60 }
 0x393   : > { %2485 = vmatpush1.bf16.msra.mxu0 %v6904_v54  ;;  %v2107_v54 = vadd.f32 %v2106_v14, %v1973_v18 }
 0x394   : > { %2614 = vmatpush1.bf16.msra.mxu1 %v6895_v48  ;;  %2736 = vmatprep.subr.bf16.mxu0 %v6912_v7 }
 0x395   : > { %2615 = vmatprep.subr.bf16.mxu1 %v6903_v0 }
 0x398   : > { %2616 = vmatpush1.bf16.msra.mxu1 %v6901_v4  ;;  %v2266_v4 = vrot.slane %v5901_v26, %v7785_v25 }
 0x399   : > { %2617 = vmatprep.subr.bf16.mxu1 %v6909_v3 }
 0x39c   : > { %2618 = vmatpush1.bf16.msra.mxu1 %v6907_v52 }
 0x437   : > { %v1979_v20 = vpop.f32.mrf.mxu1 }
 0x438   : > { %v2113_v19 = vadd.f32 %v2112_v46, %v1979_v20 }
 0x439   : > { %v1981_v12 = vpop.f32.mrf.mxu1 }
 0x43a   : > { %v2115_v36 = vadd.f32 %v2114_v24, %v1981_v12 }
 0x43b   : > { %v8329_v17 = vpop.f32.mrf.mxu1 }
 0x43d   : > { %v1985_v1 = vpop.f32.mrf.mxu1 }
 0x43e   : > { %v2119_v41 = vadd.f32 %v2118_v39, %v1985_v1  ;;  %v6915_v39 = vld [vmem:[%s9334_s1 + $0x764] ss:$8 sps:$4 sm:$0xff]  }
 0x43f   : > { %v2235_v27 = vpop.f32.mrf.mxu1 }
 0x440   : > { %v2254_v0 = vadd.f32 %v2235_v27, %v2103_v62  ;;  %v2117_v27 = vadd.f32 %v2116_v61, %v8329_v17  ;;  %v6931_v62 = vld [vmem:[%s9334_s1 + $0x700] ss:$8 sps:$4 sm:$0xff]  }
 0x441   : > { %v2237_v13 = vpop.f32.mrf.mxu1 }
 0x442   : > { %v2255_v55 = vadd.f32 %v2237_v13, %v2105_v28  ;;  %v2273_v52 = vadd.f32 %v2266_v4, %v2254_v0 }
 0x443   : > { %v2239_v31 = vpop.f32.mrf.mxu1 }
 0x444   : > { %v2274_v8 = vadd.f32 %v2270_v30, %v2255_v55  ;;  %v2256_v10 = vadd.f32 %v2239_v31, %v2107_v54  ;;  %v6939_v54 = vld [vmem:[%s9334_s1 + $0x7f4] ss:$8 sps:$4 sm:$0xff]  }
 0x445   : > { %v2241_v21 = vpop.f32.mrf.mxu1 }
 0x446   : > { %v5950_v29 = vmul.f32 -1.442695, %v2274_v8  ;;  %v2257_v34 = vadd.f32 %v2241_v21, %v2109_v32  ;;  %v2275_v9 = vadd.f32 %v2266_v4, %v2256_v10  ;;  %v6910_v21 = vld [vmem:[%s9334_s1 + $0x770] ss:$8 sps:$4 sm:$0xff]   ;;  %v6945_v10 = vld [vmem:[%s9334_s1 + $0x7e4] ss:$8 sps:$4 sm:$0xff]  }
 0x447   : > { %v2245_v35 = vpop.f32.mrf.mxu1 }
 0x448   : > { %7342 = vpow2.f32 %v5950_v29  ;;  %v2276_v37 = vadd.f32 %v2270_v30, %v2257_v34  ;;  %v2258_v28 = vadd.f32 %v2245_v35, %v2113_v19  ;;  %v6943_v19 = vld [vmem:[%s9334_s1 + $0x7e0] ss:$8 sps:$4 sm:$0xff]  }
 0x449   : > { %v2247_v42 = vpop.f32.mrf.mxu1 }
 0x44a   : > { %v5951_v44 = vmul.f32 -1.442695, %v2276_v37  ;;  %v2259_v45 = vadd.f32 %v2247_v42, %v2115_v36  ;;  %v2277_v20 = vadd.f32 %v2266_v4, %v2258_v28  ;;  %v6918_v42 = vld [vmem:[%s9334_s1 + $0x754] ss:$8 sps:$4 sm:$0xff]   ;;  %v6952_v28 = vld [vmem:[%s9334_s1 + $0x840] ss:$8 sps:$4 sm:$0xff]  }
 0x44b   : > { %v2249_v38 = vpop.f32.mrf.mxu1 }
 0x44c   : > { %7344 = vpow2.f32 %v5951_v44  ;;  %v2278_v49 = vadd.f32 %v2270_v30, %v2259_v45  ;;  %v2260_v24 = vadd.f32 %v2249_v38, %v2117_v27  ;;  %v6916_v44 = vld [vmem:[%s9334_s1 + $0x750] ss:$8 sps:$4 sm:$0xff]   ;;  %v6957_v27 = vld [vmem:[%s9334_s1 + $0x7c4] ss:$8 sps:$4 sm:$0xff]  }
 0x44d   : > { %v2251_v50 = vpop.f32.mrf.mxu1 }
 0x44e   : > { %v5952_v40 = vmul.f32 -1.442695, %v2278_v49  ;;  %v2261_v47 = vadd.f32 %v2251_v50, %v2119_v41  ;;  %v2279_v17 = vadd.f32 %v2266_v4, %v2260_v24  ;;  %v6936_v4 = vld [vmem:[%s9334_s1 + $0x874] ss:$8 sps:$4 sm:$0xff]   ;;  %v6966_v24 = vld [vmem:[%s9334_s1 + $0x824] ss:$8 sps:$4 sm:$0xff]  }
 0x44f   : > { %3005 = vmatprep.subr.bf16.mxu1 %v6936_v4 }
 0x450   : > { %7346 = vpow2.f32 %v5952_v40  ;;  %v2280_v53 = vadd.f32 %v2270_v30, %v2261_v47  ;;  %v6921_v47 = vld [vmem:[%s9334_s1 + $0x744] ss:$8 sps:$4 sm:$0xff]  }
 0x452   : > { %v5953_v43 = vmul.f32 -1.442695, %v2280_v53  ;;  %v6919_v53 = vld [vmem:[%s9334_s1 + $0x740] ss:$8 sps:$4 sm:$0xff]  }
 0x454   : > { %7348 = vpow2.f32 %v5953_v43  ;;  %v6924_v43 = vld [vmem:[%s9334_s1 + $0x734] ss:$8 sps:$4 sm:$0xff]  }
 0x455   : > { %v7343_v56 = vpop.eup %7342 }
 0x456   : > { %v2293_v57 = vadd.f32 1.0, %v7343_v56  ;;  %v6922_v56 = vld [vmem:[%s9334_s1 + $0x730] ss:$8 sps:$4 sm:$0xff]  }
 0x458   : > { %7350 = vrcp.f32 %v2293_v57  ;;  %v6927_v57 = vld [vmem:[%s9334_s1 + $0x724] ss:$8 sps:$4 sm:$0xff]  }
 0x459   : > { %v7345_v58 = vpop.eup %7344 }
 0x45a   : > { %v2294_v59 = vadd.f32 1.0, %v7345_v58  ;;  %v6925_v58 = vld [vmem:[%s9334_s1 + $0x720] ss:$8 sps:$4 sm:$0xff]  }
 0x45c   : > { %7352 = vrcp.f32 %v2294_v59  ;;  %v6930_v59 = vld [vmem:[%s9334_s1 + $0x714] ss:$8 sps:$4 sm:$0xff]  }
 0x45d   : > { %v7347_v60 = vpop.eup %7346 }
 0x45e   : > { %v2295_v48 = vadd.f32 1.0, %v7347_v60  ;;  %v6928_v60 = vld [vmem:[%s9334_s1 + $0x710] ss:$8 sps:$4 sm:$0xff]  }
 0x460   : > { %7354 = vrcp.f32 %v2295_v48  ;;  %v6933_v48 = vld [vmem:[%s9334_s1 + $0x704] ss:$8 sps:$4 sm:$0xff]  }
 0x461   : > { %v7349_v63 = vpop.eup %7348 }
 0x462   : > { %v2296_v5 = vadd.f32 1.0, %v7349_v63 }
 0x464   : > { %7356 = vrcp.f32 %v2296_v5  ;;  %v6934_v5 = vld [vmem:[%s9334_s1 + $0x870] ss:$8 sps:$4 sm:$0xff]  }
 0x465   : > { %v7351_v3 = vpop.eup %7350 }
 0x466   : > { %v2309_v7 = vsub.f32 1.0, %v7351_v3  ;;  %v2305_v22 = vmul.f32 %v7351_v3, %v2273_v52  ;;  %v6937_v3 = vld [vmem:[%s9334_s1 + $0x7f0] ss:$8 sps:$4 sm:$0xff]   ;;  %v6942_v52 = vld [vmem:[%s9334_s1 + $0x864] ss:$8 sps:$4 sm:$0xff]  }
 0x468   : > { %v2313_v12 = vmul.f32 %v2309_v7, %v8207_v6  ;;  %v6940_v7 = vld [vmem:[%s9334_s1 + $0x860] ss:$8 sps:$4 sm:$0xff]  }
 0x469   : > { %v7353_v23 = vpop.eup %7352 }
 0x46a   : > { %v8337_v1 = vadd.f32 %v2313_v12, %v2305_v22  ;;  %v2310_v15 = vsub.f32 1.0, %v7353_v23  ;;  %v2306_v18 = vmul.f32 %v7353_v23, %v2275_v9  ;;  %v6948_v22 = vld [vmem:[%s9334_s1 + $0x854] ss:$8 sps:$4 sm:$0xff]   ;;  %v6946_v12 = vld [vmem:[%s9334_s1 + $0x850] ss:$8 sps:$4 sm:$0xff]  }
 0x46b   : > { %v6951_v23 = vld [vmem:[%s9334_s1 + $0x7d4] ss:$8 sps:$4 sm:$0xff]   ;;  %v6949_v9 = vld [vmem:[%s9334_s1 + $0x7d0] ss:$8 sps:$4 sm:$0xff]  }
 0x46c   : > { %2321 = vst [vmem:[#allocation2 + $0x38] sm:$0xff] %v8337_v1  ;;  %v2314_v14 = vmul.f32 %v2310_v15, %v8216_v11  ;;  %v6954_v15 = vld [vmem:[%s9334_s1 + $0x844] ss:$8 sps:$4 sm:$0xff]  }
 0x46d   : > { %v7355_v26 = vpop.eup %7354 }
 0x46e   : > { %v8342_v30 = vadd.f32 %v2314_v14, %v2306_v18  ;;  %v2311_v46 = vsub.f32 1.0, %v7355_v26  ;;  %v2307_v6 = vmul.f32 %v7355_v26, %v2277_v20  ;;  %v6955_v18 = vld [vmem:[%s9334_s1 + $0x7c0] ss:$8 sps:$4 sm:$0xff]   ;;  %v6960_v14 = vld [vmem:[%s9334_s1 + $0x834] ss:$8 sps:$4 sm:$0xff]  }
 0x46f   : > { %v6958_v26 = vld [vmem:[%s9334_s1 + $0x830] ss:$8 sps:$4 sm:$0xff]   ;;  %v6963_v20 = vld [vmem:[%s9334_s1 + $0x7b4] ss:$8 sps:$4 sm:$0xff]  }
 0x470   : > { %2322 = vst [vmem:[#allocation2 + $0x40] sm:$0xff] %v8342_v30  ;;  %v2315_v13 = vmul.f32 %v2311_v46, %v8225_v33  ;;  %v2388_v63 = vpack.c.bf16 %v8342_v30, %v8337_v1  ;;  %v6961_v46 = vld [vmem:[%s9334_s1 + $0x7b0] ss:$8 sps:$4 sm:$0xff]  }
 0x471   : > { %v7357_v55 = vpop.eup %7356 }
 0x472   : > { %v8346_v31 = vadd.f32 %v2315_v13, %v2307_v6  ;;  %v2312_v32 = vsub.f32 1.0, %v7357_v55  ;;  %v2308_v8 = vmul.f32 %v7357_v55, %v2279_v17  ;;  %v6964_v6 = vld [vmem:[%s9334_s1 + $0x820] ss:$8 sps:$4 sm:$0xff]   ;;  %v6969_v13 = vld [vmem:[%s9334_s1 + $0x7a4] ss:$8 sps:$4 sm:$0xff]  }
 0x473   : > { %v2382_v29 = vld [vmem:[#allocation2 + $0x37] sm:$0xff]  ;;  %v6967_v55 = vld [vmem:[%s9334_s1 + $0x7a0] ss:$8 sps:$4 sm:$0xff]  }
 0x474   : > { %2323 = vst [vmem:[#allocation2 + $0x48] sm:$0xff] %v8346_v31  ;;  %v2316_v11 = vmul.f32 %v2312_v32, %v8223_v16  ;;  %v2376_v35 = vld [vmem:[#allocation2 + $0x36] sm:$0xff]  ;;  %v6913_v16 = vld [vmem:[%s9334_s1 + $0x760] ss:$8 sps:$4 sm:$0xff]  }
 0x475   : > { %v6972_v17 = vld [vmem:[%s9334_s1 + $0x814] ss:$8 sps:$4 sm:$0xff]   ;;  %v6970_v32 = vld [vmem:[%s9334_s1 + $0x810] ss:$8 sps:$4 sm:$0xff]  }
 0x476   : > { %v8350_v61 = vadd.f32 %v2316_v11, %v2308_v8  ;;  %v6975_v8 = vld [vmem:[%s9334_s1 + $0x794] ss:$8 sps:$4 sm:$0xff]   ;;  %v6973_v11 = vld [vmem:[%s9334_s1 + $0x790] ss:$8 sps:$4 sm:$0xff]  }
 0x477   : > { %v2383_v34 = vld [vmem:[#allocation2 + $0x3f] sm:$0xff] }
 0x478   : > { %v2377_v33 = vld [vmem:[#allocation2 + $0x3e] sm:$0xff]  ;;  %2324 = vst [vmem:[#allocation2 + $0x50] sm:$0xff] %v8350_v61  ;;  %v2386_v36 = vpack.c.bf16 %v2383_v34, %v2382_v29  ;;  %v2389_v0 = vpack.c.bf16 %v8350_v61, %v8346_v31 }
 0x479   : > { %v2380_v37 = vpack.c.bf16 %v2377_v33, %v2376_v35  ;;  %v6976_v29 = vld [vmem:[%s9334_s1 + $0x800] ss:$8 sps:$4 sm:$0xff]   ;;  %v6981_v34 = vld [vmem:[%s9334_s1 + $0x784] ss:$8 sps:$4 sm:$0xff]   ;;  %v6984_v33 = vld [vmem:[%s9334_s1 + $0x8f4] ss:$8 sps:$4 sm:$0xff]  }
 0x47a   : > { %2503 = vmatmul.mubr.bf16.vlgmr.msra.gmra.mxu0 %v2386_v36  ;;  %v6979_v35 = vld [vmem:[%s9334_s1 + $0x780] ss:$8 sps:$4 sm:$0xff]  }
 0x47b   : > { %2636 = vmatmul.mubr.bf16.vlgmr.msra.gmra.mxu1 %v2380_v37  ;;  %2737 = vmatpush1.bf16.msra.mxu0 %v6910_v21  ;;  %v2384_v45 = vld [vmem:[#allocation2 + $0x47] sm:$0xff] }
 0x47c   : > { %2512 = vmatprep.mubr.bf16.mxu0 %v7466_v2  ;;  %2738 = vmatprep.subr.bf16.mxu0 %v6915_v39  ;;  %v2378_v41 = vld [vmem:[#allocation2 + $0x46] sm:$0xff] }
 0x47d   : > { %2645 = vmatprep.mubr.bf16.mxu1 %v7466_v2  ;;  %3006 = vmatpush1.bf16.msra.mxu1 %v6934_v5  ;;  %v6978_v21 = vld [vmem:[%s9334_s1 + $0x804] ss:$8 sps:$4 sm:$0xff]  }
 0x47e   : > { %3007 = vmatprep.subr.bf16.mxu1 %v6942_v52 }
 0x47f   : > { %2739 = vmatpush1.bf16.msra.mxu0 %v6913_v16  ;;  %v2385_v38 = vld [vmem:[#allocation2 + $0x4f] sm:$0xff] }
 0x480   : > { %v2379_v49 = vld [vmem:[#allocation2 + $0x4e] sm:$0xff]  ;;  %2740 = vmatprep.subr.bf16.mxu0 %v6918_v42  ;;  %v2387_v50 = vpack.c.bf16 %v2385_v38, %v2384_v45 }
 0x481   : > { %v2381_v40 = vpack.c.bf16 %v2379_v49, %v2378_v41  ;;  %3008 = vmatpush1.bf16.msra.mxu1 %v6940_v7 }
 0x482   : > { %2513 = vmatmul.mubr.bf16.gmra.mxu0 %v2387_v50  ;;  %3009 = vmatprep.subr.bf16.mxu1 %v6948_v22 }
 0x483   : > { %2646 = vmatmul.mubr.bf16.gmra.mxu1 %v2381_v40  ;;  %2741 = vmatpush1.bf16.msra.mxu0 %v6916_v44 }
 0x484   : > { %2768 = vmatprep.mubr.bf16.mxu0 %v7466_v2  ;;  %2742 = vmatprep.subr.bf16.mxu0 %v6921_v47 }
 0x485   : > { %3037 = vmatprep.mubr.bf16.mxu1 %v7466_v2  ;;  %3010 = vmatpush1.bf16.msra.mxu1 %v6946_v12 }
 0x486   : > { %3011 = vmatprep.subr.bf16.mxu1 %v6954_v15 }
 0x487   : > { %2743 = vmatpush1.bf16.msra.mxu0 %v6919_v53  ;;  %v6002_v53 = vld [vmem:[%s9335_s2 + $0x8] sm:$0x3] }
 0x488   : > { %2744 = vmatprep.subr.bf16.mxu0 %v6924_v43 }
 0x489   : > { %3012 = vmatpush1.bf16.msra.mxu1 %v6952_v28 }
 0x48a   : > { %3013 = vmatprep.subr.bf16.mxu1 %v6960_v14 }
 0x48b   : > { %2745 = vmatpush1.bf16.msra.mxu0 %v6922_v56 }
 0x48c   : > { %2746 = vmatprep.subr.bf16.mxu0 %v6927_v57  ;;  %v2805_v57 = vrot.slane %v6002_v53, %v7779_v51 }
 0x48d   : > { %3014 = vmatpush1.bf16.msra.mxu1 %v6958_v26 }
 0x48e   : > { %3015 = vmatprep.subr.bf16.mxu1 %v6966_v24 }
 0x48f   : > { %2747 = vmatpush1.bf16.msra.mxu0 %v6925_v58 }
 0x490   : > { %2748 = vmatprep.subr.bf16.mxu0 %v6930_v59 }
 0x491   : > { %3016 = vmatpush1.bf16.msra.mxu1 %v6964_v6 }
 0x492   : > { %3017 = vmatprep.subr.bf16.mxu1 %v6972_v17 }
 0x493   : > { %2749 = vmatpush1.bf16.msra.mxu0 %v6928_v60 }
 0x494   : > { %2750 = vmatprep.subr.bf16.mxu0 %v6933_v48 }
 0x495   : > { %3018 = vmatpush1.bf16.msra.mxu1 %v6970_v32 }
 0x496   : > { %3019 = vmatprep.subr.bf16.mxu1 %v6978_v21 }
 0x497   : > { %2751 = vmatpush1.bf16.msra.mxu0 %v6931_v62 }
 0x498   : > { %3138 = vmatprep.subr.bf16.mxu0 %v6939_v54 }
 0x499   : > { %3020 = vmatpush1.bf16.msra.mxu1 %v6976_v29 }
 0x49a   : > { %2769 = vmatmul.mubr.bf16.vlgmr.msra.gmra.mxu0 %v2388_v63  ;;  %3271 = vmatprep.subr.bf16.mxu1 %v6984_v33 }
 0x49b   : > { %2778 = vmatprep.mubr.bf16.mxu0 %v7466_v2  ;;  %3139 = vmatpush1.bf16.msra.mxu0 %v6937_v3 }
 0x49c   : > { %3140 = vmatprep.subr.bf16.mxu0 %v6945_v10 }
 0x49f   : > { %3141 = vmatpush1.bf16.msra.mxu0 %v6943_v19 }
 0x4a0   : > { %3142 = vmatprep.subr.bf16.mxu0 %v6951_v23 }
 0x4a2   : > { %2779 = vmatmul.mubr.bf16.gmra.mxu0 %v2389_v0 }
 0x4a3   : > { %3170 = vmatprep.mubr.bf16.mxu0 %v7466_v2  ;;  %3143 = vmatpush1.bf16.msra.mxu0 %v6949_v9 }
 0x4a4   : > { %3144 = vmatprep.subr.bf16.mxu0 %v6957_v27 }
 0x4a7   : > { %3145 = vmatpush1.bf16.msra.mxu0 %v6955_v18 }
 0x4a8   : > { %3146 = vmatprep.subr.bf16.mxu0 %v6963_v20 }
 0x4ab   : > { %3147 = vmatpush1.bf16.msra.mxu0 %v6961_v46 }
 0x4ac   : > { %3148 = vmatprep.subr.bf16.mxu0 %v6969_v13 }
 0x4af   : > { %3149 = vmatpush1.bf16.msra.mxu0 %v6967_v55 }
 0x4b0   : > { %3150 = vmatprep.subr.bf16.mxu0 %v6975_v8 }
 0x4b3   : > { %3151 = vmatpush1.bf16.msra.mxu0 %v6973_v11  ;;  %v2801_v11 = vrot.slane %v6002_v53, %v7785_v25 }
 0x4b4   : > { %3152 = vmatprep.subr.bf16.mxu0 %v6981_v34 }
 0x4b7   : > { %3153 = vmatpush1.bf16.msra.mxu0 %v6979_v35 }
 0x53a   : > { %v2504_v36 = vpop.f32.mrf.mxu0 }
 0x53b   : > { %v2637_v16 = vpop.f32.mrf.mxu1 }
 0x53c   : > { %v2506_v37 = vpop.f32.mrf.mxu0  ;;  %v2638_v17 = vadd.f32 %v2637_v16, %v2504_v36 }
 0x53d   : > { %v2639_v44 = vpop.f32.mrf.mxu1 }
 0x53e   : > { %v2508_v39 = vpop.f32.mrf.mxu0  ;;  %v2640_v56 = vadd.f32 %v2639_v44, %v2506_v37 }
 0x53f   : > { %v2641_v38 = vpop.f32.mrf.mxu1 }
 0x540   : > { %v2510_v42 = vpop.f32.mrf.mxu0  ;;  %v2642_v29 = vadd.f32 %v2641_v38, %v2508_v39 }
 0x541   : > { %v2643_v49 = vpop.f32.mrf.mxu1 }
 0x542   : > { %v2514_v45 = vpop.f32.mrf.mxu0  ;;  %v2644_v62 = vadd.f32 %v2643_v49, %v2510_v42 }
 0x543   : > { %v2647_v40 = vpop.f32.mrf.mxu1 }
 0x544   : > { %v2516_v41 = vpop.f32.mrf.mxu0  ;;  %v2648_v42 = vadd.f32 %v2647_v40, %v2514_v45 }
 0x545   : > { %v2649_v58 = vpop.f32.mrf.mxu1 }
 0x546   : > { %v8507_v50 = vpop.f32.mrf.mxu0  ;;  %v2650_v52 = vadd.f32 %v2649_v58, %v2516_v41 }
 0x547   : > { %v2651_v0 = vpop.f32.mrf.mxu1 }
 0x548   : > { %v2520_v47 = vpop.f32.mrf.mxu0 }
 0x549   : > { %v2653_v10 = vpop.f32.mrf.mxu1 }
 0x54a   : > { %v2654_v9 = vadd.f32 %v2653_v10, %v2520_v47  ;;  %v6987_v10 = vld [vmem:[%s9334_s1 + $0x8e4] ss:$8 sps:$4 sm:$0xff]  }
 0x55a   : > { %v2770_v43 = vpop.f32.mrf.mxu0 }
 0x55b   : > { %v2789_v8 = vadd.f32 %v2770_v43, %v2638_v17  ;;  %v2652_v43 = vadd.f32 %v2651_v0, %v8507_v50  ;;  %v7003_v17 = vld [vmem:[%s9334_s1 + $0x880] ss:$8 sps:$4 sm:$0xff]  }
 0x55c   : > { %v2772_v59 = vpop.f32.mrf.mxu0 }
 0x55d   : > { %v2790_v60 = vadd.f32 %v2772_v59, %v2640_v56  ;;  %v2808_v35 = vadd.f32 %v2801_v11, %v2789_v8 }
 0x55e   : > { %v2774_v48 = vpop.f32.mrf.mxu0 }
 0x55f   : > { %v2809_v63 = vadd.f32 %v2805_v57, %v2790_v60  ;;  %v2791_v37 = vadd.f32 %v2774_v48, %v2642_v29  ;;  %v7011_v29 = vld [vmem:[%s9334_s1 + $0x9f4] ss:$8 sps:$4 sm:$0xff]  }
 0x560   : > { %v2776_v4 = vpop.f32.mrf.mxu0  ;;  %3540 = vmatprep.subr.bf16.mxu0 %v7011_v29 }
 0x561   : > { %v6051_v5 = vmul.f32 -1.442695, %v2809_v63  ;;  %v2792_v54 = vadd.f32 %v2776_v4, %v2644_v62  ;;  %v2810_v36 = vadd.f32 %v2801_v11, %v2791_v37  ;;  %v6982_v4 = vld [vmem:[%s9334_s1 + $0x8f0] ss:$8 sps:$4 sm:$0xff]   ;;  %v7017_v37 = vld [vmem:[%s9334_s1 + $0x9e4] ss:$8 sps:$4 sm:$0xff]  }
 0x562   : > { %v2780_v3 = vpop.f32.mrf.mxu0 }
 0x563   : > { %7358 = vpow2.f32 %v6051_v5  ;;  %v2811_v7 = vadd.f32 %v2805_v57, %v2792_v54  ;;  %v2793_v56 = vadd.f32 %v2780_v3, %v2648_v42  ;;  %v7015_v42 = vld [vmem:[%s9334_s1 + $0x9e0] ss:$8 sps:$4 sm:$0xff]  }
 0x564   : > { %v2782_v19 = vpop.f32.mrf.mxu0 }
 0x565   : > { %v6052_v22 = vmul.f32 -1.442695, %v2811_v7  ;;  %v2794_v12 = vadd.f32 %v2782_v19, %v2650_v52  ;;  %v2812_v45 = vadd.f32 %v2801_v11, %v2793_v56  ;;  %v6990_v19 = vld [vmem:[%s9334_s1 + $0x8d4] ss:$8 sps:$4 sm:$0xff]   ;;  %v7024_v56 = vld [vmem:[%s9334_s1 + $0x940] ss:$8 sps:$4 sm:$0xff]  }
 0x566   : > { %v2784_v23 = vpop.f32.mrf.mxu0 }
 0x567   : > { %7360 = vpow2.f32 %v6052_v22  ;;  %v2813_v15 = vadd.f32 %v2805_v57, %v2794_v12  ;;  %v2795_v58 = vadd.f32 %v2784_v23, %v2652_v43  ;;  %v6988_v22 = vld [vmem:[%s9334_s1 + $0x8d0] ss:$8 sps:$4 sm:$0xff]   ;;  %v7029_v43 = vld [vmem:[%s9334_s1 + $0x9c4] ss:$8 sps:$4 sm:$0xff]  }
 0x568   : > { %v2786_v28 = vpop.f32.mrf.mxu0 }
 0x569   : > { %v6053_v27 = vmul.f32 -1.442695, %v2813_v15  ;;  %v2796_v18 = vadd.f32 %v2786_v28, %v2654_v9  ;;  %v2814_v50 = vadd.f32 %v2801_v11, %v2795_v58  ;;  %v7008_v11 = vld [vmem:[%s9334_s1 + $0x974] ss:$8 sps:$4 sm:$0xff]   ;;  %v7038_v58 = vld [vmem:[%s9334_s1 + $0x924] ss:$8 sps:$4 sm:$0xff]  }
 0x56b   : > { %7362 = vpow2.f32 %v6053_v27  ;;  %v2815_v14 = vadd.f32 %v2805_v57, %v2796_v18  ;;  %v6993_v18 = vld [vmem:[%s9334_s1 + $0x8c4] ss:$8 sps:$4 sm:$0xff]  }
 0x56d   : > { %v6054_v26 = vmul.f32 -1.442695, %v2815_v14  ;;  %v6991_v14 = vld [vmem:[%s9334_s1 + $0x8c0] ss:$8 sps:$4 sm:$0xff]  }
 0x56f   : > { %7364 = vpow2.f32 %v6054_v26  ;;  %v6996_v26 = vld [vmem:[%s9334_s1 + $0x8b4] ss:$8 sps:$4 sm:$0xff]  }
 0x570   : > { %v7359_v20 = vpop.eup %7358 }
 0x571   : > { %v2828_v46 = vadd.f32 1.0, %v7359_v20  ;;  %v6994_v20 = vld [vmem:[%s9334_s1 + $0x8b0] ss:$8 sps:$4 sm:$0xff]  }
 0x573   : > { %7366 = vrcp.f32 %v2828_v46  ;;  %v6999_v46 = vld [vmem:[%s9334_s1 + $0x8a4] ss:$8 sps:$4 sm:$0xff]  }
 0x574   : > { %v7361_v24 = vpop.eup %7360 }
 0x575   : > { %v2829_v6 = vadd.f32 1.0, %v7361_v24  ;;  %v6997_v24 = vld [vmem:[%s9334_s1 + $0x8a0] ss:$8 sps:$4 sm:$0xff]  }
 0x577   : > { %7368 = vrcp.f32 %v2829_v6  ;;  %v7002_v6 = vld [vmem:[%s9334_s1 + $0x894] ss:$8 sps:$4 sm:$0xff]  }
 0x578   : > { %v7363_v13 = vpop.eup %7362 }
 0x579   : > { %v2830_v55 = vadd.f32 1.0, %v7363_v13  ;;  %v7000_v13 = vld [vmem:[%s9334_s1 + $0x890] ss:$8 sps:$4 sm:$0xff]  }
 0x57b   : > { %7370 = vrcp.f32 %v2830_v55  ;;  %v7005_v55 = vld [vmem:[%s9334_s1 + $0x884] ss:$8 sps:$4 sm:$0xff]  }
 0x57c   : > { %v7365_v32 = vpop.eup %7364 }
 0x57d   : > { %v2831_v21 = vadd.f32 1.0, %v7365_v32 }
 0x57f   : > { %7372 = vrcp.f32 %v2831_v21  ;;  %v7006_v21 = vld [vmem:[%s9334_s1 + $0x970] ss:$8 sps:$4 sm:$0xff]  }
 0x580   : > { %v7367_v34 = vpop.eup %7366 }
 0x581   : > { %v2844_v33 = vsub.f32 1.0, %v7367_v34  ;;  %v2840_v44 = vmul.f32 %v7367_v34, %v2808_v35  ;;  %v7009_v34 = vld [vmem:[%s9334_s1 + $0x9f0] ss:$8 sps:$4 sm:$0xff]   ;;  %v7014_v35 = vld [vmem:[%s9334_s1 + $0x964] ss:$8 sps:$4 sm:$0xff]  }
 0x583   : > { %v2848_v41 = vmul.f32 %v2844_v33, %v8337_v1  ;;  %v7012_v33 = vld [vmem:[%s9334_s1 + $0x960] ss:$8 sps:$4 sm:$0xff]  }
 0x584   : > { %v7369_v49 = vpop.eup %7368 }
 0x585   : > { %v8515_v47 = vadd.f32 %v2848_v41, %v2840_v44  ;;  %v2845_v16 = vsub.f32 1.0, %v7369_v49  ;;  %v2841_v39 = vmul.f32 %v7369_v49, %v2810_v36  ;;  %v7020_v44 = vld [vmem:[%s9334_s1 + $0x954] ss:$8 sps:$4 sm:$0xff]   ;;  %v7018_v41 = vld [vmem:[%s9334_s1 + $0x950] ss:$8 sps:$4 sm:$0xff]  }
 0x586   : > { %v7023_v49 = vld [vmem:[%s9334_s1 + $0x9d4] ss:$8 sps:$4 sm:$0xff]   ;;  %v7021_v36 = vld [vmem:[%s9334_s1 + $0x9d0] ss:$8 sps:$4 sm:$0xff]  }
 0x587   : > { %2856 = vst [vmem:[#allocation2 + $0x38] sm:$0xff] %v8515_v47  ;;  %v2849_v38 = vmul.f32 %v2845_v16, %v8342_v30  ;;  %v7026_v16 = vld [vmem:[%s9334_s1 + $0x944] ss:$8 sps:$4 sm:$0xff]  }
 0x588   : > { %v7371_v53 = vpop.eup %7370 }
 0x589   : > { %v8520_v57 = vadd.f32 %v2849_v38, %v2841_v39  ;;  %v2846_v40 = vsub.f32 1.0, %v7371_v53  ;;  %v2842_v1 = vmul.f32 %v7371_v53, %v2812_v45  ;;  %v7027_v39 = vld [vmem:[%s9334_s1 + $0x9c0] ss:$8 sps:$4 sm:$0xff]   ;;  %v7032_v38 = vld [vmem:[%s9334_s1 + $0x934] ss:$8 sps:$4 sm:$0xff]  }
 0x58a   : > { %v7030_v53 = vld [vmem:[%s9334_s1 + $0x930] ss:$8 sps:$4 sm:$0xff]   ;;  %v7035_v45 = vld [vmem:[%s9334_s1 + $0x9b4] ss:$8 sps:$4 sm:$0xff]  }
 0x58b   : > { %2857 = vst [vmem:[#allocation2 + $0x40] sm:$0xff] %v8520_v57  ;;  %v2850_v59 = vmul.f32 %v2846_v40, %v8346_v31  ;;  %v2923_v32 = vpack.c.bf16 %v8520_v57, %v8515_v47  ;;  %v7033_v40 = vld [vmem:[%s9334_s1 + $0x9b0] ss:$8 sps:$4 sm:$0xff]  }
 0x58c   : > { %v7373_v60 = vpop.eup %7372 }
 0x58d   : > { %v8524_v48 = vadd.f32 %v2850_v59, %v2842_v1  ;;  %v2847_v62 = vsub.f32 1.0, %v7373_v60  ;;  %v2843_v63 = vmul.f32 %v7373_v60, %v2814_v50  ;;  %v7036_v1 = vld [vmem:[%s9334_s1 + $0x920] ss:$8 sps:$4 sm:$0xff]   ;;  %v7041_v59 = vld [vmem:[%s9334_s1 + $0x9a4] ss:$8 sps:$4 sm:$0xff]  }
 0x58e   : > { %v2917_v5 = vld [vmem:[#allocation2 + $0x35] sm:$0xff]  ;;  %v7039_v60 = vld [vmem:[%s9334_s1 + $0x9a0] ss:$8 sps:$4 sm:$0xff]  }
 0x58f   : > { %2858 = vst [vmem:[#allocation2 + $0x48] sm:$0xff] %v8524_v48  ;;  %v2851_v30 = vmul.f32 %v2847_v62, %v8350_v61  ;;  %v2911_v3 = vld [vmem:[#allocation2 + $0x32] sm:$0xff]  ;;  %v6985_v61 = vld [vmem:[%s9334_s1 + $0x8e0] ss:$8 sps:$4 sm:$0xff]  }
 0x590   : > { %v7044_v50 = vld [vmem:[%s9334_s1 + $0x914] ss:$8 sps:$4 sm:$0xff]   ;;  %v7042_v62 = vld [vmem:[%s9334_s1 + $0x910] ss:$8 sps:$4 sm:$0xff]  }
 0x591   : > { %v8528_v0 = vadd.f32 %v2851_v30, %v2843_v63  ;;  %v7047_v63 = vld [vmem:[%s9334_s1 + $0x994] ss:$8 sps:$4 sm:$0xff]   ;;  %v7045_v30 = vld [vmem:[%s9334_s1 + $0x990] ss:$8 sps:$4 sm:$0xff]  }
 0x592   : > { %v2918_v54 = vld [vmem:[#allocation2 + $0x3d] sm:$0xff] }
 0x593   : > { %v2912_v31 = vld [vmem:[#allocation2 + $0x3a] sm:$0xff]  ;;  %2859 = vst [vmem:[#allocation2 + $0x50] sm:$0xff] %v8528_v0  ;;  %v2921_v52 = vpack.c.bf16 %v2918_v54, %v2917_v5  ;;  %v2924_v8 = vpack.c.bf16 %v8528_v0, %v8524_v48  ;;  %v7053_v54 = vld [vmem:[%s9334_s1 + $0x984] ss:$8 sps:$4 sm:$0xff]  }
 0x594   : > { %v2915_v7 = vpack.c.bf16 %v2912_v31, %v2911_v3  ;;  %v7048_v5 = vld [vmem:[%s9334_s1 + $0x900] ss:$8 sps:$4 sm:$0xff]   ;;  %v3447_v31 = vld [vmem:[#allocation2 + $0x2e] sm:$0xff] }
 0x595   : > { %3038 = vmatmul.mubr.bf16.vlgmr.msra.gmra.mxu1 %v2921_v52  ;;  %v3446_v3 = vld [vmem:[#allocation2 + $0x26] sm:$0xff] }
 0x596   : > { %3171 = vmatmul.mubr.bf16.vlgmr.msra.gmra.mxu0 %v2915_v7  ;;  %3272 = vmatpush1.bf16.msra.mxu1 %v6982_v4  ;;  %v2919_v12 = vld [vmem:[#allocation2 + $0x45] sm:$0xff]  ;;  %v3450_v7 = vpack.c.bf16 %v3447_v31, %v3446_v3 }
 0x597   : > { %3047 = vmatprep.mubr.bf16.mxu1 %v7466_v2  ;;  %3273 = vmatprep.subr.bf16.mxu1 %v6987_v10  ;;  %v2913_v9 = vld [vmem:[#allocation2 + $0x42] sm:$0xff]  ;;  %v7056_v10 = vld [vmem:[%s9334_s1 + $0xa74] ss:$8 sps:$4 sm:$0xff]  }
 0x598   : > { %3180 = vmatprep.mubr.bf16.mxu0 %v7466_v2  ;;  %3541 = vmatpush1.bf16.msra.mxu0 %v7009_v34  ;;  %v7050_v4 = vld [vmem:[%s9334_s1 + $0x904] ss:$8 sps:$4 sm:$0xff]   ;;  %v7051_v52 = vld [vmem:[%s9334_s1 + $0x980] ss:$8 sps:$4 sm:$0xff]  }
 0x599   : > { %3542 = vmatprep.subr.bf16.mxu0 %v7017_v37 }
 0x59a   : > { %3274 = vmatpush1.bf16.msra.mxu1 %v6985_v61  ;;  %v2920_v23 = vld [vmem:[#allocation2 + $0x4d] sm:$0xff] }
 0x59b   : > { %v2914_v15 = vld [vmem:[#allocation2 + $0x4a] sm:$0xff]  ;;  %3275 = vmatprep.subr.bf16.mxu1 %v6990_v19  ;;  %v2922_v28 = vpack.c.bf16 %v2920_v23, %v2919_v12 }
 0x59c   : > { %v2916_v27 = vpack.c.bf16 %v2914_v15, %v2913_v9  ;;  %3543 = vmatpush1.bf16.msra.mxu0 %v7015_v42 }
 0x59d   : > { %3048 = vmatmul.mubr.bf16.gmra.mxu1 %v2922_v28  ;;  %3544 = vmatprep.subr.bf16.mxu0 %v7023_v49 }
 0x59e   : > { %3181 = vmatmul.mubr.bf16.gmra.mxu0 %v2916_v27  ;;  %3276 = vmatpush1.bf16.msra.mxu1 %v6988_v22 }
 0x59f   : > { %3303 = vmatprep.mubr.bf16.mxu1 %v7466_v2  ;;  %3277 = vmatprep.subr.bf16.mxu1 %v6993_v18 }
 0x5a0   : > { %3572 = vmatprep.mubr.bf16.mxu0 %v7466_v2  ;;  %3545 = vmatpush1.bf16.msra.mxu0 %v7021_v36 }
 0x5a1   : > { %3546 = vmatprep.subr.bf16.mxu0 %v7029_v43 }
 0x5a2   : > { %3278 = vmatpush1.bf16.msra.mxu1 %v6991_v14 }
 0x5a3   : > { %3279 = vmatprep.subr.bf16.mxu1 %v6996_v26 }
 0x5a4   : > { %3547 = vmatpush1.bf16.msra.mxu0 %v7027_v39 }
 0x5a5   : > { %3548 = vmatprep.subr.bf16.mxu0 %v7035_v45 }
 0x5a6   : > { %3280 = vmatpush1.bf16.msra.mxu1 %v6994_v20  ;;  %v6103_v20 = vld [vmem:[%s9335_s2 + $0xa] sm:$0x3] }
 0x5a7   : > { %3281 = vmatprep.subr.bf16.mxu1 %v6999_v46 }
 0x5a8   : > { %3549 = vmatpush1.bf16.msra.mxu0 %v7033_v40 }
 0x5a9   : > { %3550 = vmatprep.subr.bf16.mxu0 %v7041_v59 }
 0x5aa   : > { %3282 = vmatpush1.bf16.msra.mxu1 %v6997_v24 }
 0x5ab   : > { %3283 = vmatprep.subr.bf16.mxu1 %v7002_v6  ;;  %v3340_v6 = vrot.slane %v6103_v20, %v7779_v51 }
 0x5ac   : > { %3551 = vmatpush1.bf16.msra.mxu0 %v7039_v60 }
 0x5ad   : > { %3552 = vmatprep.subr.bf16.mxu0 %v7047_v63 }
 0x5ae   : > { %3284 = vmatpush1.bf16.msra.mxu1 %v7000_v13 }
 0x5af   : > { %3285 = vmatprep.subr.bf16.mxu1 %v7005_v55 }
 0x5b0   : > { %3553 = vmatpush1.bf16.msra.mxu0 %v7045_v30  ;;  %v8697_v30 = vrot.slane %v6103_v20, %v7785_v25 }
 0x5b1   : > { %3554 = vmatprep.subr.bf16.mxu0 %v7053_v54 }
 0x5b2   : > { %3286 = vmatpush1.bf16.msra.mxu1 %v7003_v17 }
 0x5b3   : > { %3673 = vmatprep.subr.bf16.mxu1 %v7008_v11 }
 0x5b4   : > { %3555 = vmatpush1.bf16.msra.mxu0 %v7051_v52 }
 0x5b5   : > { %3304 = vmatmul.mubr.bf16.vlgmr.msra.gmra.mxu1 %v2923_v32  ;;  %3806 = vmatprep.subr.bf16.mxu0 %v7056_v10 }
 0x5b6   : > { %3313 = vmatprep.mubr.bf16.mxu1 %v7466_v2  ;;  %3674 = vmatpush1.bf16.msra.mxu1 %v7006_v21 }
 0x5b7   : > { %3675 = vmatprep.subr.bf16.mxu1 %v7014_v35 }
 0x5ba   : > { %3676 = vmatpush1.bf16.msra.mxu1 %v7012_v33 }
 0x5bb   : > { %3677 = vmatprep.subr.bf16.mxu1 %v7020_v44 }
 0x5bd   : > { %3314 = vmatmul.mubr.bf16.gmra.mxu1 %v2924_v8 }
 0x5be   : > { %3705 = vmatprep.mubr.bf16.mxu1 %v7466_v2  ;;  %3678 = vmatpush1.bf16.msra.mxu1 %v7018_v41 }
 0x5bf   : > { %3679 = vmatprep.subr.bf16.mxu1 %v7026_v16 }
 0x5c2   : > { %3680 = vmatpush1.bf16.msra.mxu1 %v7024_v56 }
 0x5c3   : > { %3681 = vmatprep.subr.bf16.mxu1 %v7032_v38 }
 0x5c6   : > { %3682 = vmatpush1.bf16.msra.mxu1 %v7030_v53 }
 0x5c7   : > { %3683 = vmatprep.subr.bf16.mxu1 %v7038_v58 }
 0x5ca   : > { %3684 = vmatpush1.bf16.msra.mxu1 %v7036_v1 }
 0x5cb   : > { %3685 = vmatprep.subr.bf16.mxu1 %v7044_v50 }
 0x5ce   : > { %3686 = vmatpush1.bf16.msra.mxu1 %v7042_v62 }
 0x5cf   : > { %3687 = vmatprep.subr.bf16.mxu1 %v7050_v4 }
 0x5d2   : > { %3688 = vmatpush1.bf16.msra.mxu1 %v7048_v5 }
 0x5d5   : > { %3706 = vmatmul.mubr.bf16.vlgmr.msra.gmra.mxu1 %v3450_v7 }
 0x5d6   : > { %3715 = vmatprep.mubr.bf16.mxu1 %v7466_v2 }
 0x655   : > { %v3039_v61 = vpop.f32.mrf.mxu1 }
 0x656   : > { %v3172_v23 = vpop.f32.mrf.mxu0 }
 0x657   : > { %v3041_v19 = vpop.f32.mrf.mxu1  ;;  %v3173_v50 = vadd.f32 %v3172_v23, %v3039_v61 }
 0x658   : > { %v3174_v15 = vpop.f32.mrf.mxu0 }
 0x659   : > { %v3043_v22 = vpop.f32.mrf.mxu1  ;;  %v3175_v24 = vadd.f32 %v3174_v15, %v3041_v19 }
 0x65a   : > { %v3176_v27 = vpop.f32.mrf.mxu0 }
 0x65b   : > { %v3045_v12 = vpop.f32.mrf.mxu1  ;;  %v3177_v4 = vadd.f32 %v3176_v27, %v3043_v22 }
 0x65c   : > { %v3178_v14 = vpop.f32.mrf.mxu0 }
 0x65d   : > { %v3049_v9 = vpop.f32.mrf.mxu1  ;;  %v3179_v8 = vadd.f32 %v3178_v14, %v3045_v12 }
 0x65e   : > { %v3182_v13 = vpop.f32.mrf.mxu0 }
 0x65f   : > { %v3051_v28 = vpop.f32.mrf.mxu1  ;;  %v3183_v7 = vadd.f32 %v3182_v13, %v3049_v9 }
 0x660   : > { %v3184_v21 = vpop.f32.mrf.mxu0 }
 0x661   : > { %v8686_v18 = vpop.f32.mrf.mxu1  ;;  %v3185_v37 = vadd.f32 %v3184_v21, %v3051_v28 }
 0x662   : > { %v8692_v39 = vpop.f32.mrf.mxu0 }
 0x663   : > { %v3055_v26 = vpop.f32.mrf.mxu1 }
 0x664   : > { %v3188_v40 = vpop.f32.mrf.mxu0 }
 0x665   : > { %v3189_v59 = vadd.f32 %v3188_v40, %v3055_v26  ;;  %v7077_v40 = vld [vmem:[%s9334_s1 + $0xa04] ss:$8 sps:$4 sm:$0xff]  }
 0x675   : > { %v3305_v46 = vpop.f32.mrf.mxu1 }
 0x676   : > { %v3324_v63 = vadd.f32 %v3305_v46, %v3173_v50 }
 0x677   : > { %v3307_v55 = vpop.f32.mrf.mxu1 }
 0x678   : > { %v3325_v17 = vadd.f32 %v3307_v55, %v3175_v24  ;;  %v3343_v3 = vadd.f32 %v8697_v30, %v3324_v63  ;;  %v7054_v55 = vld [vmem:[%s9334_s1 + $0xa70] ss:$8 sps:$4 sm:$0xff]  }
 0x679   : > { %v3309_v32 = vpop.f32.mrf.mxu1 }
 0x67a   : > { %v3344_v11 = vadd.f32 %v3340_v6, %v3325_v17  ;;  %v3326_v52 = vadd.f32 %v3309_v32, %v3177_v4  ;;  %v7059_v32 = vld [vmem:[%s9334_s1 + $0xa64] ss:$8 sps:$4 sm:$0xff]  }
 0x67b   : > { %v3311_v29 = vpop.f32.mrf.mxu1 }
 0x67c   : > { %v6152_v34 = vmul.f32 -1.442695, %v3344_v11  ;;  %v3327_v35 = vadd.f32 %v3311_v29, %v3179_v8  ;;  %v3345_v23 = vadd.f32 %v8697_v30, %v3326_v52  ;;  %v7062_v29 = vld [vmem:[%s9334_s1 + $0xa54] ss:$8 sps:$4 sm:$0xff]   ;;  %v7084_v52 = vld [vmem:[%s9334_s1 + $0xb60] ss:$8 sps:$4 sm:$0xff]  }
 0x67d   : > { %v3315_v33 = vpop.f32.mrf.mxu1 }
 0x67e   : > { %7374 = vpow2.f32 %v6152_v34  ;;  %v3346_v42 = vadd.f32 %v3340_v6, %v3327_v35  ;;  %v3328_v14 = vadd.f32 %v3315_v33, %v3183_v7  ;;  %v7060_v35 = vld [vmem:[%s9334_s1 + $0xa50] ss:$8 sps:$4 sm:$0xff]   ;;  %v7087_v7 = vld [vmem:[%s9334_s1 + $0xae0] ss:$8 sps:$4 sm:$0xff]  }
 0x67f   : > { %v3317_v44 = vpop.f32.mrf.mxu1 }
 0x680   : > { %v6153_v41 = vmul.f32 -1.442695, %v3346_v42  ;;  %v3329_v49 = vadd.f32 %v3317_v44, %v3185_v37  ;;  %v3347_v9 = vadd.f32 %v8697_v30, %v3328_v14  ;;  %v7096_v14 = vld [vmem:[%s9334_s1 + $0xb40] ss:$8 sps:$4 sm:$0xff]  }
 0x681   : > { %v8694_v53 = vpop.f32.mrf.mxu1 }
 0x682   : > { %7376 = vpow2.f32 %v6153_v41  ;;  %v3348_v36 = vadd.f32 %v3340_v6, %v3329_v49  ;;  %v7065_v41 = vld [vmem:[%s9334_s1 + $0xa44] ss:$8 sps:$4 sm:$0xff]   ;;  %v7063_v49 = vld [vmem:[%s9334_s1 + $0xa40] ss:$8 sps:$4 sm:$0xff]  }
 0x683   : > { %v3321_v1 = vpop.f32.mrf.mxu1 }
 0x684   : > { %v6154_v16 = vmul.f32 -1.442695, %v3348_v36  ;;  %v3331_v62 = vadd.f32 %v3321_v1, %v3189_v59  ;;  %v7068_v36 = vld [vmem:[%s9334_s1 + $0xa34] ss:$8 sps:$4 sm:$0xff]   ;;  %v3187_v1 = vadd.f32 %v8692_v39, %v8686_v18  ;;  %v7075_v59 = vld [vmem:[%s9334_s1 + $0xa00] ss:$8 sps:$4 sm:$0xff]  }
 0x686   : > { %7378 = vpow2.f32 %v6154_v16  ;;  %v3350_v5 = vadd.f32 %v3340_v6, %v3331_v62  ;;  %v3452_v6 = vld [vmem:[#allocation2 + $0x2f] sm:$0xff] }
 0x687   : > { %v7066_v16 = vld [vmem:[%s9334_s1 + $0xa30] ss:$8 sps:$4 sm:$0xff]  }
 0x688   : > { %v6155_v12 = vmul.f32 -1.442695, %v3350_v5 }
 0x68b   : > { %v7375_v56 = vpop.eup %7374 }
 0x68c   : > { %v3363_v43 = vadd.f32 1.0, %v7375_v56  ;;  %v7071_v56 = vld [vmem:[%s9334_s1 + $0xa24] ss:$8 sps:$4 sm:$0xff]  }
 0x68e   : > { %7380 = vrcp.f32 %v3363_v43  ;;  %v7069_v43 = vld [vmem:[%s9334_s1 + $0xa20] ss:$8 sps:$4 sm:$0xff]  }
 0x68f   : > { %v7377_v38 = vpop.eup %7376 }
 0x690   : > { %v3364_v45 = vadd.f32 1.0, %v7377_v38  ;;  %v7074_v38 = vld [vmem:[%s9334_s1 + $0xa14] ss:$8 sps:$4 sm:$0xff]  }
 0x692   : > { %7382 = vrcp.f32 %v3364_v45  ;;  %v7072_v45 = vld [vmem:[%s9334_s1 + $0xa10] ss:$8 sps:$4 sm:$0xff]  }
 0x693   : > { %v7379_v58 = vpop.eup %7378 }
 0x694   : > { %v3365_v60 = vadd.f32 1.0, %v7379_v58 }
 0x696   : > { %7384 = vrcp.f32 %v3365_v60  ;;  %v3330_v60 = vadd.f32 %v8694_v53, %v3187_v1  ;;  %v7078_v53 = vld [vmem:[%s9334_s1 + $0xb70] ss:$8 sps:$4 sm:$0xff]   ;;  %v7143_v1 = vld [vmem:[%s9334_s1 + $0xba4] ss:$8 sps:$4 sm:$0xff]  }
 0x697   : > { %7386 = vpow2.f32 %v6155_v12  ;;  %v7090_v12 = vld [vmem:[%s9334_s1 + $0xb50] ss:$8 sps:$4 sm:$0xff]  }
 0x698   : > { %v3349_v62 = vadd.f32 %v8697_v30, %v3330_v60  ;;  %v7081_v30 = vld [vmem:[%s9334_s1 + $0xaf0] ss:$8 sps:$4 sm:$0xff]  }
 0x699   : > { %v3983_v60 = vld [vmem:[#allocation2 + $0x12] sm:$0xff] }
 0x69b   : > { %v7381_v54 = vpop.eup %7380 }
 0x69c   : > { %v3379_v31 = vsub.f32 1.0, %v7381_v54  ;;  %v3375_v10 = vmul.f32 %v7381_v54, %v3343_v3  ;;  %v7083_v54 = vld [vmem:[%s9334_s1 + $0xaf4] ss:$8 sps:$4 sm:$0xff]   ;;  %v7086_v3 = vld [vmem:[%s9334_s1 + $0xb64] ss:$8 sps:$4 sm:$0xff]  }
 0x69e   : > { %v3383_v19 = vmul.f32 %v3379_v31, %v8515_v47  ;;  %v7089_v31 = vld [vmem:[%s9334_s1 + $0xae4] ss:$8 sps:$4 sm:$0xff]  }
 0x69f   : > { %v7383_v15 = vpop.eup %7382 }
 0x6a0   : > { %v8701_v61 = vadd.f32 %v3383_v19, %v3375_v10  ;;  %v3380_v28 = vsub.f32 1.0, %v7383_v15  ;;  %v3376_v22 = vmul.f32 %v7383_v15, %v3345_v23  ;;  %v7092_v10 = vld [vmem:[%s9334_s1 + $0xb54] ss:$8 sps:$4 sm:$0xff]   ;;  %v7093_v15 = vld [vmem:[%s9334_s1 + $0xad0] ss:$8 sps:$4 sm:$0xff]  }
 0x6a1   : > { %v7095_v19 = vld [vmem:[%s9334_s1 + $0xad4] ss:$8 sps:$4 sm:$0xff]   ;;  %v7098_v23 = vld [vmem:[%s9334_s1 + $0xb44] ss:$8 sps:$4 sm:$0xff]  }
 0x6a2   : > { %3391 = vst [vmem:[#allocation2 + $0x38] sm:$0xff] %v8701_v61  ;;  %v3384_v27 = vmul.f32 %v3380_v28, %v8520_v57  ;;  %v7101_v28 = vld [vmem:[%s9334_s1 + $0xac4] ss:$8 sps:$4 sm:$0xff]  }
 0x6a3   : > { %v7385_v26 = vpop.eup %7384 }
 0x6a4   : > { %v8706_v20 = vadd.f32 %v3384_v27, %v3376_v22  ;;  %v3381_v47 = vsub.f32 1.0, %v7385_v26  ;;  %v3377_v46 = vmul.f32 %v7385_v26, %v3347_v9  ;;  %v7387_v34 = vpop.eup %7386  ;;  %v7099_v22 = vld [vmem:[%s9334_s1 + $0xac0] ss:$8 sps:$4 sm:$0xff]   ;;  %v7104_v27 = vld [vmem:[%s9334_s1 + $0xb34] ss:$8 sps:$4 sm:$0xff]  }
 0x6a5   : > { %v3366_v42 = vadd.f32 1.0, %v7387_v34  ;;  %v7107_v26 = vld [vmem:[%s9334_s1 + $0xab4] ss:$8 sps:$4 sm:$0xff]   ;;  %v7102_v9 = vld [vmem:[%s9334_s1 + $0xb30] ss:$8 sps:$4 sm:$0xff]  }
 0x6a6   : > { %3392 = vst [vmem:[#allocation2 + $0x40] sm:$0xff] %v8706_v20  ;;  %v3385_v24 = vmul.f32 %v3381_v47, %v8524_v48  ;;  %v7057_v48 = vld [vmem:[%s9334_s1 + $0xa60] ss:$8 sps:$4 sm:$0xff]   ;;  %v3458_v63 = vpack.c.bf16 %v8706_v20, %v8701_v61  ;;  %v7105_v47 = vld [vmem:[%s9334_s1 + $0xab0] ss:$8 sps:$4 sm:$0xff]  }
 0x6a7   : > { %7388 = vrcp.f32 %v3366_v42  ;;  %v3987_v34 = vld [vmem:[#allocation2 + $0x1d] sm:$0xff]  ;;  %v3982_v42 = vld [vmem:[#allocation2 + $0xa] sm:$0xff] }
 0x6a8   : > { %v8711_v13 = vadd.f32 %v3385_v24, %v3377_v46  ;;  %v7110_v46 = vld [vmem:[%s9334_s1 + $0xb24] ss:$8 sps:$4 sm:$0xff]  }
 0x6a9   : > { %v3453_v57 = vld [vmem:[#allocation2 + $0x37] sm:$0xff]  ;;  %v7113_v24 = vld [vmem:[%s9334_s1 + $0xaa4] ss:$8 sps:$4 sm:$0xff]  }
 0x6aa   : > { %3393 = vst [vmem:[#allocation2 + $0x48] sm:$0xff] %v8711_v13  ;;  %v3456_v17 = vpack.c.bf16 %v3453_v57, %v3452_v6  ;;  %v3448_v8 = vld [vmem:[#allocation2 + $0x36] sm:$0xff]  ;;  %v7108_v6 = vld [vmem:[%s9334_s1 + $0xb20] ss:$8 sps:$4 sm:$0xff]  }
 0x6ab   : > { %v7116_v57 = vld [vmem:[%s9334_s1 + $0xb14] ss:$8 sps:$4 sm:$0xff]  }
 0x6ac   : > { %3573 = vmatmul.mubr.bf16.vlgmr.msra.gmra.mxu0 %v3456_v17  ;;  %v7119_v17 = vld [vmem:[%s9334_s1 + $0xa94] ss:$8 sps:$4 sm:$0xff]  }
 0x6ad   : > { %3807 = vmatpush1.bf16.msra.mxu0 %v7054_v55  ;;  %v3449_v11 = vld [vmem:[#allocation2 + $0x3e] sm:$0xff]  ;;  %3582 = vmatprep.mubr.bf16.mxu0 %v7466_v2 }
 0x6ae   : > { %3808 = vmatprep.subr.bf16.mxu0 %v7059_v32  ;;  %v3451_v21 = vpack.c.bf16 %v3449_v11, %v3448_v8  ;;  %v3454_v33 = vld [vmem:[#allocation2 + $0x3f] sm:$0xff]  ;;  %v7114_v32 = vld [vmem:[%s9334_s1 + $0xb10] ss:$8 sps:$4 sm:$0xff]  }
 0x6af   : > { %v7111_v55 = vld [vmem:[%s9334_s1 + $0xaa0] ss:$8 sps:$4 sm:$0xff]   ;;  %v7122_v8 = vld [vmem:[%s9334_s1 + $0xb04] ss:$8 sps:$4 sm:$0xff]  }
 0x6b0   : > { %3716 = vmatmul.mubr.bf16.gmra.mxu1 %v3451_v21  ;;  %v7125_v11 = vld [vmem:[%s9334_s1 + $0xa84] ss:$8 sps:$4 sm:$0xff]   ;;  %v7120_v21 = vld [vmem:[%s9334_s1 + $0xb00] ss:$8 sps:$4 sm:$0xff]  }
 0x6b1   : > { %3809 = vmatpush1.bf16.msra.mxu0 %v7057_v48  ;;  %v3455_v37 = vld [vmem:[#allocation2 + $0x47] sm:$0xff]  ;;  %4107 = vmatprep.mubr.bf16.mxu1 %v7466_v2  ;;  %v7117_v48 = vld [vmem:[%s9334_s1 + $0xa90] ss:$8 sps:$4 sm:$0xff]  }
 0x6b2   : > { %3810 = vmatprep.subr.bf16.mxu0 %v7062_v29  ;;  %v3457_v44 = vpack.c.bf16 %v3455_v37, %v3454_v33  ;;  %v7123_v29 = vld [vmem:[%s9334_s1 + $0xa80] ss:$8 sps:$4 sm:$0xff]  }
 0x6b3   : > { %v3981_v33 = vld [vmem:[#allocation2 + $0x2] sm:$0xff] }
 0x6b4   : > { %3583 = vmatmul.mubr.bf16.gmra.mxu0 %v3457_v44  ;;  %v7389_v58 = vpop.eup %7388  ;;  %v3985_v44 = vpack.c.bf16 %v3982_v42, %v3981_v33 }
 0x6b5   : > { %3811 = vmatpush1.bf16.msra.mxu0 %v7060_v35  ;;  %3838 = vmatprep.mubr.bf16.mxu0 %v7466_v2  ;;  %v3382_v50 = vsub.f32 1.0, %v7389_v58  ;;  %v3378_v5 = vmul.f32 %v7389_v58, %v3349_v62  ;;  %v3988_v35 = vld [vmem:[#allocation2 + $0x25] sm:$0xff]  ;;  %v7140_v58 = vld [vmem:[%s9334_s1 + $0xbb4] ss:$8 sps:$4 sm:$0xff]  }
 0x6b6   : > { %3812 = vmatprep.subr.bf16.mxu0 %v7065_v41  ;;  %v3991_v37 = vpack.c.bf16 %v3988_v35, %v3987_v34  ;;  %v7128_v41 = vld [vmem:[%s9334_s1 + $0xbf4] ss:$8 sps:$4 sm:$0xff]  }
 0x6b7   : > { %v3386_v4 = vmul.f32 %v3382_v50, %v8528_v0  ;;  %v7080_v0 = vld [vmem:[%s9334_s1 + $0xb74] ss:$8 sps:$4 sm:$0xff]  }
 0x6b8   : > { %4075 = vmatprep.subr.bf16.mxu1 %v7080_v0  ;;  %v3984_v50 = vld [vmem:[#allocation2 + $0x1a] sm:$0xff] }
 0x6b9   : > { %3813 = vmatpush1.bf16.msra.mxu0 %v7063_v49  ;;  %v8770_v18 = vadd.f32 %v3386_v4, %v3378_v5  ;;  %4076 = vmatpush1.bf16.msra.mxu1 %v7078_v53  ;;  %v7126_v49 = vld [vmem:[%s9334_s1 + $0xbf0] ss:$8 sps:$4 sm:$0xff]   ;;  %v3986_v62 = vpack.c.bf16 %v3984_v50, %v3983_v60  ;;  %v7149_v5 = vld [vmem:[%s9334_s1 + $0xb84] ss:$8 sps:$4 sm:$0xff]  }
 0x6ba   : > { %3814 = vmatprep.subr.bf16.mxu0 %v7068_v36  ;;  %4077 = vmatprep.subr.bf16.mxu1 %v7086_v3  ;;  %v7131_v36 = vld [vmem:[%s9334_s1 + $0xbe4] ss:$8 sps:$4 sm:$0xff]   ;;  %v7144_v4 = vld [vmem:[%s9334_s1 + $0xb90] ss:$8 sps:$4 sm:$0xff]   ;;  %v3707_v3 = vpop.f32.mrf.mxu1 }
 0x6bb   : > { %v3459_v39 = vpack.c.bf16 %v8770_v18, %v8711_v13 }
 0x6bd   : > { %3815 = vmatpush1.bf16.msra.mxu0 %v7066_v16  ;;  %4078 = vmatpush1.bf16.msra.mxu1 %v7084_v52  ;;  %v7129_v16 = vld [vmem:[%s9334_s1 + $0xbe0] ss:$8 sps:$4 sm:$0xff]   ;;  %v3709_v52 = vpop.f32.mrf.mxu1 }
 0x6be   : > { %3816 = vmatprep.subr.bf16.mxu0 %v7071_v56  ;;  %4079 = vmatprep.subr.bf16.mxu1 %v7092_v10  ;;  %v7134_v56 = vld [vmem:[%s9334_s1 + $0xbd4] ss:$8 sps:$4 sm:$0xff]  }
 0x6bf   : > { %v3711_v10 = vpop.f32.mrf.mxu1 }
 0x6c1   : > { %3817 = vmatpush1.bf16.msra.mxu0 %v7069_v43  ;;  %4080 = vmatpush1.bf16.msra.mxu1 %v7090_v12  ;;  %v7132_v43 = vld [vmem:[%s9334_s1 + $0xbd0] ss:$8 sps:$4 sm:$0xff]   ;;  %v3713_v12 = vpop.f32.mrf.mxu1 }
 0x6c2   : > { %3818 = vmatprep.subr.bf16.mxu0 %v7074_v38  ;;  %4081 = vmatprep.subr.bf16.mxu1 %v7098_v23  ;;  %v7137_v38 = vld [vmem:[%s9334_s1 + $0xbc4] ss:$8 sps:$4 sm:$0xff]  }
 0x6c5   : > { %3819 = vmatpush1.bf16.msra.mxu0 %v7072_v45  ;;  %4082 = vmatpush1.bf16.msra.mxu1 %v7096_v14  ;;  %v7135_v45 = vld [vmem:[%s9334_s1 + $0xbc0] ss:$8 sps:$4 sm:$0xff]  }
 0x6c6   : > { %3820 = vmatprep.subr.bf16.mxu0 %v7077_v40  ;;  %4083 = vmatprep.subr.bf16.mxu1 %v7104_v27  ;;  %v7138_v40 = vld [vmem:[%s9334_s1 + $0xbb0] ss:$8 sps:$4 sm:$0xff]  }
 0x6c9   : > { %3821 = vmatpush1.bf16.msra.mxu0 %v7075_v59  ;;  %4084 = vmatpush1.bf16.msra.mxu1 %v7102_v9  ;;  %v7141_v59 = vld [vmem:[%s9334_s1 + $0xba0] ss:$8 sps:$4 sm:$0xff]  }
 0x6ca   : > { %4208 = vmatprep.subr.bf16.mxu0 %v7083_v54  ;;  %4085 = vmatprep.subr.bf16.mxu1 %v7110_v46 }
 0x6cc   : > { %3839 = vmatmul.mubr.bf16.vlgmr.msra.gmra.mxu0 %v3458_v63  ;;  %v7146_v63 = vld [vmem:[%s9334_s1 + $0xb94] ss:$8 sps:$4 sm:$0xff]  }
 0x6cd   : > { %3848 = vmatprep.mubr.bf16.mxu0 %v7466_v2  ;;  %4209 = vmatpush1.bf16.msra.mxu0 %v7081_v30 }
 0x6ce   : > { %4210 = vmatprep.subr.bf16.mxu0 %v7089_v31  ;;  %4086 = vmatpush1.bf16.msra.mxu1 %v7108_v6 }
 0x6cf   : > { %4087 = vmatprep.subr.bf16.mxu1 %v7116_v57 }
 0x6d1   : > { %4211 = vmatpush1.bf16.msra.mxu0 %v7087_v7 }
 0x6d2   : > { %4212 = vmatprep.subr.bf16.mxu0 %v7095_v19  ;;  %4088 = vmatpush1.bf16.msra.mxu1 %v7114_v32 }
 0x6d3   : > { %4089 = vmatprep.subr.bf16.mxu1 %v7122_v8 }
 0x6d4   : > { %3849 = vmatmul.mubr.bf16.gmra.mxu0 %v3459_v39  ;;  %v7147_v39 = vld [vmem:[%s9334_s1 + $0xb80] ss:$8 sps:$4 sm:$0xff]  }
 0x6d5   : > { %4240 = vmatprep.mubr.bf16.mxu0 %v7466_v2  ;;  %4213 = vmatpush1.bf16.msra.mxu0 %v7093_v15 }
 0x6d6   : > { %4214 = vmatprep.subr.bf16.mxu0 %v7101_v28  ;;  %4090 = vmatpush1.bf16.msra.mxu1 %v7120_v21  ;;  %v6204_v28 = vld [vmem:[%s9335_s2 + $0xc] sm:$0x3] }
 0x6d7   : > { %4341 = vmatprep.subr.bf16.mxu1 %v7128_v41  ;;  %v3875_v27 = vrot.slane %v6204_v28, %v7779_v51 }
 0x6d9   : > { %4215 = vmatpush1.bf16.msra.mxu0 %v7099_v22  ;;  %4108 = vmatmul.mubr.bf16.vlgmr.msra.gmra.mxu1 %v3991_v37 }
 0x6da   : > { %4216 = vmatprep.subr.bf16.mxu0 %v7107_v26  ;;  %4117 = vmatprep.mubr.bf16.mxu1 %v7466_v2 }
 0x6db   : > { %4342 = vmatpush1.bf16.msra.mxu1 %v7126_v49 }
 0x6dc   : > { %4343 = vmatprep.subr.bf16.mxu1 %v7131_v36 }
 0x6dd   : > { %4217 = vmatpush1.bf16.msra.mxu0 %v7105_v47 }
 0x6de   : > { %4218 = vmatprep.subr.bf16.mxu0 %v7113_v24 }
 0x6df   : > { %4344 = vmatpush1.bf16.msra.mxu1 %v7129_v16 }
 0x6e0   : > { %4345 = vmatprep.subr.bf16.mxu1 %v7134_v56 }
 0x6e1   : > { %4219 = vmatpush1.bf16.msra.mxu0 %v7111_v55 }
 0x6e2   : > { %4220 = vmatprep.subr.bf16.mxu0 %v7119_v17 }
 0x6e3   : > { %4346 = vmatpush1.bf16.msra.mxu1 %v7132_v43 }
 0x6e4   : > { %4347 = vmatprep.subr.bf16.mxu1 %v7137_v38 }
 0x6e5   : > { %4221 = vmatpush1.bf16.msra.mxu0 %v7117_v48 }
 0x6e6   : > { %4222 = vmatprep.subr.bf16.mxu0 %v7125_v11 }
 0x6e7   : > { %4348 = vmatpush1.bf16.msra.mxu1 %v7135_v45 }
 0x6e8   : > { %4349 = vmatprep.subr.bf16.mxu1 %v7140_v58 }
 0x6e9   : > { %4223 = vmatpush1.bf16.msra.mxu0 %v7123_v29 }
 0x6eb   : > { %4350 = vmatpush1.bf16.msra.mxu1 %v7138_v40 }
 0x6ec   : > { %4241 = vmatmul.mubr.bf16.vlgmr.msra.gmra.mxu0 %v3985_v44  ;;  %4351 = vmatprep.subr.bf16.mxu1 %v7143_v1 }
 0x6ed   : > { %4250 = vmatprep.mubr.bf16.mxu0 %v7466_v2 }
 0x6ef   : > { %4352 = vmatpush1.bf16.msra.mxu1 %v7141_v59  ;;  %v3871_v59 = vrot.slane %v6204_v28, %v7785_v25 }
 0x6f0   : > { %4353 = vmatprep.subr.bf16.mxu1 %v7146_v63 }
 0x6f3   : > { %4354 = vmatpush1.bf16.msra.mxu1 %v7144_v4 }
 0x6f4   : > { %4251 = vmatmul.mubr.bf16.gmra.mxu0 %v3986_v62  ;;  %4355 = vmatprep.subr.bf16.mxu1 %v7149_v5 }
 0x6f5   : > { %4642 = vmatprep.mubr.bf16.mxu0 %v7466_v2 }
 0x6f7   : > { %4356 = vmatpush1.bf16.msra.mxu1 %v7147_v39 }
 0x76c   : > { %v3574_v53 = vpop.f32.mrf.mxu0 }
 0x76d   : > { %v3708_v40 = vadd.f32 %v3707_v3, %v3574_v53 }
 0x76e   : > { %v3576_v0 = vpop.f32.mrf.mxu0 }
 0x76f   : > { %v3710_v22 = vadd.f32 %v3709_v52, %v3576_v0 }
 0x770   : > { %v8922_v30 = vpop.f32.mrf.mxu0  ;;  %v8928_v23 = vpop.f32.mrf.mxu1 }
 0x771   : > { %v3712_v3 = vadd.f32 %v3711_v10, %v8922_v30 }
 0x772   : > { %v3580_v54 = vpop.f32.mrf.mxu0  ;;  %v3719_v47 = vpop.f32.mrf.mxu1 }
 0x773   : > { %v3714_v24 = vadd.f32 %v3713_v12, %v3580_v54  ;;  %v3989_v12 = vld [vmem:[#allocation2 + $0x2d] sm:$0xff] }
 0x774   : > { %v8924_v31 = vpop.f32.mrf.mxu0  ;;  %v3721_v32 = vpop.f32.mrf.mxu1 }
 0x776   : > { %v3586_v7 = vpop.f32.mrf.mxu0  ;;  %v3723_v35 = vpop.f32.mrf.mxu1 }
 0x777   : > { %v3720_v8 = vadd.f32 %v3719_v47, %v3586_v7  ;;  %v3718_v47 = vadd.f32 %v8928_v23, %v8924_v31 }
 0x778   : > { %v8926_v19 = vpop.f32.mrf.mxu0 }
 0x77a   : > { %v3590_v15 = vpop.f32.mrf.mxu0 }
 0x77b   : > { %v3724_v37 = vadd.f32 %v3723_v35, %v3590_v15  ;;  %v7161_v35 = vld [vmem:[%s9334_s1 + $0xc64] ss:$8 sps:$4 sm:$0xff]  }
 0x78c   : > { %v3840_v14 = vpop.f32.mrf.mxu0 }
 0x78d   : > { %v3859_v1 = vadd.f32 %v3840_v14, %v3708_v40  ;;  %v7177_v40 = vld [vmem:[%s9334_s1 + $0xc30] ss:$8 sps:$4 sm:$0xff]  }
 0x78e   : > { %v3842_v26 = vpop.f32.mrf.mxu0 }
 0x78f   : > { %v3860_v9 = vadd.f32 %v3842_v26, %v3710_v22  ;;  %v3878_v63 = vadd.f32 %v3871_v59, %v3859_v1  ;;  %v7180_v1 = vld [vmem:[%s9334_s1 + $0xca0] ss:$8 sps:$4 sm:$0xff]  }
 0x790   : > { %v3844_v46 = vpop.f32.mrf.mxu0 }
 0x791   : > { %v3879_v6 = vadd.f32 %v3875_v27, %v3860_v9  ;;  %v3861_v52 = vadd.f32 %v3844_v46, %v3712_v3  ;;  %v7200_v3 = vld [vmem:[%s9334_s1 + $0xd74] ss:$8 sps:$4 sm:$0xff]  }
 0x792   : > { %v3846_v55 = vpop.f32.mrf.mxu0 }
 0x793   : > { %v6253_v57 = vmul.f32 -1.442695, %v3879_v6  ;;  %v3862_v17 = vadd.f32 %v3846_v55, %v3714_v24  ;;  %v3880_v28 = vadd.f32 %v3871_v59, %v3861_v52 }
 0x794   : > { %v3850_v48 = vpop.f32.mrf.mxu0 }
 0x795   : > { %7390 = vpow2.f32 %v6253_v57  ;;  %v3881_v11 = vadd.f32 %v3875_v27, %v3862_v17  ;;  %v3863_v24 = vadd.f32 %v3850_v48, %v3718_v47 }
 0x796   : > { %v3852_v21 = vpop.f32.mrf.mxu0 }
 0x797   : > { %v6254_v29 = vmul.f32 -1.442695, %v3881_v11  ;;  %v3864_v34 = vadd.f32 %v3852_v21, %v3720_v8  ;;  %v3882_v57 = vadd.f32 %v3871_v59, %v3863_v24  ;;  %v7155_v11 = vld [vmem:[%s9334_s1 + $0xc74] ss:$8 sps:$4 sm:$0xff]   ;;  %v7153_v21 = vld [vmem:[%s9334_s1 + $0xc70] ss:$8 sps:$4 sm:$0xff]  }
 0x798   : > { %v3854_v33 = vpop.f32.mrf.mxu0  ;;  %4743 = vmatprep.subr.bf16.mxu1 %v7155_v11 }
 0x799   : > { %7392 = vpow2.f32 %v6254_v29  ;;  %v3883_v44 = vadd.f32 %v3875_v27, %v3864_v34  ;;  %v7158_v29 = vld [vmem:[%s9334_s1 + $0xce4] ss:$8 sps:$4 sm:$0xff]   ;;  %v7156_v34 = vld [vmem:[%s9334_s1 + $0xce0] ss:$8 sps:$4 sm:$0xff]   ;;  %v4109_v52 = vpop.f32.mrf.mxu1 }
 0x79a   : > { %v3856_v42 = vpop.f32.mrf.mxu0 }
 0x79b   : > { %v3866_v41 = vadd.f32 %v3856_v42, %v3724_v37  ;;  %v6255_v36 = vmul.f32 -1.442695, %v3883_v44  ;;  %v7164_v37 = vld [vmem:[%s9334_s1 + $0xcd4] ss:$8 sps:$4 sm:$0xff]   ;;  %v7162_v42 = vld [vmem:[%s9334_s1 + $0xcd0] ss:$8 sps:$4 sm:$0xff]  }
 0x79c   : > { %v7167_v44 = vld [vmem:[%s9334_s1 + $0xc54] ss:$8 sps:$4 sm:$0xff]  }
 0x79d   : > { %v3885_v49 = vadd.f32 %v3875_v27, %v3866_v41  ;;  %v7165_v41 = vld [vmem:[%s9334_s1 + $0xc50] ss:$8 sps:$4 sm:$0xff]  }
 0x79f   : > { %v6256_v16 = vmul.f32 -1.442695, %v3885_v49  ;;  %v7170_v49 = vld [vmem:[%s9334_s1 + $0xcc4] ss:$8 sps:$4 sm:$0xff]  }
 0x7a1   : > { %7394 = vpow2.f32 %v6256_v16  ;;  %v7173_v16 = vld [vmem:[%s9334_s1 + $0xc44] ss:$8 sps:$4 sm:$0xff]  }
 0x7a2   : > { %v7391_v56 = vpop.eup %7390  ;;  %7396 = vpow2.f32 %v6255_v36  ;;  %v7168_v36 = vld [vmem:[%s9334_s1 + $0xcc0] ss:$8 sps:$4 sm:$0xff]  }
 0x7a3   : > { %v3898_v43 = vadd.f32 1.0, %v7391_v56  ;;  %v7171_v56 = vld [vmem:[%s9334_s1 + $0xc40] ss:$8 sps:$4 sm:$0xff]  }
 0x7a5   : > { %7398 = vrcp.f32 %v3898_v43  ;;  %v7176_v43 = vld [vmem:[%s9334_s1 + $0xcb4] ss:$8 sps:$4 sm:$0xff]  }
 0x7a6   : > { %v7393_v38 = vpop.eup %7392 }
 0x7a7   : > { %v3899_v45 = vadd.f32 1.0, %v7393_v38  ;;  %v7174_v38 = vld [vmem:[%s9334_s1 + $0xcb0] ss:$8 sps:$4 sm:$0xff]  }
 0x7a9   : > { %7400 = vrcp.f32 %v3899_v45  ;;  %v7179_v45 = vld [vmem:[%s9334_s1 + $0xc34] ss:$8 sps:$4 sm:$0xff]  }
 0x7ae   : > { %v7395_v58 = vpop.eup %7394 }
 0x7af   : > { %v7397_v60 = vpop.eup %7396  ;;  %v3901_v50 = vadd.f32 1.0, %v7395_v58  ;;  %v7182_v58 = vld [vmem:[%s9334_s1 + $0xca4] ss:$8 sps:$4 sm:$0xff]  }
 0x7b0   : > { %v3900_v5 = vadd.f32 1.0, %v7397_v60  ;;  %v7183_v60 = vld [vmem:[%s9334_s1 + $0xc20] ss:$8 sps:$4 sm:$0xff]  }
 0x7b1   : > { %7402 = vrcp.f32 %v3901_v50  ;;  %v7188_v50 = vld [vmem:[%s9334_s1 + $0xc94] ss:$8 sps:$4 sm:$0xff]  }
 0x7b2   : > { %v7399_v62 = vpop.eup %7398  ;;  %7404 = vrcp.f32 %v3900_v5  ;;  %v7194_v5 = vld [vmem:[%s9334_s1 + $0xc84] ss:$8 sps:$4 sm:$0xff]  }
 0x7b3   : > { %v3914_v4 = vsub.f32 1.0, %v7399_v62  ;;  %v3910_v39 = vmul.f32 %v7399_v62, %v3878_v63  ;;  %v7186_v62 = vld [vmem:[%s9334_s1 + $0xc90] ss:$8 sps:$4 sm:$0xff]   ;;  %v7191_v63 = vld [vmem:[%s9334_s1 + $0xc14] ss:$8 sps:$4 sm:$0xff]  }
 0x7b5   : > { %v3918_v0 = vmul.f32 %v3914_v4, %v8701_v61  ;;  %v3722_v61 = vadd.f32 %v3721_v32, %v8926_v19  ;;  %v7189_v4 = vld [vmem:[%s9334_s1 + $0xc10] ss:$8 sps:$4 sm:$0xff]  }
 0x7b6   : > { %v7401_v53 = vpop.eup %7400 }
 0x7b7   : > { %v8936_v54 = vadd.f32 %v3918_v0, %v3910_v39  ;;  %v3915_v7 = vsub.f32 1.0, %v7401_v53  ;;  %v3911_v26 = vmul.f32 %v7401_v53, %v3880_v28  ;;  %v3865_v30 = vadd.f32 %v3854_v33, %v3722_v61  ;;  %v7159_v33 = vld [vmem:[%s9334_s1 + $0xc60] ss:$8 sps:$4 sm:$0xff]   ;;  %v7197_v0 = vld [vmem:[%s9334_s1 + $0xc04] ss:$8 sps:$4 sm:$0xff]  }
 0x7b8   : > { %v7192_v39 = vld [vmem:[%s9334_s1 + $0xc80] ss:$8 sps:$4 sm:$0xff]  }
 0x7b9   : > { %3926 = vst [vmem:[#allocation2 + $0x38] sm:$0xff] %v8936_v54  ;;  %v3919_v22 = vmul.f32 %v3915_v7, %v8706_v20  ;;  %v3884_v55 = vadd.f32 %v3871_v59, %v3865_v30  ;;  %v7185_v59 = vld [vmem:[%s9334_s1 + $0xc24] ss:$8 sps:$4 sm:$0xff]   ;;  %v7195_v53 = vld [vmem:[%s9334_s1 + $0xc00] ss:$8 sps:$4 sm:$0xff]   ;;  %v4111_v7 = vpop.f32.mrf.mxu1 }
 0x7bb   : > { %v8945_v10 = vadd.f32 %v3919_v22, %v3911_v26 }
 0x7bd   : > { %v3993_v20 = vpack.c.bf16 %v8945_v10, %v8936_v54 }
 0x7be   : > { %v7403_v27 = vpop.eup %7402 }
 0x7bf   : > { %v7405_v9 = vpop.eup %7404  ;;  %v3917_v46 = vsub.f32 1.0, %v7403_v27  ;;  %v3913_v17 = vmul.f32 %v7403_v27, %v3884_v55 }
 0x7c0   : > { %v3990_v15 = vld [vmem:[#allocation2 + $0x35] sm:$0xff]  ;;  %v3916_v6 = vsub.f32 1.0, %v7405_v9  ;;  %v3912_v31 = vmul.f32 %v7405_v9, %v3882_v57 }
 0x7c1   : > { %v3992_v14 = vpack.c.bf16 %v3990_v15, %v3989_v12  ;;  %v3921_v19 = vmul.f32 %v3917_v46, %v8770_v18  ;;  %v7152_v18 = vld [vmem:[%s9334_s1 + $0xcf4] ss:$8 sps:$4 sm:$0xff]   ;;  %v4242_v12 = vpop.f32.mrf.mxu0  ;;  %v4113_v15 = vpop.f32.mrf.mxu1  ;;  %v6305_v46 = vld [vmem:[%s9335_s2 + $0xe] sm:$0x3] }
 0x7c2   : > { %v3920_v32 = vmul.f32 %v3916_v6, %v8711_v13  ;;  %v7150_v13 = vld [vmem:[%s9334_s1 + $0xcf0] ss:$8 sps:$4 sm:$0xff]   ;;  %4610 = vmatprep.subr.bf16.mxu0 %v7152_v18  ;;  %v4410_v55 = vrot.slane %v6305_v46, %v7779_v51 }
 0x7c3   : > { %4118 = vmatmul.mubr.bf16.gmra.mxu1 %v3992_v14  ;;  %v8952_v23 = vadd.f32 %v3921_v19, %v3913_v17  ;;  %4611 = vmatpush1.bf16.msra.mxu0 %v7150_v13  ;;  %v4244_v28 = vpop.f32.mrf.mxu0  ;;  %v4115_v14 = vpop.f32.mrf.mxu1 }
 0x7c4   : > { %4373 = vmatprep.mubr.bf16.mxu1 %v7466_v2  ;;  %v8954_v8 = vadd.f32 %v3920_v32, %v3912_v31  ;;  %4612 = vmatprep.subr.bf16.mxu0 %v7158_v29  ;;  %v4245_v6 = vadd.f32 %v4244_v28, %v4111_v7 }
 0x7c5   : > { %v4246_v22 = vpop.f32.mrf.mxu0 }
 0x7c6   : > { %v3994_v48 = vpack.c.bf16 %v8952_v23, %v8954_v8 }
 0x7c7   : > { %4613 = vmatpush1.bf16.msra.mxu0 %v7156_v34  ;;  %v4248_v26 = vpop.f32.mrf.mxu0 }
 0x7c8   : > { %4614 = vmatprep.subr.bf16.mxu0 %v7164_v37  ;;  %v4249_v32 = vadd.f32 %v4248_v26, %v4115_v14 }
 0x7c9   : > { %v4252_v47 = vpop.f32.mrf.mxu0 }
 0x7cb   : > { %4374 = vmatmul.mubr.bf16.vlgmr.msra.gmra.mxu1 %v3993_v20  ;;  %4615 = vmatpush1.bf16.msra.mxu0 %v7162_v42  ;;  %v4254_v20 = vpop.f32.mrf.mxu0 }
 0x7cc   : > { %4383 = vmatprep.mubr.bf16.mxu1 %v7466_v2  ;;  %4744 = vmatpush1.bf16.msra.mxu1 %v7153_v21 }
 0x7cd   : > { %4745 = vmatprep.subr.bf16.mxu1 %v7161_v35  ;;  %4616 = vmatprep.subr.bf16.mxu0 %v7170_v49 }
 0x7cf   : > { %4617 = vmatpush1.bf16.msra.mxu0 %v7168_v36 }
 0x7d0   : > { %4746 = vmatpush1.bf16.msra.mxu1 %v7159_v33  ;;  %4618 = vmatprep.subr.bf16.mxu0 %v7176_v43 }
 0x7d1   : > { %4747 = vmatprep.subr.bf16.mxu1 %v7167_v44 }
 0x7d3   : > { %4384 = vmatmul.mubr.bf16.gmra.mxu1 %v3994_v48  ;;  %4619 = vmatpush1.bf16.msra.mxu0 %v7174_v38  ;;  %v4256_v48 = vpop.f32.mrf.mxu0 }
 0x7d4   : > { %4775 = vmatprep.mubr.bf16.mxu1 %v7466_v2  ;;  %4748 = vmatpush1.bf16.msra.mxu1 %v7165_v41 }
 0x7d5   : > { %4749 = vmatprep.subr.bf16.mxu1 %v7173_v16  ;;  %4620 = vmatprep.subr.bf16.mxu0 %v7182_v58  ;;  %v4258_v35 = vpop.f32.mrf.mxu0 }
 0x7d7   : > { %4621 = vmatpush1.bf16.msra.mxu0 %v7180_v1 }
 0x7d8   : > { %4750 = vmatpush1.bf16.msra.mxu1 %v7171_v56  ;;  %4622 = vmatprep.subr.bf16.mxu0 %v7188_v50  ;;  %v4243_v50 = vadd.f32 %v4242_v12, %v4109_v52 }
 0x7d9   : > { %4751 = vmatprep.subr.bf16.mxu1 %v7179_v45 }
 0x7db   : > { %4623 = vmatpush1.bf16.msra.mxu0 %v7186_v62 }
 0x7dc   : > { %4752 = vmatpush1.bf16.msra.mxu1 %v7177_v40  ;;  %4624 = vmatprep.subr.bf16.mxu0 %v7194_v5 }
 0x7dd   : > { %4753 = vmatprep.subr.bf16.mxu1 %v7185_v59 }
 0x7df   : > { %4625 = vmatpush1.bf16.msra.mxu0 %v7192_v39  ;;  %v4247_v39 = vadd.f32 %v4246_v22, %v4113_v15 }
 0x7e0   : > { %4754 = vmatpush1.bf16.msra.mxu1 %v7183_v60  ;;  %4876 = vmatprep.subr.bf16.mxu0 %v7200_v3 }
 0x7e1   : > { %4755 = vmatprep.subr.bf16.mxu1 %v7191_v63 }
 0x7e4   : > { %4756 = vmatpush1.bf16.msra.mxu1 %v7189_v4  ;;  %v4406_v4 = vrot.slane %v6305_v46, %v7785_v25 }
 0x7e5   : > { %4757 = vmatprep.subr.bf16.mxu1 %v7197_v0 }
 0x7e8   : > { %4758 = vmatpush1.bf16.msra.mxu1 %v7195_v53 }
 0x883   : > { %v4119_v27 = vpop.f32.mrf.mxu1 }
 0x884   : > { %v4253_v28 = vadd.f32 %v4252_v47, %v4119_v27 }
 0x885   : > { %v4121_v61 = vpop.f32.mrf.mxu1 }
 0x886   : > { %v4255_v29 = vadd.f32 %v4254_v20, %v4121_v61 }
 0x887   : > { %v9058_v9 = vpop.f32.mrf.mxu1 }
 0x889   : > { %v4125_v30 = vpop.f32.mrf.mxu1 }
 0x88a   : > { %v4259_v41 = vadd.f32 %v4258_v35, %v4125_v30  ;;  %v7203_v35 = vld [vmem:[%s9334_s1 + $0xd64] ss:$8 sps:$4 sm:$0xff]  }
 0x88b   : > { %v4375_v24 = vpop.f32.mrf.mxu1 }
 0x88c   : > { %v4394_v63 = vadd.f32 %v4375_v24, %v4243_v50  ;;  %v4257_v24 = vadd.f32 %v4256_v48, %v9058_v9  ;;  %v7219_v50 = vld [vmem:[%s9334_s1 + $0xd00] ss:$8 sps:$4 sm:$0xff]  }
 0x88d   : > { %v4377_v19 = vpop.f32.mrf.mxu1 }
 0x88e   : > { %v4395_v57 = vadd.f32 %v4377_v19, %v4245_v6  ;;  %v4413_v53 = vadd.f32 %v4406_v4, %v4394_v63 }
 0x88f   : > { %v4379_v17 = vpop.f32.mrf.mxu1 }
 0x890   : > { %v4414_v31 = vadd.f32 %v4410_v55, %v4395_v57  ;;  %v4396_v7 = vadd.f32 %v4379_v17, %v4247_v39  ;;  %v7227_v39 = vld [vmem:[%s9334_s1 + $0xdf4] ss:$8 sps:$4 sm:$0xff]  }
 0x891   : > { %v4381_v18 = vpop.f32.mrf.mxu1 }
 0x892   : > { %v6354_v13 = vmul.f32 -1.442695, %v4414_v31  ;;  %v4397_v11 = vadd.f32 %v4381_v18, %v4249_v32  ;;  %v4415_v52 = vadd.f32 %v4406_v4, %v4396_v7  ;;  %v7198_v18 = vld [vmem:[%s9334_s1 + $0xd70] ss:$8 sps:$4 sm:$0xff]   ;;  %v7233_v7 = vld [vmem:[%s9334_s1 + $0xde4] ss:$8 sps:$4 sm:$0xff]  }
 0x893   : > { %v4385_v21 = vpop.f32.mrf.mxu1 }
 0x894   : > { %7406 = vpow2.f32 %v6354_v13  ;;  %v4416_v34 = vadd.f32 %v4410_v55, %v4397_v11  ;;  %v4398_v6 = vadd.f32 %v4385_v21, %v4253_v28  ;;  %v7231_v28 = vld [vmem:[%s9334_s1 + $0xde0] ss:$8 sps:$4 sm:$0xff]  }
 0x895   : > { %v4387_v33 = vpop.f32.mrf.mxu1 }
 0x896   : > { %v6355_v37 = vmul.f32 -1.442695, %v4416_v34  ;;  %v4399_v42 = vadd.f32 %v4387_v33, %v4255_v29  ;;  %v4417_v27 = vadd.f32 %v4406_v4, %v4398_v6  ;;  %v7206_v33 = vld [vmem:[%s9334_s1 + $0xd54] ss:$8 sps:$4 sm:$0xff]   ;;  %v7240_v6 = vld [vmem:[%s9334_s1 + $0xe40] ss:$8 sps:$4 sm:$0xff]  }
 0x897   : > { %v4389_v44 = vpop.f32.mrf.mxu1 }
 0x898   : > { %7408 = vpow2.f32 %v6355_v37  ;;  %v4418_v49 = vadd.f32 %v4410_v55, %v4399_v42  ;;  %v4400_v20 = vadd.f32 %v4389_v44, %v4257_v24  ;;  %v7204_v37 = vld [vmem:[%s9334_s1 + $0xd50] ss:$8 sps:$4 sm:$0xff]   ;;  %v7245_v24 = vld [vmem:[%s9334_s1 + $0xdc4] ss:$8 sps:$4 sm:$0xff]  }
 0x899   : > { %v4391_v36 = vpop.f32.mrf.mxu1 }
 0x89a   : > { %v6356_v16 = vmul.f32 -1.442695, %v4418_v49  ;;  %v4401_v56 = vadd.f32 %v4391_v36, %v4259_v41  ;;  %v4419_v9 = vadd.f32 %v4406_v4, %v4400_v20  ;;  %v7224_v4 = vld [vmem:[%s9334_s1 + $0xe74] ss:$8 sps:$4 sm:$0xff]   ;;  %v7254_v20 = vld [vmem:[%s9334_s1 + $0xe24] ss:$8 sps:$4 sm:$0xff]  }
 0x89b   : > { %5145 = vmatprep.subr.bf16.mxu1 %v7224_v4 }
 0x89c   : > { %7410 = vpow2.f32 %v6356_v16  ;;  %v4420_v43 = vadd.f32 %v4410_v55, %v4401_v56  ;;  %v7209_v56 = vld [vmem:[%s9334_s1 + $0xd44] ss:$8 sps:$4 sm:$0xff]  }
 0x89e   : > { %v6357_v38 = vmul.f32 -1.442695, %v4420_v43  ;;  %v7207_v43 = vld [vmem:[%s9334_s1 + $0xd40] ss:$8 sps:$4 sm:$0xff]  }
 0x8a0   : > { %7412 = vpow2.f32 %v6357_v38  ;;  %v7212_v38 = vld [vmem:[%s9334_s1 + $0xd34] ss:$8 sps:$4 sm:$0xff]  }
 0x8a1   : > { %v7407_v45 = vpop.eup %7406 }
 0x8a2   : > { %v4433_v40 = vadd.f32 1.0, %v7407_v45  ;;  %v7210_v45 = vld [vmem:[%s9334_s1 + $0xd30] ss:$8 sps:$4 sm:$0xff]  }
 0x8a4   : > { %7414 = vrcp.f32 %v4433_v40  ;;  %v7215_v40 = vld [vmem:[%s9334_s1 + $0xd24] ss:$8 sps:$4 sm:$0xff]  }
 0x8a5   : > { %v7409_v58 = vpop.eup %7408 }
 0x8a6   : > { %v4434_v1 = vadd.f32 1.0, %v7409_v58  ;;  %v7213_v58 = vld [vmem:[%s9334_s1 + $0xd20] ss:$8 sps:$4 sm:$0xff]  }
 0x8a8   : > { %7416 = vrcp.f32 %v4434_v1  ;;  %v7218_v1 = vld [vmem:[%s9334_s1 + $0xd14] ss:$8 sps:$4 sm:$0xff]  }
 0x8a9   : > { %v7411_v59 = vpop.eup %7410 }
 0x8aa   : > { %v4435_v60 = vadd.f32 1.0, %v7411_v59  ;;  %v7216_v59 = vld [vmem:[%s9334_s1 + $0xd10] ss:$8 sps:$4 sm:$0xff]  }
 0x8ac   : > { %7418 = vrcp.f32 %v4435_v60  ;;  %v7221_v60 = vld [vmem:[%s9334_s1 + $0xd04] ss:$8 sps:$4 sm:$0xff]  }
 0x8ad   : > { %v7413_v62 = vpop.eup %7412 }
 0x8ae   : > { %v4436_v5 = vadd.f32 1.0, %v7413_v62 }
 0x8b0   : > { %7420 = vrcp.f32 %v4436_v5  ;;  %v7222_v5 = vld [vmem:[%s9334_s1 + $0xe70] ss:$8 sps:$4 sm:$0xff]  }
 0x8b1   : > { %v7415_v0 = vpop.eup %7414 }
 0x8b2   : > { %v4449_v3 = vsub.f32 1.0, %v7415_v0  ;;  %v4445_v14 = vmul.f32 %v7415_v0, %v4413_v53  ;;  %v7225_v0 = vld [vmem:[%s9334_s1 + $0xdf0] ss:$8 sps:$4 sm:$0xff]   ;;  %v7230_v53 = vld [vmem:[%s9334_s1 + $0xe64] ss:$8 sps:$4 sm:$0xff]  }
 0x8b4   : > { %v4453_v61 = vmul.f32 %v4449_v3, %v8936_v54  ;;  %v7228_v3 = vld [vmem:[%s9334_s1 + $0xe60] ss:$8 sps:$4 sm:$0xff]  }
 0x8b5   : > { %v7417_v26 = vpop.eup %7416 }
 0x8b6   : > { %v9066_v30 = vadd.f32 %v4453_v61, %v4445_v14  ;;  %v4450_v12 = vsub.f32 1.0, %v7417_v26  ;;  %v4446_v15 = vmul.f32 %v7417_v26, %v4415_v52  ;;  %v7236_v14 = vld [vmem:[%s9334_s1 + $0xe54] ss:$8 sps:$4 sm:$0xff]   ;;  %v7234_v61 = vld [vmem:[%s9334_s1 + $0xe50] ss:$8 sps:$4 sm:$0xff]  }
 0x8b7   : > { %v7239_v26 = vld [vmem:[%s9334_s1 + $0xdd4] ss:$8 sps:$4 sm:$0xff]   ;;  %v7237_v52 = vld [vmem:[%s9334_s1 + $0xdd0] ss:$8 sps:$4 sm:$0xff]  }
 0x8b8   : > { %4461 = vst [vmem:[#allocation2 + $0x38] sm:$0xff] %v9066_v30  ;;  %v4454_v22 = vmul.f32 %v4450_v12, %v8945_v10  ;;  %v7242_v12 = vld [vmem:[%s9334_s1 + $0xe44] ss:$8 sps:$4 sm:$0xff]  }
 0x8b9   : > { %v7419_v46 = vpop.eup %7418 }
 0x8ba   : > { %v9071_v55 = vadd.f32 %v4454_v22, %v4446_v15  ;;  %v4451_v47 = vsub.f32 1.0, %v7419_v46  ;;  %v4447_v54 = vmul.f32 %v7419_v46, %v4417_v27  ;;  %v7243_v15 = vld [vmem:[%s9334_s1 + $0xdc0] ss:$8 sps:$4 sm:$0xff]   ;;  %v7248_v22 = vld [vmem:[%s9334_s1 + $0xe34] ss:$8 sps:$4 sm:$0xff]  }
 0x8bb   : > { %v7246_v46 = vld [vmem:[%s9334_s1 + $0xe30] ss:$8 sps:$4 sm:$0xff]   ;;  %v7251_v27 = vld [vmem:[%s9334_s1 + $0xdb4] ss:$8 sps:$4 sm:$0xff]  }
 0x8bc   : > { %4462 = vst [vmem:[#allocation2 + $0x40] sm:$0xff] %v9071_v55  ;;  %v4455_v19 = vmul.f32 %v4451_v47, %v8954_v8  ;;  %v4528_v62 = vpack.c.bf16 %v9071_v55, %v9066_v30  ;;  %v7249_v47 = vld [vmem:[%s9334_s1 + $0xdb0] ss:$8 sps:$4 sm:$0xff]  }
 0x8bd   : > { %v7421_v57 = vpop.eup %7420 }
 0x8be   : > { %v9075_v17 = vadd.f32 %v4455_v19, %v4447_v54  ;;  %v4452_v32 = vsub.f32 1.0, %v7421_v57  ;;  %v4448_v31 = vmul.f32 %v7421_v57, %v4419_v9  ;;  %v7252_v54 = vld [vmem:[%s9334_s1 + $0xe20] ss:$8 sps:$4 sm:$0xff]   ;;  %v7257_v19 = vld [vmem:[%s9334_s1 + $0xda4] ss:$8 sps:$4 sm:$0xff]  }
 0x8bf   : > { %v4522_v13 = vld [vmem:[#allocation2 + $0x35] sm:$0xff]  ;;  %v7255_v57 = vld [vmem:[%s9334_s1 + $0xda0] ss:$8 sps:$4 sm:$0xff]  }
 0x8c0   : > { %4463 = vst [vmem:[#allocation2 + $0x48] sm:$0xff] %v9075_v17  ;;  %v4456_v10 = vmul.f32 %v4452_v32, %v8952_v23  ;;  %v4516_v21 = vld [vmem:[#allocation2 + $0x32] sm:$0xff]  ;;  %v7201_v23 = vld [vmem:[%s9334_s1 + $0xd60] ss:$8 sps:$4 sm:$0xff]  }
 0x8c1   : > { %v7260_v9 = vld [vmem:[%s9334_s1 + $0xe14] ss:$8 sps:$4 sm:$0xff]   ;;  %v7258_v32 = vld [vmem:[%s9334_s1 + $0xe10] ss:$8 sps:$4 sm:$0xff]  }
 0x8c2   : > { %v9079_v48 = vadd.f32 %v4456_v10, %v4448_v31  ;;  %v7263_v31 = vld [vmem:[%s9334_s1 + $0xd94] ss:$8 sps:$4 sm:$0xff]   ;;  %v7261_v10 = vld [vmem:[%s9334_s1 + $0xd90] ss:$8 sps:$4 sm:$0xff]  }
 0x8c3   : > { %v4523_v11 = vld [vmem:[#allocation2 + $0x3d] sm:$0xff] }
 0x8c4   : > { %v4517_v8 = vld [vmem:[#allocation2 + $0x3a] sm:$0xff]  ;;  %4464 = vst [vmem:[#allocation2 + $0x50] sm:$0xff] %v9079_v48  ;;  %v4526_v29 = vpack.c.bf16 %v4523_v11, %v4522_v13  ;;  %v4529_v63 = vpack.c.bf16 %v9079_v48, %v9075_v17  ;;  %v7269_v11 = vld [vmem:[%s9334_s1 + $0xd84] ss:$8 sps:$4 sm:$0xff]  }
 0x8c5   : > { %v4520_v34 = vpack.c.bf16 %v4517_v8, %v4516_v21  ;;  %v7264_v13 = vld [vmem:[%s9334_s1 + $0xe00] ss:$8 sps:$4 sm:$0xff]   ;;  %v7272_v8 = vld [vmem:[%s9334_s1 + $0xef4] ss:$8 sps:$4 sm:$0xff]  }
 0x8c6   : > { %4643 = vmatmul.mubr.bf16.vlgmr.msra.gmra.mxu0 %v4526_v29  ;;  %v7267_v21 = vld [vmem:[%s9334_s1 + $0xd80] ss:$8 sps:$4 sm:$0xff]  }
 0x8c7   : > { %4776 = vmatmul.mubr.bf16.vlgmr.msra.gmra.mxu1 %v4520_v34  ;;  %4877 = vmatpush1.bf16.msra.mxu0 %v7198_v18  ;;  %v4524_v42 = vld [vmem:[#allocation2 + $0x45] sm:$0xff] }
 0x8c8   : > { %4652 = vmatprep.mubr.bf16.mxu0 %v7466_v2  ;;  %4878 = vmatprep.subr.bf16.mxu0 %v7203_v35  ;;  %v4518_v41 = vld [vmem:[#allocation2 + $0x42] sm:$0xff] }
 0x8c9   : > { %4785 = vmatprep.mubr.bf16.mxu1 %v7466_v2  ;;  %5146 = vmatpush1.bf16.msra.mxu1 %v7222_v5  ;;  %v7266_v18 = vld [vmem:[%s9334_s1 + $0xe04] ss:$8 sps:$4 sm:$0xff]  }
 0x8ca   : > { %5147 = vmatprep.subr.bf16.mxu1 %v7230_v53 }
 0x8cb   : > { %4879 = vmatpush1.bf16.msra.mxu0 %v7201_v23  ;;  %v4525_v44 = vld [vmem:[#allocation2 + $0x4d] sm:$0xff] }
 0x8cc   : > { %v4519_v49 = vld [vmem:[#allocation2 + $0x4a] sm:$0xff]  ;;  %4880 = vmatprep.subr.bf16.mxu0 %v7206_v33  ;;  %v4527_v36 = vpack.c.bf16 %v4525_v44, %v4524_v42 }
 0x8cd   : > { %v4521_v16 = vpack.c.bf16 %v4519_v49, %v4518_v41  ;;  %5148 = vmatpush1.bf16.msra.mxu1 %v7228_v3 }
 0x8ce   : > { %4653 = vmatmul.mubr.bf16.gmra.mxu0 %v4527_v36  ;;  %5149 = vmatprep.subr.bf16.mxu1 %v7236_v14 }
 0x8cf   : > { %4786 = vmatmul.mubr.bf16.gmra.mxu1 %v4521_v16  ;;  %4881 = vmatpush1.bf16.msra.mxu0 %v7204_v37 }
 0x8d0   : > { %4908 = vmatprep.mubr.bf16.mxu0 %v7466_v2  ;;  %4882 = vmatprep.subr.bf16.mxu0 %v7209_v56 }
 0x8d1   : > { %5177 = vmatprep.mubr.bf16.mxu1 %v7466_v2  ;;  %5150 = vmatpush1.bf16.msra.mxu1 %v7234_v61 }
 0x8d2   : > { %5151 = vmatprep.subr.bf16.mxu1 %v7242_v12 }
 0x8d3   : > { %4883 = vmatpush1.bf16.msra.mxu0 %v7207_v43  ;;  %v6406_v43 = vld [vmem:[%s9335_s2 + $0x10] sm:$0x3] }
 0x8d4   : > { %4884 = vmatprep.subr.bf16.mxu0 %v7212_v38 }
 0x8d5   : > { %5152 = vmatpush1.bf16.msra.mxu1 %v7240_v6 }
 0x8d6   : > { %5153 = vmatprep.subr.bf16.mxu1 %v7248_v22 }
 0x8d7   : > { %4885 = vmatpush1.bf16.msra.mxu0 %v7210_v45 }
 0x8d8   : > { %4886 = vmatprep.subr.bf16.mxu0 %v7215_v40  ;;  %v4945_v40 = vrot.slane %v6406_v43, %v7779_v51 }
 0x8d9   : > { %5154 = vmatpush1.bf16.msra.mxu1 %v7246_v46 }
 0x8da   : > { %5155 = vmatprep.subr.bf16.mxu1 %v7254_v20 }
 0x8db   : > { %4887 = vmatpush1.bf16.msra.mxu0 %v7213_v58 }
 0x8dc   : > { %4888 = vmatprep.subr.bf16.mxu0 %v7218_v1 }
 0x8dd   : > { %5156 = vmatpush1.bf16.msra.mxu1 %v7252_v54 }
 0x8de   : > { %5157 = vmatprep.subr.bf16.mxu1 %v7260_v9 }
 0x8df   : > { %4889 = vmatpush1.bf16.msra.mxu0 %v7216_v59 }
 0x8e0   : > { %4890 = vmatprep.subr.bf16.mxu0 %v7221_v60 }
 0x8e1   : > { %5158 = vmatpush1.bf16.msra.mxu1 %v7258_v32 }
 0x8e2   : > { %5159 = vmatprep.subr.bf16.mxu1 %v7266_v18 }
 0x8e3   : > { %4891 = vmatpush1.bf16.msra.mxu0 %v7219_v50 }
 0x8e4   : > { %5278 = vmatprep.subr.bf16.mxu0 %v7227_v39 }
 0x8e5   : > { %5160 = vmatpush1.bf16.msra.mxu1 %v7264_v13 }
 0x8e6   : > { %4909 = vmatmul.mubr.bf16.vlgmr.msra.gmra.mxu0 %v4528_v62  ;;  %5411 = vmatprep.subr.bf16.mxu1 %v7272_v8 }
 0x8e7   : > { %4918 = vmatprep.mubr.bf16.mxu0 %v7466_v2  ;;  %5279 = vmatpush1.bf16.msra.mxu0 %v7225_v0 }
 0x8e8   : > { %5280 = vmatprep.subr.bf16.mxu0 %v7233_v7 }
 0x8eb   : > { %5281 = vmatpush1.bf16.msra.mxu0 %v7231_v28 }
 0x8ec   : > { %5282 = vmatprep.subr.bf16.mxu0 %v7239_v26 }
 0x8ee   : > { %4919 = vmatmul.mubr.bf16.gmra.mxu0 %v4529_v63 }
 0x8ef   : > { %5310 = vmatprep.mubr.bf16.mxu0 %v7466_v2  ;;  %5283 = vmatpush1.bf16.msra.mxu0 %v7237_v52 }
 0x8f0   : > { %5284 = vmatprep.subr.bf16.mxu0 %v7245_v24 }
 0x8f3   : > { %5285 = vmatpush1.bf16.msra.mxu0 %v7243_v15 }
 0x8f4   : > { %5286 = vmatprep.subr.bf16.mxu0 %v7251_v27 }
 0x8f7   : > { %5287 = vmatpush1.bf16.msra.mxu0 %v7249_v47 }
 0x8f8   : > { %5288 = vmatprep.subr.bf16.mxu0 %v7257_v19 }
 0x8fb   : > { %5289 = vmatpush1.bf16.msra.mxu0 %v7255_v57 }
 0x8fc   : > { %5290 = vmatprep.subr.bf16.mxu0 %v7263_v31 }
 0x8ff   : > { %5291 = vmatpush1.bf16.msra.mxu0 %v7261_v10  ;;  %v4941_v10 = vrot.slane %v6406_v43, %v7785_v25 }
 0x900   : > { %5292 = vmatprep.subr.bf16.mxu0 %v7269_v11 }
 0x903   : > { %5293 = vmatpush1.bf16.msra.mxu0 %v7267_v21 }
 0x986   : > { %v4644_v29 = vpop.f32.mrf.mxu0 }
 0x987   : > { %v4777_v23 = vpop.f32.mrf.mxu1 }
 0x988   : > { %v4646_v34 = vpop.f32.mrf.mxu0  ;;  %v4778_v9 = vadd.f32 %v4777_v23, %v4644_v29 }
 0x989   : > { %v4779_v37 = vpop.f32.mrf.mxu1 }
 0x98a   : > { %v4648_v35 = vpop.f32.mrf.mxu0  ;;  %v4780_v45 = vadd.f32 %v4779_v37, %v4646_v34 }
 0x98b   : > { %v4781_v44 = vpop.f32.mrf.mxu1 }
 0x98c   : > { %v4650_v33 = vpop.f32.mrf.mxu0  ;;  %v4782_v13 = vadd.f32 %v4781_v44, %v4648_v35 }
 0x98d   : > { %v4783_v49 = vpop.f32.mrf.mxu1 }
 0x98e   : > { %v4654_v42 = vpop.f32.mrf.mxu0  ;;  %v4784_v50 = vadd.f32 %v4783_v49, %v4650_v33 }
 0x98f   : > { %v4787_v16 = vpop.f32.mrf.mxu1 }
 0x990   : > { %v4656_v41 = vpop.f32.mrf.mxu0  ;;  %v4788_v33 = vadd.f32 %v4787_v16, %v4654_v42 }
 0x991   : > { %v4789_v58 = vpop.f32.mrf.mxu1 }
 0x992   : > { %v9236_v36 = vpop.f32.mrf.mxu0  ;;  %v4790_v53 = vadd.f32 %v4789_v58, %v4656_v41 }
 0x993   : > { %v4791_v63 = vpop.f32.mrf.mxu1 }
 0x994   : > { %v4660_v56 = vpop.f32.mrf.mxu0 }
 0x995   : > { %v4793_v7 = vpop.f32.mrf.mxu1 }
 0x996   : > { %v4794_v52 = vadd.f32 %v4793_v7, %v4660_v56  ;;  %v7275_v7 = vld [vmem:[%s9334_s1 + $0xee4] ss:$8 sps:$4 sm:$0xff]  }
 0x9a6   : > { %v4910_v38 = vpop.f32.mrf.mxu0 }
 0x9a7   : > { %v4929_v31 = vadd.f32 %v4910_v38, %v4778_v9  ;;  %v4792_v38 = vadd.f32 %v4791_v63, %v9236_v36  ;;  %v7291_v9 = vld [vmem:[%s9334_s1 + $0xe80] ss:$8 sps:$4 sm:$0xff]  }
 0x9a8   : > { %v4912_v1 = vpop.f32.mrf.mxu0 }
 0x9a9   : > { %v4930_v59 = vadd.f32 %v4912_v1, %v4780_v45  ;;  %v4948_v21 = vadd.f32 %v4941_v10, %v4929_v31 }
 0x9aa   : > { %v4914_v60 = vpop.f32.mrf.mxu0 }
 0x9ab   : > { %v4949_v62 = vadd.f32 %v4945_v40, %v4930_v59  ;;  %v4931_v34 = vadd.f32 %v4914_v60, %v4782_v13 }
 0x9ac   : > { %v4916_v4 = vpop.f32.mrf.mxu0 }
 0x9ad   : > { %v6455_v5 = vmul.f32 -1.442695, %v4949_v62  ;;  %v4932_v39 = vadd.f32 %v4916_v4, %v4784_v50  ;;  %v4950_v29 = vadd.f32 %v4941_v10, %v4931_v34  ;;  %v7270_v4 = vld [vmem:[%s9334_s1 + $0xef0] ss:$8 sps:$4 sm:$0xff]  }
 0x9ae   : > { %v4920_v0 = vpop.f32.mrf.mxu0 }
 0x9af   : > { %7422 = vpow2.f32 %v6455_v5  ;;  %v4951_v3 = vadd.f32 %v4945_v40, %v4932_v39  ;;  %v4933_v45 = vadd.f32 %v4920_v0, %v4788_v33 }
 0x9b0   : > { %v4922_v28 = vpop.f32.mrf.mxu0 }
 0x9b1   : > { %v6456_v14 = vmul.f32 -1.442695, %v4951_v3  ;;  %v4934_v61 = vadd.f32 %v4922_v28, %v4790_v53  ;;  %v4952_v42 = vadd.f32 %v4941_v10, %v4933_v45  ;;  %v7278_v28 = vld [vmem:[%s9334_s1 + $0xed4] ss:$8 sps:$4 sm:$0xff]  }
 0x9b2   : > { %v4924_v26 = vpop.f32.mrf.mxu0 }
 0x9b3   : > { %7424 = vpow2.f32 %v6456_v14  ;;  %v4953_v12 = vadd.f32 %v4945_v40, %v4934_v61  ;;  %v4935_v58 = vadd.f32 %v4924_v26, %v4792_v38  ;;  %v7276_v14 = vld [vmem:[%s9334_s1 + $0xed0] ss:$8 sps:$4 sm:$0xff]  }
 0x9b4   : > { %v4926_v6 = vpop.f32.mrf.mxu0 }
 0x9b5   : > { %v6457_v24 = vmul.f32 -1.442695, %v4953_v12  ;;  %v4936_v15 = vadd.f32 %v4926_v6, %v4794_v52  ;;  %v4954_v36 = vadd.f32 %v4941_v10, %v4935_v58 }
 0x9b7   : > { %7426 = vpow2.f32 %v6457_v24  ;;  %v4955_v22 = vadd.f32 %v4945_v40, %v4936_v15  ;;  %v7281_v15 = vld [vmem:[%s9334_s1 + $0xec4] ss:$8 sps:$4 sm:$0xff]  }
 0x9b9   : > { %v6458_v46 = vmul.f32 -1.442695, %v4955_v22  ;;  %v7279_v22 = vld [vmem:[%s9334_s1 + $0xec0] ss:$8 sps:$4 sm:$0xff]  }
 0x9bb   : > { %7428 = vpow2.f32 %v6458_v46  ;;  %v7284_v46 = vld [vmem:[%s9334_s1 + $0xeb4] ss:$8 sps:$4 sm:$0xff]  }
 0x9bc   : > { %v7423_v27 = vpop.eup %7422 }
 0x9bd   : > { %v4968_v47 = vadd.f32 1.0, %v7423_v27  ;;  %v7282_v27 = vld [vmem:[%s9334_s1 + $0xeb0] ss:$8 sps:$4 sm:$0xff]  }
 0x9bf   : > { %7430 = vrcp.f32 %v4968_v47  ;;  %v7287_v47 = vld [vmem:[%s9334_s1 + $0xea4] ss:$8 sps:$4 sm:$0xff]  }
 0x9c0   : > { %v7425_v20 = vpop.eup %7424 }
 0x9c1   : > { %v4969_v54 = vadd.f32 1.0, %v7425_v20  ;;  %v7285_v20 = vld [vmem:[%s9334_s1 + $0xea0] ss:$8 sps:$4 sm:$0xff]  }
 0x9c3   : > { %7432 = vrcp.f32 %v4969_v54  ;;  %v7290_v54 = vld [vmem:[%s9334_s1 + $0xe94] ss:$8 sps:$4 sm:$0xff]  }
 0x9c4   : > { %v7427_v19 = vpop.eup %7426 }
 0x9c5   : > { %v4970_v57 = vadd.f32 1.0, %v7427_v19  ;;  %v7288_v19 = vld [vmem:[%s9334_s1 + $0xe90] ss:$8 sps:$4 sm:$0xff]  }
 0x9c7   : > { %7434 = vrcp.f32 %v4970_v57  ;;  %v7293_v57 = vld [vmem:[%s9334_s1 + $0xe84] ss:$8 sps:$4 sm:$0xff]  }
 0x9c8   : > { %v7429_v32 = vpop.eup %7428 }
 0x9c9   : > { %v4971_v18 = vadd.f32 1.0, %v7429_v32 }
 0x9cb   : > { %7436 = vrcp.f32 %v4971_v18 }
 0x9cc   : > { %v7431_v11 = vpop.eup %7430 }
 0x9cd   : > { %v4984_v8 = vsub.f32 1.0, %v7431_v11  ;;  %v4980_v37 = vmul.f32 %v7431_v11, %v4948_v21 }
 0x9cf   : > { %v4988_v41 = vmul.f32 %v4984_v8, %v9066_v30 }
 0x9d0   : > { %v7433_v49 = vpop.eup %7432 }
 0x9d1   : > { %v9244_v56 = vadd.f32 %v4988_v41, %v4980_v37  ;;  %v4985_v23 = vsub.f32 1.0, %v7433_v49  ;;  %v4981_v35 = vmul.f32 %v7433_v49, %v4950_v29 }
 0x9d3   : > { %4996 = vst [vmem:[#allocation2 + $0x38] sm:$0xff] %v9244_v56  ;;  %v4989_v44 = vmul.f32 %v4985_v23, %v9071_v55 }
 0x9d4   : > { %v7435_v43 = vpop.eup %7434 }
 0x9d5   : > { %v9249_v40 = vadd.f32 %v4989_v44, %v4981_v35  ;;  %v4986_v16 = vsub.f32 1.0, %v7435_v43  ;;  %v4982_v30 = vmul.f32 %v7435_v43, %v4952_v42 }
 0x9d7   : > { %4997 = vst [vmem:[#allocation2 + $0x40] sm:$0xff] %v9249_v40  ;;  %v4990_v1 = vmul.f32 %v4986_v16, %v9075_v17  ;;  %v5063_v32 = vpack.c.bf16 %v9249_v40, %v9244_v56 }
 0x9d8   : > { %v7437_v59 = vpop.eup %7436 }
 0x9d9   : > { %v9253_v60 = vadd.f32 %v4990_v1, %v4982_v30  ;;  %v4987_v50 = vsub.f32 1.0, %v7437_v59  ;;  %v4983_v62 = vmul.f32 %v7437_v59, %v4954_v36 }
 0x9da   : > { %v5057_v5 = vld [vmem:[#allocation2 + $0x35] sm:$0xff] }
 0x9db   : > { %4998 = vst [vmem:[#allocation2 + $0x48] sm:$0xff] %v9253_v60  ;;  %v4991_v55 = vmul.f32 %v4987_v50, %v9079_v48  ;;  %v5051_v0 = vld [vmem:[#allocation2 + $0x32] sm:$0xff]  ;;  %v7273_v48 = vld [vmem:[%s9334_s1 + $0xee0] ss:$8 sps:$4 sm:$0xff]  }
 0x9dd   : > { %v9257_v63 = vadd.f32 %v4991_v55, %v4983_v62 }
 0x9de   : > { %v5058_v39 = vld [vmem:[#allocation2 + $0x3d] sm:$0xff] }
 0x9df   : > { %v5052_v17 = vld [vmem:[#allocation2 + $0x3a] sm:$0xff]  ;;  %4999 = vst [vmem:[#allocation2 + $0x50] sm:$0xff] %v9257_v63  ;;  %v5061_v53 = vpack.c.bf16 %v5058_v39, %v5057_v5  ;;  %v5064_v31 = vpack.c.bf16 %v9257_v63, %v9253_v60 }
 0x9e0   : > { %v5055_v3 = vpack.c.bf16 %v5052_v17, %v5051_v0 }
 0x9e1   : > { %5178 = vmatmul.mubr.bf16.vlgmr.msra.gmra.mxu1 %v5061_v53 }
 0x9e2   : > { %5311 = vmatmul.mubr.bf16.vlgmr.msra.gmra.mxu0 %v5055_v3  ;;  %5412 = vmatpush1.bf16.msra.mxu1 %v7270_v4  ;;  %v5059_v61 = vld [vmem:[#allocation2 + $0x45] sm:$0xff] }
 0x9e3   : > { %5187 = vmatprep.mubr.bf16.mxu1 %v7466_v2  ;;  %5413 = vmatprep.subr.bf16.mxu1 %v7275_v7  ;;  %v5053_v52 = vld [vmem:[#allocation2 + $0x42] sm:$0xff] }
 0x9e4   : > { %5320 = vmatprep.mubr.bf16.mxu0 %v7466_v2 }
 0x9e6   : > { %5414 = vmatpush1.bf16.msra.mxu1 %v7273_v48  ;;  %v5060_v26 = vld [vmem:[#allocation2 + $0x4d] sm:$0xff] }
 0x9e7   : > { %v5054_v12 = vld [vmem:[#allocation2 + $0x4a] sm:$0xff]  ;;  %5415 = vmatprep.subr.bf16.mxu1 %v7278_v28  ;;  %v5062_v6 = vpack.c.bf16 %v5060_v26, %v5059_v61 }
 0x9e8   : > { %v5056_v24 = vpack.c.bf16 %v5054_v12, %v5053_v52 }
 0x9e9   : > { %5188 = vmatmul.mubr.bf16.gmra.mxu1 %v5062_v6 }
 0x9ea   : > { %5321 = vmatmul.mubr.bf16.gmra.mxu0 %v5056_v24  ;;  %5416 = vmatpush1.bf16.msra.mxu1 %v7276_v14 }
 0x9eb   : > { %5443 = vmatprep.mubr.bf16.mxu1 %v7466_v2  ;;  %5417 = vmatprep.subr.bf16.mxu1 %v7281_v15 }
 0x9ee   : > { %5418 = vmatpush1.bf16.msra.mxu1 %v7279_v22 }
 0x9ef   : > { %5419 = vmatprep.subr.bf16.mxu1 %v7284_v46 }
 0x9f2   : > { %5420 = vmatpush1.bf16.msra.mxu1 %v7282_v27 }
 0x9f3   : > { %5421 = vmatprep.subr.bf16.mxu1 %v7287_v47 }
 0x9f6   : > { %5422 = vmatpush1.bf16.msra.mxu1 %v7285_v20 }
 0x9f7   : > { %5423 = vmatprep.subr.bf16.mxu1 %v7290_v54 }
 0x9fa   : > { %5424 = vmatpush1.bf16.msra.mxu1 %v7288_v19 }
 0x9fb   : > { %5425 = vmatprep.subr.bf16.mxu1 %v7293_v57 }
 0x9fe   : > { %5426 = vmatpush1.bf16.msra.mxu1 %v7291_v9 }
 0xa01   : > { %5444 = vmatmul.mubr.bf16.vlgmr.msra.gmra.mxu1 %v5063_v32 }
 0xa02   : > { %5453 = vmatprep.mubr.bf16.mxu1 %v7466_v2  ;;  %v6507_v2 = vld [vmem:[%s9335_s2 + $0x12] sm:$0x3] }
 0xa03   : > { %v5480_v35 = vrot.slane %v6507_v2, %v7779_v51  ;;  %v5476_v47 = vrot.slane %v6507_v2, %v7785_v25 }
 0xa09   : > { %5454 = vmatmul.mubr.bf16.gmra.mxu1 %v5064_v31 }
 0xaa1   : > { %v5179_v10 = vpop.f32.mrf.mxu1 }
 0xaa2   : > { %v5312_v11 = vpop.f32.mrf.mxu0 }
 0xaa3   : > { %v5181_v18 = vpop.f32.mrf.mxu1  ;;  %v5313_v22 = vadd.f32 %v5312_v11, %v5179_v10 }
 0xaa4   : > { %v5314_v8 = vpop.f32.mrf.mxu0 }
 0xaa5   : > { %v5183_v13 = vpop.f32.mrf.mxu1  ;;  %v5315_v38 = vadd.f32 %v5314_v8, %v5181_v18 }
 0xaa6   : > { %v5316_v33 = vpop.f32.mrf.mxu0 }
 0xaa7   : > { %v5185_v21 = vpop.f32.mrf.mxu1  ;;  %v5317_v54 = vadd.f32 %v5316_v33, %v5183_v13 }
 0xaa8   : > { %v5318_v41 = vpop.f32.mrf.mxu0 }
 0xaa9   : > { %v5189_v34 = vpop.f32.mrf.mxu1  ;;  %v5319_v58 = vadd.f32 %v5318_v41, %v5185_v21 }
 0xaaa   : > { %v5322_v29 = vpop.f32.mrf.mxu0 }
 0xaab   : > { %v5191_v37 = vpop.f32.mrf.mxu1  ;;  %v5323_v31 = vadd.f32 %v5322_v29, %v5189_v34 }
 0xaac   : > { %v5324_v44 = vpop.f32.mrf.mxu0 }
 0xaad   : > { %v9313_v49 = vpop.f32.mrf.mxu1  ;;  %v5325_v55 = vadd.f32 %v5324_v44, %v5191_v37 }
 0xaae   : > { %v5326_v1 = vpop.f32.mrf.mxu0 }
 0xaaf   : > { %v5195_v23 = vpop.f32.mrf.mxu1  ;;  %v5327_v13 = vadd.f32 %v5326_v1, %v9313_v49 }
 0xab0   : > { %v5328_v5 = vpop.f32.mrf.mxu0 }
 0xab1   : > { %v5329_v51 = vadd.f32 %v5328_v5, %v5195_v23 }
 0xac1   : > { %v5445_v45 = vpop.f32.mrf.mxu1 }
 0xac2   : > { %v5464_v27 = vadd.f32 %v5445_v45, %v5313_v22 }
 0xac3   : > { %v5447_v43 = vpop.f32.mrf.mxu1 }
 0xac4   : > { %v5465_v42 = vadd.f32 %v5447_v43, %v5315_v38  ;;  %v5483_v57 = vadd.f32 %v5476_v47, %v5464_v27 }
 0xac5   : > { %v5449_v16 = vpop.f32.mrf.mxu1 }
 0xac6   : > { %v5484_v30 = vadd.f32 %v5480_v35, %v5465_v42  ;;  %v5466_v32 = vadd.f32 %v5449_v16, %v5317_v54 }
 0xac7   : > { %v5451_v59 = vpop.f32.mrf.mxu1 }
 0xac8   : > { %v6556_v36 = vmul.f32 -1.442695, %v5484_v30  ;;  %v5467_v50 = vadd.f32 %v5451_v59, %v5319_v58  ;;  %v5485_v11 = vadd.f32 %v5476_v47, %v5466_v32 }
 0xac9   : > { %v5455_v62 = vpop.f32.mrf.mxu1 }
 0xaca   : > { %7438 = vpow2.f32 %v6556_v36  ;;  %v5486_v4 = vadd.f32 %v5480_v35, %v5467_v50  ;;  %v5468_v37 = vadd.f32 %v5455_v62, %v5323_v31 }
 0xacb   : > { %v5457_v39 = vpop.f32.mrf.mxu1 }
 0xacc   : > { %v6557_v0 = vmul.f32 -1.442695, %v5486_v4  ;;  %v5469_v17 = vadd.f32 %v5457_v39, %v5325_v55  ;;  %v5487_v23 = vadd.f32 %v5476_v47, %v5468_v37 }
 0xacd   : > { %v5459_v53 = vpop.f32.mrf.mxu1 }
 0xace   : > { %7440 = vpow2.f32 %v6557_v0  ;;  %v5488_v3 = vadd.f32 %v5480_v35, %v5469_v17  ;;  %v5470_v2 = vadd.f32 %v5459_v53, %v5327_v13 }
 0xacf   : > { %v5461_v7 = vpop.f32.mrf.mxu1 }
 0xad0   : > { %v6558_v48 = vmul.f32 -1.442695, %v5488_v3  ;;  %v5471_v28 = vadd.f32 %v5461_v7, %v5329_v51  ;;  %v5489_v43 = vadd.f32 %v5476_v47, %v5470_v2 }
 0xad2   : > { %7442 = vpow2.f32 %v6558_v48  ;;  %v5490_v14 = vadd.f32 %v5480_v35, %v5471_v28 }
 0xad4   : > { %v6559_v61 = vmul.f32 -1.442695, %v5490_v14 }
 0xad6   : > { %7444 = vpow2.f32 %v6559_v61 }
 0xad7   : > { %v7439_v26 = vpop.eup %7438 }
 0xad8   : > { %v5503_v52 = vadd.f32 1.0, %v7439_v26 }
 0xada   : > { %7446 = vrcp.f32 %v5503_v52 }
 0xadb   : > { %v7441_v12 = vpop.eup %7440 }
 0xadc   : > { %v5504_v6 = vadd.f32 1.0, %v7441_v12 }
 0xade   : > { %7448 = vrcp.f32 %v5504_v6 }
 0xadf   : > { %v7443_v24 = vpop.eup %7442 }
 0xae0   : > { %v5505_v15 = vadd.f32 1.0, %v7443_v24 }
 0xae2   : > { %7450 = vrcp.f32 %v5505_v15 }
 0xae3   : > { %v7445_v46 = vpop.eup %7444 }
 0xae4   : > { %v5506_v20 = vadd.f32 1.0, %v7445_v46 }
 0xae6   : > { %7452 = vrcp.f32 %v5506_v20 }
 0xae7   : > { %v7447_v19 = vpop.eup %7446 }
 0xae8   : > { %v5519_v9 = vsub.f32 1.0, %v7447_v19  ;;  %v5515_v18 = vmul.f32 %v7447_v19, %v5483_v57 }
 0xaea   : > { %v5523_v21 = vmul.f32 %v5519_v9, %v9244_v56 }
 0xaeb   : > { %v7449_v8 = vpop.eup %7448 }
 0xaec   : > { %v5527_v10 = vadd.f32 %v5523_v21, %v5515_v18  ;;  %v5520_v25 = vsub.f32 1.0, %v7449_v8  ;;  %v5516_v33 = vmul.f32 %v7449_v8, %v5485_v11 }
 0xaee   : > { %5531 = vst [vmem:[%s170_s14] sm:$0xff] %v5527_v10  ;;  %v5524_v41 = vmul.f32 %v5520_v25, %v9249_v40 }
 0xaef   : > { %v7451_v34 = vpop.eup %7450 }
 0xaf0   : > { %v5528_v29 = vadd.f32 %v5524_v41, %v5516_v33  ;;  %v5521_v56 = vsub.f32 1.0, %v7451_v34  ;;  %v5517_v45 = vmul.f32 %v7451_v34, %v5487_v23 }
 0xaf2   : > { %5532 = vst [vmem:[%s170_s14 + $0x8] sm:$0xff] %v5528_v29  ;;  %v5525_v38 = vmul.f32 %v5521_v56, %v9253_v60 }
 0xaf3   : > { %v7453_v35 = vpop.eup %7452 }
 0xaf4   : > { %v5529_v44 = vadd.f32 %v5525_v38, %v5517_v45  ;;  %v5522_v42 = vsub.f32 1.0, %v7453_v35  ;;  %v5518_v16 = vmul.f32 %v7453_v35, %v5489_v43 }
 0xaf6   : > { %5533 = vst [vmem:[%s170_s14 + $0x10] sm:$0xff] %v5529_v44  ;;  %v5526_v49 = vmul.f32 %v5522_v42, %v9257_v63 }
 0xaf8   : > { %v5530_v58 = vadd.f32 %v5526_v49, %v5518_v16 }
 0xafa   : > { %5534 = vst [vmem:[%s170_s14 + $0x18] sm:$0xff] %v5530_v58 }
 0xafb PF: > { %s13_s12 = sadd.s32 1, %s7464_s12  }
 0xafc   : > { %p10_p4 = scmp.ge.s32.totalorder %s13_s12, 4  }
 0xafe   :  { %12 = sbr.rel (!%p10_p4) target bundleno = 1 (0x1), region = 80 }

// kernel: decoder_forward.8
= control target key start
LH: loop header
LB: loop body
LE: loop exit
PB: predicated region body
PF: predicated region fallthrough
CT: control target
= control target key end

     0   :  { %s4588_s12 = smov 0   ;;  %s5708_s0 = inlined_call_operand.vmem [shape: f32[2,32,128], index: 0, kind: input, shape index: {}]   ;;  %s5709_s1 = inlined_call_operand.vmem [shape: bf16[6,384,256], index: 1, kind: input, shape index: {}]   ;;  %s5710_s2 = inlined_call_operand.vmem [shape: f32[6,1,256], index: 2, kind: input, shape index: {}]   ;;  %s5711_s3 = inlined_call_operand.vmem [shape: f32[2,32,128], index: 3, kind: output, shape index: {}]  }
   0x1 LB: > { %s3450_s13 = sadd.s32 4294967295, %s4564_s12   ;;  %p3454_p0 = scmp.ge.s32.totalorder %s4564_s12, 1  ;;  %s4564_s12 = sphi %s4588_s12, %s13_s12  }
   0x2   : > { %p137_p1 = scmp.lt.s32.totalorder %s4564_s12, 3 }
   0x4   : > { %p138_p2 = pnand %p3454_p0, %p137_p1 }
   0x5   : > { %p161_p3 = scmp.lt.s32.totalorder (!%p138_p2), %s3450_s13, 1 }
   0x6   : > { %141 = sbr.rel (%p138_p2) target bundleno = 1710 (0x6ae), region = 32 }
   0xb   : > { %v4030_v0 = vld [vmem:[%s5709_s1 + $0xf4] ss:$8 sps:$4 sm:$0xff]   ;;  %v4566_v2 = vmov 0   ;;  %v4034_v3 = vld [vmem:[%s5709_s1 + $0xf0] ss:$8 sps:$4 sm:$0xff]   ;;  %v4567_v5 = vmov 0.0  }
   0xc   : > { %v4032_v1 = vld [vmem:[%s5709_s1 + $0x74] ss:$8 sps:$4 sm:$0xff]   ;;  %362 = vmatprep.mubr.bf16.mxu0 %v4566_v2  ;;  %495 = vmatprep.mubr.bf16.mxu1 %v4566_v2  ;;  %v4035_v4 = vld [vmem:[%s5709_s1 + $0x70] ss:$8 sps:$4 sm:$0xff]   ;;  %178 = vst [vmem:[#allocation2 + $0x30] sm:$0xff] %v4567_v5  ;;  %172 = vst [vmem:[#allocation2] sm:$0xff] %v4567_v5 }
   0xd   : > { %330 = vmatprep.subr.bf16.mxu0 %v4030_v0  ;;  %173 = vst [vmem:[#allocation2 + $0x8] sm:$0xff] %v4567_v5  ;;  %174 = vst [vmem:[#allocation2 + $0x10] sm:$0xff] %v4567_v5  ;;  %463 = vmatprep.subr.bf16.mxu1 %v4032_v1  ;;  %v4036_v6 = vld [vmem:[%s5709_s1 + $0xe4] ss:$8 sps:$4 sm:$0xff]   ;;  %v4040_v8 = vld [vmem:[%s5709_s1 + $0xe0] ss:$8 sps:$4 sm:$0xff]  }
   0xe   : > { %175 = vst [vmem:[#allocation2 + $0x18] sm:$0xff] %v4567_v5  ;;  %176 = vst [vmem:[#allocation2 + $0x20] sm:$0xff] %v4567_v5  ;;  %331 = vmatpush1.bf16.msra.mxu0 %v4034_v3  ;;  %464 = vmatpush1.bf16.msra.mxu1 %v4035_v4  ;;  %v4038_v7 = vld [vmem:[%s5709_s1 + $0x64] ss:$8 sps:$4 sm:$0xff]   ;;  %v4041_v9 = vld [vmem:[%s5709_s1 + $0x60] ss:$8 sps:$4 sm:$0xff]  }
   0xf   : > { %177 = vst [vmem:[#allocation2 + $0x28] sm:$0xff] %v4567_v5  ;;  %332 = vmatprep.subr.bf16.mxu0 %v4036_v6  ;;  %465 = vmatprep.subr.bf16.mxu1 %v4038_v7  ;;  %v4042_v10 = vld [vmem:[%s5709_s1 + $0xd4] ss:$8 sps:$4 sm:$0xff]   ;;  %v4046_v12 = vld [vmem:[%s5709_s1 + $0xd0] ss:$8 sps:$4 sm:$0xff]   ;;  %s5713_s13 = smov (!%p161_p3, %s3450_s13), 1 }
  0x10   : > { %v4044_v11 = vld [vmem:[%s5709_s1 + $0x54] ss:$8 sps:$4 sm:$0xff]   ;;  %v4047_v13 = vld [vmem:[%s5709_s1 + $0x50] ss:$8 sps:$4 sm:$0xff]   ;;  %v4048_v14 = vld [vmem:[%s5709_s1 + $0xc4] ss:$8 sps:$4 sm:$0xff]  }
  0x11   : > { %v4050_v15 = vld [vmem:[%s5709_s1 + $0x44] ss:$8 sps:$4 sm:$0xff]   ;;  %v4052_v16 = vld [vmem:[%s5709_s1 + $0xc0] ss:$8 sps:$4 sm:$0xff]   ;;  %v4054_v18 = vld [vmem:[%s5709_s1 + $0xb4] ss:$8 sps:$4 sm:$0xff]  }
  0x12   : > { %333 = vmatpush1.bf16.msra.mxu0 %v4040_v8  ;;  %466 = vmatpush1.bf16.msra.mxu1 %v4041_v9  ;;  %v4053_v17 = vld [vmem:[%s5709_s1 + $0x40] ss:$8 sps:$4 sm:$0xff]   ;;  %v4056_v19 = vld [vmem:[%s5709_s1 + $0x34] ss:$8 sps:$4 sm:$0xff]   ;;  %v4058_v20 = vld [vmem:[%s5709_s1 + $0xb0] ss:$8 sps:$4 sm:$0xff]  }
  0x13   : > { %334 = vmatprep.subr.bf16.mxu0 %v4042_v10  ;;  %467 = vmatprep.subr.bf16.mxu1 %v4044_v11  ;;  %v4059_v21 = vld [vmem:[%s5709_s1 + $0x30] ss:$8 sps:$4 sm:$0xff]   ;;  %s4018_s29 = sshll.u32 %s5713_s13, 5  ;;  %v4060_v22 = vld [vmem:[%s5709_s1 + $0xa4] ss:$8 sps:$4 sm:$0xff]  }
  0x14   : > { %v4062_v23 = vld [vmem:[%s5709_s1 + $0x24] ss:$8 sps:$4 sm:$0xff]   ;;  %s165_s9 = scalar_lea.vmem %s5708_s0, %s4018_s29  ;;  %v4064_v24 = vld [vmem:[%s5709_s1 + $0xa0] ss:$8 sps:$4 sm:$0xff]   ;;  %v4066_v26 = vld [vmem:[%s5709_s1 + $0x94] ss:$8 sps:$4 sm:$0xff]   ;;  %s170_s4 = scalar_lea.vmem %s5711_s3, %s4018_s29 }
  0x15   : > { %v4065_v25 = vld [vmem:[%s5709_s1 + $0x20] ss:$8 sps:$4 sm:$0xff]   ;;  %v4068_v27 = vld [vmem:[%s5709_s1 + $0x14] ss:$8 sps:$4 sm:$0xff]   ;;  %v4070_v32 = vld [vmem:[%s5709_s1 + $0x90] ss:$8 sps:$4 sm:$0xff]  }
  0x16   : > { %335 = vmatpush1.bf16.msra.mxu0 %v4046_v12  ;;  %468 = vmatpush1.bf16.msra.mxu1 %v4047_v13  ;;  %v4688_v28 = vld [vmem:[%s165_s9] sm:$0xff]  ;;  %v4690_v29 = vld [vmem:[%s165_s9 + $0x8] sm:$0xff]  ;;  %v4692_v30 = vld [vmem:[%s165_s9 + $0x10] sm:$0xff] }
  0x17   : > { %336 = vmatprep.subr.bf16.mxu0 %v4048_v14  ;;  %469 = vmatprep.subr.bf16.mxu1 %v4050_v15  ;;  %v4694_v31 = vld [vmem:[%s165_s9 + $0x18] sm:$0xff]  ;;  %183 = vst [vmem:[#allocation2 + $0x38] sm:$0xff] %v4688_v28  ;;  %184 = vst [vmem:[#allocation2 + $0x40] sm:$0xff] %v4690_v29  ;;  %v4072_v34 = vld [vmem:[%s5709_s1 + $0x84] ss:$8 sps:$4 sm:$0xff]   ;;  %v248_v3 = vpack.c.bf16 %v4690_v29, %v4688_v28 }
  0x18   : > { %v4071_v33 = vld [vmem:[%s5709_s1 + $0x10] ss:$8 sps:$4 sm:$0xff]   ;;  %185 = vst [vmem:[#allocation2 + $0x48] sm:$0xff] %v4692_v30  ;;  %186 = vst [vmem:[#allocation2 + $0x50] sm:$0xff] %v4694_v31  ;;  %v4074_v35 = vld [vmem:[%s5709_s1 + $0x4] ss:$8 sps:$4 sm:$0xff]   ;;  %v249_v4 = vpack.c.bf16 %v4694_v31, %v4692_v30 }
  0x19   : > { %v4076_v36 = vld [vmem:[%s5709_s1 + $0x80] ss:$8 sps:$4 sm:$0xff]   ;;  %v4080_v38 = vld [vmem:[%s5709_s1 + $0x174] ss:$8 sps:$4 sm:$0xff]   ;;  %v4078_v45 = vld [vmem:[%s5709_s1 + $0x170] ss:$8 sps:$4 sm:$0xff]  }
  0x1a   : > { %337 = vmatpush1.bf16.msra.mxu0 %v4052_v16  ;;  %470 = vmatpush1.bf16.msra.mxu1 %v4053_v17  ;;  %v4077_v37 = vld [vmem:[%s5709_s1] ss:$8 sps:$4 sm:$0xff]   ;;  %v4083_v46 = vld [vmem:[%s5709_s1 + $0x164] ss:$8 sps:$4 sm:$0xff]   ;;  %v4086_v50 = vld [vmem:[%s5709_s1 + $0x154] ss:$8 sps:$4 sm:$0xff]  }
  0x1b   : > { %338 = vmatprep.subr.bf16.mxu0 %v4054_v18  ;;  %471 = vmatprep.subr.bf16.mxu1 %v4056_v19  ;;  %v4081_v47 = vld [vmem:[%s5709_s1 + $0x160] ss:$8 sps:$4 sm:$0xff]   ;;  %v4084_v53 = vld [vmem:[%s5709_s1 + $0x150] ss:$8 sps:$4 sm:$0xff]   ;;  %v4089_v54 = vld [vmem:[%s5709_s1 + $0x144] ss:$8 sps:$4 sm:$0xff]  }
  0x1c   : > { %v4087_v57 = vld [vmem:[%s5709_s1 + $0x140] ss:$8 sps:$4 sm:$0xff]   ;;  %v4092_v58 = vld [vmem:[%s5709_s1 + $0x134] ss:$8 sps:$4 sm:$0xff]   ;;  %v4090_v59 = vld [vmem:[%s5709_s1 + $0x130] ss:$8 sps:$4 sm:$0xff]  }
  0x1d   : > { %v4095_v60 = vld [vmem:[%s5709_s1 + $0x124] ss:$8 sps:$4 sm:$0xff]   ;;  %v4093_v61 = vld [vmem:[%s5709_s1 + $0x120] ss:$8 sps:$4 sm:$0xff]   ;;  %v4098_v62 = vld [vmem:[%s5709_s1 + $0x114] ss:$8 sps:$4 sm:$0xff]  }
  0x1e   : > { %339 = vmatpush1.bf16.msra.mxu0 %v4058_v20  ;;  %472 = vmatpush1.bf16.msra.mxu1 %v4059_v21  ;;  %v242_v39 = vld [vmem:[#allocation2 + $0x37] sm:$0xff]  ;;  %v243_v40 = vld [vmem:[#allocation2 + $0x3f] sm:$0xff] }
  0x1f   : > { %340 = vmatprep.subr.bf16.mxu0 %v4060_v22  ;;  %473 = vmatprep.subr.bf16.mxu1 %v4062_v23  ;;  %v236_v41 = vld [vmem:[#allocation2 + $0x36] sm:$0xff]  ;;  %v237_v42 = vld [vmem:[#allocation2 + $0x3e] sm:$0xff]  ;;  %v246_v43 = vpack.c.bf16 %v243_v40, %v242_v39  ;;  %v244_v48 = vld [vmem:[#allocation2 + $0x47] sm:$0xff] }
  0x20   : > { %v240_v44 = vpack.c.bf16 %v237_v42, %v236_v41  ;;  %v245_v49 = vld [vmem:[#allocation2 + $0x4f] sm:$0xff]  ;;  %v238_v51 = vld [vmem:[#allocation2 + $0x46] sm:$0xff] }
  0x21   : > { %v239_v52 = vld [vmem:[#allocation2 + $0x4e] sm:$0xff]  ;;  %v247_v55 = vpack.c.bf16 %v245_v49, %v244_v48  ;;  %v4099_v1 = vld [vmem:[%s5709_s1 + $0x100] ss:$8 sps:$4 sm:$0xff]  }
  0x22   : > { %341 = vmatpush1.bf16.msra.mxu0 %v4064_v24  ;;  %474 = vmatpush1.bf16.msra.mxu1 %v4065_v25  ;;  %v241_v56 = vpack.c.bf16 %v239_v52, %v238_v51  ;;  %v4096_v63 = vld [vmem:[%s5709_s1 + $0x110] ss:$8 sps:$4 sm:$0xff]   ;;  %v4101_v0 = vld [vmem:[%s5709_s1 + $0x104] ss:$8 sps:$4 sm:$0xff]   ;;  %v4104_v5 = vld [vmem:[%s5709_s1 + $0x274] ss:$8 sps:$4 sm:$0xff]  }
  0x23   : > { %342 = vmatprep.subr.bf16.mxu0 %v4066_v26  ;;  %475 = vmatprep.subr.bf16.mxu1 %v4068_v27  ;;  %v4102_v6 = vld [vmem:[%s5709_s1 + $0x270] ss:$8 sps:$4 sm:$0xff]   ;;  %v4107_v7 = vld [vmem:[%s5709_s1 + $0x1f4] ss:$8 sps:$4 sm:$0xff]   ;;  %v4110_v9 = vld [vmem:[%s5709_s1 + $0x264] ss:$8 sps:$4 sm:$0xff]  }
  0x24   : > { %v4105_v8 = vld [vmem:[%s5709_s1 + $0x1f0] ss:$8 sps:$4 sm:$0xff]   ;;  %v4108_v10 = vld [vmem:[%s5709_s1 + $0x260] ss:$8 sps:$4 sm:$0xff]   ;;  %v4113_v11 = vld [vmem:[%s5709_s1 + $0x1e4] ss:$8 sps:$4 sm:$0xff]  }
  0x25   : > { %v4111_v12 = vld [vmem:[%s5709_s1 + $0x1e0] ss:$8 sps:$4 sm:$0xff]   ;;  %v4116_v13 = vld [vmem:[%s5709_s1 + $0x254] ss:$8 sps:$4 sm:$0xff]   ;;  %v4114_v14 = vld [vmem:[%s5709_s1 + $0x250] ss:$8 sps:$4 sm:$0xff]  }
  0x26   : > { %343 = vmatpush1.bf16.msra.mxu0 %v4070_v32  ;;  %476 = vmatpush1.bf16.msra.mxu1 %v4071_v33  ;;  %v4119_v15 = vld [vmem:[%s5709_s1 + $0x1d4] ss:$8 sps:$4 sm:$0xff]   ;;  %v4117_v16 = vld [vmem:[%s5709_s1 + $0x1d0] ss:$8 sps:$4 sm:$0xff]   ;;  %v4122_v17 = vld [vmem:[%s5709_s1 + $0x244] ss:$8 sps:$4 sm:$0xff]  }
  0x27   : > { %344 = vmatprep.subr.bf16.mxu0 %v4072_v34  ;;  %477 = vmatprep.subr.bf16.mxu1 %v4074_v35  ;;  %v4120_v18 = vld [vmem:[%s5709_s1 + $0x240] ss:$8 sps:$4 sm:$0xff]   ;;  %v4125_v19 = vld [vmem:[%s5709_s1 + $0x1c4] ss:$8 sps:$4 sm:$0xff]   ;;  %v4128_v21 = vld [vmem:[%s5709_s1 + $0x234] ss:$8 sps:$4 sm:$0xff]  }
  0x28   : > { %v4123_v20 = vld [vmem:[%s5709_s1 + $0x1c0] ss:$8 sps:$4 sm:$0xff]   ;;  %v4126_v22 = vld [vmem:[%s5709_s1 + $0x230] ss:$8 sps:$4 sm:$0xff]   ;;  %v4131_v23 = vld [vmem:[%s5709_s1 + $0x1b4] ss:$8 sps:$4 sm:$0xff]  }
  0x29   : > { %v4129_v24 = vld [vmem:[%s5709_s1 + $0x1b0] ss:$8 sps:$4 sm:$0xff]   ;;  %v4134_v25 = vld [vmem:[%s5709_s1 + $0x224] ss:$8 sps:$4 sm:$0xff]   ;;  %v4132_v26 = vld [vmem:[%s5709_s1 + $0x220] ss:$8 sps:$4 sm:$0xff]  }
  0x2a   : > { %345 = vmatpush1.bf16.msra.mxu0 %v4076_v36  ;;  %478 = vmatpush1.bf16.msra.mxu1 %v4077_v37  ;;  %v4137_v27 = vld [vmem:[%s5709_s1 + $0x1a4] ss:$8 sps:$4 sm:$0xff]   ;;  %v4135_v32 = vld [vmem:[%s5709_s1 + $0x1a0] ss:$8 sps:$4 sm:$0xff]   ;;  %v4140_v33 = vld [vmem:[%s5709_s1 + $0x214] ss:$8 sps:$4 sm:$0xff]  }
  0x2b   : > { %596 = vmatprep.subr.bf16.mxu0 %v4080_v38  ;;  %865 = vmatprep.subr.bf16.mxu1 %v4104_v5  ;;  %v4138_v34 = vld [vmem:[%s5709_s1 + $0x210] ss:$8 sps:$4 sm:$0xff]   ;;  %v4143_v35 = vld [vmem:[%s5709_s1 + $0x194] ss:$8 sps:$4 sm:$0xff]   ;;  %v4146_v37 = vld [vmem:[%s5709_s1 + $0x204] ss:$8 sps:$4 sm:$0xff]  }
  0x2c   : > { %v4141_v36 = vld [vmem:[%s5709_s1 + $0x190] ss:$8 sps:$4 sm:$0xff]   ;;  %v4144_v38 = vld [vmem:[%s5709_s1 + $0x200] ss:$8 sps:$4 sm:$0xff]   ;;  %v4149_v39 = vld [vmem:[%s5709_s1 + $0x184] ss:$8 sps:$4 sm:$0xff]  }
  0x2d   : > { %363 = vmatmul.mubr.bf16.vlgmr.msra.gmra.mxu0 %v246_v43  ;;  %496 = vmatmul.mubr.bf16.vlgmr.msra.gmra.mxu1 %v240_v44  ;;  %v4147_v40 = vld [vmem:[%s5709_s1 + $0x180] ss:$8 sps:$4 sm:$0xff]   ;;  %v4152_v41 = vld [vmem:[%s5709_s1 + $0x2f4] ss:$8 sps:$4 sm:$0xff]  }
  0x2e   : > { %597 = vmatpush1.bf16.msra.mxu0 %v4078_v45  ;;  %372 = vmatprep.mubr.bf16.mxu0 %v4566_v2 }
  0x2f   : > { %598 = vmatprep.subr.bf16.mxu0 %v4083_v46  ;;  %505 = vmatprep.mubr.bf16.mxu1 %v4566_v2 }
  0x30   : > { %866 = vmatpush1.bf16.msra.mxu1 %v4102_v6 }
  0x31   : > { %867 = vmatprep.subr.bf16.mxu1 %v4110_v9 }
  0x32   : > { %599 = vmatpush1.bf16.msra.mxu0 %v4081_v47 }
  0x33   : > { %600 = vmatprep.subr.bf16.mxu0 %v4086_v50  ;;  %v658_v50 = vlaneseq }
  0x34   : > { %868 = vmatpush1.bf16.msra.mxu1 %v4108_v10 }
  0x35   : > { %373 = vmatmul.mubr.bf16.gmra.mxu0 %v247_v55  ;;  %506 = vmatmul.mubr.bf16.gmra.mxu1 %v241_v56 }
  0x36   : > { %601 = vmatpush1.bf16.msra.mxu0 %v4084_v53  ;;  %628 = vmatprep.mubr.bf16.mxu0 %v4566_v2  ;;  %v659_v53 = vshrl.u32 %v658_v50, 7 }
  0x37   : > { %602 = vmatprep.subr.bf16.mxu0 %v4089_v54  ;;  %897 = vmatprep.mubr.bf16.mxu1 %v4566_v2 }
  0x38   : > { %869 = vmatprep.subr.bf16.mxu1 %v4116_v13  ;;  %v4879_v55 = vsub.s32 1, %v659_v53 }
  0x39   : > { %870 = vmatpush1.bf16.msra.mxu1 %v4114_v14 }
  0x3a   : > { %603 = vmatpush1.bf16.msra.mxu0 %v4087_v57  ;;  %871 = vmatprep.subr.bf16.mxu1 %v4122_v17 }
  0x3b   : > { %604 = vmatprep.subr.bf16.mxu0 %v4092_v58  ;;  %v235_v58 = vld [vmem:[%s5710_s2] sm:$0x3] }
  0x3d   : > { %872 = vmatpush1.bf16.msra.mxu1 %v4120_v18 }
  0x3e   : > { %605 = vmatpush1.bf16.msra.mxu0 %v4090_v59  ;;  %873 = vmatprep.subr.bf16.mxu1 %v4128_v21 }
  0x3f   : > { %606 = vmatprep.subr.bf16.mxu0 %v4095_v60 }
  0x41   : > { %874 = vmatpush1.bf16.msra.mxu1 %v4126_v22 }
  0x42   : > { %607 = vmatpush1.bf16.msra.mxu0 %v4093_v61  ;;  %875 = vmatprep.subr.bf16.mxu1 %v4134_v25  ;;  %v665_v61 = vrot.slane %v235_v58, %v4879_v55 }
  0x43   : > { %608 = vmatprep.subr.bf16.mxu0 %v4098_v62 }
  0x45   : > { %876 = vmatpush1.bf16.msra.mxu1 %v4132_v26 }
  0x46   : > { %609 = vmatpush1.bf16.msra.mxu0 %v4096_v63  ;;  %877 = vmatprep.subr.bf16.mxu1 %v4140_v33  ;;  %v4885_v33 = vsub.s32 0, %v659_v53 }
  0x47   : > { %610 = vmatprep.subr.bf16.mxu0 %v4101_v0 }
  0x49   : > { %878 = vmatpush1.bf16.msra.mxu1 %v4138_v34 }
  0x4a   : > { %611 = vmatpush1.bf16.msra.mxu0 %v4099_v1  ;;  %879 = vmatprep.subr.bf16.mxu1 %v4146_v37 }
  0x4b   : > { %998 = vmatprep.subr.bf16.mxu0 %v4107_v7 }
  0x4d   : > { %629 = vmatmul.mubr.bf16.vlgmr.msra.gmra.mxu0 %v248_v3  ;;  %880 = vmatpush1.bf16.msra.mxu1 %v4144_v38  ;;  %v661_v38 = vrot.slane %v235_v58, %v4885_v33 }
  0x4e   : > { %638 = vmatprep.mubr.bf16.mxu0 %v4566_v2  ;;  %999 = vmatpush1.bf16.msra.mxu0 %v4105_v8 }
  0x4f   : > { %1000 = vmatprep.subr.bf16.mxu0 %v4113_v11  ;;  %1131 = vmatprep.subr.bf16.mxu1 %v4152_v41 }
  0x52   : > { %1001 = vmatpush1.bf16.msra.mxu0 %v4111_v12 }
  0x53   : > { %1002 = vmatprep.subr.bf16.mxu0 %v4119_v15 }
  0x55   : > { %639 = vmatmul.mubr.bf16.gmra.mxu0 %v249_v4 }
  0x56   : > { %1030 = vmatprep.mubr.bf16.mxu0 %v4566_v2  ;;  %1003 = vmatpush1.bf16.msra.mxu0 %v4117_v16 }
  0x57   : > { %1004 = vmatprep.subr.bf16.mxu0 %v4125_v19 }
  0x5a   : > { %1005 = vmatpush1.bf16.msra.mxu0 %v4123_v20 }
  0x5b   : > { %1006 = vmatprep.subr.bf16.mxu0 %v4131_v23 }
  0x5e   : > { %1007 = vmatpush1.bf16.msra.mxu0 %v4129_v24 }
  0x5f   : > { %1008 = vmatprep.subr.bf16.mxu0 %v4137_v27 }
  0x62   : > { %1009 = vmatpush1.bf16.msra.mxu0 %v4135_v32 }
  0x63   : > { %1010 = vmatprep.subr.bf16.mxu0 %v4143_v35 }
  0x66   : > { %1011 = vmatpush1.bf16.msra.mxu0 %v4141_v36 }
  0x67   : > { %1012 = vmatprep.subr.bf16.mxu0 %v4149_v39 }
  0x6a   : > { %1013 = vmatpush1.bf16.msra.mxu0 %v4147_v40 }
  0xed   : > { %v364_v42 = vpop.f32.mrf.mxu0  ;;  %v497_v45 = vpop.f32.mrf.mxu1 }
  0xee   : > { %v498_v35 = vadd.f32 %v497_v45, %v364_v42 }
  0xef   : > { %v366_v43 = vpop.f32.mrf.mxu0  ;;  %v499_v48 = vpop.f32.mrf.mxu1 }
  0xf0   : > { %v500_v60 = vadd.f32 %v499_v48, %v366_v43 }
  0xf1   : > { %v368_v44 = vpop.f32.mrf.mxu0  ;;  %v501_v51 = vpop.f32.mrf.mxu1 }
  0xf2   : > { %v502_v40 = vadd.f32 %v501_v51, %v368_v44 }
  0xf3   : > { %v370_v46 = vpop.f32.mrf.mxu0  ;;  %v503_v54 = vpop.f32.mrf.mxu1 }
  0xf4   : > { %v504_v3 = vadd.f32 %v503_v54, %v370_v46 }
  0xf5   : > { %v4875_v47 = vpop.f32.mrf.mxu0  ;;  %v507_v56 = vpop.f32.mrf.mxu1 }
  0xf7   : > { %v376_v49 = vpop.f32.mrf.mxu0  ;;  %v509_v62 = vpop.f32.mrf.mxu1 }
  0xf8   : > { %v510_v10 = vadd.f32 %v509_v62, %v376_v49  ;;  %v508_v49 = vadd.f32 %v507_v56, %v4875_v47 }
  0xf9   : > { %v4877_v52 = vpop.f32.mrf.mxu0  ;;  %v511_v5 = vpop.f32.mrf.mxu1 }
  0xfa   : > { %v512_v58 = vadd.f32 %v511_v5, %v4877_v52 }
  0xfb   : > { %v380_v57 = vpop.f32.mrf.mxu0  ;;  %v513_v12 = vpop.f32.mrf.mxu1 }
  0xfc   : > { %v514_v17 = vadd.f32 %v513_v12, %v380_v57  ;;  %v4155_v12 = vld [vmem:[%s5709_s1 + $0x2e4] ss:$8 sps:$4 sm:$0xff]  }
 0x10d   : > { %v630_v59 = vpop.f32.mrf.mxu0 }
 0x10e   : > { %v649_v37 = vadd.f32 %v630_v59, %v498_v35  ;;  %v4171_v35 = vld [vmem:[%s5709_s1 + $0x280] ss:$8 sps:$4 sm:$0xff]  }
 0x10f   : > { %v632_v63 = vpop.f32.mrf.mxu0 }
 0x110   : > { %v650_v0 = vadd.f32 %v632_v63, %v500_v60  ;;  %v668_v43 = vadd.f32 %v661_v38, %v649_v37 }
 0x111   : > { %v634_v1 = vpop.f32.mrf.mxu0 }
 0x112   : > { %v669_v4 = vadd.f32 %v665_v61, %v650_v0  ;;  %v651_v48 = vadd.f32 %v634_v1, %v502_v40  ;;  %v4179_v40 = vld [vmem:[%s5709_s1 + $0x3f4] ss:$8 sps:$4 sm:$0xff]  }
 0x113   : > { %v636_v6 = vpop.f32.mrf.mxu0  ;;  %1400 = vmatprep.subr.bf16.mxu0 %v4179_v40 }
 0x114   : > { %v3507_v7 = vmul.f32 -1.442695, %v669_v4  ;;  %v652_v8 = vadd.f32 %v636_v6, %v504_v3  ;;  %v670_v42 = vadd.f32 %v661_v38, %v651_v48  ;;  %v4150_v6 = vld [vmem:[%s5709_s1 + $0x2f0] ss:$8 sps:$4 sm:$0xff]   ;;  %v4185_v48 = vld [vmem:[%s5709_s1 + $0x3e4] ss:$8 sps:$4 sm:$0xff]  }
 0x115   : > { %v640_v9 = vpop.f32.mrf.mxu0 }
 0x116   : > { %4462 = vpow2.f32 %v3507_v7  ;;  %v671_v11 = vadd.f32 %v665_v61, %v652_v8  ;;  %v653_v59 = vadd.f32 %v640_v9, %v508_v49  ;;  %v4183_v49 = vld [vmem:[%s5709_s1 + $0x3e0] ss:$8 sps:$4 sm:$0xff]  }
 0x117   : > { %v642_v13 = vpop.f32.mrf.mxu0 }
 0x118   : > { %v3508_v14 = vmul.f32 -1.442695, %v671_v11  ;;  %v654_v15 = vadd.f32 %v642_v13, %v510_v10  ;;  %v672_v47 = vadd.f32 %v661_v38, %v653_v59  ;;  %v4158_v13 = vld [vmem:[%s5709_s1 + $0x2d4] ss:$8 sps:$4 sm:$0xff]   ;;  %v4192_v59 = vld [vmem:[%s5709_s1 + $0x340] ss:$8 sps:$4 sm:$0xff]  }
 0x119   : > { %v644_v16 = vpop.f32.mrf.mxu0 }
 0x11a   : > { %4464 = vpow2.f32 %v3508_v14  ;;  %v673_v18 = vadd.f32 %v665_v61, %v654_v15  ;;  %v655_v62 = vadd.f32 %v644_v16, %v512_v58  ;;  %v4156_v14 = vld [vmem:[%s5709_s1 + $0x2d0] ss:$8 sps:$4 sm:$0xff]   ;;  %v4197_v58 = vld [vmem:[%s5709_s1 + $0x3c4] ss:$8 sps:$4 sm:$0xff]  }
 0x11b   : > { %v646_v19 = vpop.f32.mrf.mxu0 }
 0x11c   : > { %v3509_v20 = vmul.f32 -1.442695, %v673_v18  ;;  %v656_v21 = vadd.f32 %v646_v19, %v514_v17  ;;  %v674_v52 = vadd.f32 %v661_v38, %v655_v62  ;;  %v4176_v38 = vld [vmem:[%s5709_s1 + $0x374] ss:$8 sps:$4 sm:$0xff]   ;;  %v4206_v62 = vld [vmem:[%s5709_s1 + $0x324] ss:$8 sps:$4 sm:$0xff]  }
 0x11e   : > { %4466 = vpow2.f32 %v3509_v20  ;;  %v675_v22 = vadd.f32 %v665_v61, %v656_v21  ;;  %v4161_v21 = vld [vmem:[%s5709_s1 + $0x2c4] ss:$8 sps:$4 sm:$0xff]  }
 0x120   : > { %v3510_v23 = vmul.f32 -1.442695, %v675_v22  ;;  %v4159_v22 = vld [vmem:[%s5709_s1 + $0x2c0] ss:$8 sps:$4 sm:$0xff]  }
 0x122   : > { %4468 = vpow2.f32 %v3510_v23  ;;  %v4164_v23 = vld [vmem:[%s5709_s1 + $0x2b4] ss:$8 sps:$4 sm:$0xff]  }
 0x123   : > { %v4463_v24 = vpop.eup %4462 }
 0x124   : > { %v688_v25 = vadd.f32 1.0, %v4463_v24  ;;  %v4162_v24 = vld [vmem:[%s5709_s1 + $0x2b0] ss:$8 sps:$4 sm:$0xff]  }
 0x126   : > { %4470 = vrcp.f32 %v688_v25  ;;  %v4167_v25 = vld [vmem:[%s5709_s1 + $0x2a4] ss:$8 sps:$4 sm:$0xff]  }
 0x127   : > { %v4465_v26 = vpop.eup %4464 }
 0x128   : > { %v689_v27 = vadd.f32 1.0, %v4465_v26  ;;  %v4165_v26 = vld [vmem:[%s5709_s1 + $0x2a0] ss:$8 sps:$4 sm:$0xff]  }
 0x12a   : > { %4472 = vrcp.f32 %v689_v27  ;;  %v4170_v27 = vld [vmem:[%s5709_s1 + $0x294] ss:$8 sps:$4 sm:$0xff]  }
 0x12b   : > { %v4467_v32 = vpop.eup %4466 }
 0x12c   : > { %v690_v34 = vadd.f32 1.0, %v4467_v32  ;;  %v4168_v32 = vld [vmem:[%s5709_s1 + $0x290] ss:$8 sps:$4 sm:$0xff]  }
 0x12e   : > { %4474 = vrcp.f32 %v690_v34  ;;  %v4173_v34 = vld [vmem:[%s5709_s1 + $0x284] ss:$8 sps:$4 sm:$0xff]  }
 0x12f   : > { %v4469_v36 = vpop.eup %4468 }
 0x130   : > { %v691_v39 = vadd.f32 1.0, %v4469_v36 }
 0x132   : > { %4476 = vrcp.f32 %v691_v39  ;;  %v4174_v39 = vld [vmem:[%s5709_s1 + $0x370] ss:$8 sps:$4 sm:$0xff]  }
 0x133   : > { %v4471_v41 = vpop.eup %4470 }
 0x134   : > { %v704_v46 = vsub.f32 1.0, %v4471_v41  ;;  %v700_v50 = vmul.f32 %v4471_v41, %v668_v43  ;;  %v4177_v41 = vld [vmem:[%s5709_s1 + $0x3f0] ss:$8 sps:$4 sm:$0xff]   ;;  %v4182_v43 = vld [vmem:[%s5709_s1 + $0x364] ss:$8 sps:$4 sm:$0xff]  }
 0x136   : > { %v708_v53 = vmul.f32 %v704_v46, %v4688_v28  ;;  %v4180_v46 = vld [vmem:[%s5709_s1 + $0x360] ss:$8 sps:$4 sm:$0xff]  }
 0x137   : > { %v4473_v54 = vpop.eup %4472 }
 0x138   : > { %v4890_v57 = vadd.f32 %v708_v53, %v700_v50  ;;  %v705_v45 = vsub.f32 1.0, %v4473_v54  ;;  %v701_v44 = vmul.f32 %v4473_v54, %v670_v42  ;;  %v4188_v50 = vld [vmem:[%s5709_s1 + $0x354] ss:$8 sps:$4 sm:$0xff]   ;;  %v4186_v53 = vld [vmem:[%s5709_s1 + $0x350] ss:$8 sps:$4 sm:$0xff]  }
 0x139   : > { %v4191_v54 = vld [vmem:[%s5709_s1 + $0x3d4] ss:$8 sps:$4 sm:$0xff]   ;;  %v4189_v42 = vld [vmem:[%s5709_s1 + $0x3d0] ss:$8 sps:$4 sm:$0xff]  }
 0x13a   : > { %716 = vst [vmem:[#allocation2 + $0x38] sm:$0xff] %v4890_v57  ;;  %v709_v51 = vmul.f32 %v705_v45, %v4690_v29  ;;  %v4194_v45 = vld [vmem:[%s5709_s1 + $0x344] ss:$8 sps:$4 sm:$0xff]  }
 0x13b   : > { %v4475_v60 = vpop.eup %4474 }
 0x13c   : > { %v4895_v61 = vadd.f32 %v709_v51, %v701_v44  ;;  %v706_v56 = vsub.f32 1.0, %v4475_v60  ;;  %v702_v28 = vmul.f32 %v4475_v60, %v672_v47  ;;  %v4195_v44 = vld [vmem:[%s5709_s1 + $0x3c0] ss:$8 sps:$4 sm:$0xff]   ;;  %v4200_v51 = vld [vmem:[%s5709_s1 + $0x334] ss:$8 sps:$4 sm:$0xff]  }
 0x13d   : > { %v4198_v60 = vld [vmem:[%s5709_s1 + $0x330] ss:$8 sps:$4 sm:$0xff]   ;;  %v4203_v47 = vld [vmem:[%s5709_s1 + $0x3b4] ss:$8 sps:$4 sm:$0xff]  }
 0x13e   : > { %717 = vst [vmem:[#allocation2 + $0x40] sm:$0xff] %v4895_v61  ;;  %v710_v63 = vmul.f32 %v706_v56, %v4692_v30  ;;  %v783_v36 = vpack.c.bf16 %v4895_v61, %v4890_v57  ;;  %v4201_v56 = vld [vmem:[%s5709_s1 + $0x3b0] ss:$8 sps:$4 sm:$0xff]  }
 0x13f   : > { %v4477_v0 = vpop.eup %4476 }
 0x140   : > { %v4899_v1 = vadd.f32 %v710_v63, %v702_v28  ;;  %v707_v3 = vsub.f32 1.0, %v4477_v0  ;;  %v703_v4 = vmul.f32 %v4477_v0, %v674_v52  ;;  %v4204_v28 = vld [vmem:[%s5709_s1 + $0x320] ss:$8 sps:$4 sm:$0xff]   ;;  %v4209_v63 = vld [vmem:[%s5709_s1 + $0x3a4] ss:$8 sps:$4 sm:$0xff]  }
 0x141   : > { %v777_v7 = vld [vmem:[#allocation2 + $0x35] sm:$0xff]  ;;  %v4207_v0 = vld [vmem:[%s5709_s1 + $0x3a0] ss:$8 sps:$4 sm:$0xff]  }
 0x142   : > { %718 = vst [vmem:[#allocation2 + $0x48] sm:$0xff] %v4899_v1  ;;  %v711_v29 = vmul.f32 %v707_v3, %v4694_v31  ;;  %v771_v9 = vld [vmem:[#allocation2 + $0x32] sm:$0xff]  ;;  %v4153_v31 = vld [vmem:[%s5709_s1 + $0x2e0] ss:$8 sps:$4 sm:$0xff]  }
 0x143   : > { %v4212_v52 = vld [vmem:[%s5709_s1 + $0x314] ss:$8 sps:$4 sm:$0xff]   ;;  %v4210_v3 = vld [vmem:[%s5709_s1 + $0x310] ss:$8 sps:$4 sm:$0xff]  }
 0x144   : > { %v4903_v5 = vadd.f32 %v711_v29, %v703_v4  ;;  %v4215_v4 = vld [vmem:[%s5709_s1 + $0x394] ss:$8 sps:$4 sm:$0xff]   ;;  %v4213_v29 = vld [vmem:[%s5709_s1 + $0x390] ss:$8 sps:$4 sm:$0xff]  }
 0x145   : > { %v778_v8 = vld [vmem:[#allocation2 + $0x3d] sm:$0xff] }
 0x146   : > { %v772_v30 = vld [vmem:[#allocation2 + $0x3a] sm:$0xff]  ;;  %719 = vst [vmem:[#allocation2 + $0x50] sm:$0xff] %v4903_v5  ;;  %v781_v10 = vpack.c.bf16 %v778_v8, %v777_v7  ;;  %v784_v37 = vpack.c.bf16 %v4903_v5, %v4899_v1  ;;  %v4221_v8 = vld [vmem:[%s5709_s1 + $0x384] ss:$8 sps:$4 sm:$0xff]  }
 0x147   : > { %v775_v11 = vpack.c.bf16 %v772_v30, %v771_v9  ;;  %v4216_v7 = vld [vmem:[%s5709_s1 + $0x300] ss:$8 sps:$4 sm:$0xff]   ;;  %v1307_v30 = vld [vmem:[#allocation2 + $0x2e] sm:$0xff] }
 0x148   : > { %898 = vmatmul.mubr.bf16.vlgmr.msra.gmra.mxu1 %v781_v10  ;;  %v1306_v9 = vld [vmem:[#allocation2 + $0x26] sm:$0xff] }
 0x149   : > { %1031 = vmatmul.mubr.bf16.vlgmr.msra.gmra.mxu0 %v775_v11  ;;  %1132 = vmatpush1.bf16.msra.mxu1 %v4150_v6  ;;  %v779_v15 = vld [vmem:[#allocation2 + $0x45] sm:$0xff]  ;;  %v1310_v11 = vpack.c.bf16 %v1307_v30, %v1306_v9 }
 0x14a   : > { %907 = vmatprep.mubr.bf16.mxu1 %v4566_v2  ;;  %1133 = vmatprep.subr.bf16.mxu1 %v4155_v12  ;;  %v773_v17 = vld [vmem:[#allocation2 + $0x42] sm:$0xff]  ;;  %v4224_v12 = vld [vmem:[%s5709_s1 + $0x474] ss:$8 sps:$4 sm:$0xff]  }
 0x14b   : > { %1040 = vmatprep.mubr.bf16.mxu0 %v4566_v2  ;;  %1401 = vmatpush1.bf16.msra.mxu0 %v4177_v41  ;;  %v4218_v6 = vld [vmem:[%s5709_s1 + $0x304] ss:$8 sps:$4 sm:$0xff]   ;;  %v4219_v10 = vld [vmem:[%s5709_s1 + $0x380] ss:$8 sps:$4 sm:$0xff]  }
 0x14c   : > { %1402 = vmatprep.subr.bf16.mxu0 %v4185_v48 }
 0x14d   : > { %1134 = vmatpush1.bf16.msra.mxu1 %v4153_v31  ;;  %v780_v16 = vld [vmem:[#allocation2 + $0x4d] sm:$0xff] }
 0x14e   : > { %v774_v18 = vld [vmem:[#allocation2 + $0x4a] sm:$0xff]  ;;  %1135 = vmatprep.subr.bf16.mxu1 %v4158_v13  ;;  %v782_v19 = vpack.c.bf16 %v780_v16, %v779_v15 }
 0x14f   : > { %v776_v20 = vpack.c.bf16 %v774_v18, %v773_v17  ;;  %1403 = vmatpush1.bf16.msra.mxu0 %v4183_v49 }
 0x150   : > { %908 = vmatmul.mubr.bf16.gmra.mxu1 %v782_v19  ;;  %1404 = vmatprep.subr.bf16.mxu0 %v4191_v54 }
 0x151   : > { %1041 = vmatmul.mubr.bf16.gmra.mxu0 %v776_v20  ;;  %1136 = vmatpush1.bf16.msra.mxu1 %v4156_v14 }
 0x152   : > { %1163 = vmatprep.mubr.bf16.mxu1 %v4566_v2  ;;  %1137 = vmatprep.subr.bf16.mxu1 %v4161_v21 }
 0x153   : > { %1432 = vmatprep.mubr.bf16.mxu0 %v4566_v2  ;;  %1405 = vmatpush1.bf16.msra.mxu0 %v4189_v42 }
 0x154   : > { %1406 = vmatprep.subr.bf16.mxu0 %v4197_v58 }
 0x155   : > { %1138 = vmatpush1.bf16.msra.mxu1 %v4159_v22 }
 0x156   : > { %1139 = vmatprep.subr.bf16.mxu1 %v4164_v23 }
 0x157   : > { %1407 = vmatpush1.bf16.msra.mxu0 %v4195_v44 }
 0x158   : > { %1408 = vmatprep.subr.bf16.mxu0 %v4203_v47 }
 0x159   : > { %1140 = vmatpush1.bf16.msra.mxu1 %v4162_v24  ;;  %v3559_v24 = vld [vmem:[%s5710_s2 + $0x2] sm:$0x3] }
 0x15a   : > { %1141 = vmatprep.subr.bf16.mxu1 %v4167_v25 }
 0x15b   : > { %1409 = vmatpush1.bf16.msra.mxu0 %v4201_v56 }
 0x15c   : > { %1410 = vmatprep.subr.bf16.mxu0 %v4209_v63 }
 0x15d   : > { %1142 = vmatpush1.bf16.msra.mxu1 %v4165_v26 }
 0x15e   : > { %1143 = vmatprep.subr.bf16.mxu1 %v4170_v27  ;;  %v1200_v27 = vrot.slane %v3559_v24, %v4879_v55 }
 0x15f   : > { %1411 = vmatpush1.bf16.msra.mxu0 %v4207_v0 }
 0x160   : > { %1412 = vmatprep.subr.bf16.mxu0 %v4215_v4 }
 0x161   : > { %1144 = vmatpush1.bf16.msra.mxu1 %v4168_v32 }
 0x162   : > { %1145 = vmatprep.subr.bf16.mxu1 %v4173_v34 }
 0x163   : > { %1413 = vmatpush1.bf16.msra.mxu0 %v4213_v29  ;;  %v5072_v29 = vrot.slane %v3559_v24, %v4885_v33 }
 0x164   : > { %1414 = vmatprep.subr.bf16.mxu0 %v4221_v8 }
 0x165   : > { %1146 = vmatpush1.bf16.msra.mxu1 %v4171_v35 }
 0x166   : > { %1533 = vmatprep.subr.bf16.mxu1 %v4176_v38 }
 0x167   : > { %1415 = vmatpush1.bf16.msra.mxu0 %v4219_v10 }
 0x168   : > { %1164 = vmatmul.mubr.bf16.vlgmr.msra.gmra.mxu1 %v783_v36  ;;  %1666 = vmatprep.subr.bf16.mxu0 %v4224_v12 }
 0x169   : > { %1173 = vmatprep.mubr.bf16.mxu1 %v4566_v2  ;;  %1534 = vmatpush1.bf16.msra.mxu1 %v4174_v39 }
 0x16a   : > { %1535 = vmatprep.subr.bf16.mxu1 %v4182_v43 }
 0x16d   : > { %1536 = vmatpush1.bf16.msra.mxu1 %v4180_v46 }
 0x16e   : > { %1537 = vmatprep.subr.bf16.mxu1 %v4188_v50 }
 0x170   : > { %1174 = vmatmul.mubr.bf16.gmra.mxu1 %v784_v37 }
 0x171   : > { %1565 = vmatprep.mubr.bf16.mxu1 %v4566_v2  ;;  %1538 = vmatpush1.bf16.msra.mxu1 %v4186_v53 }
 0x172   : > { %1539 = vmatprep.subr.bf16.mxu1 %v4194_v45 }
 0x175   : > { %1540 = vmatpush1.bf16.msra.mxu1 %v4192_v59 }
 0x176   : > { %1541 = vmatprep.subr.bf16.mxu1 %v4200_v51 }
 0x179   : > { %1542 = vmatpush1.bf16.msra.mxu1 %v4198_v60 }
 0x17a   : > { %1543 = vmatprep.subr.bf16.mxu1 %v4206_v62 }
 0x17d   : > { %1544 = vmatpush1.bf16.msra.mxu1 %v4204_v28 }
 0x17e   : > { %1545 = vmatprep.subr.bf16.mxu1 %v4212_v52 }
 0x181   : > { %1546 = vmatpush1.bf16.msra.mxu1 %v4210_v3 }
 0x182   : > { %1547 = vmatprep.subr.bf16.mxu1 %v4218_v6 }
 0x185   : > { %1548 = vmatpush1.bf16.msra.mxu1 %v4216_v7 }
 0x188   : > { %1566 = vmatmul.mubr.bf16.vlgmr.msra.gmra.mxu1 %v1310_v11 }
 0x189   : > { %1575 = vmatprep.mubr.bf16.mxu1 %v4566_v2 }
 0x208   : > { %v899_v31 = vpop.f32.mrf.mxu1 }
 0x209   : > { %v1032_v16 = vpop.f32.mrf.mxu0 }
 0x20a   : > { %v901_v13 = vpop.f32.mrf.mxu1  ;;  %v1033_v52 = vadd.f32 %v1032_v16, %v899_v31 }
 0x20b   : > { %v1034_v18 = vpop.f32.mrf.mxu0 }
 0x20c   : > { %v903_v14 = vpop.f32.mrf.mxu1  ;;  %v1035_v26 = vadd.f32 %v1034_v18, %v901_v13 }
 0x20d   : > { %v1036_v20 = vpop.f32.mrf.mxu0 }
 0x20e   : > { %v905_v15 = vpop.f32.mrf.mxu1  ;;  %v1037_v6 = vadd.f32 %v1036_v20, %v903_v14 }
 0x20f   : > { %v1038_v22 = vpop.f32.mrf.mxu0 }
 0x210   : > { %v909_v17 = vpop.f32.mrf.mxu1  ;;  %v1039_v37 = vadd.f32 %v1038_v22, %v905_v15 }
 0x211   : > { %v1042_v32 = vpop.f32.mrf.mxu0 }
 0x212   : > { %v911_v19 = vpop.f32.mrf.mxu1  ;;  %v1043_v11 = vadd.f32 %v1042_v32, %v909_v17 }
 0x213   : > { %v1044_v39 = vpop.f32.mrf.mxu0 }
 0x214   : > { %v5061_v21 = vpop.f32.mrf.mxu1  ;;  %v1045_v48 = vadd.f32 %v1044_v39, %v911_v19 }
 0x215   : > { %v5067_v44 = vpop.f32.mrf.mxu0 }
 0x216   : > { %v915_v23 = vpop.f32.mrf.mxu1 }
 0x217   : > { %v1048_v56 = vpop.f32.mrf.mxu0 }
 0x218   : > { %v1049_v63 = vadd.f32 %v1048_v56, %v915_v23  ;;  %v4245_v56 = vld [vmem:[%s5709_s1 + $0x404] ss:$8 sps:$4 sm:$0xff]  }
 0x228   : > { %v1165_v25 = vpop.f32.mrf.mxu1 }
 0x229   : > { %v1184_v4 = vadd.f32 %v1165_v25, %v1033_v52 }
 0x22a   : > { %v1167_v34 = vpop.f32.mrf.mxu1 }
 0x22b   : > { %v1185_v35 = vadd.f32 %v1167_v34, %v1035_v26  ;;  %v1203_v9 = vadd.f32 %v5072_v29, %v1184_v4  ;;  %v4222_v34 = vld [vmem:[%s5709_s1 + $0x470] ss:$8 sps:$4 sm:$0xff]  }
 0x22c   : > { %v1169_v36 = vpop.f32.mrf.mxu1 }
 0x22d   : > { %v1204_v38 = vadd.f32 %v1200_v27, %v1185_v35  ;;  %v1186_v10 = vadd.f32 %v1169_v36, %v1037_v6  ;;  %v4227_v36 = vld [vmem:[%s5709_s1 + $0x464] ss:$8 sps:$4 sm:$0xff]  }
 0x22e   : > { %v1171_v40 = vpop.f32.mrf.mxu1 }
 0x22f   : > { %v3608_v41 = vmul.f32 -1.442695, %v1204_v38  ;;  %v1187_v43 = vadd.f32 %v1171_v40, %v1039_v37  ;;  %v1205_v16 = vadd.f32 %v5072_v29, %v1186_v10  ;;  %v4230_v40 = vld [vmem:[%s5709_s1 + $0x454] ss:$8 sps:$4 sm:$0xff]   ;;  %v4252_v10 = vld [vmem:[%s5709_s1 + $0x560] ss:$8 sps:$4 sm:$0xff]  }
 0x230   : > { %v1175_v46 = vpop.f32.mrf.mxu1 }
 0x231   : > { %4478 = vpow2.f32 %v3608_v41  ;;  %v1206_v49 = vadd.f32 %v1200_v27, %v1187_v43  ;;  %v1188_v22 = vadd.f32 %v1175_v46, %v1043_v11  ;;  %v4228_v43 = vld [vmem:[%s5709_s1 + $0x450] ss:$8 sps:$4 sm:$0xff]   ;;  %v4255_v11 = vld [vmem:[%s5709_s1 + $0x4e0] ss:$8 sps:$4 sm:$0xff]  }
 0x232   : > { %v1177_v50 = vpop.f32.mrf.mxu1 }
 0x233   : > { %v3609_v53 = vmul.f32 -1.442695, %v1206_v49  ;;  %v1189_v54 = vadd.f32 %v1177_v50, %v1045_v48  ;;  %v1207_v17 = vadd.f32 %v5072_v29, %v1188_v22  ;;  %v4264_v22 = vld [vmem:[%s5709_s1 + $0x540] ss:$8 sps:$4 sm:$0xff]  }
 0x234   : > { %v5069_v60 = vpop.f32.mrf.mxu1 }
 0x235   : > { %4480 = vpow2.f32 %v3609_v53  ;;  %v1208_v42 = vadd.f32 %v1200_v27, %v1189_v54  ;;  %v4233_v53 = vld [vmem:[%s5709_s1 + $0x444] ss:$8 sps:$4 sm:$0xff]   ;;  %v4231_v54 = vld [vmem:[%s5709_s1 + $0x440] ss:$8 sps:$4 sm:$0xff]  }
 0x236   : > { %v1181_v28 = vpop.f32.mrf.mxu1 }
 0x237   : > { %v3610_v45 = vmul.f32 -1.442695, %v1208_v42  ;;  %v1191_v3 = vadd.f32 %v1181_v28, %v1049_v63  ;;  %v4236_v42 = vld [vmem:[%s5709_s1 + $0x434] ss:$8 sps:$4 sm:$0xff]   ;;  %v1047_v28 = vadd.f32 %v5067_v44, %v5061_v21  ;;  %v4243_v63 = vld [vmem:[%s5709_s1 + $0x400] ss:$8 sps:$4 sm:$0xff]  }
 0x239   : > { %4482 = vpow2.f32 %v3610_v45  ;;  %v1210_v7 = vadd.f32 %v1200_v27, %v1191_v3  ;;  %v1312_v27 = vld [vmem:[#allocation2 + $0x2f] sm:$0xff] }
 0x23a   : > { %v4234_v45 = vld [vmem:[%s5709_s1 + $0x430] ss:$8 sps:$4 sm:$0xff]  }
 0x23b   : > { %v3611_v15 = vmul.f32 -1.442695, %v1210_v7 }
 0x23e   : > { %v4479_v59 = vpop.eup %4478 }
 0x23f   : > { %v1223_v58 = vadd.f32 1.0, %v4479_v59  ;;  %v4239_v59 = vld [vmem:[%s5709_s1 + $0x424] ss:$8 sps:$4 sm:$0xff]  }
 0x241   : > { %4484 = vrcp.f32 %v1223_v58  ;;  %v4237_v58 = vld [vmem:[%s5709_s1 + $0x420] ss:$8 sps:$4 sm:$0xff]  }
 0x242   : > { %v4481_v51 = vpop.eup %4480 }
 0x243   : > { %v1224_v47 = vadd.f32 1.0, %v4481_v51  ;;  %v4242_v51 = vld [vmem:[%s5709_s1 + $0x414] ss:$8 sps:$4 sm:$0xff]  }
 0x245   : > { %4486 = vrcp.f32 %v1224_v47  ;;  %v4240_v47 = vld [vmem:[%s5709_s1 + $0x410] ss:$8 sps:$4 sm:$0xff]  }
 0x246   : > { %v4483_v62 = vpop.eup %4482 }
 0x247   : > { %v1225_v0 = vadd.f32 1.0, %v4483_v62 }
 0x249   : > { %4488 = vrcp.f32 %v1225_v0  ;;  %v1190_v0 = vadd.f32 %v5069_v60, %v1047_v28  ;;  %v4246_v60 = vld [vmem:[%s5709_s1 + $0x570] ss:$8 sps:$4 sm:$0xff]   ;;  %v4311_v28 = vld [vmem:[%s5709_s1 + $0x5a4] ss:$8 sps:$4 sm:$0xff]  }
 0x24a   : > { %4490 = vpow2.f32 %v3611_v15  ;;  %v4258_v15 = vld [vmem:[%s5709_s1 + $0x550] ss:$8 sps:$4 sm:$0xff]  }
 0x24b   : > { %v1209_v3 = vadd.f32 %v5072_v29, %v1190_v0  ;;  %v4249_v29 = vld [vmem:[%s5709_s1 + $0x4f0] ss:$8 sps:$4 sm:$0xff]  }
 0x24c   : > { %v1843_v0 = vld [vmem:[#allocation2 + $0x12] sm:$0xff] }
 0x24e   : > { %v4485_v8 = vpop.eup %4484 }
 0x24f   : > { %v1239_v30 = vsub.f32 1.0, %v4485_v8  ;;  %v1235_v12 = vmul.f32 %v4485_v8, %v1203_v9  ;;  %v4251_v8 = vld [vmem:[%s5709_s1 + $0x4f4] ss:$8 sps:$4 sm:$0xff]   ;;  %v4254_v9 = vld [vmem:[%s5709_s1 + $0x564] ss:$8 sps:$4 sm:$0xff]  }
 0x251   : > { %v1243_v13 = vmul.f32 %v1239_v30, %v4890_v57  ;;  %v4257_v30 = vld [vmem:[%s5709_s1 + $0x4e4] ss:$8 sps:$4 sm:$0xff]  }
 0x252   : > { %v4487_v18 = vpop.eup %4486 }
 0x253   : > { %v5076_v31 = vadd.f32 %v1243_v13, %v1235_v12  ;;  %v1240_v19 = vsub.f32 1.0, %v4487_v18  ;;  %v1236_v14 = vmul.f32 %v4487_v18, %v1205_v16  ;;  %v4260_v12 = vld [vmem:[%s5709_s1 + $0x554] ss:$8 sps:$4 sm:$0xff]   ;;  %v4261_v18 = vld [vmem:[%s5709_s1 + $0x4d0] ss:$8 sps:$4 sm:$0xff]  }
 0x254   : > { %v4263_v13 = vld [vmem:[%s5709_s1 + $0x4d4] ss:$8 sps:$4 sm:$0xff]   ;;  %v4266_v16 = vld [vmem:[%s5709_s1 + $0x544] ss:$8 sps:$4 sm:$0xff]  }
 0x255   : > { %1251 = vst [vmem:[#allocation2 + $0x38] sm:$0xff] %v5076_v31  ;;  %v1244_v20 = vmul.f32 %v1240_v19, %v4895_v61  ;;  %v4269_v19 = vld [vmem:[%s5709_s1 + $0x4c4] ss:$8 sps:$4 sm:$0xff]  }
 0x256   : > { %v4489_v23 = vpop.eup %4488 }
 0x257   : > { %v5081_v24 = vadd.f32 %v1244_v20, %v1236_v14  ;;  %v1241_v57 = vsub.f32 1.0, %v4489_v23  ;;  %v1237_v25 = vmul.f32 %v4489_v23, %v1207_v17  ;;  %v4491_v41 = vpop.eup %4490  ;;  %v4267_v14 = vld [vmem:[%s5709_s1 + $0x4c0] ss:$8 sps:$4 sm:$0xff]   ;;  %v4272_v20 = vld [vmem:[%s5709_s1 + $0x534] ss:$8 sps:$4 sm:$0xff]  }
 0x258   : > { %v1226_v49 = vadd.f32 1.0, %v4491_v41  ;;  %v4275_v23 = vld [vmem:[%s5709_s1 + $0x4b4] ss:$8 sps:$4 sm:$0xff]   ;;  %v4270_v17 = vld [vmem:[%s5709_s1 + $0x530] ss:$8 sps:$4 sm:$0xff]  }
 0x259   : > { %1252 = vst [vmem:[#allocation2 + $0x40] sm:$0xff] %v5081_v24  ;;  %v1245_v26 = vmul.f32 %v1241_v57, %v4899_v1  ;;  %v4225_v1 = vld [vmem:[%s5709_s1 + $0x460] ss:$8 sps:$4 sm:$0xff]   ;;  %v1318_v4 = vpack.c.bf16 %v5081_v24, %v5076_v31  ;;  %v4273_v57 = vld [vmem:[%s5709_s1 + $0x4b0] ss:$8 sps:$4 sm:$0xff]  }
 0x25a   : > { %4492 = vrcp.f32 %v1226_v49  ;;  %v1847_v41 = vld [vmem:[#allocation2 + $0x1d] sm:$0xff]  ;;  %v1842_v49 = vld [vmem:[#allocation2 + $0xa] sm:$0xff] }
 0x25b   : > { %v5086_v32 = vadd.f32 %v1245_v26, %v1237_v25  ;;  %v4278_v25 = vld [vmem:[%s5709_s1 + $0x524] ss:$8 sps:$4 sm:$0xff]  }
 0x25c   : > { %v1313_v61 = vld [vmem:[#allocation2 + $0x37] sm:$0xff]  ;;  %v4281_v26 = vld [vmem:[%s5709_s1 + $0x4a4] ss:$8 sps:$4 sm:$0xff]  }
 0x25d   : > { %1253 = vst [vmem:[#allocation2 + $0x48] sm:$0xff] %v5086_v32  ;;  %v1316_v35 = vpack.c.bf16 %v1313_v61, %v1312_v27  ;;  %v1308_v37 = vld [vmem:[#allocation2 + $0x36] sm:$0xff]  ;;  %v4276_v27 = vld [vmem:[%s5709_s1 + $0x520] ss:$8 sps:$4 sm:$0xff]  }
 0x25e   : > { %v4284_v61 = vld [vmem:[%s5709_s1 + $0x514] ss:$8 sps:$4 sm:$0xff]  }
 0x25f   : > { %1433 = vmatmul.mubr.bf16.vlgmr.msra.gmra.mxu0 %v1316_v35  ;;  %v4287_v35 = vld [vmem:[%s5709_s1 + $0x494] ss:$8 sps:$4 sm:$0xff]  }
 0x260   : > { %1667 = vmatpush1.bf16.msra.mxu0 %v4222_v34  ;;  %v1309_v38 = vld [vmem:[#allocation2 + $0x3e] sm:$0xff]  ;;  %1442 = vmatprep.mubr.bf16.mxu0 %v4566_v2 }
 0x261   : > { %1668 = vmatprep.subr.bf16.mxu0 %v4227_v36  ;;  %v1311_v39 = vpack.c.bf16 %v1309_v38, %v1308_v37  ;;  %v1314_v46 = vld [vmem:[#allocation2 + $0x3f] sm:$0xff]  ;;  %v4282_v36 = vld [vmem:[%s5709_s1 + $0x510] ss:$8 sps:$4 sm:$0xff]  }
 0x262   : > { %v4279_v34 = vld [vmem:[%s5709_s1 + $0x4a0] ss:$8 sps:$4 sm:$0xff]   ;;  %v4290_v37 = vld [vmem:[%s5709_s1 + $0x504] ss:$8 sps:$4 sm:$0xff]  }
 0x263   : > { %1576 = vmatmul.mubr.bf16.gmra.mxu1 %v1311_v39  ;;  %v4293_v38 = vld [vmem:[%s5709_s1 + $0x484] ss:$8 sps:$4 sm:$0xff]   ;;  %v4288_v39 = vld [vmem:[%s5709_s1 + $0x500] ss:$8 sps:$4 sm:$0xff]  }
 0x264   : > { %1669 = vmatpush1.bf16.msra.mxu0 %v4225_v1  ;;  %v1315_v48 = vld [vmem:[#allocation2 + $0x47] sm:$0xff]  ;;  %1967 = vmatprep.mubr.bf16.mxu1 %v4566_v2  ;;  %v4285_v1 = vld [vmem:[%s5709_s1 + $0x490] ss:$8 sps:$4 sm:$0xff]  }
 0x265   : > { %1670 = vmatprep.subr.bf16.mxu0 %v4230_v40  ;;  %v1317_v50 = vpack.c.bf16 %v1315_v48, %v1314_v46  ;;  %v4291_v40 = vld [vmem:[%s5709_s1 + $0x480] ss:$8 sps:$4 sm:$0xff]  }
 0x266   : > { %v1841_v46 = vld [vmem:[#allocation2 + $0x2] sm:$0xff] }
 0x267   : > { %1443 = vmatmul.mubr.bf16.gmra.mxu0 %v1317_v50  ;;  %v4493_v62 = vpop.eup %4492  ;;  %v1845_v50 = vpack.c.bf16 %v1842_v49, %v1841_v46 }
 0x268   : > { %1671 = vmatpush1.bf16.msra.mxu0 %v4228_v43  ;;  %1698 = vmatprep.mubr.bf16.mxu0 %v4566_v2  ;;  %v1242_v52 = vsub.f32 1.0, %v4493_v62  ;;  %v1238_v7 = vmul.f32 %v4493_v62, %v1209_v3  ;;  %v1848_v43 = vld [vmem:[#allocation2 + $0x25] sm:$0xff]  ;;  %v4308_v62 = vld [vmem:[%s5709_s1 + $0x5b4] ss:$8 sps:$4 sm:$0xff]  }
 0x269   : > { %1672 = vmatprep.subr.bf16.mxu0 %v4233_v53  ;;  %v1851_v48 = vpack.c.bf16 %v1848_v43, %v1847_v41  ;;  %v4296_v53 = vld [vmem:[%s5709_s1 + $0x5f4] ss:$8 sps:$4 sm:$0xff]  }
 0x26a   : > { %v1246_v6 = vmul.f32 %v1242_v52, %v4903_v5  ;;  %v4248_v5 = vld [vmem:[%s5709_s1 + $0x574] ss:$8 sps:$4 sm:$0xff]  }
 0x26b   : > { %1935 = vmatprep.subr.bf16.mxu1 %v4248_v5  ;;  %v1844_v52 = vld [vmem:[#allocation2 + $0x1a] sm:$0xff] }
 0x26c   : > { %1673 = vmatpush1.bf16.msra.mxu0 %v4231_v54  ;;  %v5145_v21 = vadd.f32 %v1246_v6, %v1238_v7  ;;  %1936 = vmatpush1.bf16.msra.mxu1 %v4246_v60  ;;  %v4294_v54 = vld [vmem:[%s5709_s1 + $0x5f0] ss:$8 sps:$4 sm:$0xff]   ;;  %v1846_v3 = vpack.c.bf16 %v1844_v52, %v1843_v0  ;;  %v4317_v7 = vld [vmem:[%s5709_s1 + $0x584] ss:$8 sps:$4 sm:$0xff]  }
 0x26d   : > { %1674 = vmatprep.subr.bf16.mxu0 %v4236_v42  ;;  %1937 = vmatprep.subr.bf16.mxu1 %v4254_v9  ;;  %v4299_v42 = vld [vmem:[%s5709_s1 + $0x5e4] ss:$8 sps:$4 sm:$0xff]   ;;  %v4312_v6 = vld [vmem:[%s5709_s1 + $0x590] ss:$8 sps:$4 sm:$0xff]   ;;  %v1567_v9 = vpop.f32.mrf.mxu1 }
 0x26e   : > { %v1319_v44 = vpack.c.bf16 %v5145_v21, %v5086_v32 }
 0x270   : > { %1675 = vmatpush1.bf16.msra.mxu0 %v4234_v45  ;;  %1938 = vmatpush1.bf16.msra.mxu1 %v4252_v10  ;;  %v4297_v45 = vld [vmem:[%s5709_s1 + $0x5e0] ss:$8 sps:$4 sm:$0xff]   ;;  %v1569_v10 = vpop.f32.mrf.mxu1 }
 0x271   : > { %1676 = vmatprep.subr.bf16.mxu0 %v4239_v59  ;;  %1939 = vmatprep.subr.bf16.mxu1 %v4260_v12  ;;  %v4302_v59 = vld [vmem:[%s5709_s1 + $0x5d4] ss:$8 sps:$4 sm:$0xff]  }
 0x272   : > { %v1571_v12 = vpop.f32.mrf.mxu1 }
 0x274   : > { %1677 = vmatpush1.bf16.msra.mxu0 %v4237_v58  ;;  %1940 = vmatpush1.bf16.msra.mxu1 %v4258_v15  ;;  %v4300_v58 = vld [vmem:[%s5709_s1 + $0x5d0] ss:$8 sps:$4 sm:$0xff]   ;;  %v1573_v15 = vpop.f32.mrf.mxu1 }
 0x275   : > { %1678 = vmatprep.subr.bf16.mxu0 %v4242_v51  ;;  %1941 = vmatprep.subr.bf16.mxu1 %v4266_v16  ;;  %v4305_v51 = vld [vmem:[%s5709_s1 + $0x5c4] ss:$8 sps:$4 sm:$0xff]  }
 0x278   : > { %1679 = vmatpush1.bf16.msra.mxu0 %v4240_v47  ;;  %1942 = vmatpush1.bf16.msra.mxu1 %v4264_v22  ;;  %v4303_v47 = vld [vmem:[%s5709_s1 + $0x5c0] ss:$8 sps:$4 sm:$0xff]  }
 0x279   : > { %1680 = vmatprep.subr.bf16.mxu0 %v4245_v56  ;;  %1943 = vmatprep.subr.bf16.mxu1 %v4272_v20  ;;  %v4306_v56 = vld [vmem:[%s5709_s1 + $0x5b0] ss:$8 sps:$4 sm:$0xff]  }
 0x27c   : > { %1681 = vmatpush1.bf16.msra.mxu0 %v4243_v63  ;;  %1944 = vmatpush1.bf16.msra.mxu1 %v4270_v17  ;;  %v4309_v63 = vld [vmem:[%s5709_s1 + $0x5a0] ss:$8 sps:$4 sm:$0xff]  }
 0x27d   : > { %2068 = vmatprep.subr.bf16.mxu0 %v4251_v8  ;;  %1945 = vmatprep.subr.bf16.mxu1 %v4278_v25 }
 0x27f   : > { %1699 = vmatmul.mubr.bf16.vlgmr.msra.gmra.mxu0 %v1318_v4  ;;  %v4314_v4 = vld [vmem:[%s5709_s1 + $0x594] ss:$8 sps:$4 sm:$0xff]  }
 0x280   : > { %1708 = vmatprep.mubr.bf16.mxu0 %v4566_v2  ;;  %2069 = vmatpush1.bf16.msra.mxu0 %v4249_v29 }
 0x281   : > { %2070 = vmatprep.subr.bf16.mxu0 %v4257_v30  ;;  %1946 = vmatpush1.bf16.msra.mxu1 %v4276_v27 }
 0x282   : > { %1947 = vmatprep.subr.bf16.mxu1 %v4284_v61 }
 0x284   : > { %2071 = vmatpush1.bf16.msra.mxu0 %v4255_v11 }
 0x285   : > { %2072 = vmatprep.subr.bf16.mxu0 %v4263_v13  ;;  %1948 = vmatpush1.bf16.msra.mxu1 %v4282_v36 }
 0x286   : > { %1949 = vmatprep.subr.bf16.mxu1 %v4290_v37 }
 0x287   : > { %1709 = vmatmul.mubr.bf16.gmra.mxu0 %v1319_v44  ;;  %v4315_v44 = vld [vmem:[%s5709_s1 + $0x580] ss:$8 sps:$4 sm:$0xff]  }
 0x288   : > { %2100 = vmatprep.mubr.bf16.mxu0 %v4566_v2  ;;  %2073 = vmatpush1.bf16.msra.mxu0 %v4261_v18 }
 0x289   : > { %2074 = vmatprep.subr.bf16.mxu0 %v4269_v19  ;;  %1950 = vmatpush1.bf16.msra.mxu1 %v4288_v39  ;;  %v3660_v19 = vld [vmem:[%s5710_s2 + $0x4] sm:$0x3] }
 0x28a   : > { %2201 = vmatprep.subr.bf16.mxu1 %v4296_v53  ;;  %v1735_v20 = vrot.slane %v3660_v19, %v4879_v55 }
 0x28c   : > { %2075 = vmatpush1.bf16.msra.mxu0 %v4267_v14  ;;  %1968 = vmatmul.mubr.bf16.vlgmr.msra.gmra.mxu1 %v1851_v48 }
 0x28d   : > { %2076 = vmatprep.subr.bf16.mxu0 %v4275_v23  ;;  %1977 = vmatprep.mubr.bf16.mxu1 %v4566_v2 }
 0x28e   : > { %2202 = vmatpush1.bf16.msra.mxu1 %v4294_v54 }
 0x28f   : > { %2203 = vmatprep.subr.bf16.mxu1 %v4299_v42 }
 0x290   : > { %2077 = vmatpush1.bf16.msra.mxu0 %v4273_v57 }
 0x291   : > { %2078 = vmatprep.subr.bf16.mxu0 %v4281_v26 }
 0x292   : > { %2204 = vmatpush1.bf16.msra.mxu1 %v4297_v45 }
 0x293   : > { %2205 = vmatprep.subr.bf16.mxu1 %v4302_v59 }
 0x294   : > { %2079 = vmatpush1.bf16.msra.mxu0 %v4279_v34 }
 0x295   : > { %2080 = vmatprep.subr.bf16.mxu0 %v4287_v35 }
 0x296   : > { %2206 = vmatpush1.bf16.msra.mxu1 %v4300_v58 }
 0x297   : > { %2207 = vmatprep.subr.bf16.mxu1 %v4305_v51 }
 0x298   : > { %2081 = vmatpush1.bf16.msra.mxu0 %v4285_v1 }
 0x299   : > { %2082 = vmatprep.subr.bf16.mxu0 %v4293_v38 }
 0x29a   : > { %2208 = vmatpush1.bf16.msra.mxu1 %v4303_v47 }
 0x29b   : > { %2209 = vmatprep.subr.bf16.mxu1 %v4308_v62 }
 0x29c   : > { %2083 = vmatpush1.bf16.msra.mxu0 %v4291_v40 }
 0x29e   : > { %2210 = vmatpush1.bf16.msra.mxu1 %v4306_v56 }
 0x29f   : > { %2101 = vmatmul.mubr.bf16.vlgmr.msra.gmra.mxu0 %v1845_v50  ;;  %2211 = vmatprep.subr.bf16.mxu1 %v4311_v28 }
 0x2a0   : > { %2110 = vmatprep.mubr.bf16.mxu0 %v4566_v2 }
 0x2a2   : > { %2212 = vmatpush1.bf16.msra.mxu1 %v4309_v63  ;;  %v1731_v63 = vrot.slane %v3660_v19, %v4885_v33 }
 0x2a3   : > { %2213 = vmatprep.subr.bf16.mxu1 %v4314_v4 }
 0x2a6   : > { %2214 = vmatpush1.bf16.msra.mxu1 %v4312_v6 }
 0x2a7   : > { %2111 = vmatmul.mubr.bf16.gmra.mxu0 %v1846_v3  ;;  %2215 = vmatprep.subr.bf16.mxu1 %v4317_v7 }
 0x2a8   : > { %2502 = vmatprep.mubr.bf16.mxu0 %v4566_v2 }
 0x2aa   : > { %2216 = vmatpush1.bf16.msra.mxu1 %v4315_v44 }
 0x31f   : > { %v1434_v60 = vpop.f32.mrf.mxu0 }
 0x320   : > { %v1568_v56 = vadd.f32 %v1567_v9, %v1434_v60 }
 0x321   : > { %v1436_v5 = vpop.f32.mrf.mxu0 }
 0x322   : > { %v1570_v14 = vadd.f32 %v1569_v10, %v1436_v5 }
 0x323   : > { %v5297_v29 = vpop.f32.mrf.mxu0  ;;  %v5303_v16 = vpop.f32.mrf.mxu1 }
 0x324   : > { %v1572_v9 = vadd.f32 %v1571_v12, %v5297_v29 }
 0x325   : > { %v1440_v8 = vpop.f32.mrf.mxu0  ;;  %v1579_v57 = vpop.f32.mrf.mxu1 }
 0x326   : > { %v1574_v26 = vadd.f32 %v1573_v15, %v1440_v8  ;;  %v1849_v15 = vld [vmem:[#allocation2 + $0x2d] sm:$0xff] }
 0x327   : > { %v5299_v30 = vpop.f32.mrf.mxu0  ;;  %v1581_v36 = vpop.f32.mrf.mxu1 }
 0x329   : > { %v1446_v11 = vpop.f32.mrf.mxu0  ;;  %v1583_v43 = vpop.f32.mrf.mxu1 }
 0x32a   : > { %v1580_v37 = vadd.f32 %v1579_v57, %v1446_v11  ;;  %v1578_v57 = vadd.f32 %v5303_v16, %v5299_v30 }
 0x32b   : > { %v5301_v13 = vpop.f32.mrf.mxu0 }
 0x32d   : > { %v1450_v18 = vpop.f32.mrf.mxu0 }
 0x32e   : > { %v1584_v48 = vadd.f32 %v1583_v43, %v1450_v18  ;;  %v4329_v43 = vld [vmem:[%s5709_s1 + $0x664] ss:$8 sps:$4 sm:$0xff]  }
 0x33f   : > { %v1700_v22 = vpop.f32.mrf.mxu0 }
 0x340   : > { %v1719_v28 = vadd.f32 %v1700_v22, %v1568_v56  ;;  %v4345_v56 = vld [vmem:[%s5709_s1 + $0x630] ss:$8 sps:$4 sm:$0xff]  }
 0x341   : > { %v1702_v23 = vpop.f32.mrf.mxu0 }
 0x342   : > { %v1720_v17 = vadd.f32 %v1702_v23, %v1570_v14  ;;  %v1738_v4 = vadd.f32 %v1731_v63, %v1719_v28  ;;  %v4348_v28 = vld [vmem:[%s5709_s1 + $0x6a0] ss:$8 sps:$4 sm:$0xff]  }
 0x343   : > { %v1704_v25 = vpop.f32.mrf.mxu0 }
 0x344   : > { %v1739_v27 = vadd.f32 %v1735_v20, %v1720_v17  ;;  %v1721_v10 = vadd.f32 %v1704_v25, %v1572_v9  ;;  %v4368_v9 = vld [vmem:[%s5709_s1 + $0x774] ss:$8 sps:$4 sm:$0xff]  }
 0x345   : > { %v1706_v34 = vpop.f32.mrf.mxu0 }
 0x346   : > { %v3709_v61 = vmul.f32 -1.442695, %v1739_v27  ;;  %v1722_v35 = vadd.f32 %v1706_v34, %v1574_v26  ;;  %v1740_v19 = vadd.f32 %v1731_v63, %v1721_v10 }
 0x347   : > { %v1710_v1 = vpop.f32.mrf.mxu0 }
 0x348   : > { %4494 = vpow2.f32 %v3709_v61  ;;  %v1741_v38 = vadd.f32 %v1735_v20, %v1722_v35  ;;  %v1723_v26 = vadd.f32 %v1710_v1, %v1578_v57 }
 0x349   : > { %v1712_v39 = vpop.f32.mrf.mxu0 }
 0x34a   : > { %v3710_v40 = vmul.f32 -1.442695, %v1741_v38  ;;  %v1724_v41 = vadd.f32 %v1712_v39, %v1580_v37  ;;  %v1742_v61 = vadd.f32 %v1731_v63, %v1723_v26  ;;  %v4323_v38 = vld [vmem:[%s5709_s1 + $0x674] ss:$8 sps:$4 sm:$0xff]   ;;  %v4321_v39 = vld [vmem:[%s5709_s1 + $0x670] ss:$8 sps:$4 sm:$0xff]  }
 0x34b   : > { %v1714_v46 = vpop.f32.mrf.mxu0  ;;  %2603 = vmatprep.subr.bf16.mxu1 %v4323_v38 }
 0x34c   : > { %4496 = vpow2.f32 %v3710_v40  ;;  %v1743_v50 = vadd.f32 %v1735_v20, %v1724_v41  ;;  %v4326_v40 = vld [vmem:[%s5709_s1 + $0x6e4] ss:$8 sps:$4 sm:$0xff]   ;;  %v4324_v41 = vld [vmem:[%s5709_s1 + $0x6e0] ss:$8 sps:$4 sm:$0xff]   ;;  %v1969_v10 = vpop.f32.mrf.mxu1 }
 0x34d   : > { %v1716_v49 = vpop.f32.mrf.mxu0 }
 0x34e   : > { %v1726_v53 = vadd.f32 %v1716_v49, %v1584_v48  ;;  %v3711_v42 = vmul.f32 -1.442695, %v1743_v50  ;;  %v4332_v48 = vld [vmem:[%s5709_s1 + $0x6d4] ss:$8 sps:$4 sm:$0xff]   ;;  %v4330_v49 = vld [vmem:[%s5709_s1 + $0x6d0] ss:$8 sps:$4 sm:$0xff]  }
 0x34f   : > { %v4335_v50 = vld [vmem:[%s5709_s1 + $0x654] ss:$8 sps:$4 sm:$0xff]  }
 0x350   : > { %v1745_v54 = vadd.f32 %v1735_v20, %v1726_v53  ;;  %v4333_v53 = vld [vmem:[%s5709_s1 + $0x650] ss:$8 sps:$4 sm:$0xff]  }
 0x352   : > { %v3712_v45 = vmul.f32 -1.442695, %v1745_v54  ;;  %v4338_v54 = vld [vmem:[%s5709_s1 + $0x6c4] ss:$8 sps:$4 sm:$0xff]  }
 0x354   : > { %4498 = vpow2.f32 %v3712_v45  ;;  %v4341_v45 = vld [vmem:[%s5709_s1 + $0x644] ss:$8 sps:$4 sm:$0xff]  }
 0x355   : > { %v4495_v59 = vpop.eup %4494  ;;  %4500 = vpow2.f32 %v3711_v42  ;;  %v4336_v42 = vld [vmem:[%s5709_s1 + $0x6c0] ss:$8 sps:$4 sm:$0xff]  }
 0x356   : > { %v1758_v58 = vadd.f32 1.0, %v4495_v59  ;;  %v4339_v59 = vld [vmem:[%s5709_s1 + $0x640] ss:$8 sps:$4 sm:$0xff]  }
 0x358   : > { %4502 = vrcp.f32 %v1758_v58  ;;  %v4344_v58 = vld [vmem:[%s5709_s1 + $0x6b4] ss:$8 sps:$4 sm:$0xff]  }
 0x359   : > { %v4497_v51 = vpop.eup %4496 }
 0x35a   : > { %v1759_v47 = vadd.f32 1.0, %v4497_v51  ;;  %v4342_v51 = vld [vmem:[%s5709_s1 + $0x6b0] ss:$8 sps:$4 sm:$0xff]  }
 0x35c   : > { %4504 = vrcp.f32 %v1759_v47  ;;  %v4347_v47 = vld [vmem:[%s5709_s1 + $0x634] ss:$8 sps:$4 sm:$0xff]  }
 0x361   : > { %v4499_v62 = vpop.eup %4498 }
 0x362   : > { %v4501_v0 = vpop.eup %4500  ;;  %v1761_v52 = vadd.f32 1.0, %v4499_v62  ;;  %v4350_v62 = vld [vmem:[%s5709_s1 + $0x6a4] ss:$8 sps:$4 sm:$0xff]  }
 0x363   : > { %v1760_v7 = vadd.f32 1.0, %v4501_v0  ;;  %v4351_v0 = vld [vmem:[%s5709_s1 + $0x620] ss:$8 sps:$4 sm:$0xff]  }
 0x364   : > { %4506 = vrcp.f32 %v1761_v52  ;;  %v4356_v52 = vld [vmem:[%s5709_s1 + $0x694] ss:$8 sps:$4 sm:$0xff]  }
 0x365   : > { %v4503_v3 = vpop.eup %4502  ;;  %4508 = vrcp.f32 %v1760_v7  ;;  %v4362_v7 = vld [vmem:[%s5709_s1 + $0x684] ss:$8 sps:$4 sm:$0xff]  }
 0x366   : > { %v1774_v6 = vsub.f32 1.0, %v4503_v3  ;;  %v1770_v44 = vmul.f32 %v4503_v3, %v1738_v4  ;;  %v4354_v3 = vld [vmem:[%s5709_s1 + $0x690] ss:$8 sps:$4 sm:$0xff]   ;;  %v4359_v4 = vld [vmem:[%s5709_s1 + $0x614] ss:$8 sps:$4 sm:$0xff]  }
 0x368   : > { %v1778_v5 = vmul.f32 %v1774_v6, %v5076_v31  ;;  %v1582_v31 = vadd.f32 %v1581_v36, %v5301_v13  ;;  %v4357_v6 = vld [vmem:[%s5709_s1 + $0x610] ss:$8 sps:$4 sm:$0xff]  }
 0x369   : > { %v4505_v60 = vpop.eup %4504 }
 0x36a   : > { %v5311_v8 = vadd.f32 %v1778_v5, %v1770_v44  ;;  %v1775_v11 = vsub.f32 1.0, %v4505_v60  ;;  %v1771_v23 = vmul.f32 %v4505_v60, %v1740_v19  ;;  %v1725_v29 = vadd.f32 %v1714_v46, %v1582_v31  ;;  %v4327_v46 = vld [vmem:[%s5709_s1 + $0x660] ss:$8 sps:$4 sm:$0xff]   ;;  %v4365_v5 = vld [vmem:[%s5709_s1 + $0x604] ss:$8 sps:$4 sm:$0xff]  }
 0x36b   : > { %v4360_v44 = vld [vmem:[%s5709_s1 + $0x680] ss:$8 sps:$4 sm:$0xff]  }
 0x36c   : > { %1786 = vst [vmem:[#allocation2 + $0x38] sm:$0xff] %v5311_v8  ;;  %v1779_v14 = vmul.f32 %v1775_v11, %v5081_v24  ;;  %v1744_v34 = vadd.f32 %v1731_v63, %v1725_v29  ;;  %v4353_v63 = vld [vmem:[%s5709_s1 + $0x624] ss:$8 sps:$4 sm:$0xff]   ;;  %v4363_v60 = vld [vmem:[%s5709_s1 + $0x600] ss:$8 sps:$4 sm:$0xff]   ;;  %v1971_v11 = vpop.f32.mrf.mxu1 }
 0x36e   : > { %v5320_v12 = vadd.f32 %v1779_v14, %v1771_v23 }
 0x370   : > { %v1853_v24 = vpack.c.bf16 %v5320_v12, %v5311_v8 }
 0x371   : > { %v4507_v20 = vpop.eup %4506 }
 0x372   : > { %v4509_v17 = vpop.eup %4508  ;;  %v1777_v25 = vsub.f32 1.0, %v4507_v20  ;;  %v1773_v35 = vmul.f32 %v4507_v20, %v1744_v34 }
 0x373   : > { %v1850_v18 = vld [vmem:[#allocation2 + $0x35] sm:$0xff]  ;;  %v1776_v27 = vsub.f32 1.0, %v4509_v17  ;;  %v1772_v30 = vmul.f32 %v4509_v17, %v1742_v61 }
 0x374   : > { %v1852_v22 = vpack.c.bf16 %v1850_v18, %v1849_v15  ;;  %v1781_v13 = vmul.f32 %v1777_v25, %v5145_v21  ;;  %v4320_v21 = vld [vmem:[%s5709_s1 + $0x6f4] ss:$8 sps:$4 sm:$0xff]   ;;  %v2102_v15 = vpop.f32.mrf.mxu0  ;;  %v1973_v18 = vpop.f32.mrf.mxu1  ;;  %v3761_v25 = vld [vmem:[%s5710_s2 + $0x6] sm:$0x3] }
 0x375   : > { %v1780_v36 = vmul.f32 %v1776_v27, %v5086_v32  ;;  %v4318_v32 = vld [vmem:[%s5709_s1 + $0x6f0] ss:$8 sps:$4 sm:$0xff]   ;;  %2470 = vmatprep.subr.bf16.mxu0 %v4320_v21  ;;  %v2270_v34 = vrot.slane %v3761_v25, %v4879_v55 }
 0x376   : > { %1978 = vmatmul.mubr.bf16.gmra.mxu1 %v1852_v22  ;;  %v5327_v16 = vadd.f32 %v1781_v13, %v1773_v35  ;;  %2471 = vmatpush1.bf16.msra.mxu0 %v4318_v32  ;;  %v2104_v19 = vpop.f32.mrf.mxu0  ;;  %v1975_v22 = vpop.f32.mrf.mxu1 }
 0x377   : > { %2233 = vmatprep.mubr.bf16.mxu1 %v4566_v2  ;;  %v5329_v37 = vadd.f32 %v1780_v36, %v1772_v30  ;;  %2472 = vmatprep.subr.bf16.mxu0 %v4326_v40  ;;  %v2105_v27 = vadd.f32 %v2104_v19, %v1971_v11 }
 0x378   : > { %v2106_v14 = vpop.f32.mrf.mxu0 }
 0x379   : > { %v1854_v1 = vpack.c.bf16 %v5327_v16, %v5329_v37 }
 0x37a   : > { %2473 = vmatpush1.bf16.msra.mxu0 %v4324_v41  ;;  %v2108_v23 = vpop.f32.mrf.mxu0 }
 0x37b   : > { %2474 = vmatprep.subr.bf16.mxu0 %v4332_v48  ;;  %v2109_v36 = vadd.f32 %v2108_v23, %v1975_v22 }
 0x37c   : > { %v2112_v57 = vpop.f32.mrf.mxu0 }
 0x37e   : > { %2234 = vmatmul.mubr.bf16.vlgmr.msra.gmra.mxu1 %v1853_v24  ;;  %2475 = vmatpush1.bf16.msra.mxu0 %v4330_v49  ;;  %v2114_v24 = vpop.f32.mrf.mxu0 }
 0x37f   : > { %2243 = vmatprep.mubr.bf16.mxu1 %v4566_v2  ;;  %2604 = vmatpush1.bf16.msra.mxu1 %v4321_v39 }
 0x380   : > { %2605 = vmatprep.subr.bf16.mxu1 %v4329_v43  ;;  %2476 = vmatprep.subr.bf16.mxu0 %v4338_v54 }
 0x382   : > { %2477 = vmatpush1.bf16.msra.mxu0 %v4336_v42 }
 0x383   : > { %2606 = vmatpush1.bf16.msra.mxu1 %v4327_v46  ;;  %2478 = vmatprep.subr.bf16.mxu0 %v4344_v58 }
 0x384   : > { %2607 = vmatprep.subr.bf16.mxu1 %v4335_v50 }
 0x386   : > { %2244 = vmatmul.mubr.bf16.gmra.mxu1 %v1854_v1  ;;  %2479 = vmatpush1.bf16.msra.mxu0 %v4342_v51  ;;  %v2116_v1 = vpop.f32.mrf.mxu0 }
 0x387   : > { %2635 = vmatprep.mubr.bf16.mxu1 %v4566_v2  ;;  %2608 = vmatpush1.bf16.msra.mxu1 %v4333_v53 }
 0x388   : > { %2609 = vmatprep.subr.bf16.mxu1 %v4341_v45  ;;  %2480 = vmatprep.subr.bf16.mxu0 %v4350_v62  ;;  %v2118_v43 = vpop.f32.mrf.mxu0 }
 0x38a   : > { %2481 = vmatpush1.bf16.msra.mxu0 %v4348_v28 }
 0x38b   : > { %2610 = vmatpush1.bf16.msra.mxu1 %v4339_v59  ;;  %2482 = vmatprep.subr.bf16.mxu0 %v4356_v52  ;;  %v2103_v52 = vadd.f32 %v2102_v15, %v1969_v10 }
 0x38c   : > { %2611 = vmatprep.subr.bf16.mxu1 %v4347_v47 }
 0x38e   : > { %2483 = vmatpush1.bf16.msra.mxu0 %v4354_v3 }
 0x38f   : > { %2612 = vmatpush1.bf16.msra.mxu1 %v4345_v56  ;;  %2484 = vmatprep.subr.bf16.mxu0 %v4362_v7 }
 0x390   : > { %2613 = vmatprep.subr.bf16.mxu1 %v4353_v63 }
 0x392   : > { %2485 = vmatpush1.bf16.msra.mxu0 %v4360_v44  ;;  %v2107_v44 = vadd.f32 %v2106_v14, %v1973_v18 }
 0x393   : > { %2614 = vmatpush1.bf16.msra.mxu1 %v4351_v0  ;;  %2736 = vmatprep.subr.bf16.mxu0 %v4368_v9 }
 0x394   : > { %2615 = vmatprep.subr.bf16.mxu1 %v4359_v4 }
 0x397   : > { %2616 = vmatpush1.bf16.msra.mxu1 %v4357_v6  ;;  %v2266_v6 = vrot.slane %v3761_v25, %v4885_v33 }
 0x398   : > { %2617 = vmatprep.subr.bf16.mxu1 %v4365_v5 }
 0x39b   : > { %2618 = vmatpush1.bf16.msra.mxu1 %v4363_v60 }
 0x436   : > { %v1979_v20 = vpop.f32.mrf.mxu1 }
 0x437   : > { %v2113_v19 = vadd.f32 %v2112_v57, %v1979_v20 }
 0x438   : > { %v1981_v31 = vpop.f32.mrf.mxu1 }
 0x439   : > { %v2115_v40 = vadd.f32 %v2114_v24, %v1981_v31 }
 0x43a   : > { %v5433_v17 = vpop.f32.mrf.mxu1 }
 0x43c   : > { %v1985_v29 = vpop.f32.mrf.mxu1 }
 0x43d   : > { %v2119_v53 = vadd.f32 %v2118_v43, %v1985_v29  ;;  %v4371_v43 = vld [vmem:[%s5709_s1 + $0x764] ss:$8 sps:$4 sm:$0xff]  }
 0x43e   : > { %v2235_v26 = vpop.f32.mrf.mxu1 }
 0x43f   : > { %v2254_v4 = vadd.f32 %v2235_v26, %v2103_v52  ;;  %v2117_v26 = vadd.f32 %v2116_v1, %v5433_v17  ;;  %v4387_v52 = vld [vmem:[%s5709_s1 + $0x700] ss:$8 sps:$4 sm:$0xff]  }
 0x440   : > { %v2237_v13 = vpop.f32.mrf.mxu1 }
 0x441   : > { %v2255_v61 = vadd.f32 %v2237_v13, %v2105_v27  ;;  %v2273_v60 = vadd.f32 %v2266_v6, %v2254_v4 }
 0x442   : > { %v2239_v35 = vpop.f32.mrf.mxu1 }
 0x443   : > { %v2274_v30 = vadd.f32 %v2270_v34, %v2255_v61  ;;  %v2256_v11 = vadd.f32 %v2239_v35, %v2107_v44  ;;  %v4395_v44 = vld [vmem:[%s5709_s1 + $0x7f4] ss:$8 sps:$4 sm:$0xff]  }
 0x444   : > { %v2241_v21 = vpop.f32.mrf.mxu1 }
 0x445   : > { %v3810_v32 = vmul.f32 -1.442695, %v2274_v30  ;;  %v2257_v38 = vadd.f32 %v2241_v21, %v2109_v36  ;;  %v2275_v10 = vadd.f32 %v2266_v6, %v2256_v11  ;;  %v4366_v21 = vld [vmem:[%s5709_s1 + $0x770] ss:$8 sps:$4 sm:$0xff]   ;;  %v4401_v11 = vld [vmem:[%s5709_s1 + $0x7e4] ss:$8 sps:$4 sm:$0xff]  }
 0x446   : > { %v2245_v39 = vpop.f32.mrf.mxu1 }
 0x447   : > { %4510 = vpow2.f32 %v3810_v32  ;;  %v2276_v41 = vadd.f32 %v2270_v34, %v2257_v38  ;;  %v2258_v27 = vadd.f32 %v2245_v39, %v2113_v19  ;;  %v4399_v19 = vld [vmem:[%s5709_s1 + $0x7e0] ss:$8 sps:$4 sm:$0xff]  }
 0x448   : > { %v2247_v46 = vpop.f32.mrf.mxu1 }
 0x449   : > { %v3811_v48 = vmul.f32 -1.442695, %v2276_v41  ;;  %v2259_v49 = vadd.f32 %v2247_v46, %v2115_v40  ;;  %v2277_v20 = vadd.f32 %v2266_v6, %v2258_v27  ;;  %v4374_v46 = vld [vmem:[%s5709_s1 + $0x754] ss:$8 sps:$4 sm:$0xff]   ;;  %v4408_v27 = vld [vmem:[%s5709_s1 + $0x840] ss:$8 sps:$4 sm:$0xff]  }
 0x44a   : > { %v2249_v50 = vpop.f32.mrf.mxu1 }
 0x44b   : > { %4512 = vpow2.f32 %v3811_v48  ;;  %v2278_v54 = vadd.f32 %v2270_v34, %v2259_v49  ;;  %v2260_v24 = vadd.f32 %v2249_v50, %v2117_v26  ;;  %v4372_v48 = vld [vmem:[%s5709_s1 + $0x750] ss:$8 sps:$4 sm:$0xff]   ;;  %v4413_v26 = vld [vmem:[%s5709_s1 + $0x7c4] ss:$8 sps:$4 sm:$0xff]  }
 0x44c   : > { %v2251_v42 = vpop.f32.mrf.mxu1 }
 0x44d   : > { %v3812_v45 = vmul.f32 -1.442695, %v2278_v54  ;;  %v2261_v59 = vadd.f32 %v2251_v42, %v2119_v53  ;;  %v2279_v17 = vadd.f32 %v2266_v6, %v2260_v24  ;;  %v4392_v6 = vld [vmem:[%s5709_s1 + $0x874] ss:$8 sps:$4 sm:$0xff]   ;;  %v4422_v24 = vld [vmem:[%s5709_s1 + $0x824] ss:$8 sps:$4 sm:$0xff]  }
 0x44e   : > { %3005 = vmatprep.subr.bf16.mxu1 %v4392_v6 }
 0x44f   : > { %4514 = vpow2.f32 %v3812_v45  ;;  %v2280_v58 = vadd.f32 %v2270_v34, %v2261_v59  ;;  %v4377_v59 = vld [vmem:[%s5709_s1 + $0x744] ss:$8 sps:$4 sm:$0xff]  }
 0x451   : > { %v3813_v51 = vmul.f32 -1.442695, %v2280_v58  ;;  %v4375_v58 = vld [vmem:[%s5709_s1 + $0x740] ss:$8 sps:$4 sm:$0xff]  }
 0x453   : > { %4516 = vpow2.f32 %v3813_v51  ;;  %v4380_v51 = vld [vmem:[%s5709_s1 + $0x734] ss:$8 sps:$4 sm:$0xff]  }
 0x454   : > { %v4511_v47 = vpop.eup %4510 }
 0x455   : > { %v2293_v56 = vadd.f32 1.0, %v4511_v47  ;;  %v4378_v47 = vld [vmem:[%s5709_s1 + $0x730] ss:$8 sps:$4 sm:$0xff]  }
 0x457   : > { %4518 = vrcp.f32 %v2293_v56  ;;  %v4383_v56 = vld [vmem:[%s5709_s1 + $0x724] ss:$8 sps:$4 sm:$0xff]  }
 0x458   : > { %v4513_v62 = vpop.eup %4512 }
 0x459   : > { %v2294_v28 = vadd.f32 1.0, %v4513_v62  ;;  %v4381_v62 = vld [vmem:[%s5709_s1 + $0x720] ss:$8 sps:$4 sm:$0xff]  }
 0x45b   : > { %4520 = vrcp.f32 %v2294_v28  ;;  %v4386_v28 = vld [vmem:[%s5709_s1 + $0x714] ss:$8 sps:$4 sm:$0xff]  }
 0x45c   : > { %v4515_v63 = vpop.eup %4514 }
 0x45d   : > { %v2295_v0 = vadd.f32 1.0, %v4515_v63  ;;  %v4384_v63 = vld [vmem:[%s5709_s1 + $0x710] ss:$8 sps:$4 sm:$0xff]  }
 0x45f   : > { %4522 = vrcp.f32 %v2295_v0  ;;  %v4389_v0 = vld [vmem:[%s5709_s1 + $0x704] ss:$8 sps:$4 sm:$0xff]  }
 0x460   : > { %v4517_v3 = vpop.eup %4516 }
 0x461   : > { %v2296_v7 = vadd.f32 1.0, %v4517_v3 }
 0x463   : > { %4524 = vrcp.f32 %v2296_v7  ;;  %v4390_v7 = vld [vmem:[%s5709_s1 + $0x870] ss:$8 sps:$4 sm:$0xff]  }
 0x464   : > { %v4519_v5 = vpop.eup %4518 }
 0x465   : > { %v2309_v9 = vsub.f32 1.0, %v4519_v5  ;;  %v2305_v22 = vmul.f32 %v4519_v5, %v2273_v60  ;;  %v4393_v5 = vld [vmem:[%s5709_s1 + $0x7f0] ss:$8 sps:$4 sm:$0xff]   ;;  %v4398_v60 = vld [vmem:[%s5709_s1 + $0x864] ss:$8 sps:$4 sm:$0xff]  }
 0x467   : > { %v2313_v31 = vmul.f32 %v2309_v9, %v5311_v8  ;;  %v4396_v9 = vld [vmem:[%s5709_s1 + $0x860] ss:$8 sps:$4 sm:$0xff]  }
 0x468   : > { %v4521_v23 = vpop.eup %4520 }
 0x469   : > { %v5441_v29 = vadd.f32 %v2313_v31, %v2305_v22  ;;  %v2310_v15 = vsub.f32 1.0, %v4521_v23  ;;  %v2306_v18 = vmul.f32 %v4521_v23, %v2275_v10  ;;  %v4404_v22 = vld [vmem:[%s5709_s1 + $0x854] ss:$8 sps:$4 sm:$0xff]   ;;  %v4402_v31 = vld [vmem:[%s5709_s1 + $0x850] ss:$8 sps:$4 sm:$0xff]  }
 0x46a   : > { %v4407_v23 = vld [vmem:[%s5709_s1 + $0x7d4] ss:$8 sps:$4 sm:$0xff]   ;;  %v4405_v10 = vld [vmem:[%s5709_s1 + $0x7d0] ss:$8 sps:$4 sm:$0xff]  }
 0x46b   : > { %2321 = vst [vmem:[#allocation2 + $0x38] sm:$0xff] %v5441_v29  ;;  %v2314_v14 = vmul.f32 %v2310_v15, %v5320_v12  ;;  %v4410_v15 = vld [vmem:[%s5709_s1 + $0x844] ss:$8 sps:$4 sm:$0xff]  }
 0x46c   : > { %v4523_v25 = vpop.eup %4522 }
 0x46d   : > { %v5446_v34 = vadd.f32 %v2314_v14, %v2306_v18  ;;  %v2311_v57 = vsub.f32 1.0, %v4523_v25  ;;  %v2307_v8 = vmul.f32 %v4523_v25, %v2277_v20  ;;  %v4411_v18 = vld [vmem:[%s5709_s1 + $0x7c0] ss:$8 sps:$4 sm:$0xff]   ;;  %v4416_v14 = vld [vmem:[%s5709_s1 + $0x834] ss:$8 sps:$4 sm:$0xff]  }
 0x46e   : > { %v4414_v25 = vld [vmem:[%s5709_s1 + $0x830] ss:$8 sps:$4 sm:$0xff]   ;;  %v4419_v20 = vld [vmem:[%s5709_s1 + $0x7b4] ss:$8 sps:$4 sm:$0xff]  }
 0x46f   : > { %2322 = vst [vmem:[#allocation2 + $0x40] sm:$0xff] %v5446_v34  ;;  %v2315_v13 = vmul.f32 %v2311_v57, %v5329_v37  ;;  %v2388_v3 = vpack.c.bf16 %v5446_v34, %v5441_v29  ;;  %v4417_v57 = vld [vmem:[%s5709_s1 + $0x7b0] ss:$8 sps:$4 sm:$0xff]  }
 0x470   : > { %v4525_v61 = vpop.eup %4524 }
 0x471   : > { %v5450_v35 = vadd.f32 %v2315_v13, %v2307_v8  ;;  %v2312_v36 = vsub.f32 1.0, %v4525_v61  ;;  %v2308_v30 = vmul.f32 %v4525_v61, %v2279_v17  ;;  %v4420_v8 = vld [vmem:[%s5709_s1 + $0x820] ss:$8 sps:$4 sm:$0xff]   ;;  %v4425_v13 = vld [vmem:[%s5709_s1 + $0x7a4] ss:$8 sps:$4 sm:$0xff]  }
 0x472   : > { %v2382_v32 = vld [vmem:[#allocation2 + $0x37] sm:$0xff]  ;;  %v4423_v61 = vld [vmem:[%s5709_s1 + $0x7a0] ss:$8 sps:$4 sm:$0xff]  }
 0x473   : > { %2323 = vst [vmem:[#allocation2 + $0x48] sm:$0xff] %v5450_v35  ;;  %v2316_v12 = vmul.f32 %v2312_v36, %v5327_v16  ;;  %v2376_v39 = vld [vmem:[#allocation2 + $0x36] sm:$0xff]  ;;  %v4369_v16 = vld [vmem:[%s5709_s1 + $0x760] ss:$8 sps:$4 sm:$0xff]  }
 0x474   : > { %v4428_v17 = vld [vmem:[%s5709_s1 + $0x814] ss:$8 sps:$4 sm:$0xff]   ;;  %v4426_v36 = vld [vmem:[%s5709_s1 + $0x810] ss:$8 sps:$4 sm:$0xff]  }
 0x475   : > { %v5454_v1 = vadd.f32 %v2316_v12, %v2308_v30  ;;  %v4431_v30 = vld [vmem:[%s5709_s1 + $0x794] ss:$8 sps:$4 sm:$0xff]   ;;  %v4429_v12 = vld [vmem:[%s5709_s1 + $0x790] ss:$8 sps:$4 sm:$0xff]  }
 0x476   : > { %v2383_v38 = vld [vmem:[#allocation2 + $0x3f] sm:$0xff] }
 0x477   : > { %v2377_v37 = vld [vmem:[#allocation2 + $0x3e] sm:$0xff]  ;;  %2324 = vst [vmem:[#allocation2 + $0x50] sm:$0xff] %v5454_v1  ;;  %v2386_v40 = vpack.c.bf16 %v2383_v38, %v2382_v32  ;;  %v2389_v4 = vpack.c.bf16 %v5454_v1, %v5450_v35 }
 0x478   : > { %v2380_v41 = vpack.c.bf16 %v2377_v37, %v2376_v39  ;;  %v4432_v32 = vld [vmem:[%s5709_s1 + $0x800] ss:$8 sps:$4 sm:$0xff]   ;;  %v4437_v38 = vld [vmem:[%s5709_s1 + $0x784] ss:$8 sps:$4 sm:$0xff]   ;;  %v4440_v37 = vld [vmem:[%s5709_s1 + $0x8f4] ss:$8 sps:$4 sm:$0xff]  }
 0x479   : > { %2503 = vmatmul.mubr.bf16.vlgmr.msra.gmra.mxu0 %v2386_v40  ;;  %v4435_v39 = vld [vmem:[%s5709_s1 + $0x780] ss:$8 sps:$4 sm:$0xff]  }
 0x47a   : > { %2636 = vmatmul.mubr.bf16.vlgmr.msra.gmra.mxu1 %v2380_v41  ;;  %2737 = vmatpush1.bf16.msra.mxu0 %v4366_v21  ;;  %v2384_v49 = vld [vmem:[#allocation2 + $0x47] sm:$0xff] }
 0x47b   : > { %2512 = vmatprep.mubr.bf16.mxu0 %v4566_v2  ;;  %2738 = vmatprep.subr.bf16.mxu0 %v4371_v43  ;;  %v2378_v53 = vld [vmem:[#allocation2 + $0x46] sm:$0xff] }
 0x47c   : > { %2645 = vmatprep.mubr.bf16.mxu1 %v4566_v2  ;;  %3006 = vmatpush1.bf16.msra.mxu1 %v4390_v7  ;;  %v4434_v21 = vld [vmem:[%s5709_s1 + $0x804] ss:$8 sps:$4 sm:$0xff]  }
 0x47d   : > { %3007 = vmatprep.subr.bf16.mxu1 %v4398_v60 }
 0x47e   : > { %2739 = vmatpush1.bf16.msra.mxu0 %v4369_v16  ;;  %v2385_v50 = vld [vmem:[#allocation2 + $0x4f] sm:$0xff] }
 0x47f   : > { %v2379_v54 = vld [vmem:[#allocation2 + $0x4e] sm:$0xff]  ;;  %2740 = vmatprep.subr.bf16.mxu0 %v4374_v46  ;;  %v2387_v42 = vpack.c.bf16 %v2385_v50, %v2384_v49 }
 0x480   : > { %v2381_v45 = vpack.c.bf16 %v2379_v54, %v2378_v53  ;;  %3008 = vmatpush1.bf16.msra.mxu1 %v4396_v9 }
 0x481   : > { %2513 = vmatmul.mubr.bf16.gmra.mxu0 %v2387_v42  ;;  %3009 = vmatprep.subr.bf16.mxu1 %v4404_v22 }
 0x482   : > { %2646 = vmatmul.mubr.bf16.gmra.mxu1 %v2381_v45  ;;  %2741 = vmatpush1.bf16.msra.mxu0 %v4372_v48 }
 0x483   : > { %2768 = vmatprep.mubr.bf16.mxu0 %v4566_v2  ;;  %2742 = vmatprep.subr.bf16.mxu0 %v4377_v59 }
 0x484   : > { %3037 = vmatprep.mubr.bf16.mxu1 %v4566_v2  ;;  %3010 = vmatpush1.bf16.msra.mxu1 %v4402_v31 }
 0x485   : > { %3011 = vmatprep.subr.bf16.mxu1 %v4410_v15 }
 0x486   : > { %2743 = vmatpush1.bf16.msra.mxu0 %v4375_v58  ;;  %v3862_v58 = vld [vmem:[%s5710_s2 + $0x8] sm:$0x3] }
 0x487   : > { %2744 = vmatprep.subr.bf16.mxu0 %v4380_v51 }
 0x488   : > { %3012 = vmatpush1.bf16.msra.mxu1 %v4408_v27 }
 0x489   : > { %3013 = vmatprep.subr.bf16.mxu1 %v4416_v14 }
 0x48a   : > { %2745 = vmatpush1.bf16.msra.mxu0 %v4378_v47 }
 0x48b   : > { %2746 = vmatprep.subr.bf16.mxu0 %v4383_v56  ;;  %v2805_v56 = vrot.slane %v3862_v58, %v4879_v55 }
 0x48c   : > { %3014 = vmatpush1.bf16.msra.mxu1 %v4414_v25 }
 0x48d   : > { %3015 = vmatprep.subr.bf16.mxu1 %v4422_v24 }
 0x48e   : > { %2747 = vmatpush1.bf16.msra.mxu0 %v4381_v62 }
 0x48f   : > { %2748 = vmatprep.subr.bf16.mxu0 %v4386_v28 }
 0x490   : > { %3016 = vmatpush1.bf16.msra.mxu1 %v4420_v8 }
 0x491   : > { %3017 = vmatprep.subr.bf16.mxu1 %v4428_v17 }
 0x492   : > { %2749 = vmatpush1.bf16.msra.mxu0 %v4384_v63 }
 0x493   : > { %2750 = vmatprep.subr.bf16.mxu0 %v4389_v0 }
 0x494   : > { %3018 = vmatpush1.bf16.msra.mxu1 %v4426_v36 }
 0x495   : > { %3019 = vmatprep.subr.bf16.mxu1 %v4434_v21 }
 0x496   : > { %2751 = vmatpush1.bf16.msra.mxu0 %v4387_v52 }
 0x497   : > { %3138 = vmatprep.subr.bf16.mxu0 %v4395_v44 }
 0x498   : > { %3020 = vmatpush1.bf16.msra.mxu1 %v4432_v32 }
 0x499   : > { %2769 = vmatmul.mubr.bf16.vlgmr.msra.gmra.mxu0 %v2388_v3  ;;  %3271 = vmatprep.subr.bf16.mxu1 %v4440_v37 }
 0x49a   : > { %2778 = vmatprep.mubr.bf16.mxu0 %v4566_v2  ;;  %3139 = vmatpush1.bf16.msra.mxu0 %v4393_v5 }
 0x49b   : > { %3140 = vmatprep.subr.bf16.mxu0 %v4401_v11 }
 0x49e   : > { %3141 = vmatpush1.bf16.msra.mxu0 %v4399_v19 }
 0x49f   : > { %3142 = vmatprep.subr.bf16.mxu0 %v4407_v23 }
 0x4a1   : > { %2779 = vmatmul.mubr.bf16.gmra.mxu0 %v2389_v4 }
 0x4a2   : > { %3170 = vmatprep.mubr.bf16.mxu0 %v4566_v2  ;;  %3143 = vmatpush1.bf16.msra.mxu0 %v4405_v10 }
 0x4a3   : > { %3144 = vmatprep.subr.bf16.mxu0 %v4413_v26 }
 0x4a6   : > { %3145 = vmatpush1.bf16.msra.mxu0 %v4411_v18 }
 0x4a7   : > { %3146 = vmatprep.subr.bf16.mxu0 %v4419_v20 }
 0x4aa   : > { %3147 = vmatpush1.bf16.msra.mxu0 %v4417_v57 }
 0x4ab   : > { %3148 = vmatprep.subr.bf16.mxu0 %v4425_v13 }
 0x4ae   : > { %3149 = vmatpush1.bf16.msra.mxu0 %v4423_v61 }
 0x4af   : > { %3150 = vmatprep.subr.bf16.mxu0 %v4431_v30 }
 0x4b2   : > { %3151 = vmatpush1.bf16.msra.mxu0 %v4429_v12  ;;  %v2801_v12 = vrot.slane %v3862_v58, %v4885_v33 }
 0x4b3   : > { %3152 = vmatprep.subr.bf16.mxu0 %v4437_v38 }
 0x4b6   : > { %3153 = vmatpush1.bf16.msra.mxu0 %v4435_v39 }
 0x539   : > { %v2504_v40 = vpop.f32.mrf.mxu0 }
 0x53a   : > { %v2637_v16 = vpop.f32.mrf.mxu1 }
 0x53b   : > { %v2506_v41 = vpop.f32.mrf.mxu0  ;;  %v2638_v17 = vadd.f32 %v2637_v16, %v2504_v40 }
 0x53c   : > { %v2639_v48 = vpop.f32.mrf.mxu1 }
 0x53d   : > { %v2508_v43 = vpop.f32.mrf.mxu0  ;;  %v2640_v47 = vadd.f32 %v2639_v48, %v2506_v41 }
 0x53e   : > { %v2641_v50 = vpop.f32.mrf.mxu1 }
 0x53f   : > { %v2510_v46 = vpop.f32.mrf.mxu0  ;;  %v2642_v32 = vadd.f32 %v2641_v50, %v2508_v43 }
 0x540   : > { %v2643_v54 = vpop.f32.mrf.mxu1 }
 0x541   : > { %v2514_v49 = vpop.f32.mrf.mxu0  ;;  %v2644_v52 = vadd.f32 %v2643_v54, %v2510_v46 }
 0x542   : > { %v2647_v45 = vpop.f32.mrf.mxu1 }
 0x543   : > { %v2516_v53 = vpop.f32.mrf.mxu0  ;;  %v2648_v46 = vadd.f32 %v2647_v45, %v2514_v49 }
 0x544   : > { %v2649_v62 = vpop.f32.mrf.mxu1 }
 0x545   : > { %v5611_v42 = vpop.f32.mrf.mxu0  ;;  %v2650_v60 = vadd.f32 %v2649_v62, %v2516_v53 }
 0x546   : > { %v2651_v4 = vpop.f32.mrf.mxu1 }
 0x547   : > { %v2520_v59 = vpop.f32.mrf.mxu0 }
 0x548   : > { %v2653_v11 = vpop.f32.mrf.mxu1 }
 0x549   : > { %v2654_v10 = vadd.f32 %v2653_v11, %v2520_v59  ;;  %v4443_v11 = vld [vmem:[%s5709_s1 + $0x8e4] ss:$8 sps:$4 sm:$0xff]  }
 0x559   : > { %v2770_v51 = vpop.f32.mrf.mxu0 }
 0x55a   : > { %v2789_v30 = vadd.f32 %v2770_v51, %v2638_v17  ;;  %v2652_v51 = vadd.f32 %v2651_v4, %v5611_v42  ;;  %v4459_v17 = vld [vmem:[%s5709_s1 + $0x880] ss:$8 sps:$4 sm:$0xff]  }
 0x55b   : > { %v2772_v28 = vpop.f32.mrf.mxu0 }
 0x55c   : > { %v2790_v63 = vadd.f32 %v2772_v28, %v2640_v47  ;;  %v2808_v39 = vadd.f32 %v2801_v12, %v2789_v30 }
 0x55d   : > { %v2774_v0 = vpop.f32.mrf.mxu0 }
 0x55e   : > { %v2809_v3 = vadd.f32 %v2805_v56, %v2790_v63  ;;  %v2791_v41 = vadd.f32 %v2774_v0, %v2642_v32 }
 0x55f   : > { %v2776_v6 = vpop.f32.mrf.mxu0 }
 0x560   : > { %v3911_v7 = vmul.f32 -1.442695, %v2809_v3  ;;  %v2792_v44 = vadd.f32 %v2776_v6, %v2644_v52  ;;  %v2810_v40 = vadd.f32 %v2801_v12, %v2791_v41  ;;  %v4438_v6 = vld [vmem:[%s5709_s1 + $0x8f0] ss:$8 sps:$4 sm:$0xff]  }
 0x561   : > { %v2780_v5 = vpop.f32.mrf.mxu0 }
 0x562   : > { %4526 = vpow2.f32 %v3911_v7  ;;  %v2811_v9 = vadd.f32 %v2805_v56, %v2792_v44  ;;  %v2793_v47 = vadd.f32 %v2780_v5, %v2648_v46 }
 0x563   : > { %v2782_v19 = vpop.f32.mrf.mxu0 }
 0x564   : > { %v3912_v22 = vmul.f32 -1.442695, %v2811_v9  ;;  %v2794_v31 = vadd.f32 %v2782_v19, %v2650_v60  ;;  %v2812_v49 = vadd.f32 %v2801_v12, %v2793_v47  ;;  %v4446_v19 = vld [vmem:[%s5709_s1 + $0x8d4] ss:$8 sps:$4 sm:$0xff]  }
 0x565   : > { %v2784_v23 = vpop.f32.mrf.mxu0 }
 0x566   : > { %4528 = vpow2.f32 %v3912_v22  ;;  %v2813_v15 = vadd.f32 %v2805_v56, %v2794_v31  ;;  %v2795_v62 = vadd.f32 %v2784_v23, %v2652_v51  ;;  %v4444_v22 = vld [vmem:[%s5709_s1 + $0x8d0] ss:$8 sps:$4 sm:$0xff]  }
 0x567   : > { %v2786_v27 = vpop.f32.mrf.mxu0 }
 0x568   : > { %v3913_v26 = vmul.f32 -1.442695, %v2813_v15  ;;  %v2796_v18 = vadd.f32 %v2786_v27, %v2654_v10  ;;  %v2814_v42 = vadd.f32 %v2801_v12, %v2795_v62 }
 0x56a   : > { %4530 = vpow2.f32 %v3913_v26  ;;  %v2815_v14 = vadd.f32 %v2805_v56, %v2796_v18  ;;  %v4449_v18 = vld [vmem:[%s5709_s1 + $0x8c4] ss:$8 sps:$4 sm:$0xff]  }
 0x56c   : > { %v3914_v25 = vmul.f32 -1.442695, %v2815_v14  ;;  %v4447_v14 = vld [vmem:[%s5709_s1 + $0x8c0] ss:$8 sps:$4 sm:$0xff]  }
 0x56e   : > { %4532 = vpow2.f32 %v3914_v25  ;;  %v4452_v25 = vld [vmem:[%s5709_s1 + $0x8b4] ss:$8 sps:$4 sm:$0xff]  }
 0x56f   : > { %v4527_v20 = vpop.eup %4526 }
 0x570   : > { %v2828_v57 = vadd.f32 1.0, %v4527_v20  ;;  %v4450_v20 = vld [vmem:[%s5709_s1 + $0x8b0] ss:$8 sps:$4 sm:$0xff]  }
 0x572   : > { %4534 = vrcp.f32 %v2828_v57  ;;  %v4455_v57 = vld [vmem:[%s5709_s1 + $0x8a4] ss:$8 sps:$4 sm:$0xff]  }
 0x573   : > { %v4529_v24 = vpop.eup %4528 }
 0x574   : > { %v2829_v8 = vadd.f32 1.0, %v4529_v24  ;;  %v4453_v24 = vld [vmem:[%s5709_s1 + $0x8a0] ss:$8 sps:$4 sm:$0xff]  }
 0x576   : > { %4536 = vrcp.f32 %v2829_v8  ;;  %v4458_v8 = vld [vmem:[%s5709_s1 + $0x894] ss:$8 sps:$4 sm:$0xff]  }
 0x577   : > { %v4531_v13 = vpop.eup %4530 }
 0x578   : > { %v2830_v61 = vadd.f32 1.0, %v4531_v13  ;;  %v4456_v13 = vld [vmem:[%s5709_s1 + $0x890] ss:$8 sps:$4 sm:$0xff]  }
 0x57a   : > { %4538 = vrcp.f32 %v2830_v61  ;;  %v4461_v61 = vld [vmem:[%s5709_s1 + $0x884] ss:$8 sps:$4 sm:$0xff]  }
 0x57b   : > { %v4533_v36 = vpop.eup %4532 }
 0x57c   : > { %v2831_v21 = vadd.f32 1.0, %v4533_v36 }
 0x57e   : > { %4540 = vrcp.f32 %v2831_v21 }
 0x57f   : > { %v4535_v38 = vpop.eup %4534 }
 0x580   : > { %v2844_v37 = vsub.f32 1.0, %v4535_v38  ;;  %v2840_v48 = vmul.f32 %v4535_v38, %v2808_v39 }
 0x582   : > { %v2848_v53 = vmul.f32 %v2844_v37, %v5441_v29 }
 0x583   : > { %v4537_v54 = vpop.eup %4536 }
 0x584   : > { %v5619_v59 = vadd.f32 %v2848_v53, %v2840_v48  ;;  %v2845_v16 = vsub.f32 1.0, %v4537_v54  ;;  %v2841_v43 = vmul.f32 %v4537_v54, %v2810_v40 }
 0x586   : > { %2856 = vst [vmem:[#allocation2 + $0x38] sm:$0xff] %v5619_v59  ;;  %v2849_v50 = vmul.f32 %v2845_v16, %v5446_v34 }
 0x587   : > { %v4539_v58 = vpop.eup %4538 }
 0x588   : > { %v5624_v56 = vadd.f32 %v2849_v50, %v2841_v43  ;;  %v2846_v45 = vsub.f32 1.0, %v4539_v58  ;;  %v2842_v29 = vmul.f32 %v4539_v58, %v2812_v49 }
 0x58a   : > { %2857 = vst [vmem:[#allocation2 + $0x40] sm:$0xff] %v5624_v56  ;;  %v2850_v28 = vmul.f32 %v2846_v45, %v5450_v35  ;;  %v2923_v36 = vpack.c.bf16 %v5624_v56, %v5619_v59 }
 0x58b   : > { %v4541_v63 = vpop.eup %4540 }
 0x58c   : > { %v5628_v0 = vadd.f32 %v2850_v28, %v2842_v29  ;;  %v2847_v52 = vsub.f32 1.0, %v4541_v63  ;;  %v2843_v3 = vmul.f32 %v4541_v63, %v2814_v42 }
 0x58d   : > { %v2917_v7 = vld [vmem:[#allocation2 + $0x37] sm:$0xff] }
 0x58e   : > { %2858 = vst [vmem:[#allocation2 + $0x48] sm:$0xff] %v5628_v0  ;;  %v2851_v34 = vmul.f32 %v2847_v52, %v5454_v1  ;;  %v2911_v5 = vld [vmem:[#allocation2 + $0x36] sm:$0xff]  ;;  %v4441_v1 = vld [vmem:[%s5709_s1 + $0x8e0] ss:$8 sps:$4 sm:$0xff]  }
 0x590   : > { %v5632_v4 = vadd.f32 %v2851_v34, %v2843_v3 }
 0x591   : > { %v2918_v44 = vld [vmem:[#allocation2 + $0x3f] sm:$0xff] }
 0x592   : > { %v2912_v35 = vld [vmem:[#allocation2 + $0x3e] sm:$0xff]  ;;  %2859 = vst [vmem:[#allocation2 + $0x50] sm:$0xff] %v5632_v4  ;;  %v2921_v60 = vpack.c.bf16 %v2918_v44, %v2917_v7  ;;  %v2924_v30 = vpack.c.bf16 %v5632_v4, %v5628_v0 }
 0x593   : > { %v2915_v9 = vpack.c.bf16 %v2912_v35, %v2911_v5 }
 0x594   : > { %3038 = vmatmul.mubr.bf16.vlgmr.msra.gmra.mxu1 %v2921_v60 }
 0x595   : > { %3171 = vmatmul.mubr.bf16.vlgmr.msra.gmra.mxu0 %v2915_v9  ;;  %3272 = vmatpush1.bf16.msra.mxu1 %v4438_v6  ;;  %v2919_v31 = vld [vmem:[#allocation2 + $0x47] sm:$0xff] }
 0x596   : > { %3047 = vmatprep.mubr.bf16.mxu1 %v4566_v2  ;;  %3273 = vmatprep.subr.bf16.mxu1 %v4443_v11  ;;  %v2913_v10 = vld [vmem:[#allocation2 + $0x46] sm:$0xff] }
 0x597   : > { %3180 = vmatprep.mubr.bf16.mxu0 %v4566_v2 }
 0x599   : > { %3274 = vmatpush1.bf16.msra.mxu1 %v4441_v1  ;;  %v2920_v23 = vld [vmem:[#allocation2 + $0x4f] sm:$0xff] }
 0x59a   : > { %v2914_v15 = vld [vmem:[#allocation2 + $0x4e] sm:$0xff]  ;;  %3275 = vmatprep.subr.bf16.mxu1 %v4446_v19  ;;  %v2922_v27 = vpack.c.bf16 %v2920_v23, %v2919_v31 }
 0x59b   : > { %v2916_v26 = vpack.c.bf16 %v2914_v15, %v2913_v10 }
 0x59c   : > { %3048 = vmatmul.mubr.bf16.gmra.mxu1 %v2922_v27 }
 0x59d   : > { %3181 = vmatmul.mubr.bf16.gmra.mxu0 %v2916_v26  ;;  %3276 = vmatpush1.bf16.msra.mxu1 %v4444_v22 }
 0x59e   : > { %3303 = vmatprep.mubr.bf16.mxu1 %v4566_v2  ;;  %3277 = vmatprep.subr.bf16.mxu1 %v4449_v18 }
 0x5a1   : > { %3278 = vmatpush1.bf16.msra.mxu1 %v4447_v14 }
 0x5a2   : > { %3279 = vmatprep.subr.bf16.mxu1 %v4452_v25 }
 0x5a5   : > { %3280 = vmatpush1.bf16.msra.mxu1 %v4450_v20 }
 0x5a6   : > { %3281 = vmatprep.subr.bf16.mxu1 %v4455_v57 }
 0x5a9   : > { %3282 = vmatpush1.bf16.msra.mxu1 %v4453_v24 }
 0x5aa   : > { %3283 = vmatprep.subr.bf16.mxu1 %v4458_v8 }
 0x5ad   : > { %3284 = vmatpush1.bf16.msra.mxu1 %v4456_v13 }
 0x5ae   : > { %3285 = vmatprep.subr.bf16.mxu1 %v4461_v61 }
 0x5b1   : > { %3286 = vmatpush1.bf16.msra.mxu1 %v4459_v17 }
 0x5b4   : > { %3304 = vmatmul.mubr.bf16.vlgmr.msra.gmra.mxu1 %v2923_v36 }
 0x5b5   : > { %3313 = vmatprep.mubr.bf16.mxu1 %v4566_v2  ;;  %v3963_v2 = vld [vmem:[%s5710_s2 + $0xa] sm:$0x3] }
 0x5b6   : > { %v3340_v43 = vrot.slane %v3963_v2, %v4879_v55  ;;  %v3336_v57 = vrot.slane %v3963_v2, %v4885_v33 }
 0x5bc   : > { %3314 = vmatmul.mubr.bf16.gmra.mxu1 %v2924_v30 }
 0x654   : > { %v3039_v12 = vpop.f32.mrf.mxu1 }
 0x655   : > { %v3172_v38 = vpop.f32.mrf.mxu0 }
 0x656   : > { %v3041_v21 = vpop.f32.mrf.mxu1  ;;  %v3173_v14 = vadd.f32 %v3172_v38, %v3039_v12 }
 0x657   : > { %v3174_v37 = vpop.f32.mrf.mxu0 }
 0x658   : > { %v3043_v32 = vpop.f32.mrf.mxu1  ;;  %v3175_v51 = vadd.f32 %v3174_v37, %v3041_v21 }
 0x659   : > { %v3176_v46 = vpop.f32.mrf.mxu0 }
 0x65a   : > { %v3045_v39 = vpop.f32.mrf.mxu1  ;;  %v3177_v8 = vadd.f32 %v3176_v46, %v3043_v32 }
 0x65b   : > { %v3178_v53 = vpop.f32.mrf.mxu0 }
 0x65c   : > { %v3049_v41 = vpop.f32.mrf.mxu1  ;;  %v3179_v62 = vadd.f32 %v3178_v53, %v3045_v39 }
 0x65d   : > { %v3182_v40 = vpop.f32.mrf.mxu0 }
 0x65e   : > { %v3051_v48 = vpop.f32.mrf.mxu1  ;;  %v3183_v30 = vadd.f32 %v3182_v40, %v3049_v41 }
 0x65f   : > { %v3184_v50 = vpop.f32.mrf.mxu0 }
 0x660   : > { %v5688_v54 = vpop.f32.mrf.mxu1  ;;  %v3185_v34 = vadd.f32 %v3184_v50, %v3051_v48 }
 0x661   : > { %v3186_v28 = vpop.f32.mrf.mxu0 }
 0x662   : > { %v3055_v16 = vpop.f32.mrf.mxu1  ;;  %v3187_v32 = vadd.f32 %v3186_v28, %v5688_v54 }
 0x663   : > { %v3188_v7 = vpop.f32.mrf.mxu0 }
 0x664   : > { %v3189_v55 = vadd.f32 %v3188_v7, %v3055_v16 }
 0x674   : > { %v3305_v47 = vpop.f32.mrf.mxu1 }
 0x675   : > { %v3324_v20 = vadd.f32 %v3305_v47, %v3173_v14 }
 0x676   : > { %v3307_v58 = vpop.f32.mrf.mxu1 }
 0x677   : > { %v3325_v49 = vadd.f32 %v3307_v58, %v3175_v51  ;;  %v3343_v61 = vadd.f32 %v3336_v57, %v3324_v20 }
 0x678   : > { %v3309_v45 = vpop.f32.mrf.mxu1 }
 0x679   : > { %v3344_v29 = vadd.f32 %v3340_v43, %v3325_v49  ;;  %v3326_v36 = vadd.f32 %v3309_v45, %v3177_v8 }
 0x67a   : > { %v3311_v63 = vpop.f32.mrf.mxu1 }
 0x67b   : > { %v4012_v42 = vmul.f32 -1.442695, %v3344_v29  ;;  %v3327_v52 = vadd.f32 %v3311_v63, %v3179_v62  ;;  %v3345_v38 = vadd.f32 %v3336_v57, %v3326_v36 }
 0x67c   : > { %v3315_v3 = vpop.f32.mrf.mxu1 }
 0x67d   : > { %4542 = vpow2.f32 %v4012_v42  ;;  %v3346_v6 = vadd.f32 %v3340_v43, %v3327_v52  ;;  %v3328_v48 = vadd.f32 %v3315_v3, %v3183_v30 }
 0x67e   : > { %v3317_v44 = vpop.f32.mrf.mxu1 }
 0x67f   : > { %v4013_v5 = vmul.f32 -1.442695, %v3346_v6  ;;  %v3329_v35 = vadd.f32 %v3317_v44, %v3185_v34  ;;  %v3347_v16 = vadd.f32 %v3336_v57, %v3328_v48 }
 0x680   : > { %v3319_v60 = vpop.f32.mrf.mxu1 }
 0x681   : > { %4544 = vpow2.f32 %v4013_v5  ;;  %v3348_v9 = vadd.f32 %v3340_v43, %v3329_v35  ;;  %v3330_v2 = vadd.f32 %v3319_v60, %v3187_v32 }
 0x682   : > { %v3321_v11 = vpop.f32.mrf.mxu1 }
 0x683   : > { %v4014_v1 = vmul.f32 -1.442695, %v3348_v9  ;;  %v3331_v19 = vadd.f32 %v3321_v11, %v3189_v55  ;;  %v3349_v58 = vadd.f32 %v3336_v57, %v3330_v2 }
 0x685   : > { %4546 = vpow2.f32 %v4014_v1  ;;  %v3350_v22 = vadd.f32 %v3340_v43, %v3331_v19 }
 0x687   : > { %v4015_v31 = vmul.f32 -1.442695, %v3350_v22 }
 0x689   : > { %4548 = vpow2.f32 %v4015_v31 }
 0x68a   : > { %v4543_v23 = vpop.eup %4542 }
 0x68b   : > { %v3363_v10 = vadd.f32 1.0, %v4543_v23 }
 0x68d   : > { %4550 = vrcp.f32 %v3363_v10 }
 0x68e   : > { %v4545_v15 = vpop.eup %4544 }
 0x68f   : > { %v3364_v27 = vadd.f32 1.0, %v4545_v15 }
 0x691   : > { %4552 = vrcp.f32 %v3364_v27 }
 0x692   : > { %v4547_v26 = vpop.eup %4546 }
 0x693   : > { %v3365_v18 = vadd.f32 1.0, %v4547_v26 }
 0x695   : > { %4554 = vrcp.f32 %v3365_v18 }
 0x696   : > { %v4549_v25 = vpop.eup %4548 }
 0x697   : > { %v3366_v24 = vadd.f32 1.0, %v4549_v25 }
 0x699   : > { %4556 = vrcp.f32 %v3366_v24 }
 0x69a   : > { %v4551_v13 = vpop.eup %4550 }
 0x69b   : > { %v3379_v17 = vsub.f32 1.0, %v4551_v13  ;;  %v3375_v21 = vmul.f32 %v4551_v13, %v3343_v61 }
 0x69d   : > { %v3383_v39 = vmul.f32 %v3379_v17, %v5619_v59 }
 0x69e   : > { %v4553_v37 = vpop.eup %4552 }
 0x69f   : > { %v3387_v12 = vadd.f32 %v3383_v39, %v3375_v21  ;;  %v3380_v33 = vsub.f32 1.0, %v4553_v37  ;;  %v3376_v46 = vmul.f32 %v4553_v37, %v3345_v38 }
 0x6a1   : > { %3391 = vst [vmem:[%s170_s4] sm:$0xff] %v3387_v12  ;;  %v3384_v53 = vmul.f32 %v3380_v33, %v5624_v56 }
 0x6a2   : > { %v4555_v41 = vpop.eup %4554 }
 0x6a3   : > { %v3388_v40 = vadd.f32 %v3384_v53, %v3376_v46  ;;  %v3381_v59 = vsub.f32 1.0, %v4555_v41  ;;  %v3377_v47 = vmul.f32 %v4555_v41, %v3347_v16 }
 0x6a5   : > { %3392 = vst [vmem:[%s170_s4 + $0x8] sm:$0xff] %v3388_v40  ;;  %v3385_v51 = vmul.f32 %v3381_v59, %v5628_v0 }
 0x6a6   : > { %v4557_v43 = vpop.eup %4556 }
 0x6a7   : > { %v3389_v50 = vadd.f32 %v3385_v51, %v3377_v47  ;;  %v3382_v49 = vsub.f32 1.0, %v4557_v43  ;;  %v3378_v45 = vmul.f32 %v4557_v43, %v3349_v58 }
 0x6a9   : > { %3393 = vst [vmem:[%s170_s4 + $0x10] sm:$0xff] %v3389_v50  ;;  %v3386_v54 = vmul.f32 %v3382_v49, %v5632_v4 }
 0x6ab   : > { %v3390_v62 = vadd.f32 %v3386_v54, %v3378_v45 }
 0x6ad   : > { %3394 = vst [vmem:[%s170_s4 + $0x18] sm:$0xff] %v3390_v62 }
 0x6ae PF: > { %s13_s12 = sadd.s32 1, %s4564_s12  }
 0x6af   : > { %p10_p4 = scmp.ge.s32.totalorder %s13_s12, 4  }
 0x6b1   :  { %12 = sbr.rel (!%p10_p4) target bundleno = 1 (0x1), region = 72 }

// kernel: decoder_forward.9
= control target key start
LH: loop header
LB: loop body
LE: loop exit
PB: predicated region body
PF: predicated region fallthrough
CT: control target
= control target key end

     0   :  { %s1439_s0 = inlined_call_operand.vmem [shape: f32[64,128], index: 0, kind: input, shape index: {}]   ;;  %s1440_s1 = inlined_call_operand.vmem [shape: bf16[3,128,128], index: 1, kind: input, shape index: {}]   ;;  %s1441_s2 = inlined_call_operand.vmem [shape: f32[3,1,128], index: 2, kind: input, shape index: {}]   ;;  %s1442_s3 = inlined_call_operand.vmem [shape: bf16[128,128], index: 3, kind: input, shape index: {}]   ;;  %s1443_s4 = inlined_call_operand.vmem [shape: f32[1,128], index: 4, kind: input, shape index: {}]   ;;  %s1444_s5 = inlined_call_operand.vmem [shape: f32[1,128], index: 5, kind: input, shape index: {}]   ;;  %s1445_s6 = inlined_call_operand.<no memory space> [shape: f32[1,1], index: 6, kind: input, shape index: {}]   ;;  %s1446_s7 = inlined_call_operand.hbm [shape: f32[64,128], index: 7, kind: output, shape index: {0}]   ;;  %s1447_s8 = inlined_call_operand.hbm [shape: f32[64,128], index: 8, kind: output, shape index: {1}]   ;;  %s1448_s9 = inlined_call_operand.vmem [shape: f32[64,1], index: 9, kind: output, shape index: {2}]  }
   0x1   :  { %v15_v0 = vstv %s1445_s6 }
   0x2   :  { %16 = vst [vmem:[#allocation2] sm:$0x1] %v15_v0 }
   0x3   :  { %17 = vsyncpa [#allocation4], 0  ;;  %v1069_v1 = vld [vmem:[%s1440_s1 + $0x38] sm:$0xff]   ;;  %v1070_v2 = vld [vmem:[%s1440_s1 + $0x30] sm:$0xff]  }
   0x4   :  { %969 = vmatprep.subr.bf16.mxu0 %v1069_v1  ;;  %v1071_v3 = vld [vmem:[%s1440_s1 + $0x28] sm:$0xff]   ;;  %v1072_v4 = vld [vmem:[%s1440_s1 + $0x20] sm:$0xff]   ;;  %v1073_v8 = vld [vmem:[%s1440_s1 + $0x18] sm:$0xff]  }
   0x5   :  { %970 = vmatpush3.bf16.msra.mxu0 %v1069_v1  ;;  %v34_v5 = vld [vmem:[%s1439_s0] sm:$0xff]  ;;  %v35_v6 = vld [vmem:[%s1439_s0 + $0x8] sm:$0xff]  ;;  %v1077_v9 = vld [vmem:[%s1440_s1 + $0x78] sm:$0xff]  }
   0x6   :  { %971 = vmatprep.subr.bf16.mxu0 %v1070_v2  ;;  %v42_v7 = vpack.c.bf16 %v35_v6, %v34_v5  ;;  %v1078_v10 = vld [vmem:[%s1440_s1 + $0x70] sm:$0xff]   ;;  %993 = vmatprep.subr.bf16.mxu1 %v1077_v9  ;;  %v1079_v12 = vld [vmem:[%s1440_s1 + $0x68] sm:$0xff]   ;;  %v1080_v13 = vld [vmem:[%s1440_s1 + $0x60] sm:$0xff]  }
   0x7   :  { %v1074_v11 = vld [vmem:[%s1440_s1 + $0x10] sm:$0xff]   ;;  %994 = vmatpush3.bf16.msra.mxu1 %v1077_v9  ;;  %v1075_v14 = vld [vmem:[%s1440_s1 + $0x8] sm:$0xff]   ;;  %v1081_v15 = vld [vmem:[%s1440_s1 + $0x58] sm:$0xff]  }
   0x8   :  { %985 = vmatprep.mubr.bf16.mxu0 %v42_v7  ;;  %995 = vmatprep.subr.bf16.mxu1 %v1078_v10  ;;  %v1076_v16 = vld [vmem:[%s1440_s1] sm:$0xff]   ;;  %v36_v17 = vld [vmem:[%s1439_s0 + $0x10] sm:$0xff]  ;;  %v37_v18 = vld [vmem:[%s1439_s0 + $0x18] sm:$0xff] }
   0x9   :  { %972 = vmatpush3.bf16.msra.mxu0 %v1070_v2  ;;  %v38_v19 = vld [vmem:[%s1439_s0 + $0x20] sm:$0xff]  ;;  %v39_v20 = vld [vmem:[%s1439_s0 + $0x28] sm:$0xff] }
   0xa   :  { %973 = vmatprep.subr.bf16.mxu0 %v1071_v3 }
   0xb   :  { %996 = vmatpush3.bf16.msra.mxu1 %v1078_v10 }
   0xc   :  { %997 = vmatprep.subr.bf16.mxu1 %v1079_v12 }
   0xd   :  { %974 = vmatpush3.bf16.msra.mxu0 %v1071_v3 }
   0xe   :  { %975 = vmatprep.subr.bf16.mxu0 %v1072_v4 }
   0xf   :  { %998 = vmatpush3.bf16.msra.mxu1 %v1079_v12 }
  0x10   :  { %999 = vmatprep.subr.bf16.mxu1 %v1080_v13 }
  0x11   :  { %976 = vmatpush3.bf16.msra.mxu0 %v1072_v4 }
  0x12   :  { %977 = vmatprep.subr.bf16.mxu0 %v1073_v8 }
  0x13   :  { %1000 = vmatpush3.bf16.msra.mxu1 %v1080_v13 }
  0x14   :  { %1001 = vmatprep.subr.bf16.mxu1 %v1081_v15 }
  0x15   :  { %978 = vmatpush3.bf16.msra.mxu0 %v1073_v8 }
  0x16   :  { %979 = vmatprep.subr.bf16.mxu0 %v1074_v11 }
  0x19   :  { %980 = vmatpush3.bf16.msra.mxu0 %v1074_v11 }
  0x1a   :  { %981 = vmatprep.subr.bf16.mxu0 %v1075_v14 }
  0x1d   :  { %982 = vmatpush3.bf16.msra.mxu0 %v1075_v14 }
  0x1e   :  { %983 = vmatprep.subr.bf16.mxu0 %v1076_v16 }
  0x1f   :  { %18 = vsyncpa [#allocation6], 0  ;;  %v43_v21 = vpack.c.bf16 %v37_v18, %v36_v17  ;;  %1002 = vmatpush3.bf16.msra.mxu1 %v1081_v15  ;;  %v44_v22 = vpack.c.bf16 %v39_v20, %v38_v19  ;;  %v40_v23 = vld [vmem:[%s1439_s0 + $0x30] sm:$0xff]  ;;  %v41_v24 = vld [vmem:[%s1439_s0 + $0x38] sm:$0xff]  ;;  %s1210_s29 = smov [#allocation5]  }
  0x20   :  { %v45_v25 = vpack.c.bf16 %v41_v24, %v40_v23  ;;  %v1082_v26 = vld [vmem:[%s1440_s1 + $0x50] sm:$0xff]   ;;  %v1083_v27 = vld [vmem:[%s1440_s1 + $0x48] sm:$0xff]   ;;  %v1084_v28 = vld [vmem:[%s1440_s1 + $0x40] sm:$0xff]   ;;  %s814_s30 = sshll.u32 %s1210_s29, 4  ;;  %s815_s30 = int_to_ptr.vmem [resolvable:$true] %s814_s30 }
  0x21   :  { %984 = vmatpush3.bf16.msra.mxu0 %v1076_v16  ;;  %1003 = vmatprep.subr.bf16.mxu1 %v1082_v26  ;;  %v1085_v29 = vld [vmem:[%s1440_s1 + $0xb8] sm:$0xff]   ;;  %v1086_v30 = vld [vmem:[%s1440_s1 + $0xb0] sm:$0xff]   ;;  %v1087_v31 = vld [vmem:[%s1440_s1 + $0xa8] sm:$0xff]  }
  0x22   :  { %1017 = vmatprep.subr.bf16.mxu0 %v1085_v29  ;;  %v1088_v32 = vld [vmem:[%s1440_s1 + $0xa0] sm:$0xff]   ;;  %v1089_v33 = vld [vmem:[%s1440_s1 + $0x98] sm:$0xff]   ;;  %v1090_v63 = vld [vmem:[%s1440_s1 + $0x90] sm:$0xff]  }
  0x23   :  { %1004 = vmatpush3.bf16.msra.mxu1 %v1082_v26  ;;  %v833_v36 = vld [vmem:[%s1441_s2] ss:$0 sm:$0xff]  ;;  %v1091_v0 = vld [vmem:[%s1440_s1 + $0x88] sm:$0xff]   ;;  %v1093_v2 = vld [vmem:[%s1442_s3 + $0x38] sm:$0xff]  }
  0x24   :  { %986 = vmatmul.mubr.bf16.vlgmr.msra.gmra.mxu0 %v43_v21  ;;  %1005 = vmatprep.subr.bf16.mxu1 %v1083_v27  ;;  %v1092_v1 = vld [vmem:[%s1440_s1 + $0x80] sm:$0xff]   ;;  %v1094_v3 = vld [vmem:[%s1442_s3 + $0x30] sm:$0xff]   ;;  %v1095_v4 = vld [vmem:[%s1442_s3 + $0x28] sm:$0xff]  }
  0x25   :  { %989 = vmatprep.mubr.bf16.mxu0 %v44_v22  ;;  %1018 = vmatpush3.bf16.msra.mxu0 %v1085_v29  ;;  %v1096_v5 = vld [vmem:[%s1442_s3 + $0x20] sm:$0xff]   ;;  %v1097_v6 = vld [vmem:[%s1442_s3 + $0x18] sm:$0xff]  }
  0x26   :  { %1019 = vmatprep.subr.bf16.mxu0 %v1086_v30  ;;  %v859_v9 = vld [vmem:[%s1441_s2 + $0x1] ss:$0 sm:$0xff] }
  0x27   :  { %1006 = vmatpush3.bf16.msra.mxu1 %v1083_v27 }
  0x28   :  { %1007 = vmatprep.subr.bf16.mxu1 %v1084_v28 }
  0x29   :  { %1020 = vmatpush3.bf16.msra.mxu0 %v1086_v30 }
  0x2a   :  { %1021 = vmatprep.subr.bf16.mxu0 %v1087_v31 }
  0x2b   :  { %1008 = vmatpush3.bf16.msra.mxu1 %v1084_v28 }
  0x2c   :  { %990 = vmatmul.mubr.bf16.gmra.mxu0 %v45_v25  ;;  %1041 = vmatprep.subr.bf16.mxu1 %v1093_v2 }
  0x2d   :  { %1022 = vmatpush3.bf16.msra.mxu0 %v1087_v31 }
  0x2e   :  { %1023 = vmatprep.subr.bf16.mxu0 %v1088_v32 }
  0x31   :  { %1024 = vmatpush3.bf16.msra.mxu0 %v1088_v32 }
  0x32   :  { %1025 = vmatprep.subr.bf16.mxu0 %v1089_v33 }
  0x35   :  { %1026 = vmatpush3.bf16.msra.mxu0 %v1089_v33 }
  0x36   :  { %1027 = vmatprep.subr.bf16.mxu0 %v1090_v63 }
  0x39   :  { %1028 = vmatpush3.bf16.msra.mxu0 %v1090_v63 }
  0x3a   :  { %1029 = vmatprep.subr.bf16.mxu0 %v1091_v0 }
  0x3d   :  { %1030 = vmatpush3.bf16.msra.mxu0 %v1091_v0 }
  0x3e   :  { %1031 = vmatprep.subr.bf16.mxu0 %v1092_v1 }
  0x41   :  { %1032 = vmatpush3.bf16.msra.mxu0 %v1092_v1 }
  0xe4   :  { %v987_v34 = vpop.f32.mrf.mxu0 }
  0xe5   :  { %v160_v40 = vadd.f32 %v987_v34, %v833_v36 }
  0xe6   :  { %v151_v35 = vpop.f32.mrf.mxu0 }
  0xe7   :  { %v152_v38 = vadd.f32 %v833_v36, %v151_v35  ;;  %v184_v47 = vmax.f32 %v160_v40, 0.0 }
  0xe8   :  { %v988_v37 = vpop.f32.mrf.mxu0 }
  0xe9   :  { %v163_v39 = vadd.f32 %v988_v37, %v833_v36  ;;  %v182_v45 = vmax.f32 %v152_v38, 0.0  ;;  %v1099_v37 = vld [vmem:[%s1442_s3 + $0x8] sm:$0xff]   ;;  %v1100_v38 = vld [vmem:[%s1442_s3] sm:$0xff]  }
  0xea   :  { %v154_v41 = vpop.f32.mrf.mxu0 }
  0xeb   :  { %v155_v42 = vadd.f32 %v833_v36, %v154_v41  ;;  %v185_v43 = vmax.f32 %v163_v39, 0.0  ;;  %v885_v39 = vld [vmem:[%s1441_s2 + $0x2] ss:$0 sm:$0xff] }
  0xec   :  { %v991_v44 = vpop.f32.mrf.mxu0 }
  0xed   :  { %v183_v46 = vmax.f32 %v155_v42, 0.0  ;;  %v191_v50 = vpack.c.bf16 %v185_v43, %v184_v47  ;;  %v176_v54 = vadd.f32 %v991_v44, %v833_v36 }
  0xee   :  { %v167_v48 = vpop.f32.mrf.mxu0 }
  0xef   :  { %v190_v49 = vpack.c.bf16 %v183_v46, %v182_v45  ;;  %v168_v52 = vadd.f32 %v833_v36, %v167_v48  ;;  %v188_v60 = vmax.f32 %v176_v54, 0.0 }
  0xf0   :  { %v992_v51 = vpop.f32.mrf.mxu0 }
  0xf1   :  { %v179_v53 = vadd.f32 %v992_v51, %v833_v36  ;;  %1009 = vmatprep.mubr.bf16.mxu1 %v190_v49  ;;  %v186_v58 = vmax.f32 %v168_v52, 0.0 }
  0xf2   :  { %v170_v55 = vpop.f32.mrf.mxu0  ;;  %1010 = vmatmul.mubr.bf16.vlgmr.msra.gmra.mxu1 %v191_v50 }
  0xf3   :  { %v171_v56 = vadd.f32 %v833_v36, %v170_v55  ;;  %v189_v57 = vmax.f32 %v179_v53, 0.0  ;;  %1042 = vmatpush3.bf16.msra.mxu1 %v1093_v2  ;;  %v1098_v36 = vld [vmem:[%s1442_s3 + $0x10] sm:$0xff]  }
  0xf4   :  { %1043 = vmatprep.subr.bf16.mxu1 %v1094_v3 }
  0xf5   :  { %v187_v59 = vmax.f32 %v171_v56, 0.0  ;;  %v193_v62 = vpack.c.bf16 %v189_v57, %v188_v60 }
  0xf7   :  { %v192_v61 = vpack.c.bf16 %v187_v59, %v186_v58  ;;  %1044 = vmatpush3.bf16.msra.mxu1 %v1094_v3 }
  0xf8   :  { %1045 = vmatprep.subr.bf16.mxu1 %v1095_v4 }
  0xf9   :  { %1013 = vmatprep.mubr.bf16.mxu1 %v192_v61 }
  0xfa   :  { %1014 = vmatmul.mubr.bf16.gmra.mxu1 %v193_v62 }
  0xfb   :  { %1046 = vmatpush3.bf16.msra.mxu1 %v1095_v4  ;;  %v894_v4 = vld [vmem:[%s1443_s4] ss:$0 sm:$0xff]  ;;  %s1209_s4 = smov [#allocation3]  }
  0xfc   :  { %1047 = vmatprep.subr.bf16.mxu1 %v1096_v5 }
  0xff   :  { %1048 = vmatpush3.bf16.msra.mxu1 %v1096_v5 }
 0x100   :  { %1049 = vmatprep.subr.bf16.mxu1 %v1097_v6 }
 0x103   :  { %1050 = vmatpush3.bf16.msra.mxu1 %v1097_v6  ;;  %v911_v6 = vld [vmem:[%s1444_s5] ss:$0 sm:$0xff]  ;;  %s802_s5 = sshll.u32 %s1209_s4, 4  ;;  %s803_s5 = int_to_ptr.vmem [resolvable:$true] %s802_s5 }
 0x104   :  { %1051 = vmatprep.subr.bf16.mxu1 %v1098_v36  ;;  %s1165_s10 = scalar_lea.vmem %s803_s5, 1024  ;;  %p1170_p1 = scmp.lt.s32.totalorder %s803_s5, %s803_s5 }
 0x105   :  { %p1166_p0 = scmp.ne.s32.totalorder %s803_s5, %s1165_s10  ;;  %p1171_p2 = scmp.lt.s32.totalorder %s1165_s10, %s1165_s10 }
 0x107   :  { %1052 = vmatpush3.bf16.msra.mxu1 %v1098_v36  ;;  %p1172_p3 = por %p1171_p2, %p1170_p1 }
 0x108   :  { %1053 = vmatprep.subr.bf16.mxu1 %v1099_v37 }
 0x109   :  { %p1173_p4 = pnand %p1172_p3, %p1166_p0 }
 0x10b   :  { %1054 = vmatpush3.bf16.msra.mxu1 %v1099_v37 }
 0x10c   :  { %1055 = vmatprep.subr.bf16.mxu1 %v1100_v38 }
 0x10f   :  { %1056 = vmatpush3.bf16.msra.mxu1 %v1100_v38 }
 0x1b2   :  { %v1011_v7 = vpop.f32.mrf.mxu1 }
 0x1b3   :  { %v310_v13 = vadd.f32 %v1011_v7, %v859_v9 }
 0x1b4   :  { %v301_v8 = vpop.f32.mrf.mxu1 }
 0x1b5   :  { %v302_v11 = vadd.f32 %v859_v9, %v301_v8  ;;  %v334_v20 = vmax.f32 %v310_v13, 0.0 }
 0x1b6   :  { %v1012_v10 = vpop.f32.mrf.mxu1 }
 0x1b7   :  { %v313_v12 = vadd.f32 %v1012_v10, %v859_v9  ;;  %v332_v18 = vmax.f32 %v302_v11, 0.0 }
 0x1b8   :  { %v304_v14 = vpop.f32.mrf.mxu1 }
 0x1b9   :  { %v305_v15 = vadd.f32 %v859_v9, %v304_v14  ;;  %v335_v16 = vmax.f32 %v313_v12, 0.0 }
 0x1ba   :  { %v1015_v17 = vpop.f32.mrf.mxu1 }
 0x1bb   :  { %v333_v19 = vmax.f32 %v305_v15, 0.0  ;;  %v341_v23 = vpack.c.bf16 %v335_v16, %v334_v20  ;;  %v326_v27 = vadd.f32 %v1015_v17, %v859_v9 }
 0x1bc   :  { %v317_v21 = vpop.f32.mrf.mxu1 }
 0x1bd   :  { %v340_v22 = vpack.c.bf16 %v333_v19, %v332_v18  ;;  %v318_v25 = vadd.f32 %v859_v9, %v317_v21  ;;  %v338_v33 = vmax.f32 %v326_v27, 0.0 }
 0x1be   :  { %v1016_v24 = vpop.f32.mrf.mxu1 }
 0x1bf   :  { %v329_v26 = vadd.f32 %v1016_v24, %v859_v9  ;;  %1033 = vmatprep.mubr.bf16.mxu0 %v340_v22  ;;  %v336_v31 = vmax.f32 %v318_v25, 0.0 }
 0x1c0   :  { %v320_v28 = vpop.f32.mrf.mxu1  ;;  %1034 = vmatmul.mubr.bf16.vlgmr.msra.gmra.mxu0 %v341_v23 }
 0x1c1   :  { %v321_v29 = vadd.f32 %v859_v9, %v320_v28  ;;  %v339_v30 = vmax.f32 %v329_v26, 0.0 }
 0x1c3   :  { %v337_v32 = vmax.f32 %v321_v29, 0.0  ;;  %v343_v35 = vpack.c.bf16 %v339_v30, %v338_v33 }
 0x1c5   :  { %v342_v34 = vpack.c.bf16 %v337_v32, %v336_v31 }
 0x1c7   :  { %1037 = vmatprep.mubr.bf16.mxu0 %v342_v34 }
 0x1c8   :  { %1038 = vmatmul.mubr.bf16.gmra.mxu0 %v343_v35 }
 0x280   :  { %v1035_v40 = vpop.f32.mrf.mxu0 }
 0x281   :  { %v460_v41 = vadd.f32 %v1035_v40, %v885_v39 }
 0x282   :  { %v451_v42 = vpop.f32.mrf.mxu0 }
 0x283   :  { %v484_v43 = vmax.f32 %v460_v41, 0.0  ;;  %v452_v44 = vadd.f32 %v885_v39, %v451_v42 }
 0x284   :  { %v1036_v45 = vpop.f32.mrf.mxu0 }
 0x285   :  { %492 = vst [vmem:[#allocation3 + $0x10] sm:$0xff] %v484_v43  ;;  %v482_v46 = vmax.f32 %v452_v44, 0.0  ;;  %v463_v47 = vadd.f32 %v1036_v45, %v885_v39 }
 0x286   :  { %v454_v48 = vpop.f32.mrf.mxu0 }
 0x287   :  { %490 = vst [vmem:[#allocation3] sm:$0xff] %v482_v46  ;;  %v485_v49 = vmax.f32 %v463_v47, 0.0  ;;  %v455_v50 = vadd.f32 %v885_v39, %v454_v48 }
 0x288   :  { %v1039_v51 = vpop.f32.mrf.mxu0 }
 0x289   :  { %493 = vst [vmem:[#allocation3 + $0x18] sm:$0xff] %v485_v49  ;;  %v483_v52 = vmax.f32 %v455_v50, 0.0  ;;  %v476_v53 = vadd.f32 %v1039_v51, %v885_v39  ;;  %v499_v58 = vpack.c.bf16 %v485_v49, %v484_v43 }
 0x28a   :  { %v467_v54 = vpop.f32.mrf.mxu0 }
 0x28b   :  { %491 = vst [vmem:[#allocation3 + $0x8] sm:$0xff] %v483_v52  ;;  %v498_v55 = vpack.c.bf16 %v483_v52, %v482_v46  ;;  %v488_v56 = vmax.f32 %v476_v53, 0.0  ;;  %v468_v57 = vadd.f32 %v885_v39, %v467_v54 }
 0x28c   :  { %v1040_v59 = vpop.f32.mrf.mxu0 }
 0x28d   :  { %496 = vst [vmem:[#allocation3 + $0x30] sm:$0xff] %v488_v56  ;;  %v486_v60 = vmax.f32 %v468_v57, 0.0  ;;  %v479_v61 = vadd.f32 %v1040_v59, %v885_v39  ;;  %1057 = vmatprep.mubr.bf16.mxu1 %v498_v55 }
 0x28e   :  { %v470_v62 = vpop.f32.mrf.mxu0  ;;  %1058 = vmatmul.mubr.bf16.vlgmr.msra.gmra.mxu1 %v499_v58 }
 0x28f   :  { %494 = vst [vmem:[#allocation3 + $0x20] sm:$0xff] %v486_v60  ;;  %v489_v63 = vmax.f32 %v479_v61, 0.0  ;;  %v471_v0 = vadd.f32 %v885_v39, %v470_v62 }
 0x291   :  { %497 = vst [vmem:[#allocation3 + $0x38] sm:$0xff] %v489_v63  ;;  %v487_v1 = vmax.f32 %v471_v0, 0.0  ;;  %v501_v3 = vpack.c.bf16 %v489_v63, %v488_v56 }
 0x293   :  { %495 = vst [vmem:[#allocation3 + $0x28] sm:$0xff] %v487_v1  ;;  %v500_v2 = vpack.c.bf16 %v487_v1, %v486_v60 }
 0x295   :  { %1061 = vmatprep.mubr.bf16.mxu1 %v500_v2 }
 0x296   :  { %1062 = vmatmul.mubr.bf16.gmra.mxu1 %v501_v3 }
 0x34e   :  { %v1059_v5 = vpop.f32.mrf.mxu1 }
 0x34f   :  { %v616_v7 = vadd.f32 %v1059_v5, %v894_v4 }
 0x350   :  { %v607_v8 = vpop.f32.mrf.mxu1 }
 0x351   :  { %v905_v9 = vmul.f32 -1.442695, %v616_v7  ;;  %v608_v10 = vadd.f32 %v894_v4, %v607_v8  ;;  %v703_v11 = vmul.f32 %v911_v6, %v616_v7 }
 0x352   :  { %v1060_v12 = vpop.f32.mrf.mxu1 }
 0x353   :  { %1101 = vpow2.f32 %v905_v9  ;;  %v903_v13 = vmul.f32 -1.442695, %v608_v10  ;;  %v619_v14 = vadd.f32 %v1060_v12, %v894_v4  ;;  %713 = vadd.xlane.f32.xlu1 %v703_v11  ;;  %v701_v15 = vmul.f32 %v911_v6, %v608_v10 }
 0x354   :  { %v610_v16 = vpop.f32.mrf.mxu1 }
 0x355   :  { %1103 = vpow2.f32 %v903_v13  ;;  %v906_v17 = vmul.f32 -1.442695, %v619_v14  ;;  %v611_v18 = vadd.f32 %v894_v4, %v610_v16  ;;  %709 = vadd.xlane.f32.xlu0 %v701_v15  ;;  %v704_v19 = vmul.f32 %v911_v6, %v619_v14 }
 0x356   :  { %v1063_v20 = vpop.f32.mrf.mxu1 }
 0x357   :  { %1105 = vpow2.f32 %v906_v17  ;;  %v904_v21 = vmul.f32 -1.442695, %v611_v18  ;;  %v632_v22 = vadd.f32 %v1063_v20, %v894_v4  ;;  %715 = vadd.xlane.f32.xlu1 %v704_v19  ;;  %v702_v23 = vmul.f32 %v911_v6, %v611_v18 }
 0x358   :  { %v623_v24 = vpop.f32.mrf.mxu1 }
 0x359   :  { %1107 = vpow2.f32 %v904_v21  ;;  %v909_v25 = vmul.f32 -1.442695, %v632_v22  ;;  %v624_v26 = vadd.f32 %v894_v4, %v623_v24  ;;  %711 = vadd.xlane.f32.xlu0 %v702_v23  ;;  %v707_v36 = vmul.f32 %v911_v6, %v632_v22 }
 0x35a   :  { %v1064_v27 = vpop.f32.mrf.mxu1 }
 0x35b   :  { %1109 = vpow2.f32 %v909_v25  ;;  %v907_v28 = vmul.f32 -1.442695, %v624_v26  ;;  %v635_v29 = vadd.f32 %v1064_v27, %v894_v4  ;;  %v705_v30 = vmul.f32 %v911_v6, %v624_v26 }
 0x35c   :  { %v626_v31 = vpop.f32.mrf.mxu1 }
 0x35d   :  { %1111 = vpow2.f32 %v907_v28  ;;  %v910_v32 = vmul.f32 -1.442695, %v635_v29  ;;  %v627_v33 = vadd.f32 %v894_v4, %v626_v31  ;;  %717 = vadd.xlane.f32.xlu0 %v705_v30  ;;  %v708_v41 = vmul.f32 %v911_v6, %v635_v29 }
 0x35f   :  { %1113 = vpow2.f32 %v910_v32  ;;  %v908_v34 = vmul.f32 -1.442695, %v627_v33  ;;  %v706_v35 = vmul.f32 %v911_v6, %v627_v33 }
 0x360   :  { %v1102_v37 = vpop.eup %1101 }
 0x361   :  { %v664_v38 = vadd.f32 1.0, %v1102_v37  ;;  %1115 = vpow2.f32 %v908_v34  ;;  %719 = vadd.xlane.f32.xlu1 %v706_v35  ;;  %721 = vadd.xlane.f32.xlu0 %v707_v36 }
 0x362   :  { %v1104_v39 = vpop.eup %1103 }
 0x363   :  { %1117 = vrcp.f32 %v664_v38  ;;  %v662_v40 = vadd.f32 1.0, %v1104_v39 }
 0x364   :  { %v1106_v42 = vpop.eup %1105 }
 0x365   :  { %1119 = vrcp.f32 %v662_v40  ;;  %v665_v43 = vadd.f32 1.0, %v1106_v42  ;;  %723 = vadd.xlane.f32.xlu1 %v708_v41 }
 0x366   :  { %v1108_v44 = vpop.eup %1107 }
 0x367   :  { %1121 = vrcp.f32 %v665_v43  ;;  %v663_v45 = vadd.f32 1.0, %v1108_v44 }
 0x368   :  { %v1110_v46 = vpop.eup %1109 }
 0x369   :  { %1123 = vrcp.f32 %v663_v45  ;;  %v668_v47 = vadd.f32 1.0, %v1110_v46 }
 0x36a   :  { %v1112_v48 = vpop.eup %1111 }
 0x36b   :  { %1125 = vrcp.f32 %v668_v47  ;;  %v666_v49 = vadd.f32 1.0, %v1112_v48 }
 0x36c   :  { %v1114_v50 = vpop.eup %1113 }
 0x36d   :  { %1127 = vrcp.f32 %v666_v49  ;;  %v669_v51 = vadd.f32 1.0, %v1114_v50 }
 0x36e   :  { %v1116_v52 = vpop.eup %1115 }
 0x36f   :  { %1129 = vrcp.f32 %v669_v51  ;;  %v667_v53 = vadd.f32 1.0, %v1116_v52 }
 0x370   :  { %v1118_v54 = vpop.eup %1117 }
 0x371   :  { %688 = vst [vmem:[#allocation5 + $0x10] sm:$0xff] %v1118_v54  ;;  %1131 = vrcp.f32 %v667_v53 }
 0x372   :  { %v1120_v55 = vpop.eup %1119 }
 0x373   :  { %686 = vst [vmem:[#allocation5] sm:$0xff] %v1120_v55 }
 0x374   :  { %v1122_v56 = vpop.eup %1121 }
 0x375   :  { %689 = vst [vmem:[#allocation5 + $0x18] sm:$0xff] %v1122_v56 }
 0x376   :  { %v1124_v57 = vpop.eup %1123 }
 0x377   :  { %687 = vst [vmem:[#allocation5 + $0x8] sm:$0xff] %v1124_v57 }
 0x378   :  { %v1126_v58 = vpop.eup %1125 }
 0x379   :  { %692 = vst [vmem:[#allocation5 + $0x30] sm:$0xff] %v1126_v58 }
 0x37a   :  { %v1128_v59 = vpop.eup %1127 }
 0x37b   :  { %690 = vst [vmem:[#allocation5 + $0x20] sm:$0xff] %v1128_v59 }
 0x37c   :  { %v1130_v60 = vpop.eup %1129 }
 0x37d   :  { %693 = vst [vmem:[#allocation5 + $0x38] sm:$0xff] %v1130_v60 }
 0x37e   :  { %v1132_v61 = vpop.eup %1131 }
 0x37f   :  { %691 = vst [vmem:[#allocation5 + $0x28] sm:$0xff] %v1132_v61 }
 0x380   :  { %1176 = shalt.err (!%p1173_p4)
}
 0x381   :  { %s1211_s11 = smov 128   ;;  %s1212_s12 = smov 8  }
 0x382   :  { %808 = dma.vmem_to_hbm [thread:$0]  %s803_s5, 1024, %s1446_s7, [#allocation4], %s1211_s11, %s1211_s11, %s1212_s12  }
 0x383   :  { %s1185_s0 = scalar_lea.vmem %s815_s30, 1024  ;;  %p1190_p6 = scmp.lt.s32.totalorder %s815_s30, %s815_s30 }
 0x384   :  { %p1186_p5 = scmp.ne.s32.totalorder %s815_s30, %s1185_s0  ;;  %p1191_p7 = scmp.lt.s32.totalorder %s1185_s0, %s1185_s0 }
 0x386   :  { %p1192_p8 = por %p1191_p7, %p1190_p6 }
 0x388   :  { %p1193_p9 = pnand %p1192_p8, %p1186_p5 }
 0x38a   :  { %1196 = shalt.err (!%p1193_p9)
}
 0x38b   :  { %820 = dma.vmem_to_hbm [thread:$0]  %s815_s30, 1024, %s1447_s8, [#allocation6], %s1211_s11, %s1211_s11, %s1212_s12   ;;  %v912_v62 = vld [vmem:[#allocation2] ss:$0 sm:$0xff]  ;;  %vm788_vm0 = vcmask 7168  }
 0x3dc   :  { %v714_v63 = vpop.xlane.xlu1 %713 }
 0x3dd   :  { %v734_v0 = vadd.f32 %v912_v62, %v714_v63 }
 0x3de   :  { %v710_v1 = vpop.xlane.xlu0 %709 }
 0x3df   :  { %v915_v2 = vmul.f32 -1.442695, %v734_v0  ;;  %v732_v3 = vadd.f32 %v912_v62, %v710_v1 }
 0x3e0   :  { %v716_v4 = vpop.xlane.xlu1 %715 }
 0x3e1   :  { %1133 = vpow2.f32 %v915_v2  ;;  %v913_v5 = vmul.f32 -1.442695, %v732_v3  ;;  %v735_v6 = vadd.f32 %v912_v62, %v716_v4 }
 0x3e2   :  { %v712_v7 = vpop.xlane.xlu0 %711 }
 0x3e3   :  { %1135 = vpow2.f32 %v913_v5  ;;  %v916_v8 = vmul.f32 -1.442695, %v735_v6  ;;  %v733_v9 = vadd.f32 %v912_v62, %v712_v7 }
 0x3e5   :  { %1137 = vpow2.f32 %v916_v8  ;;  %v914_v10 = vmul.f32 -1.442695, %v733_v9 }
 0x3e6   :  { %v718_v11 = vpop.xlane.xlu0 %717 }
 0x3e7   :  { %1139 = vpow2.f32 %v914_v10  ;;  %v736_v12 = vadd.f32 %v912_v62, %v718_v11 }
 0x3e9   :  { %v917_v13 = vmul.f32 -1.442695, %v736_v12 }
 0x3ea   :  { %v720_v14 = vpop.xlane.xlu1 %719  ;;  %v722_v15 = vpop.xlane.xlu0 %721 }
 0x3eb   :  { %1141 = vpow2.f32 %v917_v13  ;;  %v737_v16 = vadd.f32 %v912_v62, %v720_v14  ;;  %v738_v17 = vadd.f32 %v912_v62, %v722_v15 }
 0x3ed   :  { %v918_v18 = vmul.f32 -1.442695, %v737_v16  ;;  %v919_v19 = vmul.f32 -1.442695, %v738_v17 }
 0x3ee   :  { %v1134_v20 = vpop.eup %1133  ;;  %v724_v21 = vpop.xlane.xlu1 %723 }
 0x3ef   :  { %v766_v22 = vadd.f32 1.0, %v1134_v20  ;;  %1143 = vpow2.f32 %v918_v18  ;;  %v739_v23 = vadd.f32 %v912_v62, %v724_v21 }
 0x3f0   :  { %v1136_v24 = vpop.eup %1135  ;;  %1145 = vpow2.f32 %v919_v19 }
 0x3f1   :  { %1147 = vrcp.f32 %v766_v22  ;;  %v764_v25 = vadd.f32 1.0, %v1136_v24  ;;  %v920_v26 = vmul.f32 -1.442695, %v739_v23 }
 0x3f2   :  { %v1138_v27 = vpop.eup %1137 }
 0x3f3   :  { %1149 = vrcp.f32 %v764_v25  ;;  %v767_v28 = vadd.f32 1.0, %v1138_v27 }
 0x3f4   :  { %v1140_v29 = vpop.eup %1139  ;;  %1151 = vpow2.f32 %v920_v26 }
 0x3f5   :  { %1153 = vrcp.f32 %v767_v28  ;;  %v765_v30 = vadd.f32 1.0, %v1140_v29 }
 0x3f7   :  { %1155 = vrcp.f32 %v765_v30 }
 0x3f8   :  { %v1142_v31 = vpop.eup %1141 }
 0x3f9   :  { %v768_v32 = vadd.f32 1.0, %v1142_v31 }
 0x3fb   :  { %1157 = vrcp.f32 %v768_v32 }
 0x3fc   :  { %v1144_v33 = vpop.eup %1143 }
 0x3fd   :  { %v1146_v34 = vpop.eup %1145  ;;  %v769_v35 = vadd.f32 1.0, %v1144_v33 }
 0x3fe   :  { %v1148_v36 = vpop.eup %1147  ;;  %v770_v37 = vadd.f32 1.0, %v1146_v34 }
 0x3ff   :  { %791 = vst.msk [vmem:[%s1448_s9 + $0x10] sm:$0xff] %vm788_vm0, %v1148_v36  ;;  %1159 = vrcp.f32 %v769_v35 }
 0x400   :  { %v1150_v38 = vpop.eup %1149  ;;  %1161 = vrcp.f32 %v770_v37 }
 0x401   :  { %v1152_v39 = vpop.eup %1151  ;;  %789 = vst.msk [vmem:[%s1448_s9] sm:$0xff] %vm788_vm0, %v1150_v38 }
 0x402   :  { %v1154_v40 = vpop.eup %1153  ;;  %v771_v41 = vadd.f32 1.0, %v1152_v39 }
 0x403   :  { %792 = vst.msk [vmem:[%s1448_s9 + $0x18] sm:$0xff] %vm788_vm0, %v1154_v40 }
 0x404   :  { %v1156_v42 = vpop.eup %1155  ;;  %1163 = vrcp.f32 %v771_v41 }
 0x405   :  { %790 = vst.msk [vmem:[%s1448_s9 + $0x8] sm:$0xff] %vm788_vm0, %v1156_v42 }
 0x408   :  { %v1158_v43 = vpop.eup %1157 }
 0x409   :  { %793 = vst.msk [vmem:[%s1448_s9 + $0x20] sm:$0xff] %vm788_vm0, %v1158_v43 }
 0x40c   :  { %v1160_v44 = vpop.eup %1159 }
 0x40d   :  { %v1162_v45 = vpop.eup %1161  ;;  %794 = vst.msk [vmem:[%s1448_s9 + $0x28] sm:$0xff] %vm788_vm0, %v1160_v44 }
 0x40e   :  { %795 = vst.msk [vmem:[%s1448_s9 + $0x30] sm:$0xff] %vm788_vm0, %v1162_v45 }
 0x411   :  { %v1164_v46 = vpop.eup %1163 }
 0x412   :  { %796 = vst.msk [vmem:[%s1448_s9 + $0x38] sm:$0xff] %vm788_vm0, %v1164_v46 }
 0x413   :  { %1205 = dma.done.wait [#allocation4], 1024  }
 0x414   :  { %1206 = vsyncadd [#allocation4], 4294966272 }
 0x415   :  { %1207 = dma.done.wait [#allocation6], 1024  }
 0x416   :  { %1208 = vsyncadd [#allocation6], 4294966272 }
 0x417   :  { %831 = vsyncpa [#allocation4], 1 }
 0x418   :  { %832 = vsyncpa [#allocation6], 1 }

</bundles_post_ra>
